<compile_context>
chip_gen: v7x
topology: tpu7x:2x2x1
jax: 0.10.0
libtpu: 0.0.40
codegen_flags: <defaults>
</compile_context>

<pallas_src>
import functools

import jax
import jax.numpy as jnp
from jax.experimental import pallas as pl
from jax.experimental.pallas import tpu as pltpu

LEAK = 0.1
ACT_DTYPE = jnp.bfloat16                  # matmul operands / HBM activations
_ROW_TILE_TARGET_BYTES = 2 * 1024 * 1024  # main input block per grid step


def _round_up(x, m):
    return (x + m - 1) // m * m


@functools.lru_cache(maxsize=None)
def _vmem_limit_bytes():
    """Generation-aware VMEM limit (~40 MiB on v7x, ~96 MiB on v5e/v6e)."""
    try:
        info = pltpu.get_tpu_info()
        cap = getattr(info, "vmem_capacity_bytes", None)
        if cap:
            return int(min(max(cap - 24 * 1024 * 1024, cap // 2),
                           96 * 1024 * 1024))
    except Exception:
        pass
    return 48 * 1024 * 1024


def _compiler_params(n_grid):
    return pltpu.CompilerParams(
        dimension_semantics=("parallel",) * n_grid,
        vmem_limit_bytes=_vmem_limit_bytes(),
    )


def _pick_tile_rows(rows_out, stride, cin, forced):
    if forced is not None:
        return max(1, min(rows_out, int(forced)))
    per_row = stride * cin * 2                      # bf16 input bytes per row
    return int(max(1, min(rows_out, _ROW_TILE_TARGET_BYTES // per_row)))


def _leaky(v):
    return jnp.maximum(v, LEAK * v)                 # 2 VPU ops, not 3


# ----------------------------------------------------------------------------
# Pallas kernels
# ----------------------------------------------------------------------------
def _conv3x3_kernel(x_ref, ha_ref, hb_ref, w_ref, b_ref, o_ref, *, stride, act):
    """Row-tiled 3x3 VALID conv on a strided-flat image.

    x_ref  : (1, tm*S, Cin)    main row-tile
    ha/hb  : (1, S, Cin)       2-row halo (next two logical rows, clamped)
    w_ref  : (3, 3*Cin, Cout)  taps; row kh stacks (kw, ci) along K
    b_ref  : (1, Cout) f32
    o_ref  : (1, tm*S, Cout)
    """
    lo = o_ref.shape[1]
    cin = x_ref.shape[-1]
    lx = lo + 2 * stride
    x = jnp.concatenate(
        [x_ref[0], ha_ref[0], hb_ref[0], jnp.zeros((8, cin), x_ref.dtype)],
        axis=0)
    # tap-concat: xc[j, kw*Cin + ci] = x[j + kw, ci]  ->  K = 3*Cin per matmul
    xc = jnp.concatenate([x[0:lx], x[1:lx + 1], x[2:lx + 2]], axis=-1)
    acc = jnp.dot(xc[0:lo], w_ref[0], preferred_element_type=jnp.float32)
    acc = acc + jnp.dot(xc[stride:stride + lo], w_ref[1],
                        preferred_element_type=jnp.float32)
    acc = acc + jnp.dot(xc[2 * stride:2 * stride + lo], w_ref[2],
                        preferred_element_type=jnp.float32)
    acc = acc + b_ref[...]
    if act:
        acc = _leaky(acc)
    o_ref[0] = acc.astype(o_ref.dtype)


def _gemm_kernel(x_ref, w_ref, b_ref, o_ref, *, act):
    """(bm, K) @ (K, N) + bias (+LeakyReLU) on one row-tile."""
    acc = jnp.dot(x_ref[0], w_ref[...], preferred_element_type=jnp.float32)
    acc = acc + b_ref[...]
    if act:
        acc = _leaky(acc)
    o_ref[0] = acc.astype(o_ref.dtype)


def _gate_gemm_kernel(x_ref, g_ref, w_ref, b_ref, o_ref):
    """SE excite gate fused with the conv2_up GEMM (+ bias + LeakyReLU)."""
    xg = x_ref[0] * g_ref[0]                        # bf16 gating, never to HBM
    acc = jnp.dot(xg, w_ref[...], preferred_element_type=jnp.float32)
    acc = _leaky(acc + b_ref[...])
    o_ref[0] = acc.astype(o_ref.dtype)


# ----------------------------------------------------------------------------
# pallas_call wrappers (all row-tiled, grid = (batch, row_tiles))
# ----------------------------------------------------------------------------
def conv3x3_flat(x_flat, w3, b, *, stride, rows_out, act, tile_rows=None):
    n, l_in, cin = x_flat.shape
    assert stride % 8 == 0 and l_in % stride == 0
    rows_in = l_in // stride
    assert rows_in >= rows_out + 2
    assert w3.shape[0] == 3 and w3.shape[1] == 3 * cin
    cout = w3.shape[-1]

    tm = _pick_tile_rows(rows_out, stride, cin, tile_rows)
    lo = tm * stride
    rmax = rows_in - 1
    kernel = functools.partial(_conv3x3_kernel, stride=stride, act=act)
    return pl.pallas_call(
        kernel,
        out_shape=jax.ShapeDtypeStruct((n, rows_out * stride, cout), ACT_DTYPE),
        grid_spec=pltpu.PrefetchScalarGridSpec(
            num_scalar_prefetch=0,
            grid=(n, pl.cdiv(rows_out, tm)),
            in_specs=[
                pl.BlockSpec((1, lo, cin), lambda nb, i: (nb, i, 0)),
                pl.BlockSpec(
                    (1, stride, cin),
                    lambda nb, i: (nb, jnp.minimum((i + 1) * tm, rmax), 0)),
                pl.BlockSpec(
                    (1, stride, cin),
                    lambda nb, i: (nb, jnp.minimum((i + 1) * tm + 1, rmax), 0)),
                pl.BlockSpec((3, 3 * cin, cout), lambda nb, i: (0, 0, 0)),
                pl.BlockSpec((1, cout), lambda nb, i: (0, 0)),
            ],
            out_specs=pl.BlockSpec((1, lo, cout), lambda nb, i: (nb, i, 0)),
        ),
        compiler_params=_compiler_params(2),
    )(x_flat, x_flat, x_flat, w3, b.reshape(1, cout).astype(jnp.float32))


def gemm_flat(x_flat, w, b, *, act, stride, tile_rows=None):
    n, m, k = x_flat.shape
    assert stride % 8 == 0 and m % stride == 0 and w.shape[0] == k
    rows = m // stride
    cout = w.shape[-1]
    tm = _pick_tile_rows(rows, stride, k, tile_rows)
    bm = tm * stride
    return pl.pallas_call(
        functools.partial(_gemm_kernel, act=act),
        out_shape=jax.ShapeDtypeStruct((n, m, cout), ACT_DTYPE),
        grid_spec=pltpu.PrefetchScalarGridSpec(
            num_scalar_prefetch=0,
            grid=(n, pl.cdiv(rows, tm)),
            in_specs=[pl.BlockSpec((1, bm, k), lambda nb, i: (nb, i, 0)),
                      pl.BlockSpec((k, cout), lambda nb, i: (0, 0)),
                      pl.BlockSpec((1, cout), lambda nb, i: (0, 0))],
            out_specs=pl.BlockSpec((1, bm, cout), lambda nb, i: (nb, i, 0)),
        ),
        compiler_params=_compiler_params(2),
    )(x_flat, w, b.reshape(1, cout).astype(jnp.float32))


def gate_upconv_flat(x_flat, gate, w, b, *, stride, tile_rows=None):
    n, m, c = x_flat.shape
    assert stride % 8 == 0 and m % stride == 0 and w.shape[0] == c
    rows = m // stride
    cout = w.shape[-1]
    tm = _pick_tile_rows(rows, stride, c, tile_rows)
    bm = tm * stride
    return pl.pallas_call(
        _gate_gemm_kernel,
        out_shape=jax.ShapeDtypeStruct((n, m, cout), ACT_DTYPE),
        grid_spec=pltpu.PrefetchScalarGridSpec(
            num_scalar_prefetch=0,
            grid=(n, pl.cdiv(rows, tm)),
            in_specs=[pl.BlockSpec((1, bm, c), lambda nb, i: (nb, i, 0)),
                      pl.BlockSpec((1, 1, c), lambda nb, i: (nb, 0, 0)),
                      pl.BlockSpec((c, cout), lambda nb, i: (0, 0)),
                      pl.BlockSpec((1, cout), lambda nb, i: (0, 0))],
            out_specs=pl.BlockSpec((1, bm, cout), lambda nb, i: (nb, i, 0)),
        ),
        compiler_params=_compiler_params(2),
    )(x_flat, gate, w, b.reshape(1, cout).astype(jnp.float32))


# ----------------------------------------------------------------------------
# Weight packing helpers
# ----------------------------------------------------------------------------
def _conv3x3_w3(w_oihw):
    """OIHW conv weight -> (3, 3*Cin, Cout) with rows ordered (kw, ci)."""
    w = jnp.transpose(w_oihw, (2, 3, 1, 0))            # (3, 3, ci, co)
    ci, co = w.shape[2], w.shape[3]
    return w.reshape(3, 3 * ci, co).astype(ACT_DTYPE)


# ----------------------------------------------------------------------------
# UNet1x3 forward (deconv=False)
# ----------------------------------------------------------------------------
def unet1x3_forward(x_nchw, p, *, tile_rows=None):
    n, cin, h, w = x_nchw.shape
    assert h >= 18 and w >= 18 and (h - 4) % 2 == 0 and (w - 4) % 2 == 0
    cout = p["bot_w"].shape[0]
    cout_p = _round_up(max(cout, 8), 8)

    s0 = _round_up(w, 8)
    h2, w2 = (h - 4) // 2, (w - 4) // 2
    s2 = _round_up(w2, 8)
    hu, wu = h2 - 4, w2 - 4
    s3 = _round_up(2 * wu, 8)

    # -- parameters in fused-GEMM layout (bf16 matmul operands, f32 biases) --
    k1 = 9 * cin
    k1p = _round_up(k1, 8)
    c1a_w = jnp.transpose(p["c1a_w"], (2, 3, 1, 0)).reshape(k1, 32)
    c1a_w = jnp.pad(c1a_w, ((0, k1p - k1), (0, 0))).astype(ACT_DTYPE)
    c1b_w = _conv3x3_w3(p["c1b_w"])
    down_w = jnp.transpose(p["down_w"], (2, 3, 1, 0)).reshape(256, 64)
    down_w = down_w.astype(ACT_DTYPE)
    c2a_w = _conv3x3_w3(p["c2a_w"])
    c2b_w = _conv3x3_w3(p["c2b_w"])
    se1_w = p["se1_w"].reshape(8, 64).T.astype(jnp.float32)      # (64, 8)
    se2_w = p["se2_w"].reshape(64, 8).T.astype(jnp.float32)      # (8, 64)
    up_w = jnp.transpose(p["up_w"], (0, 2, 3, 1)).reshape(64, 256)
    up_w = up_w.astype(ACT_DTYPE)
    up_b4 = jnp.tile(p["up_b"], 4)                    # bias per (kh, kw, co)
    c3_w = _conv3x3_w3(p["c3_w"])
    bot_w = jnp.pad(_conv3x3_w3(p["bot_w"]),
                    ((0, 0), (0, 0), (0, cout_p - cout)))
    bot_b = jnp.pad(p["bot_b"], (0, cout_p - cout))

    # -- conv1a: XLA im2col (K = 9*Cin, lane-dense) + fused Pallas GEMM -------
    x_sp = jnp.transpose(x_nchw, (0, 2, 3, 1)).astype(ACT_DTYPE)   # NHWC
    taps = [x_sp[:, kh:kh + h - 2, kw:kw + w - 2, :]
            for kh in range(3) for kw in range(3)]
    pat = jnp.concatenate(taps, axis=-1)                # (n, h-2, w-2, 9*cin)
    pat = jnp.pad(pat, ((0, 0), (0, 0), (0, s0 - (w - 2)), (0, k1p - k1)))
    pat = pat.reshape(n, (h - 2) * s0, k1p)
    x1 = gemm_flat(pat, c1a_w, p["c1a_b"], act=True, stride=s0,
                   tile_rows=tile_rows)                 # rows h-2, 32 ch

    # conv1b (3x3, 32 -> 64) + LeakyReLU
    x1 = conv3x3_flat(x1, c1b_w, p["c1b_b"], stride=s0, rows_out=h - 4,
                      act=True, tile_rows=tile_rows)

    # -- conv1_down (2x2, stride 2): space-to-depth + fused Pallas GEMM -------
    x1_sp = x1.reshape(n, h - 4, s0, 64)
    sd = x1_sp[:, :, :w - 4, :].reshape(n, h2, 2, w2, 2, 64)
    sd = sd.transpose(0, 1, 3, 2, 4, 5).reshape(n, h2, w2, 256)
    sd = jnp.pad(sd, ((0, 0), (0, 0), (0, s2 - w2), (0, 0)))
    sd = sd.reshape(n, h2 * s2, 256)
    x2 = gemm_flat(sd, down_w, p["down_b"], act=True, stride=s2,
                   tile_rows=tile_rows)                 # rows h2, 64 ch

    # -- conv2 = UNetConv(64, 128, 64, se=True) --------------------------------
    x2 = conv3x3_flat(x2, c2a_w, p["c2a_b"], stride=s2, rows_out=h2 - 2,
                      act=True, tile_rows=tile_rows)
    x2 = conv3x3_flat(x2, c2b_w, p["c2b_b"], stride=s2, rows_out=h2 - 4,
                      act=True, tile_rows=tile_rows)

    # SE squeeze in XLA (global mean over the valid window + two tiny FCs)
    x2_sp = x2.reshape(n, hu, s2, 64)[:, :, :wu, :].astype(jnp.float32)
    se_mean = jnp.mean(x2_sp, axis=(1, 2))              # (n, 64)
    se_h = jax.nn.relu(se_mean @ se1_w + p["se1_b"])
    gate = jax.nn.sigmoid(se_h @ se2_w + p["se2_b"])    # (n, 64)
    gate = gate.reshape(n, 1, 64).astype(ACT_DTYPE)

    # SE excite fused with conv2_up (ConvTranspose2d 2x2 s2) + LeakyReLU
    y = gate_upconv_flat(x2, gate, up_w, up_b4, stride=s2,
                         tile_rows=tile_rows)           # (n, hu*s2, 256)

    # -- pixel shuffle + x1-crop skip add + repack at tighter stride s3 -------
    y_sp = y.reshape(n, hu, s2, 256)[:, :, :wu, :].reshape(n, hu, wu, 2, 2, 64)
    y_sp = y_sp.transpose(0, 1, 3, 2, 4, 5).reshape(n, 2 * hu, 2 * wu, 64)
    x1c = x1_sp[:, 4:4 + 2 * hu, 4:4 + 2 * wu, :]
    xs = jnp.pad(y_sp + x1c, ((0, 0), (0, 0), (0, s3 - 2 * wu), (0, 0)))
    xs = xs.reshape(n, 2 * hu * s3, 64)

    # conv3 (3x3, 64 -> 64) + LeakyReLU
    x3 = conv3x3_flat(xs, c3_w, p["c3_b"], stride=s3, rows_out=2 * hu - 2,
                      act=True, tile_rows=tile_rows)

    # conv_bottom (deconv=False): 3x3, 64 -> cout (padded to >=8 lanes), no act
    z = conv3x3_flat(x3, bot_w, bot_b, stride=s3, rows_out=2 * hu - 4,
                     act=False, tile_rows=tile_rows)

    z_sp = z.reshape(n, 2 * hu - 4, s3, cout_p)[:, :, :2 * wu - 4, :cout]
    return jnp.transpose(z_sp.astype(jnp.float32), (0, 3, 1, 2))   # NCHW


# ----------------------------------------------------------------------------
# Deterministic parameter init (kaiming-style, synthetic)
# ----------------------------------------------------------------------------
def init_params(key, in_channels, out_channels):
    keys = iter(jax.random.split(key, 32))

    def conv(cout, cin, kh, kw):
        w = jax.random.normal(next(keys), (cout, cin, kh, kw), jnp.float32)
        w = w * (2.0 / (cout * kh * kw)) ** 0.5
        b = jax.random.uniform(next(keys), (cout,), jnp.float32, -1.0, 1.0)
        return w, b / (cin * kh * kw) ** 0.5

    def deconv(cin, cout, kh, kw):
        w = jax.random.normal(next(keys), (cin, cout, kh, kw), jnp.float32)
        w = w * (2.0 / (cout * kh * kw)) ** 0.5
        b = jax.random.uniform(next(keys), (cout,), jnp.float32, -1.0, 1.0)
        return w, b / (cin * kh * kw) ** 0.5

    p = {}
    p["c1a_w"], p["c1a_b"] = conv(32, in_channels, 3, 3)
    p["c1b_w"], p["c1b_b"] = conv(64, 32, 3, 3)
    p["down_w"], p["down_b"] = conv(64, 64, 2, 2)
    p["c2a_w"], p["c2a_b"] = conv(128, 64, 3, 3)
    p["c2b_w"], p["c2b_b"] = conv(64, 128, 3, 3)
    p["se1_w"], p["se1_b"] = conv(8, 64, 1, 1)            # SE conv1, bias=True
    p["se2_w"], p["se2_b"] = conv(64, 8, 1, 1)            # SE conv2, bias=True
    p["up_w"], p["up_b"] = deconv(64, 64, 2, 2)
    p["c3_w"], p["c3_b"] = conv(64, 64, 3, 3)
    p["bot_w"], p["bot_b"] = conv(out_channels, 64, 3, 3)  # deconv=False bottom
    return p


# ----------------------------------------------------------------------------
# Pure-JAX f32 reference (for correctness check only)
# ----------------------------------------------------------------------------
def unet1x3_reference(x_nchw, p):
    dn = ("NHWC", "HWIO", "NHWC")
    hi = jax.lax.Precision.HIGHEST

    def conv(x, w, b, stride=1):
        w = jnp.transpose(w, (2, 3, 1, 0))
        y = jax.lax.conv_general_dilated(
            x, w, (stride, stride), "VALID", dimension_numbers=dn, precision=hi)
        return y + b

    def leaky(v):
        return jnp.where(v >= 0, v, LEAK * v)

    x = jnp.transpose(x_nchw, (0, 2, 3, 1))
    x1 = leaky(conv(x, p["c1a_w"], p["c1a_b"]))
    x1 = leaky(conv(x1, p["c1b_w"], p["c1b_b"]))
    x2 = leaky(conv(x1, p["down_w"], p["down_b"], stride=2))
    x1c = x1[:, 4:-4, 4:-4, :]
    x2 = leaky(conv(x2, p["c2a_w"], p["c2a_b"]))
    x2 = leaky(conv(x2, p["c2b_w"], p["c2b_b"]))
    m = jnp.mean(x2, axis=(1, 2), keepdims=True)
    h = jax.nn.relu(jnp.einsum("nijc,mc->nijm", m, p["se1_w"].reshape(8, 64),
                               precision=hi) + p["se1_b"])
    s = jax.nn.sigmoid(jnp.einsum("nijm,cm->nijc", h, p["se2_w"].reshape(64, 8),
                                  precision=hi) + p["se2_b"])
    x2 = x2 * s
    y = jnp.einsum("nijc,cokl->nikjlo", x2, p["up_w"], precision=hi)
    nb, hh, kh, ww, kw, o = y.shape
    x2 = leaky(y.reshape(nb, hh * kh, ww * kw, o) + p["up_b"])
    x3 = leaky(conv(x1c + x2, p["c3_w"], p["c3_b"]))
    z = conv(x3, p["bot_w"], p["bot_b"])
    return jnp.transpose(z, (0, 3, 1, 2))


# ----------------------------------------------------------------------------
if __name__ == "__main__":
    key = jax.random.PRNGKey(0)
    kx, kp = jax.random.split(key)
    N, Cin, H, W = 2, 3, 24, 24
    Cout = 3
    x = jax.random.normal(kx, (N, Cin, H, W), jnp.float32)
    params = init_params(kp, Cin, Cout)

    ref = unet1x3_reference(x, params)

    # 1) default auto row-tiling (one tile per conv at this small shape)
    out = jax.block_until_ready(jax.jit(unet1x3_forward)(x, params))
    assert out.shape == (N, Cout, H - 16, W - 16), out.shape
    rel = float(jnp.max(jnp.abs(out - ref)) / (jnp.max(jnp.abs(ref)) + 1e-6))
    assert rel < 5e-2, f"auto-tile mismatch vs reference: rel_err={rel}"

    # 2) forced small row tiles: exercises multi-tile grids, halo clamping and
    #    partially-masked edge blocks (the production tiling path).
    forced = jax.jit(functools.partial(unet1x3_forward, tile_rows=4))
    out2 = jax.block_until_ready(forced(x, params))
    rel2 = float(jnp.max(jnp.abs(out2 - ref)) / (jnp.max(jnp.abs(ref)) + 1e-6))
    assert rel2 < 5e-2, f"row-tiled mismatch vs reference: rel_err={rel2}"

    print("KERNEL_OK")
</pallas_src>

<mosaic_0001>
module attributes {stable_mosaic.version = 11 : i64} {
  func.func @_gemm_kernel(%arg0: i32, %arg1: i32, %arg2: memref<1x528x32xbf16, #tpu.memory_space<vmem>>, %arg3: memref<32x32xbf16, #tpu.memory_space<vmem>>, %arg4: memref<1x32xf32, #tpu.memory_space<vmem>>, %arg5: memref<1x528x32xbf16, #tpu.memory_space<vmem>>) attributes {dimension_semantics = [#tpu.dimension_semantics<parallel>, #tpu.dimension_semantics<parallel>], iteration_bounds = array<i64: 2, 1>, scalar_prefetch = 0 : i64, scratch_operands = 0 : i64, tpu.core_type = #tpu.core_type<tc>, window_params = [{transform_indices = @transform_0, window_bounds = array<i64: 1, 528, 32>}, {pipeline_mode = #tpu.pipeline_mode<synchronous>, transform_indices = @transform_1, window_bounds = array<i64: 32, 32>}, {pipeline_mode = #tpu.pipeline_mode<synchronous>, transform_indices = @transform_2, window_bounds = array<i64: 1, 32>}, {transform_indices = @transform_3, window_bounds = array<i64: 1, 528, 32>}]} {
    %c0 = arith.constant 0 : index
    %c0_0 = arith.constant 0 : index
    %c0_1 = arith.constant 0 : index
    %0 = vector.load %arg2[%c0, %c0_0, %c0_1] : memref<1x528x32xbf16, #tpu.memory_space<vmem>>, vector<1x528x32xbf16>
    %1 = vector.shape_cast %0 : vector<1x528x32xbf16> to vector<528x32xbf16>
    %c0_2 = arith.constant 0 : index
    %c0_3 = arith.constant 0 : index
    %2 = vector.load %arg3[%c0_2, %c0_3] : memref<32x32xbf16, #tpu.memory_space<vmem>>, vector<32x32xbf16>
    %cst = arith.constant dense<0.000000e+00> : vector<528x32xf32>
    %3 = tpu.matmul %1, %2, %cst {dimension_numbers = #tpu.dot_dimension_numbers<[1], [0], [0], [1], [0, 0, 1, 1], [], []>} : vector<528x32xbf16>, vector<32x32xbf16>, vector<528x32xf32> -> vector<528x32xf32>
    %c0_4 = arith.constant 0 : index
    %c0_5 = arith.constant 0 : index
    %4 = vector.load %arg4[%c0_4, %c0_5] : memref<1x32xf32, #tpu.memory_space<vmem>>, vector<1x32xf32>
    %5 = vector.broadcast %4 : vector<1x32xf32> to vector<528x32xf32>
    %6 = arith.addf %3, %5 : vector<528x32xf32>
    %cst_6 = arith.constant 1.000000e-01 : f32
    %7 = vector.broadcast %cst_6 : f32 to vector<528x32xf32>
    %8 = arith.mulf %7, %6 : vector<528x32xf32>
    %9 = arith.maximumf %6, %8 : vector<528x32xf32>
    %10 = arith.truncf %9 : vector<528x32xf32> to vector<528x32xbf16>
    %c0_7 = arith.constant 0 : index
    %c0_8 = arith.constant 0 : index
    %c0_9 = arith.constant 0 : index
    %11 = vector.load %arg5[%c0_7, %c0_8, %c0_9] : memref<1x528x32xbf16, #tpu.memory_space<vmem>>, vector<1x528x32xbf16>
    %12 = vector.shape_cast %11 : vector<1x528x32xbf16> to vector<528x32xbf16>
    %13 = vector.shape_cast %10 : vector<528x32xbf16> to vector<1x528x32xbf16>
    tpu.vector_store %arg5[%c0_7, %c0_8, %c0_9], %13 {strides = array<i32>} : memref<1x528x32xbf16, #tpu.memory_space<vmem>>, vector<1x528x32xbf16>,
    return
  }
  func.func @transform_0(%arg0: i32, %arg1: i32) -> (i32, i32, i32) {
    %c0_i32 = arith.constant 0 : i32
    %c0_i32_0 = arith.constant 0 : i32
    return %arg0, %arg1, %c0_i32 : i32, i32, i32
  }
  func.func @transform_1(%arg0: i32, %arg1: i32) -> (i32, i32) {
    %c0_i32 = arith.constant 0 : i32
    %c0_i32_0 = arith.constant 0 : i32
    %c0_i32_1 = arith.constant 0 : i32
    return %c0_i32, %c0_i32_0 : i32, i32
  }
  func.func @transform_2(%arg0: i32, %arg1: i32) -> (i32, i32) {
    %c0_i32 = arith.constant 0 : i32
    %c0_i32_0 = arith.constant 0 : i32
    %c0_i32_1 = arith.constant 0 : i32
    return %c0_i32, %c0_i32_0 : i32, i32
  }
  func.func @transform_3(%arg0: i32, %arg1: i32) -> (i32, i32, i32) {
    %c0_i32 = arith.constant 0 : i32
    %c0_i32_0 = arith.constant 0 : i32
    return %arg0, %arg1, %c0_i32 : i32, i32, i32
  }
}

module attributes {stable_mosaic.version = 11 : i64} {
  func.func @_conv3x3_kernel(%arg0: i32, %arg1: i32, %arg2: memref<1x480x32xbf16, #tpu.memory_space<vmem>>, %arg3: memref<1x24x32xbf16, #tpu.memory_space<vmem>>, %arg4: memref<1x24x32xbf16, #tpu.memory_space<vmem>>, %arg5: memref<3x96x64xbf16, #tpu.memory_space<vmem>>, %arg6: memref<1x64xf32, #tpu.memory_space<vmem>>, %arg7: memref<1x480x64xbf16, #tpu.memory_space<vmem>>) attributes {dimension_semantics = [#tpu.dimension_semantics<parallel>, #tpu.dimension_semantics<parallel>], iteration_bounds = array<i64: 2, 1>, scalar_prefetch = 0 : i64, scratch_operands = 0 : i64, tpu.core_type = #tpu.core_type<tc>, window_params = [{transform_indices = @transform_0, window_bounds = array<i64: 1, 480, 32>}, {transform_indices = @transform_1, window_bounds = array<i64: 1, 24, 32>}, {transform_indices = @transform_2, window_bounds = array<i64: 1, 24, 32>}, {pipeline_mode = #tpu.pipeline_mode<synchronous>, transform_indices = @transform_3, window_bounds = array<i64: 3, 96, 64>}, {pipeline_mode = #tpu.pipeline_mode<synchronous>, transform_indices = @transform_4, window_bounds = array<i64: 1, 64>}, {transform_indices = @transform_5, window_bounds = array<i64: 1, 480, 64>}]} {
    %c0 = arith.constant 0 : index
    %c0_0 = arith.constant 0 : index
    %c0_1 = arith.constant 0 : index
    %0 = vector.load %arg2[%c0, %c0_0, %c0_1] : memref<1x480x32xbf16, #tpu.memory_space<vmem>>, vector<1x480x32xbf16>
    %1 = vector.shape_cast %0 : vector<1x480x32xbf16> to vector<480x32xbf16>
    %c0_2 = arith.constant 0 : index
    %c0_3 = arith.constant 0 : index
    %c0_4 = arith.constant 0 : index
    %2 = vector.load %arg3[%c0_2, %c0_3, %c0_4] : memref<1x24x32xbf16, #tpu.memory_space<vmem>>, vector<1x24x32xbf16>
    %3 = vector.shape_cast %2 : vector<1x24x32xbf16> to vector<24x32xbf16>
    %c0_5 = arith.constant 0 : index
    %c0_6 = arith.constant 0 : index
    %c0_7 = arith.constant 0 : index
    %4 = vector.load %arg4[%c0_5, %c0_6, %c0_7] : memref<1x24x32xbf16, #tpu.memory_space<vmem>>, vector<1x24x32xbf16>
    %5 = vector.shape_cast %4 : vector<1x24x32xbf16> to vector<24x32xbf16>
    %cst = arith.constant 0.000000e+00 : bf16
    %6 = vector.broadcast %cst : bf16 to vector<8x32xbf16>
    %7 = tpu.concatenate %1, %3, %5, %6 in 0 : vector<480x32xbf16>, vector<24x32xbf16>, vector<24x32xbf16>, vector<8x32xbf16> -> vector<536x32xbf16>
    %8 = vector.extract_strided_slice %7 {offsets = [0, 0], sizes = [528, 32], strides = [1, 1]} : vector<536x32xbf16> to vector<528x32xbf16>
    %9 = vector.extract_strided_slice %7 {offsets = [1, 0], sizes = [528, 32], strides = [1, 1]} : vector<536x32xbf16> to vector<528x32xbf16>
    %10 = vector.extract_strided_slice %7 {offsets = [2, 0], sizes = [528, 32], strides = [1, 1]} : vector<536x32xbf16> to vector<528x32xbf16>
    %11 = tpu.concatenate %8, %9, %10 in 1 : vector<528x32xbf16>, vector<528x32xbf16>, vector<528x32xbf16> -> vector<528x96xbf16>
    %12 = vector.extract_strided_slice %11 {offsets = [0, 0], sizes = [480, 96], strides = [1, 1]} : vector<528x96xbf16> to vector<480x96xbf16>
    %c0_8 = arith.constant 0 : index
    %c0_9 = arith.constant 0 : index
    %c0_10 = arith.constant 0 : index
    %13 = vector.load %arg5[%c0_8, %c0_9, %c0_10] : memref<3x96x64xbf16, #tpu.memory_space<vmem>>, vector<1x96x64xbf16>
    %14 = vector.shape_cast %13 : vector<1x96x64xbf16> to vector<96x64xbf16>
    %cst_11 = arith.constant dense<0.000000e+00> : vector<480x64xf32>
    %15 = tpu.matmul %12, %14, %cst_11 {dimension_numbers = #tpu.dot_dimension_numbers<[1], [0], [0], [1], [0, 0, 1, 1], [], []>} : vector<480x96xbf16>, vector<96x64xbf16>, vector<480x64xf32> -> vector<480x64xf32>
    %16 = vector.extract_strided_slice %11 {offsets = [24, 0], sizes = [480, 96], strides = [1, 1]} : vector<528x96xbf16> to vector<480x96xbf16>
    %c1 = arith.constant 1 : index
    %c0_12 = arith.constant 0 : index
    %c0_13 = arith.constant 0 : index
    %17 = vector.load %arg5[%c1, %c0_12, %c0_13] : memref<3x96x64xbf16, #tpu.memory_space<vmem>>, vector<1x96x64xbf16>
    %18 = vector.shape_cast %17 : vector<1x96x64xbf16> to vector<96x64xbf16>
    %cst_14 = arith.constant dense<0.000000e+00> : vector<480x64xf32>
    %19 = tpu.matmul %16, %18, %cst_14 {dimension_numbers = #tpu.dot_dimension_numbers<[1], [0], [0], [1], [0, 0, 1, 1], [], []>} : vector<480x96xbf16>, vector<96x64xbf16>, vector<480x64xf32> -> vector<480x64xf32>
    %20 = arith.addf %15, %19 : vector<480x64xf32>
    %21 = vector.extract_strided_slice %11 {offsets = [48, 0], sizes = [480, 96], strides = [1, 1]} : vector<528x96xbf16> to vector<480x96xbf16>
    %c2 = arith.constant 2 : index
    %c0_15 = arith.constant 0 : index
    %c0_16 = arith.constant 0 : index
    %22 = vector.load %arg5[%c2, %c0_15, %c0_16] : memref<3x96x64xbf16, #tpu.memory_space<vmem>>, vector<1x96x64xbf16>
    %23 = vector.shape_cast %22 : vector<1x96x64xbf16> to vector<96x64xbf16>
    %cst_17 = arith.constant dense<0.000000e+00> : vector<480x64xf32>
    %24 = tpu.matmul %21, %23, %cst_17 {dimension_numbers = #tpu.dot_dimension_numbers<[1], [0], [0], [1], [0, 0, 1, 1], [], []>} : vector<480x96xbf16>, vector<96x64xbf16>, vector<480x64xf32> -> vector<480x64xf32>
    %25 = arith.addf %20, %24 : vector<480x64xf32>
    %c0_18 = arith.constant 0 : index
    %c0_19 = arith.constant 0 : index
    %26 = vector.load %arg6[%c0_18, %c0_19] : memref<1x64xf32, #tpu.memory_space<vmem>>, vector<1x64xf32>
    %27 = vector.broadcast %26 : vector<1x64xf32> to vector<480x64xf32>
    %28 = arith.addf %25, %27 : vector<480x64xf32>
    %cst_20 = arith.constant 1.000000e-01 : f32
    %29 = vector.broadcast %cst_20 : f32 to vector<480x64xf32>
    %30 = arith.mulf %29, %28 : vector<480x64xf32>
    %31 = arith.maximumf %28, %30 : vector<480x64xf32>
    %32 = arith.truncf %31 : vector<480x64xf32> to vector<480x64xbf16>
    %c0_21 = arith.constant 0 : index
    %c0_22 = arith.constant 0 : index
    %c0_23 = arith.constant 0 : index
    %33 = vector.load %arg7[%c0_21, %c0_22, %c0_23] : memref<1x480x64xbf16, #tpu.memory_space<vmem>>, vector<1x480x64xbf16>
    %34 = vector.shape_cast %33 : vector<1x480x64xbf16> to vector<480x64xbf16>
    %35 = vector.shape_cast %32 : vector<480x64xbf16> to vector<1x480x64xbf16>
    tpu.vector_store %arg7[%c0_21, %c0_22, %c0_23], %35 {strides = array<i32>} : memref<1x480x64xbf16, #tpu.memory_space<vmem>>, vector<1x480x64xbf16>,
    return
  }
  func.func @transform_0(%arg0: i32, %arg1: i32) -> (i32, i32, i32) {
    %c0_i32 = arith.constant 0 : i32
    %c0_i32_0 = arith.constant 0 : i32
    return %arg0, %arg1, %c0_i32 : i32, i32, i32
  }
  func.func @transform_1(%arg0: i32, %arg1: i32) -> (i32, i32, i32) {
    %c1_i32 = arith.constant 1 : i32
    %0 = arith.addi %arg1, %c1_i32 : i32
    %c20_i32 = arith.constant 20 : i32
    %1 = arith.muli %0, %c20_i32 : i32
    %c21_i32 = arith.constant 21 : i32
    %2 = arith.minsi %1, %c21_i32 : i32
    %c0_i32 = arith.constant 0 : i32
    %c0_i32_0 = arith.constant 0 : i32
    return %arg0, %2, %c0_i32 : i32, i32, i32
  }
  func.func @transform_2(%arg0: i32, %arg1: i32) -> (i32, i32, i32) {
    %c1_i32 = arith.constant 1 : i32
    %0 = arith.addi %arg1, %c1_i32 : i32
    %c20_i32 = arith.constant 20 : i32
    %1 = arith.muli %0, %c20_i32 : i32
    %c1_i32_0 = arith.constant 1 : i32
    %2 = arith.addi %1, %c1_i32_0 : i32
    %c21_i32 = arith.constant 21 : i32
    %3 = arith.minsi %2, %c21_i32 : i32
    %c0_i32 = arith.constant 0 : i32
    %c0_i32_1 = arith.constant 0 : i32
    return %arg0, %3, %c0_i32 : i32, i32, i32
  }
  func.func @transform_3(%arg0: i32, %arg1: i32) -> (i32, i32, i32) {
    %c0_i32 = arith.constant 0 : i32
    %c0_i32_0 = arith.constant 0 : i32
    %c0_i32_1 = arith.constant 0 : i32
    %c0_i32_2 = arith.constant 0 : i32
    return %c0_i32, %c0_i32_0, %c0_i32_1 : i32, i32, i32
  }
  func.func @transform_4(%arg0: i32, %arg1: i32) -> (i32, i32) {
    %c0_i32 = arith.constant 0 : i32
    %c0_i32_0 = arith.constant 0 : i32
    %c0_i32_1 = arith.constant 0 : i32
    return %c0_i32, %c0_i32_0 : i32, i32
  }
  func.func @transform_5(%arg0: i32, %arg1: i32) -> (i32, i32, i32) {
    %c0_i32 = arith.constant 0 : i32
    %c0_i32_0 = arith.constant 0 : i32
    return %arg0, %arg1, %c0_i32 : i32, i32, i32
  }
}

module attributes {stable_mosaic.version = 11 : i64} {
  func.func @_gemm_kernel(%arg0: i32, %arg1: i32, %arg2: memref<1x160x256xbf16, #tpu.memory_space<vmem>>, %arg3: memref<256x64xbf16, #tpu.memory_space<vmem>>, %arg4: memref<1x64xf32, #tpu.memory_space<vmem>>, %arg5: memref<1x160x64xbf16, #tpu.memory_space<vmem>>) attributes {dimension_semantics = [#tpu.dimension_semantics<parallel>, #tpu.dimension_semantics<parallel>], iteration_bounds = array<i64: 2, 1>, scalar_prefetch = 0 : i64, scratch_operands = 0 : i64, tpu.core_type = #tpu.core_type<tc>, window_params = [{transform_indices = @transform_0, window_bounds = array<i64: 1, 160, 256>}, {pipeline_mode = #tpu.pipeline_mode<synchronous>, transform_indices = @transform_1, window_bounds = array<i64: 256, 64>}, {pipeline_mode = #tpu.pipeline_mode<synchronous>, transform_indices = @transform_2, window_bounds = array<i64: 1, 64>}, {transform_indices = @transform_3, window_bounds = array<i64: 1, 160, 64>}]} {
    %c0 = arith.constant 0 : index
    %c0_0 = arith.constant 0 : index
    %c0_1 = arith.constant 0 : index
    %0 = vector.load %arg2[%c0, %c0_0, %c0_1] : memref<1x160x256xbf16, #tpu.memory_space<vmem>>, vector<1x160x256xbf16>
    %1 = vector.shape_cast %0 : vector<1x160x256xbf16> to vector<160x256xbf16>
    %c0_2 = arith.constant 0 : index
    %c0_3 = arith.constant 0 : index
    %2 = vector.load %arg3[%c0_2, %c0_3] : memref<256x64xbf16, #tpu.memory_space<vmem>>, vector<256x64xbf16>
    %cst = arith.constant dense<0.000000e+00> : vector<160x64xf32>
    %3 = tpu.matmul %1, %2, %cst {dimension_numbers = #tpu.dot_dimension_numbers<[1], [0], [0], [1], [0, 0, 1, 1], [], []>} : vector<160x256xbf16>, vector<256x64xbf16>, vector<160x64xf32> -> vector<160x64xf32>
    %c0_4 = arith.constant 0 : index
    %c0_5 = arith.constant 0 : index
    %4 = vector.load %arg4[%c0_4, %c0_5] : memref<1x64xf32, #tpu.memory_space<vmem>>, vector<1x64xf32>
    %5 = vector.broadcast %4 : vector<1x64xf32> to vector<160x64xf32>
    %6 = arith.addf %3, %5 : vector<160x64xf32>
    %cst_6 = arith.constant 1.000000e-01 : f32
    %7 = vector.broadcast %cst_6 : f32 to vector<160x64xf32>
    %8 = arith.mulf %7, %6 : vector<160x64xf32>
    %9 = arith.maximumf %6, %8 : vector<160x64xf32>
    %10 = arith.truncf %9 : vector<160x64xf32> to vector<160x64xbf16>
    %c0_7 = arith.constant 0 : index
    %c0_8 = arith.constant 0 : index
    %c0_9 = arith.constant 0 : index
    %11 = vector.load %arg5[%c0_7, %c0_8, %c0_9] : memref<1x160x64xbf16, #tpu.memory_space<vmem>>, vector<1x160x64xbf16>
    %12 = vector.shape_cast %11 : vector<1x160x64xbf16> to vector<160x64xbf16>
    %13 = vector.shape_cast %10 : vector<160x64xbf16> to vector<1x160x64xbf16>
    tpu.vector_store %arg5[%c0_7, %c0_8, %c0_9], %13 {strides = array<i32>} : memref<1x160x64xbf16, #tpu.memory_space<vmem>>, vector<1x160x64xbf16>,
    return
  }
  func.func @transform_0(%arg0: i32, %arg1: i32) -> (i32, i32, i32) {
    %c0_i32 = arith.constant 0 : i32
    %c0_i32_0 = arith.constant 0 : i32
    return %arg0, %arg1, %c0_i32 : i32, i32, i32
  }
  func.func @transform_1(%arg0: i32, %arg1: i32) -> (i32, i32) {
    %c0_i32 = arith.constant 0 : i32
    %c0_i32_0 = arith.constant 0 : i32
    %c0_i32_1 = arith.constant 0 : i32
    return %c0_i32, %c0_i32_0 : i32, i32
  }
  func.func @transform_2(%arg0: i32, %arg1: i32) -> (i32, i32) {
    %c0_i32 = arith.constant 0 : i32
    %c0_i32_0 = arith.constant 0 : i32
    %c0_i32_1 = arith.constant 0 : i32
    return %c0_i32, %c0_i32_0 : i32, i32
  }
  func.func @transform_3(%arg0: i32, %arg1: i32) -> (i32, i32, i32) {
    %c0_i32 = arith.constant 0 : i32
    %c0_i32_0 = arith.constant 0 : i32
    return %arg0, %arg1, %c0_i32 : i32, i32, i32
  }
}

module attributes {stable_mosaic.version = 11 : i64} {
  func.func @_conv3x3_kernel(%arg0: i32, %arg1: i32, %arg2: memref<1x128x64xbf16, #tpu.memory_space<vmem>>, %arg3: memref<1x16x64xbf16, #tpu.memory_space<vmem>>, %arg4: memref<1x16x64xbf16, #tpu.memory_space<vmem>>, %arg5: memref<3x192x128xbf16, #tpu.memory_space<vmem>>, %arg6: memref<1x128xf32, #tpu.memory_space<vmem>>, %arg7: memref<1x128x128xbf16, #tpu.memory_space<vmem>>) attributes {dimension_semantics = [#tpu.dimension_semantics<parallel>, #tpu.dimension_semantics<parallel>], iteration_bounds = array<i64: 2, 1>, scalar_prefetch = 0 : i64, scratch_operands = 0 : i64, tpu.core_type = #tpu.core_type<tc>, window_params = [{transform_indices = @transform_0, window_bounds = array<i64: 1, 128, 64>}, {transform_indices = @transform_1, window_bounds = array<i64: 1, 16, 64>}, {transform_indices = @transform_2, window_bounds = array<i64: 1, 16, 64>}, {pipeline_mode = #tpu.pipeline_mode<synchronous>, transform_indices = @transform_3, window_bounds = array<i64: 3, 192, 128>}, {pipeline_mode = #tpu.pipeline_mode<synchronous>, transform_indices = @transform_4, window_bounds = array<i64: 1, 128>}, {transform_indices = @transform_5, window_bounds = array<i64: 1, 128, 128>}]} {
    %c0 = arith.constant 0 : index
    %c0_0 = arith.constant 0 : index
    %c0_1 = arith.constant 0 : index
    %0 = vector.load %arg2[%c0, %c0_0, %c0_1] : memref<1x128x64xbf16, #tpu.memory_space<vmem>>, vector<1x128x64xbf16>
    %1 = vector.shape_cast %0 : vector<1x128x64xbf16> to vector<128x64xbf16>
    %c0_2 = arith.constant 0 : index
    %c0_3 = arith.constant 0 : index
    %c0_4 = arith.constant 0 : index
    %2 = vector.load %arg3[%c0_2, %c0_3, %c0_4] : memref<1x16x64xbf16, #tpu.memory_space<vmem>>, vector<1x16x64xbf16>
    %3 = vector.shape_cast %2 : vector<1x16x64xbf16> to vector<16x64xbf16>
    %c0_5 = arith.constant 0 : index
    %c0_6 = arith.constant 0 : index
    %c0_7 = arith.constant 0 : index
    %4 = vector.load %arg4[%c0_5, %c0_6, %c0_7] : memref<1x16x64xbf16, #tpu.memory_space<vmem>>, vector<1x16x64xbf16>
    %5 = vector.shape_cast %4 : vector<1x16x64xbf16> to vector<16x64xbf16>
    %cst = arith.constant 0.000000e+00 : bf16
    %6 = vector.broadcast %cst : bf16 to vector<8x64xbf16>
    %7 = tpu.concatenate %1, %3, %5, %6 in 0 : vector<128x64xbf16>, vector<16x64xbf16>, vector<16x64xbf16>, vector<8x64xbf16> -> vector<168x64xbf16>
    %8 = vector.extract_strided_slice %7 {offsets = [0, 0], sizes = [160, 64], strides = [1, 1]} : vector<168x64xbf16> to vector<160x64xbf16>
    %9 = vector.extract_strided_slice %7 {offsets = [1, 0], sizes = [160, 64], strides = [1, 1]} : vector<168x64xbf16> to vector<160x64xbf16>
    %10 = vector.extract_strided_slice %7 {offsets = [2, 0], sizes = [160, 64], strides = [1, 1]} : vector<168x64xbf16> to vector<160x64xbf16>
    %11 = tpu.concatenate %8, %9, %10 in 1 : vector<160x64xbf16>, vector<160x64xbf16>, vector<160x64xbf16> -> vector<160x192xbf16>
    %12 = vector.extract_strided_slice %11 {offsets = [0, 0], sizes = [128, 192], strides = [1, 1]} : vector<160x192xbf16> to vector<128x192xbf16>
    %c0_8 = arith.constant 0 : index
    %c0_9 = arith.constant 0 : index
    %c0_10 = arith.constant 0 : index
    %13 = vector.load %arg5[%c0_8, %c0_9, %c0_10] : memref<3x192x128xbf16, #tpu.memory_space<vmem>>, vector<1x192x128xbf16>
    %14 = vector.shape_cast %13 : vector<1x192x128xbf16> to vector<192x128xbf16>
    %cst_11 = arith.constant dense<0.000000e+00> : vector<128x128xf32>
    %15 = tpu.matmul %12, %14, %cst_11 {dimension_numbers = #tpu.dot_dimension_numbers<[1], [0], [0], [1], [0, 0, 1, 1], [], []>} : vector<128x192xbf16>, vector<192x128xbf16>, vector<128x128xf32> -> vector<128x128xf32>
    %16 = vector.extract_strided_slice %11 {offsets = [16, 0], sizes = [128, 192], strides = [1, 1]} : vector<160x192xbf16> to vector<128x192xbf16>
    %c1 = arith.constant 1 : index
    %c0_12 = arith.constant 0 : index
    %c0_13 = arith.constant 0 : index
    %17 = vector.load %arg5[%c1, %c0_12, %c0_13] : memref<3x192x128xbf16, #tpu.memory_space<vmem>>, vector<1x192x128xbf16>
    %18 = vector.shape_cast %17 : vector<1x192x128xbf16> to vector<192x128xbf16>
    %cst_14 = arith.constant dense<0.000000e+00> : vector<128x128xf32>
    %19 = tpu.matmul %16, %18, %cst_14 {dimension_numbers = #tpu.dot_dimension_numbers<[1], [0], [0], [1], [0, 0, 1, 1], [], []>} : vector<128x192xbf16>, vector<192x128xbf16>, vector<128x128xf32> -> vector<128x128xf32>
    %20 = arith.addf %15, %19 : vector<128x128xf32>
    %21 = vector.extract_strided_slice %11 {offsets = [32, 0], sizes = [128, 192], strides = [1, 1]} : vector<160x192xbf16> to vector<128x192xbf16>
    %c2 = arith.constant 2 : index
    %c0_15 = arith.constant 0 : index
    %c0_16 = arith.constant 0 : index
    %22 = vector.load %arg5[%c2, %c0_15, %c0_16] : memref<3x192x128xbf16, #tpu.memory_space<vmem>>, vector<1x192x128xbf16>
    %23 = vector.shape_cast %22 : vector<1x192x128xbf16> to vector<192x128xbf16>
    %cst_17 = arith.constant dense<0.000000e+00> : vector<128x128xf32>
    %24 = tpu.matmul %21, %23, %cst_17 {dimension_numbers = #tpu.dot_dimension_numbers<[1], [0], [0], [1], [0, 0, 1, 1], [], []>} : vector<128x192xbf16>, vector<192x128xbf16>, vector<128x128xf32> -> vector<128x128xf32>
    %25 = arith.addf %20, %24 : vector<128x128xf32>
    %c0_18 = arith.constant 0 : index
    %c0_19 = arith.constant 0 : index
    %26 = vector.load %arg6[%c0_18, %c0_19] : memref<1x128xf32, #tpu.memory_space<vmem>>, vector<1x128xf32>
    %27 = vector.broadcast %26 : vector<1x128xf32> to vector<128x128xf32>
    %28 = arith.addf %25, %27 : vector<128x128xf32>
    %cst_20 = arith.constant 1.000000e-01 : f32
    %29 = vector.broadcast %cst_20 : f32 to vector<128x128xf32>
    %30 = arith.mulf %29, %28 : vector<128x128xf32>
    %31 = arith.maximumf %28, %30 : vector<128x128xf32>
    %32 = arith.truncf %31 : vector<128x128xf32> to vector<128x128xbf16>
    %c0_21 = arith.constant 0 : index
    %c0_22 = arith.constant 0 : index
    %c0_23 = arith.constant 0 : index
    %33 = vector.load %arg7[%c0_21, %c0_22, %c0_23] : memref<1x128x128xbf16, #tpu.memory_space<vmem>>, vector<1x128x128xbf16>
    %34 = vector.shape_cast %33 : vector<1x128x128xbf16> to vector<128x128xbf16>
    %35 = vector.shape_cast %32 : vector<128x128xbf16> to vector<1x128x128xbf16>
    tpu.vector_store %arg7[%c0_21, %c0_22, %c0_23], %35 {strides = array<i32>} : memref<1x128x128xbf16, #tpu.memory_space<vmem>>, vector<1x128x128xbf16>,
    return
  }
  func.func @transform_0(%arg0: i32, %arg1: i32) -> (i32, i32, i32) {
    %c0_i32 = arith.constant 0 : i32
    %c0_i32_0 = arith.constant 0 : i32
    return %arg0, %arg1, %c0_i32 : i32, i32, i32
  }
  func.func @transform_1(%arg0: i32, %arg1: i32) -> (i32, i32, i32) {
    %c1_i32 = arith.constant 1 : i32
    %0 = arith.addi %arg1, %c1_i32 : i32
    %c8_i32 = arith.constant 8 : i32
    %1 = arith.muli %0, %c8_i32 : i32
    %c9_i32 = arith.constant 9 : i32
    %2 = arith.minsi %1, %c9_i32 : i32
    %c0_i32 = arith.constant 0 : i32
    %c0_i32_0 = arith.constant 0 : i32
    return %arg0, %2, %c0_i32 : i32, i32, i32
  }
  func.func @transform_2(%arg0: i32, %arg1: i32) -> (i32, i32, i32) {
    %c1_i32 = arith.constant 1 : i32
    %0 = arith.addi %arg1, %c1_i32 : i32
    %c8_i32 = arith.constant 8 : i32
    %1 = arith.muli %0, %c8_i32 : i32
    %c1_i32_0 = arith.constant 1 : i32
    %2 = arith.addi %1, %c1_i32_0 : i32
    %c9_i32 = arith.constant 9 : i32
    %3 = arith.minsi %2, %c9_i32 : i32
    %c0_i32 = arith.constant 0 : i32
    %c0_i32_1 = arith.constant 0 : i32
    return %arg0, %3, %c0_i32 : i32, i32, i32
  }
  func.func @transform_3(%arg0: i32, %arg1: i32) -> (i32, i32, i32) {
    %c0_i32 = arith.constant 0 : i32
    %c0_i32_0 = arith.constant 0 : i32
    %c0_i32_1 = arith.constant 0 : i32
    %c0_i32_2 = arith.constant 0 : i32
    return %c0_i32, %c0_i32_0, %c0_i32_1 : i32, i32, i32
  }
  func.func @transform_4(%arg0: i32, %arg1: i32) -> (i32, i32) {
    %c0_i32 = arith.constant 0 : i32
    %c0_i32_0 = arith.constant 0 : i32
    %c0_i32_1 = arith.constant 0 : i32
    return %c0_i32, %c0_i32_0 : i32, i32
  }
  func.func @transform_5(%arg0: i32, %arg1: i32) -> (i32, i32, i32) {
    %c0_i32 = arith.constant 0 : i32
    %c0_i32_0 = arith.constant 0 : i32
    return %arg0, %arg1, %c0_i32 : i32, i32, i32
  }
}

module attributes {stable_mosaic.version = 11 : i64} {
  func.func @_conv3x3_kernel(%arg0: i32, %arg1: i32, %arg2: memref<1x96x128xbf16, #tpu.memory_space<vmem>>, %arg3: memref<1x16x128xbf16, #tpu.memory_space<vmem>>, %arg4: memref<1x16x128xbf16, #tpu.memory_space<vmem>>, %arg5: memref<3x384x64xbf16, #tpu.memory_space<vmem>>, %arg6: memref<1x64xf32, #tpu.memory_space<vmem>>, %arg7: memref<1x96x64xbf16, #tpu.memory_space<vmem>>) attributes {dimension_semantics = [#tpu.dimension_semantics<parallel>, #tpu.dimension_semantics<parallel>], iteration_bounds = array<i64: 2, 1>, scalar_prefetch = 0 : i64, scratch_operands = 0 : i64, tpu.core_type = #tpu.core_type<tc>, window_params = [{transform_indices = @transform_0, window_bounds = array<i64: 1, 96, 128>}, {transform_indices = @transform_1, window_bounds = array<i64: 1, 16, 128>}, {transform_indices = @transform_2, window_bounds = array<i64: 1, 16, 128>}, {pipeline_mode = #tpu.pipeline_mode<synchronous>, transform_indices = @transform_3, window_bounds = array<i64: 3, 384, 64>}, {pipeline_mode = #tpu.pipeline_mode<synchronous>, transform_indices = @transform_4, window_bounds = array<i64: 1, 64>}, {transform_indices = @transform_5, window_bounds = array<i64: 1, 96, 64>}]} {
    %c0 = arith.constant 0 : index
    %c0_0 = arith.constant 0 : index
    %c0_1 = arith.constant 0 : index
    %0 = vector.load %arg2[%c0, %c0_0, %c0_1] : memref<1x96x128xbf16, #tpu.memory_space<vmem>>, vector<1x96x128xbf16>
    %1 = vector.shape_cast %0 : vector<1x96x128xbf16> to vector<96x128xbf16>
    %c0_2 = arith.constant 0 : index
    %c0_3 = arith.constant 0 : index
    %c0_4 = arith.constant 0 : index
    %2 = vector.load %arg3[%c0_2, %c0_3, %c0_4] : memref<1x16x128xbf16, #tpu.memory_space<vmem>>, vector<1x16x128xbf16>
    %3 = vector.shape_cast %2 : vector<1x16x128xbf16> to vector<16x128xbf16>
    %c0_5 = arith.constant 0 : index
    %c0_6 = arith.constant 0 : index
    %c0_7 = arith.constant 0 : index
    %4 = vector.load %arg4[%c0_5, %c0_6, %c0_7] : memref<1x16x128xbf16, #tpu.memory_space<vmem>>, vector<1x16x128xbf16>
    %5 = vector.shape_cast %4 : vector<1x16x128xbf16> to vector<16x128xbf16>
    %cst = arith.constant 0.000000e+00 : bf16
    %6 = vector.broadcast %cst : bf16 to vector<8x128xbf16>
    %7 = tpu.concatenate %1, %3, %5, %6 in 0 : vector<96x128xbf16>, vector<16x128xbf16>, vector<16x128xbf16>, vector<8x128xbf16> -> vector<136x128xbf16>
    %8 = vector.extract_strided_slice %7 {offsets = [0, 0], sizes = [128, 128], strides = [1, 1]} : vector<136x128xbf16> to vector<128x128xbf16>
    %9 = vector.extract_strided_slice %7 {offsets = [1, 0], sizes = [128, 128], strides = [1, 1]} : vector<136x128xbf16> to vector<128x128xbf16>
    %10 = vector.extract_strided_slice %7 {offsets = [2, 0], sizes = [128, 128], strides = [1, 1]} : vector<136x128xbf16> to vector<128x128xbf16>
    %11 = tpu.concatenate %8, %9, %10 in 1 : vector<128x128xbf16>, vector<128x128xbf16>, vector<128x128xbf16> -> vector<128x384xbf16>
    %12 = vector.extract_strided_slice %11 {offsets = [0, 0], sizes = [96, 384], strides = [1, 1]} : vector<128x384xbf16> to vector<96x384xbf16>
    %c0_8 = arith.constant 0 : index
    %c0_9 = arith.constant 0 : index
    %c0_10 = arith.constant 0 : index
    %13 = vector.load %arg5[%c0_8, %c0_9, %c0_10] : memref<3x384x64xbf16, #tpu.memory_space<vmem>>, vector<1x384x64xbf16>
    %14 = vector.shape_cast %13 : vector<1x384x64xbf16> to vector<384x64xbf16>
    %cst_11 = arith.constant dense<0.000000e+00> : vector<96x64xf32>
    %15 = tpu.matmul %12, %14, %cst_11 {dimension_numbers = #tpu.dot_dimension_numbers<[1], [0], [0], [1], [0, 0, 1, 1], [], []>} : vector<96x384xbf16>, vector<384x64xbf16>, vector<96x64xf32> -> vector<96x64xf32>
    %16 = vector.extract_strided_slice %11 {offsets = [16, 0], sizes = [96, 384], strides = [1, 1]} : vector<128x384xbf16> to vector<96x384xbf16>
    %c1 = arith.constant 1 : index
    %c0_12 = arith.constant 0 : index
    %c0_13 = arith.constant 0 : index
    %17 = vector.load %arg5[%c1, %c0_12, %c0_13] : memref<3x384x64xbf16, #tpu.memory_space<vmem>>, vector<1x384x64xbf16>
    %18 = vector.shape_cast %17 : vector<1x384x64xbf16> to vector<384x64xbf16>
    %cst_14 = arith.constant dense<0.000000e+00> : vector<96x64xf32>
    %19 = tpu.matmul %16, %18, %cst_14 {dimension_numbers = #tpu.dot_dimension_numbers<[1], [0], [0], [1], [0, 0, 1, 1], [], []>} : vector<96x384xbf16>, vector<384x64xbf16>, vector<96x64xf32> -> vector<96x64xf32>
    %20 = arith.addf %15, %19 : vector<96x64xf32>
    %21 = vector.extract_strided_slice %11 {offsets = [32, 0], sizes = [96, 384], strides = [1, 1]} : vector<128x384xbf16> to vector<96x384xbf16>
    %c2 = arith.constant 2 : index
    %c0_15 = arith.constant 0 : index
    %c0_16 = arith.constant 0 : index
    %22 = vector.load %arg5[%c2, %c0_15, %c0_16] : memref<3x384x64xbf16, #tpu.memory_space<vmem>>, vector<1x384x64xbf16>
    %23 = vector.shape_cast %22 : vector<1x384x64xbf16> to vector<384x64xbf16>
    %cst_17 = arith.constant dense<0.000000e+00> : vector<96x64xf32>
    %24 = tpu.matmul %21, %23, %cst_17 {dimension_numbers = #tpu.dot_dimension_numbers<[1], [0], [0], [1], [0, 0, 1, 1], [], []>} : vector<96x384xbf16>, vector<384x64xbf16>, vector<96x64xf32> -> vector<96x64xf32>
    %25 = arith.addf %20, %24 : vector<96x64xf32>
    %c0_18 = arith.constant 0 : index
    %c0_19 = arith.constant 0 : index
    %26 = vector.load %arg6[%c0_18, %c0_19] : memref<1x64xf32, #tpu.memory_space<vmem>>, vector<1x64xf32>
    %27 = vector.broadcast %26 : vector<1x64xf32> to vector<96x64xf32>
    %28 = arith.addf %25, %27 : vector<96x64xf32>
    %cst_20 = arith.constant 1.000000e-01 : f32
    %29 = vector.broadcast %cst_20 : f32 to vector<96x64xf32>
    %30 = arith.mulf %29, %28 : vector<96x64xf32>
    %31 = arith.maximumf %28, %30 : vector<96x64xf32>
    %32 = arith.truncf %31 : vector<96x64xf32> to vector<96x64xbf16>
    %c0_21 = arith.constant 0 : index
    %c0_22 = arith.constant 0 : index
    %c0_23 = arith.constant 0 : index
    %33 = vector.load %arg7[%c0_21, %c0_22, %c0_23] : memref<1x96x64xbf16, #tpu.memory_space<vmem>>, vector<1x96x64xbf16>
    %34 = vector.shape_cast %33 : vector<1x96x64xbf16> to vector<96x64xbf16>
    %35 = vector.shape_cast %32 : vector<96x64xbf16> to vector<1x96x64xbf16>
    tpu.vector_store %arg7[%c0_21, %c0_22, %c0_23], %35 {strides = array<i32>} : memref<1x96x64xbf16, #tpu.memory_space<vmem>>, vector<1x96x64xbf16>,
    return
  }
  func.func @transform_0(%arg0: i32, %arg1: i32) -> (i32, i32, i32) {
    %c0_i32 = arith.constant 0 : i32
    %c0_i32_0 = arith.constant 0 : i32
    return %arg0, %arg1, %c0_i32 : i32, i32, i32
  }
  func.func @transform_1(%arg0: i32, %arg1: i32) -> (i32, i32, i32) {
    %c1_i32 = arith.constant 1 : i32
    %0 = arith.addi %arg1, %c1_i32 : i32
    %c6_i32 = arith.constant 6 : i32
    %1 = arith.muli %0, %c6_i32 : i32
    %c7_i32 = arith.constant 7 : i32
    %2 = arith.minsi %1, %c7_i32 : i32
    %c0_i32 = arith.constant 0 : i32
    %c0_i32_0 = arith.constant 0 : i32
    return %arg0, %2, %c0_i32 : i32, i32, i32
  }
  func.func @transform_2(%arg0: i32, %arg1: i32) -> (i32, i32, i32) {
    %c1_i32 = arith.constant 1 : i32
    %0 = arith.addi %arg1, %c1_i32 : i32
    %c6_i32 = arith.constant 6 : i32
    %1 = arith.muli %0, %c6_i32 : i32
    %c1_i32_0 = arith.constant 1 : i32
    %2 = arith.addi %1, %c1_i32_0 : i32
    %c7_i32 = arith.constant 7 : i32
    %3 = arith.minsi %2, %c7_i32 : i32
    %c0_i32 = arith.constant 0 : i32
    %c0_i32_1 = arith.constant 0 : i32
    return %arg0, %3, %c0_i32 : i32, i32, i32
  }
  func.func @transform_3(%arg0: i32, %arg1: i32) -> (i32, i32, i32) {
    %c0_i32 = arith.constant 0 : i32
    %c0_i32_0 = arith.constant 0 : i32
    %c0_i32_1 = arith.constant 0 : i32
    %c0_i32_2 = arith.constant 0 : i32
    return %c0_i32, %c0_i32_0, %c0_i32_1 : i32, i32, i32
  }
  func.func @transform_4(%arg0: i32, %arg1: i32) -> (i32, i32) {
    %c0_i32 = arith.constant 0 : i32
    %c0_i32_0 = arith.constant 0 : i32
    %c0_i32_1 = arith.constant 0 : i32
    return %c0_i32, %c0_i32_0 : i32, i32
  }
  func.func @transform_5(%arg0: i32, %arg1: i32) -> (i32, i32, i32) {
    %c0_i32 = arith.constant 0 : i32
    %c0_i32_0 = arith.constant 0 : i32
    return %arg0, %arg1, %c0_i32 : i32, i32, i32
  }
}

module attributes {stable_mosaic.version = 11 : i64} {
  func.func @_gate_gemm_kernel(%arg0: i32, %arg1: i32, %arg2: memref<1x96x64xbf16, #tpu.memory_space<vmem>>, %arg3: memref<1x1x64xbf16, #tpu.memory_space<vmem>>, %arg4: memref<64x256xbf16, #tpu.memory_space<vmem>>, %arg5: memref<1x256xf32, #tpu.memory_space<vmem>>, %arg6: memref<1x96x256xbf16, #tpu.memory_space<vmem>>) attributes {dimension_semantics = [#tpu.dimension_semantics<parallel>, #tpu.dimension_semantics<parallel>], iteration_bounds = array<i64: 2, 1>, scalar_prefetch = 0 : i64, scratch_operands = 0 : i64, tpu.core_type = #tpu.core_type<tc>, window_params = [{transform_indices = @transform_0, window_bounds = array<i64: 1, 96, 64>}, {transform_indices = @transform_1, window_bounds = array<i64: 1, 1, 64>}, {pipeline_mode = #tpu.pipeline_mode<synchronous>, transform_indices = @transform_2, window_bounds = array<i64: 64, 256>}, {pipeline_mode = #tpu.pipeline_mode<synchronous>, transform_indices = @transform_3, window_bounds = array<i64: 1, 256>}, {transform_indices = @transform_4, window_bounds = array<i64: 1, 96, 256>}]} {
    %c0 = arith.constant 0 : index
    %c0_0 = arith.constant 0 : index
    %c0_1 = arith.constant 0 : index
    %0 = vector.load %arg2[%c0, %c0_0, %c0_1] : memref<1x96x64xbf16, #tpu.memory_space<vmem>>, vector<1x96x64xbf16>
    %1 = vector.shape_cast %0 : vector<1x96x64xbf16> to vector<96x64xbf16>
    %c0_2 = arith.constant 0 : index
    %c0_3 = arith.constant 0 : index
    %c0_4 = arith.constant 0 : index
    %2 = vector.load %arg3[%c0_2, %c0_3, %c0_4] : memref<1x1x64xbf16, #tpu.memory_space<vmem>>, vector<1x1x64xbf16>
    %3 = vector.shape_cast %2 : vector<1x1x64xbf16> to vector<1x64xbf16>
    %4 = vector.broadcast %3 : vector<1x64xbf16> to vector<96x64xbf16>
    %5 = arith.mulf %1, %4 : vector<96x64xbf16>
    %c0_5 = arith.constant 0 : index
    %c0_6 = arith.constant 0 : index
    %6 = vector.load %arg4[%c0_5, %c0_6] : memref<64x256xbf16, #tpu.memory_space<vmem>>, vector<64x256xbf16>
    %cst = arith.constant dense<0.000000e+00> : vector<96x256xf32>
    %7 = tpu.matmul %5, %6, %cst {dimension_numbers = #tpu.dot_dimension_numbers<[1], [0], [0], [1], [0, 0, 1, 1], [], []>} : vector<96x64xbf16>, vector<64x256xbf16>, vector<96x256xf32> -> vector<96x256xf32>
    %c0_7 = arith.constant 0 : index
    %c0_8 = arith.constant 0 : index
    %8 = vector.load %arg5[%c0_7, %c0_8] : memref<1x256xf32, #tpu.memory_space<vmem>>, vector<1x256xf32>
    %9 = vector.broadcast %8 : vector<1x256xf32> to vector<96x256xf32>
    %10 = arith.addf %7, %9 : vector<96x256xf32>
    %cst_9 = arith.constant 1.000000e-01 : f32
    %11 = vector.broadcast %cst_9 : f32 to vector<96x256xf32>
    %12 = arith.mulf %11, %10 : vector<96x256xf32>
    %13 = arith.maximumf %10, %12 : vector<96x256xf32>
    %14 = arith.truncf %13 : vector<96x256xf32> to vector<96x256xbf16>
    %c0_10 = arith.constant 0 : index
    %c0_11 = arith.constant 0 : index
    %c0_12 = arith.constant 0 : index
    %15 = vector.load %arg6[%c0_10, %c0_11, %c0_12] : memref<1x96x256xbf16, #tpu.memory_space<vmem>>, vector<1x96x256xbf16>
    %16 = vector.shape_cast %15 : vector<1x96x256xbf16> to vector<96x256xbf16>
    %17 = vector.shape_cast %14 : vector<96x256xbf16> to vector<1x96x256xbf16>
    tpu.vector_store %arg6[%c0_10, %c0_11, %c0_12], %17 {strides = array<i32>} : memref<1x96x256xbf16, #tpu.memory_space<vmem>>, vector<1x96x256xbf16>,
    return
  }
  func.func @transform_0(%arg0: i32, %arg1: i32) -> (i32, i32, i32) {
    %c0_i32 = arith.constant 0 : i32
    %c0_i32_0 = arith.constant 0 : i32
    return %arg0, %arg1, %c0_i32 : i32, i32, i32
  }
  func.func @transform_1(%arg0: i32, %arg1: i32) -> (i32, i32, i32) {
    %c0_i32 = arith.constant 0 : i32
    %c0_i32_0 = arith.constant 0 : i32
    %c0_i32_1 = arith.constant 0 : i32
    return %arg0, %c0_i32, %c0_i32_0 : i32, i32, i32
  }
  func.func @transform_2(%arg0: i32, %arg1: i32) -> (i32, i32) {
    %c0_i32 = arith.constant 0 : i32
    %c0_i32_0 = arith.constant 0 : i32
    %c0_i32_1 = arith.constant 0 : i32
    return %c0_i32, %c0_i32_0 : i32, i32
  }
  func.func @transform_3(%arg0: i32, %arg1: i32) -> (i32, i32) {
    %c0_i32 = arith.constant 0 : i32
    %c0_i32_0 = arith.constant 0 : i32
    %c0_i32_1 = arith.constant 0 : i32
    return %c0_i32, %c0_i32_0 : i32, i32
  }
  func.func @transform_4(%arg0: i32, %arg1: i32) -> (i32, i32, i32) {
    %c0_i32 = arith.constant 0 : i32
    %c0_i32_0 = arith.constant 0 : i32
    return %arg0, %arg1, %c0_i32 : i32, i32, i32
  }
}

module attributes {stable_mosaic.version = 11 : i64} {
  func.func @_conv3x3_kernel(%arg0: i32, %arg1: i32, %arg2: memref<1x160x64xbf16, #tpu.memory_space<vmem>>, %arg3: memref<1x16x64xbf16, #tpu.memory_space<vmem>>, %arg4: memref<1x16x64xbf16, #tpu.memory_space<vmem>>, %arg5: memref<3x192x64xbf16, #tpu.memory_space<vmem>>, %arg6: memref<1x64xf32, #tpu.memory_space<vmem>>, %arg7: memref<1x160x64xbf16, #tpu.memory_space<vmem>>) attributes {dimension_semantics = [#tpu.dimension_semantics<parallel>, #tpu.dimension_semantics<parallel>], iteration_bounds = array<i64: 2, 1>, scalar_prefetch = 0 : i64, scratch_operands = 0 : i64, tpu.core_type = #tpu.core_type<tc>, window_params = [{transform_indices = @transform_0, window_bounds = array<i64: 1, 160, 64>}, {transform_indices = @transform_1, window_bounds = array<i64: 1, 16, 64>}, {transform_indices = @transform_2, window_bounds = array<i64: 1, 16, 64>}, {pipeline_mode = #tpu.pipeline_mode<synchronous>, transform_indices = @transform_3, window_bounds = array<i64: 3, 192, 64>}, {pipeline_mode = #tpu.pipeline_mode<synchronous>, transform_indices = @transform_4, window_bounds = array<i64: 1, 64>}, {transform_indices = @transform_5, window_bounds = array<i64: 1, 160, 64>}]} {
    %c0 = arith.constant 0 : index
    %c0_0 = arith.constant 0 : index
    %c0_1 = arith.constant 0 : index
    %0 = vector.load %arg2[%c0, %c0_0, %c0_1] : memref<1x160x64xbf16, #tpu.memory_space<vmem>>, vector<1x160x64xbf16>
    %1 = vector.shape_cast %0 : vector<1x160x64xbf16> to vector<160x64xbf16>
    %c0_2 = arith.constant 0 : index
    %c0_3 = arith.constant 0 : index
    %c0_4 = arith.constant 0 : index
    %2 = vector.load %arg3[%c0_2, %c0_3, %c0_4] : memref<1x16x64xbf16, #tpu.memory_space<vmem>>, vector<1x16x64xbf16>
    %3 = vector.shape_cast %2 : vector<1x16x64xbf16> to vector<16x64xbf16>
    %c0_5 = arith.constant 0 : index
    %c0_6 = arith.constant 0 : index
    %c0_7 = arith.constant 0 : index
    %4 = vector.load %arg4[%c0_5, %c0_6, %c0_7] : memref<1x16x64xbf16, #tpu.memory_space<vmem>>, vector<1x16x64xbf16>
    %5 = vector.shape_cast %4 : vector<1x16x64xbf16> to vector<16x64xbf16>
    %cst = arith.constant 0.000000e+00 : bf16
    %6 = vector.broadcast %cst : bf16 to vector<8x64xbf16>
    %7 = tpu.concatenate %1, %3, %5, %6 in 0 : vector<160x64xbf16>, vector<16x64xbf16>, vector<16x64xbf16>, vector<8x64xbf16> -> vector<200x64xbf16>
    %8 = vector.extract_strided_slice %7 {offsets = [0, 0], sizes = [192, 64], strides = [1, 1]} : vector<200x64xbf16> to vector<192x64xbf16>
    %9 = vector.extract_strided_slice %7 {offsets = [1, 0], sizes = [192, 64], strides = [1, 1]} : vector<200x64xbf16> to vector<192x64xbf16>
    %10 = vector.extract_strided_slice %7 {offsets = [2, 0], sizes = [192, 64], strides = [1, 1]} : vector<200x64xbf16> to vector<192x64xbf16>
    %11 = tpu.concatenate %8, %9, %10 in 1 : vector<192x64xbf16>, vector<192x64xbf16>, vector<192x64xbf16> -> vector<192x192xbf16>
    %12 = vector.extract_strided_slice %11 {offsets = [0, 0], sizes = [160, 192], strides = [1, 1]} : vector<192x192xbf16> to vector<160x192xbf16>
    %c0_8 = arith.constant 0 : index
    %c0_9 = arith.constant 0 : index
    %c0_10 = arith.constant 0 : index
    %13 = vector.load %arg5[%c0_8, %c0_9, %c0_10] : memref<3x192x64xbf16, #tpu.memory_space<vmem>>, vector<1x192x64xbf16>
    %14 = vector.shape_cast %13 : vector<1x192x64xbf16> to vector<192x64xbf16>
    %cst_11 = arith.constant dense<0.000000e+00> : vector<160x64xf32>
    %15 = tpu.matmul %12, %14, %cst_11 {dimension_numbers = #tpu.dot_dimension_numbers<[1], [0], [0], [1], [0, 0, 1, 1], [], []>} : vector<160x192xbf16>, vector<192x64xbf16>, vector<160x64xf32> -> vector<160x64xf32>
    %16 = vector.extract_strided_slice %11 {offsets = [16, 0], sizes = [160, 192], strides = [1, 1]} : vector<192x192xbf16> to vector<160x192xbf16>
    %c1 = arith.constant 1 : index
    %c0_12 = arith.constant 0 : index
    %c0_13 = arith.constant 0 : index
    %17 = vector.load %arg5[%c1, %c0_12, %c0_13] : memref<3x192x64xbf16, #tpu.memory_space<vmem>>, vector<1x192x64xbf16>
    %18 = vector.shape_cast %17 : vector<1x192x64xbf16> to vector<192x64xbf16>
    %cst_14 = arith.constant dense<0.000000e+00> : vector<160x64xf32>
    %19 = tpu.matmul %16, %18, %cst_14 {dimension_numbers = #tpu.dot_dimension_numbers<[1], [0], [0], [1], [0, 0, 1, 1], [], []>} : vector<160x192xbf16>, vector<192x64xbf16>, vector<160x64xf32> -> vector<160x64xf32>
    %20 = arith.addf %15, %19 : vector<160x64xf32>
    %21 = vector.extract_strided_slice %11 {offsets = [32, 0], sizes = [160, 192], strides = [1, 1]} : vector<192x192xbf16> to vector<160x192xbf16>
    %c2 = arith.constant 2 : index
    %c0_15 = arith.constant 0 : index
    %c0_16 = arith.constant 0 : index
    %22 = vector.load %arg5[%c2, %c0_15, %c0_16] : memref<3x192x64xbf16, #tpu.memory_space<vmem>>, vector<1x192x64xbf16>
    %23 = vector.shape_cast %22 : vector<1x192x64xbf16> to vector<192x64xbf16>
    %cst_17 = arith.constant dense<0.000000e+00> : vector<160x64xf32>
    %24 = tpu.matmul %21, %23, %cst_17 {dimension_numbers = #tpu.dot_dimension_numbers<[1], [0], [0], [1], [0, 0, 1, 1], [], []>} : vector<160x192xbf16>, vector<192x64xbf16>, vector<160x64xf32> -> vector<160x64xf32>
    %25 = arith.addf %20, %24 : vector<160x64xf32>
    %c0_18 = arith.constant 0 : index
    %c0_19 = arith.constant 0 : index
    %26 = vector.load %arg6[%c0_18, %c0_19] : memref<1x64xf32, #tpu.memory_space<vmem>>, vector<1x64xf32>
    %27 = vector.broadcast %26 : vector<1x64xf32> to vector<160x64xf32>
    %28 = arith.addf %25, %27 : vector<160x64xf32>
    %cst_20 = arith.constant 1.000000e-01 : f32
    %29 = vector.broadcast %cst_20 : f32 to vector<160x64xf32>
    %30 = arith.mulf %29, %28 : vector<160x64xf32>
    %31 = arith.maximumf %28, %30 : vector<160x64xf32>
    %32 = arith.truncf %31 : vector<160x64xf32> to vector<160x64xbf16>
    %c0_21 = arith.constant 0 : index
    %c0_22 = arith.constant 0 : index
    %c0_23 = arith.constant 0 : index
    %33 = vector.load %arg7[%c0_21, %c0_22, %c0_23] : memref<1x160x64xbf16, #tpu.memory_space<vmem>>, vector<1x160x64xbf16>
    %34 = vector.shape_cast %33 : vector<1x160x64xbf16> to vector<160x64xbf16>
    %35 = vector.shape_cast %32 : vector<160x64xbf16> to vector<1x160x64xbf16>
    tpu.vector_store %arg7[%c0_21, %c0_22, %c0_23], %35 {strides = array<i32>} : memref<1x160x64xbf16, #tpu.memory_space<vmem>>, vector<1x160x64xbf16>,
    return
  }
  func.func @transform_0(%arg0: i32, %arg1: i32) -> (i32, i32, i32) {
    %c0_i32 = arith.constant 0 : i32
    %c0_i32_0 = arith.constant 0 : i32
    return %arg0, %arg1, %c0_i32 : i32, i32, i32
  }
  func.func @transform_1(%arg0: i32, %arg1: i32) -> (i32, i32, i32) {
    %c1_i32 = arith.constant 1 : i32
    %0 = arith.addi %arg1, %c1_i32 : i32
    %c10_i32 = arith.constant 10 : i32
    %1 = arith.muli %0, %c10_i32 : i32
    %c11_i32 = arith.constant 11 : i32
    %2 = arith.minsi %1, %c11_i32 : i32
    %c0_i32 = arith.constant 0 : i32
    %c0_i32_0 = arith.constant 0 : i32
    return %arg0, %2, %c0_i32 : i32, i32, i32
  }
  func.func @transform_2(%arg0: i32, %arg1: i32) -> (i32, i32, i32) {
    %c1_i32 = arith.constant 1 : i32
    %0 = arith.addi %arg1, %c1_i32 : i32
    %c10_i32 = arith.constant 10 : i32
    %1 = arith.muli %0, %c10_i32 : i32
    %c1_i32_0 = arith.constant 1 : i32
    %2 = arith.addi %1, %c1_i32_0 : i32
    %c11_i32 = arith.constant 11 : i32
    %3 = arith.minsi %2, %c11_i32 : i32
    %c0_i32 = arith.constant 0 : i32
    %c0_i32_1 = arith.constant 0 : i32
    return %arg0, %3, %c0_i32 : i32, i32, i32
  }
  func.func @transform_3(%arg0: i32, %arg1: i32) -> (i32, i32, i32) {
    %c0_i32 = arith.constant 0 : i32
    %c0_i32_0 = arith.constant 0 : i32
    %c0_i32_1 = arith.constant 0 : i32
    %c0_i32_2 = arith.constant 0 : i32
    return %c0_i32, %c0_i32_0, %c0_i32_1 : i32, i32, i32
  }
  func.func @transform_4(%arg0: i32, %arg1: i32) -> (i32, i32) {
    %c0_i32 = arith.constant 0 : i32
    %c0_i32_0 = arith.constant 0 : i32
    %c0_i32_1 = arith.constant 0 : i32
    return %c0_i32, %c0_i32_0 : i32, i32
  }
  func.func @transform_5(%arg0: i32, %arg1: i32) -> (i32, i32, i32) {
    %c0_i32 = arith.constant 0 : i32
    %c0_i32_0 = arith.constant 0 : i32
    return %arg0, %arg1, %c0_i32 : i32, i32, i32
  }
}

module attributes {stable_mosaic.version = 11 : i64} {
  func.func @_conv3x3_kernel(%arg0: i32, %arg1: i32, %arg2: memref<1x128x64xbf16, #tpu.memory_space<vmem>>, %arg3: memref<1x16x64xbf16, #tpu.memory_space<vmem>>, %arg4: memref<1x16x64xbf16, #tpu.memory_space<vmem>>, %arg5: memref<3x192x8xbf16, #tpu.memory_space<vmem>>, %arg6: memref<1x8xf32, #tpu.memory_space<vmem>>, %arg7: memref<1x128x8xbf16, #tpu.memory_space<vmem>>) attributes {dimension_semantics = [#tpu.dimension_semantics<parallel>, #tpu.dimension_semantics<parallel>], iteration_bounds = array<i64: 2, 1>, scalar_prefetch = 0 : i64, scratch_operands = 0 : i64, tpu.core_type = #tpu.core_type<tc>, window_params = [{transform_indices = @transform_0, window_bounds = array<i64: 1, 128, 64>}, {transform_indices = @transform_1, window_bounds = array<i64: 1, 16, 64>}, {transform_indices = @transform_2, window_bounds = array<i64: 1, 16, 64>}, {pipeline_mode = #tpu.pipeline_mode<synchronous>, transform_indices = @transform_3, window_bounds = array<i64: 3, 192, 8>}, {pipeline_mode = #tpu.pipeline_mode<synchronous>, transform_indices = @transform_4, window_bounds = array<i64: 1, 8>}, {transform_indices = @transform_5, window_bounds = array<i64: 1, 128, 8>}]} {
    %c0 = arith.constant 0 : index
    %c0_0 = arith.constant 0 : index
    %c0_1 = arith.constant 0 : index
    %0 = vector.load %arg2[%c0, %c0_0, %c0_1] : memref<1x128x64xbf16, #tpu.memory_space<vmem>>, vector<1x128x64xbf16>
    %1 = vector.shape_cast %0 : vector<1x128x64xbf16> to vector<128x64xbf16>
    %c0_2 = arith.constant 0 : index
    %c0_3 = arith.constant 0 : index
    %c0_4 = arith.constant 0 : index
    %2 = vector.load %arg3[%c0_2, %c0_3, %c0_4] : memref<1x16x64xbf16, #tpu.memory_space<vmem>>, vector<1x16x64xbf16>
    %3 = vector.shape_cast %2 : vector<1x16x64xbf16> to vector<16x64xbf16>
    %c0_5 = arith.constant 0 : index
    %c0_6 = arith.constant 0 : index
    %c0_7 = arith.constant 0 : index
    %4 = vector.load %arg4[%c0_5, %c0_6, %c0_7] : memref<1x16x64xbf16, #tpu.memory_space<vmem>>, vector<1x16x64xbf16>
    %5 = vector.shape_cast %4 : vector<1x16x64xbf16> to vector<16x64xbf16>
    %cst = arith.constant 0.000000e+00 : bf16
    %6 = vector.broadcast %cst : bf16 to vector<8x64xbf16>
    %7 = tpu.concatenate %1, %3, %5, %6 in 0 : vector<128x64xbf16>, vector<16x64xbf16>, vector<16x64xbf16>, vector<8x64xbf16> -> vector<168x64xbf16>
    %8 = vector.extract_strided_slice %7 {offsets = [0, 0], sizes = [160, 64], strides = [1, 1]} : vector<168x64xbf16> to vector<160x64xbf16>
    %9 = vector.extract_strided_slice %7 {offsets = [1, 0], sizes = [160, 64], strides = [1, 1]} : vector<168x64xbf16> to vector<160x64xbf16>
    %10 = vector.extract_strided_slice %7 {offsets = [2, 0], sizes = [160, 64], strides = [1, 1]} : vector<168x64xbf16> to vector<160x64xbf16>
    %11 = tpu.concatenate %8, %9, %10 in 1 : vector<160x64xbf16>, vector<160x64xbf16>, vector<160x64xbf16> -> vector<160x192xbf16>
    %12 = vector.extract_strided_slice %11 {offsets = [0, 0], sizes = [128, 192], strides = [1, 1]} : vector<160x192xbf16> to vector<128x192xbf16>
    %c0_8 = arith.constant 0 : index
    %c0_9 = arith.constant 0 : index
    %c0_10 = arith.constant 0 : index
    %13 = vector.load %arg5[%c0_8, %c0_9, %c0_10] : memref<3x192x8xbf16, #tpu.memory_space<vmem>>, vector<1x192x8xbf16>
    %14 = vector.shape_cast %13 : vector<1x192x8xbf16> to vector<192x8xbf16>
    %cst_11 = arith.constant dense<0.000000e+00> : vector<128x8xf32>
    %15 = tpu.matmul %12, %14, %cst_11 {dimension_numbers = #tpu.dot_dimension_numbers<[1], [0], [0], [1], [0, 0, 1, 1], [], []>} : vector<128x192xbf16>, vector<192x8xbf16>, vector<128x8xf32> -> vector<128x8xf32>
    %16 = vector.extract_strided_slice %11 {offsets = [16, 0], sizes = [128, 192], strides = [1, 1]} : vector<160x192xbf16> to vector<128x192xbf16>
    %c1 = arith.constant 1 : index
    %c0_12 = arith.constant 0 : index
    %c0_13 = arith.constant 0 : index
    %17 = vector.load %arg5[%c1, %c0_12, %c0_13] : memref<3x192x8xbf16, #tpu.memory_space<vmem>>, vector<1x192x8xbf16>
    %18 = vector.shape_cast %17 : vector<1x192x8xbf16> to vector<192x8xbf16>
    %cst_14 = arith.constant dense<0.000000e+00> : vector<128x8xf32>
    %19 = tpu.matmul %16, %18, %cst_14 {dimension_numbers = #tpu.dot_dimension_numbers<[1], [0], [0], [1], [0, 0, 1, 1], [], []>} : vector<128x192xbf16>, vector<192x8xbf16>, vector<128x8xf32> -> vector<128x8xf32>
    %20 = arith.addf %15, %19 : vector<128x8xf32>
    %21 = vector.extract_strided_slice %11 {offsets = [32, 0], sizes = [128, 192], strides = [1, 1]} : vector<160x192xbf16> to vector<128x192xbf16>
    %c2 = arith.constant 2 : index
    %c0_15 = arith.constant 0 : index
    %c0_16 = arith.constant 0 : index
    %22 = vector.load %arg5[%c2, %c0_15, %c0_16] : memref<3x192x8xbf16, #tpu.memory_space<vmem>>, vector<1x192x8xbf16>
    %23 = vector.shape_cast %22 : vector<1x192x8xbf16> to vector<192x8xbf16>
    %cst_17 = arith.constant dense<0.000000e+00> : vector<128x8xf32>
    %24 = tpu.matmul %21, %23, %cst_17 {dimension_numbers = #tpu.dot_dimension_numbers<[1], [0], [0], [1], [0, 0, 1, 1], [], []>} : vector<128x192xbf16>, vector<192x8xbf16>, vector<128x8xf32> -> vector<128x8xf32>
    %25 = arith.addf %20, %24 : vector<128x8xf32>
    %c0_18 = arith.constant 0 : index
    %c0_19 = arith.constant 0 : index
    %26 = vector.load %arg6[%c0_18, %c0_19] : memref<1x8xf32, #tpu.memory_space<vmem>>, vector<1x8xf32>
    %27 = vector.broadcast %26 : vector<1x8xf32> to vector<128x8xf32>
    %28 = arith.addf %25, %27 : vector<128x8xf32>
    %29 = arith.truncf %28 : vector<128x8xf32> to vector<128x8xbf16>
    %c0_20 = arith.constant 0 : index
    %c0_21 = arith.constant 0 : index
    %c0_22 = arith.constant 0 : index
    %30 = vector.load %arg7[%c0_20, %c0_21, %c0_22] : memref<1x128x8xbf16, #tpu.memory_space<vmem>>, vector<1x128x8xbf16>
    %31 = vector.shape_cast %30 : vector<1x128x8xbf16> to vector<128x8xbf16>
    %32 = vector.shape_cast %29 : vector<128x8xbf16> to vector<1x128x8xbf16>
    tpu.vector_store %arg7[%c0_20, %c0_21, %c0_22], %32 {strides = array<i32>} : memref<1x128x8xbf16, #tpu.memory_space<vmem>>, vector<1x128x8xbf16>,
    return
  }
  func.func @transform_0(%arg0: i32, %arg1: i32) -> (i32, i32, i32) {
    %c0_i32 = arith.constant 0 : i32
    %c0_i32_0 = arith.constant 0 : i32
    return %arg0, %arg1, %c0_i32 : i32, i32, i32
  }
  func.func @transform_1(%arg0: i32, %arg1: i32) -> (i32, i32, i32) {
    %c1_i32 = arith.constant 1 : i32
    %0 = arith.addi %arg1, %c1_i32 : i32
    %c8_i32 = arith.constant 8 : i32
    %1 = arith.muli %0, %c8_i32 : i32
    %c9_i32 = arith.constant 9 : i32
    %2 = arith.minsi %1, %c9_i32 : i32
    %c0_i32 = arith.constant 0 : i32
    %c0_i32_0 = arith.constant 0 : i32
    return %arg0, %2, %c0_i32 : i32, i32, i32
  }
  func.func @transform_2(%arg0: i32, %arg1: i32) -> (i32, i32, i32) {
    %c1_i32 = arith.constant 1 : i32
    %0 = arith.addi %arg1, %c1_i32 : i32
    %c8_i32 = arith.constant 8 : i32
    %1 = arith.muli %0, %c8_i32 : i32
    %c1_i32_0 = arith.constant 1 : i32
    %2 = arith.addi %1, %c1_i32_0 : i32
    %c9_i32 = arith.constant 9 : i32
    %3 = arith.minsi %2, %c9_i32 : i32
    %c0_i32 = arith.constant 0 : i32
    %c0_i32_1 = arith.constant 0 : i32
    return %arg0, %3, %c0_i32 : i32, i32, i32
  }
  func.func @transform_3(%arg0: i32, %arg1: i32) -> (i32, i32, i32) {
    %c0_i32 = arith.constant 0 : i32
    %c0_i32_0 = arith.constant 0 : i32
    %c0_i32_1 = arith.constant 0 : i32
    %c0_i32_2 = arith.constant 0 : i32
    return %c0_i32, %c0_i32_0, %c0_i32_1 : i32, i32, i32
  }
  func.func @transform_4(%arg0: i32, %arg1: i32) -> (i32, i32) {
    %c0_i32 = arith.constant 0 : i32
    %c0_i32_0 = arith.constant 0 : i32
    %c0_i32_1 = arith.constant 0 : i32
    return %c0_i32, %c0_i32_0 : i32, i32
  }
  func.func @transform_5(%arg0: i32, %arg1: i32) -> (i32, i32, i32) {
    %c0_i32 = arith.constant 0 : i32
    %c0_i32_0 = arith.constant 0 : i32
    return %arg0, %arg1, %c0_i32 : i32, i32, i32
  }
}

</mosaic_0001>

<bundles_post_ra>
// kernel: unet1x3_forward.8
= control target key start
LH: loop header
LB: loop body
LE: loop exit
PB: predicated region body
PF: predicated region fallthrough
CT: control target
= control target key end

     0   :  { %s1905_s12 = smov 0   ;;  %s1907_s13 = smov 0   ;;  %s2294_s0 = inlined_call_operand.vmem [shape: bf16[2,528,32], index: 0, kind: input, shape index: {}]   ;;  %s2295_s1 = inlined_call_operand.vmem [shape: bf16[32,32], index: 1, kind: input, shape index: {}]   ;;  %s2296_s2 = inlined_call_operand.vmem [shape: f32[1,32], index: 2, kind: input, shape index: {}]   ;;  %s2297_s3 = inlined_call_operand.vmem [shape: bf16[2,528,32], index: 3, kind: output, shape index: {}]  }
   0x1   :  { %s1909_s14 = smov 0  }
   0x2 LB: > { %s25_s15 = sadd.s32 1, %s1877_s13  ;;  %p1416_p0 = scmp.ge.s32.totalorder %s1881_s14, 1  ;;  %s1881_s14 = sphi %s1909_s14, %s13_s14   ;;  %s1877_s13 = sphi %s1907_s13, %s2299_s13   ;;  %s1873_s12 = sphi %s1905_s12, %s2298_s12  }
   0x3   : > { %p27_p1 = scmp.ge.s32.totalorder %s25_s15, 2  ;;  %p158_p2 = scmp.lt.s32.totalorder %s1881_s14, 3 }
   0x5   : > { %s2301_s15 = smov (%p27_p1, %s25_s15), 0  ;;  %p159_p3 = pnand %p1416_p0, %p158_p2 }
   0x6   : > { %v1824_v0 = vld [vmem:[%s2295_s1] sm:$0xff] (!%p159_p3)   ;;  %v1883_v1 = vmov (!%p159_p3), 0.0   ;;  %v1825_v2 = vld [vmem:[%s2295_s1 + $0x8] sm:$0xff] (!%p159_p3)   ;;  %p191_p4 = scmp.lt.s32.totalorder (!%p159_p3), %s1873_s12, 1  ;;  %vm1884_vm0 = vmmov (!%p159_p3), 0   ;;  %vm465_vm1 = vcmask (!%p159_p3), 261120  }
   0x7   : > { %162 = sbr.rel (%p159_p3) target bundleno = 370 (0x172), region = 32  ;;  %1657 = vmatprep.subr.bf16.mxu0 (!%p159_p3), %v1883_v1  ;;  %1793 = vmatprep.subr.bf16.mxu1 (!%p159_p3), %v1883_v1  ;;  %v2078_v36 = vld [vmem:[%s2296_s2] ss:$0 sm:$0xff] (!%p159_p3)  ;;  %vm1258_vm2 = vcmask (!%p159_p3), 257024  }
   0x8   : > { %1658 = vmatpush3.bf16.msra.mxu0 (!%p159_p3), %v1824_v0  ;;  %1795 = vmatpush3.bf16.msra.mxu1 (!%p159_p3), %v1824_v0 }
   0x9   : > { %1659 = vmatprep.subr.bf16.mxu0 (!%p159_p3), %v1883_v1  ;;  %1661 = vmatprep.mubr.msk.bf16.mxu0 (!%p159_p3), %vm1884_vm0, %v1883_v1 }
   0xa   : > { %1794 = vmatprep.subr.bf16.mxu1 (!%p159_p3), %v1883_v1  ;;  %1729 = vmatprep.mubr.msk.bf16.mxu1 (!%p159_p3), %vm1884_vm0, %v1883_v1 }
   0xc   : > { %1660 = vmatpush3.bf16.msra.mxu0 (!%p159_p3), %v1825_v2  ;;  %1796 = vmatpush3.bf16.msra.mxu1 (!%p159_p3), %v1825_v2 }
   0xe   : > { %s2303_s12 = smov (!%p191_p4, %s1873_s12), 1 }
   0xf   : > { %s1797_s20 = smul.u32 264, %s2303_s12 }
  0x11   : > { %s1945_s23 = scalar_lea.vmem %s2294_s0, %s1797_s20  ;;  %s2089_s28 = scalar_lea.vmem %s2297_s3, %s1797_s20 }
  0x12   : > { %v1826_v3 = vld [vmem:[%s1945_s23] sm:$0xff]   ;;  %v1827_v4 = vld [vmem:[%s1945_s23 + $0x88] sm:$0xff]   ;;  %v1829_v6 = vld [vmem:[%s1945_s23 + $0x90] sm:$0xff]  }
  0x13   : > { %1662 = vmatmul.mubr.msk.bf16.vlgmr.msra.gmra.mrb[0].mxu0 %vm465_vm1, %v1826_v3  ;;  %1730 = vmatmul.mubr.msk.bf16.vlgmr.msra.gmra.mrb[0].mxu1 %vm465_vm1, %v1827_v4  ;;  %v1828_v5 = vld [vmem:[%s1945_s23 + $0x8] sm:$0xff]   ;;  %v1830_v7 = vld [vmem:[%s1945_s23 + $0x10] sm:$0xff]   ;;  %v1831_v8 = vld [vmem:[%s1945_s23 + $0x98] sm:$0xff]  }
  0x14   : > { %1665 = vmatprep.mubr.msk.bf16.mxu0 %vm1884_vm0, %v1883_v1  ;;  %1733 = vmatprep.mubr.msk.bf16.mxu1 %vm1884_vm0, %v1883_v1  ;;  %v1832_v9 = vld [vmem:[%s1945_s23 + $0x18] sm:$0xff]   ;;  %v1833_v10 = vld [vmem:[%s1945_s23 + $0xa0] sm:$0xff]   ;;  %v1835_v12 = vld [vmem:[%s1945_s23 + $0xa8] sm:$0xff]  }
  0x15   : > { %v1834_v11 = vld [vmem:[%s1945_s23 + $0x20] sm:$0xff]   ;;  %v1836_v13 = vld [vmem:[%s1945_s23 + $0x28] sm:$0xff]   ;;  %v1837_v14 = vld [vmem:[%s1945_s23 + $0xb0] sm:$0xff]  }
  0x16   : > { %v1838_v15 = vld [vmem:[%s1945_s23 + $0x30] sm:$0xff]   ;;  %v1839_v16 = vld [vmem:[%s1945_s23 + $0xb8] sm:$0xff]   ;;  %v1841_v18 = vld [vmem:[%s1945_s23 + $0xc0] sm:$0xff]  }
  0x17   : > { %v1840_v17 = vld [vmem:[%s1945_s23 + $0x38] sm:$0xff]   ;;  %v1842_v19 = vld [vmem:[%s1945_s23 + $0x40] sm:$0xff]   ;;  %v1843_v20 = vld [vmem:[%s1945_s23 + $0xc8] sm:$0xff]  }
  0x18   : > { %v1844_v21 = vld [vmem:[%s1945_s23 + $0x48] sm:$0xff]   ;;  %v1845_v22 = vld [vmem:[%s1945_s23 + $0xd0] sm:$0xff]   ;;  %v1847_v24 = vld [vmem:[%s1945_s23 + $0xd8] sm:$0xff]  }
  0x19   : > { %v1846_v23 = vld [vmem:[%s1945_s23 + $0x50] sm:$0xff]   ;;  %v1848_v25 = vld [vmem:[%s1945_s23 + $0x58] sm:$0xff]   ;;  %v1849_v26 = vld [vmem:[%s1945_s23 + $0xe0] sm:$0xff]  }
  0x1a   : > { %v1850_v27 = vld [vmem:[%s1945_s23 + $0x60] sm:$0xff]   ;;  %v1851_v28 = vld [vmem:[%s1945_s23 + $0xe8] sm:$0xff]   ;;  %v1853_v30 = vld [vmem:[%s1945_s23 + $0xf0] sm:$0xff]  }
  0x1b   : > { %1666 = vmatmul.mubr.msk.bf16.gmra.mrb[4].mxu0 %vm465_vm1, %v1828_v5  ;;  %1734 = vmatmul.mubr.msk.bf16.gmra.mrb[4].mxu1 %vm465_vm1, %v1829_v6  ;;  %v1852_v29 = vld [vmem:[%s1945_s23 + $0x68] sm:$0xff]   ;;  %v1854_v31 = vld [vmem:[%s1945_s23 + $0x70] sm:$0xff]   ;;  %v1855_v32 = vld [vmem:[%s1945_s23 + $0xf8] sm:$0xff]  }
  0x1c   : > { %1669 = vmatprep.mubr.msk.bf16.mxu0 %vm1884_vm0, %v1883_v1  ;;  %1737 = vmatprep.mubr.msk.bf16.mxu1 %vm1884_vm0, %v1883_v1  ;;  %v1856_v33 = vld [vmem:[%s1945_s23 + $0x78] sm:$0xff]   ;;  %v1857_v34 = vld [vmem:[%s1945_s23 + $0x100] sm:$0xff]  }
  0x1d   : > { %v1858_v35 = vld [vmem:[%s1945_s23 + $0x80] sm:$0xff]  }
  0x23   : > { %1670 = vmatmul.mubr.msk.bf16.gmra.mrb[8].mxu0 %vm465_vm1, %v1830_v7  ;;  %1738 = vmatmul.mubr.msk.bf16.gmra.mrb[8].mxu1 %vm465_vm1, %v1831_v8 }
  0x24   : > { %1673 = vmatprep.mubr.msk.bf16.mxu0 %vm1884_vm0, %v1883_v1  ;;  %1741 = vmatprep.mubr.msk.bf16.mxu1 %vm1884_vm0, %v1883_v1 }
  0x2b   : > { %1674 = vmatmul.mubr.msk.bf16.gmra.mrb[12].mxu0 %vm465_vm1, %v1832_v9  ;;  %1742 = vmatmul.mubr.msk.bf16.gmra.mrb[12].mxu1 %vm465_vm1, %v1833_v10 }
  0x2c   : > { %1677 = vmatprep.mubr.msk.bf16.mxu0 %vm1884_vm0, %v1883_v1  ;;  %1745 = vmatprep.mubr.msk.bf16.mxu1 %vm1884_vm0, %v1883_v1 }
  0x33   : > { %1678 = vmatmul.mubr.msk.bf16.gmra.mrb[16].mxu0 %vm465_vm1, %v1834_v11  ;;  %1746 = vmatmul.mubr.msk.bf16.gmra.mrb[16].mxu1 %vm465_vm1, %v1835_v12 }
  0x34   : > { %1681 = vmatprep.mubr.msk.bf16.mxu0 %vm1884_vm0, %v1883_v1  ;;  %1749 = vmatprep.mubr.msk.bf16.mxu1 %vm1884_vm0, %v1883_v1 }
  0x3b   : > { %1682 = vmatmul.mubr.msk.bf16.gmra.mrb[20].mxu0 %vm465_vm1, %v1836_v13  ;;  %1750 = vmatmul.mubr.msk.bf16.gmra.mrb[20].mxu1 %vm465_vm1, %v1837_v14 }
  0x3c   : > { %1685 = vmatprep.mubr.msk.bf16.mxu0 %vm1884_vm0, %v1883_v1  ;;  %1753 = vmatprep.mubr.msk.bf16.mxu1 %vm1884_vm0, %v1883_v1 }
  0x43   : > { %1686 = vmatmul.mubr.msk.bf16.gmra.mrb[24].mxu0 %vm465_vm1, %v1838_v15  ;;  %1754 = vmatmul.mubr.msk.bf16.gmra.mrb[24].mxu1 %vm465_vm1, %v1839_v16 }
  0x44   : > { %1689 = vmatprep.mubr.msk.bf16.mxu0 %vm1884_vm0, %v1883_v1  ;;  %1757 = vmatprep.mubr.msk.bf16.mxu1 %vm1884_vm0, %v1883_v1 }
  0x4b   : > { %1690 = vmatmul.mubr.msk.bf16.gmra.mrb[28].mxu0 %vm465_vm1, %v1840_v17  ;;  %1758 = vmatmul.mubr.msk.bf16.gmra.mrb[28].mxu1 %vm465_vm1, %v1841_v18 }
  0x4c   : > { %1693 = vmatprep.mubr.msk.bf16.mxu0 %vm1884_vm0, %v1883_v1  ;;  %1761 = vmatprep.mubr.msk.bf16.mxu1 %vm1884_vm0, %v1883_v1 }
  0x53   : > { %1694 = vmatmul.mubr.msk.bf16.gmra.mrb[32].mxu0 %vm465_vm1, %v1842_v19  ;;  %1762 = vmatmul.mubr.msk.bf16.gmra.mrb[32].mxu1 %vm465_vm1, %v1843_v20 }
  0x54   : > { %1697 = vmatprep.mubr.msk.bf16.mxu0 %vm1884_vm0, %v1883_v1  ;;  %1765 = vmatprep.mubr.msk.bf16.mxu1 %vm1884_vm0, %v1883_v1 }
  0x5b   : > { %1698 = vmatmul.mubr.msk.bf16.gmra.mrb[36].mxu0 %vm465_vm1, %v1844_v21  ;;  %1766 = vmatmul.mubr.msk.bf16.gmra.mrb[36].mxu1 %vm465_vm1, %v1845_v22 }
  0x5c   : > { %1701 = vmatprep.mubr.msk.bf16.mxu0 %vm1884_vm0, %v1883_v1  ;;  %1769 = vmatprep.mubr.msk.bf16.mxu1 %vm1884_vm0, %v1883_v1 }
  0x63   : > { %1702 = vmatmul.mubr.msk.bf16.gmra.mrb[40].mxu0 %vm465_vm1, %v1846_v23  ;;  %1770 = vmatmul.mubr.msk.bf16.gmra.mrb[40].mxu1 %vm465_vm1, %v1847_v24 }
  0x64   : > { %1705 = vmatprep.mubr.msk.bf16.mxu0 %vm1884_vm0, %v1883_v1  ;;  %1773 = vmatprep.mubr.msk.bf16.mxu1 %vm1884_vm0, %v1883_v1 }
  0x6b   : > { %1706 = vmatmul.mubr.msk.bf16.gmra.mrb[44].mxu0 %vm465_vm1, %v1848_v25  ;;  %1774 = vmatmul.mubr.msk.bf16.gmra.mrb[44].mxu1 %vm465_vm1, %v1849_v26 }
  0x6c   : > { %1709 = vmatprep.mubr.msk.bf16.mxu0 %vm1884_vm0, %v1883_v1  ;;  %1777 = vmatprep.mubr.msk.bf16.mxu1 %vm1884_vm0, %v1883_v1 }
  0x73   : > { %1710 = vmatmul.mubr.msk.bf16.gmra.mrb[48].mxu0 %vm465_vm1, %v1850_v27  ;;  %1778 = vmatmul.mubr.msk.bf16.gmra.mrb[48].mxu1 %vm465_vm1, %v1851_v28 }
  0x74   : > { %1713 = vmatprep.mubr.msk.bf16.mxu0 %vm1884_vm0, %v1883_v1  ;;  %1781 = vmatprep.mubr.msk.bf16.mxu1 %vm1884_vm0, %v1883_v1 }
  0x7b   : > { %1714 = vmatmul.mubr.msk.bf16.gmra.mrb[52].mxu0 %vm465_vm1, %v1852_v29  ;;  %1782 = vmatmul.mubr.msk.bf16.gmra.mrb[52].mxu1 %vm465_vm1, %v1853_v30 }
  0x7c   : > { %1717 = vmatprep.mubr.msk.bf16.mxu0 %vm1884_vm0, %v1883_v1  ;;  %1785 = vmatprep.mubr.msk.bf16.mxu1 %vm1884_vm0, %v1883_v1 }
  0x83   : > { %1718 = vmatmul.mubr.msk.bf16.gmra.mrb[56].mxu0 %vm465_vm1, %v1854_v31  ;;  %1786 = vmatmul.mubr.msk.bf16.gmra.mrb[56].mxu1 %vm465_vm1, %v1855_v32 }
  0x84   : > { %1721 = vmatprep.mubr.msk.bf16.mxu0 %vm1884_vm0, %v1883_v1  ;;  %1789 = vmatprep.mubr.msk.bf16.mxu1 %vm1884_vm0, %v1883_v1 }
  0x8b   : > { %1722 = vmatmul.mubr.msk.bf16.gmra.mrb[60].mxu0 %vm465_vm1, %v1856_v33  ;;  %1790 = vmatmul.mubr.msk.bf16.gmra.mrb[60].mxu1 %vm465_vm1, %v1857_v34 }
  0x8c   : > { %1725 = vmatprep.mubr.msk.bf16.mxu0 %vm1884_vm0, %v1883_v1 }
  0x93   : > { %1726 = vmatmul.mubr.msk.bf16.gmra.mrb[64].mxu0 %vm465_vm1, %v1858_v35 }
  0xe6   : > { %v599_v37 = vpop.f32.mrb[0].mxu0  ;;  %v735_v40 = vpop.f32.mrb[0].mxu1 }
  0xe7   : > { %v600_v38 = vadd.f32 %v2078_v36, %v599_v37  ;;  %v1663_v39 = vpop.f32.mrb[1].mxu0  ;;  %v736_v42 = vadd.f32 %v2078_v36, %v735_v40  ;;  %v1731_v43 = vpop.f32.mrb[1].mxu1 }
  0xe8   : > { %v602_v41 = vpop.f32.mrb[2].mxu0  ;;  %v738_v47 = vpop.f32.mrb[2].mxu1 }
  0xe9   : > { %v862_v44 = vmul.f32 0.1, %v600_v38  ;;  %v603_v45 = vadd.f32 %v2078_v36, %v602_v41  ;;  %v1664_v46 = vpop.f32.mrb[3].mxu0  ;;  %v896_v48 = vmul.f32 0.1, %v736_v42  ;;  %v739_v49 = vadd.f32 %v2078_v36, %v738_v47  ;;  %v1732_v50 = vpop.f32.mrb[3].mxu1 }
  0xeb   : > { %v928_v51 = vmax.f32 %v600_v38, %v862_v44  ;;  %v863_v52 = vmul.f32 0.1, %v603_v45  ;;  %v962_v53 = vmax.f32 %v736_v42, %v896_v48  ;;  %v897_v54 = vmul.f32 0.1, %v739_v49 }
  0xed   : > { %v1556_v55 = vpack.c.bf16 %v928_v51, %v928_v51  ;;  %v929_v56 = vmax.f32 %v603_v45, %v863_v52  ;;  %v1590_v57 = vpack.c.bf16 %v962_v53, %v962_v53  ;;  %v963_v58 = vmax.f32 %v739_v49, %v897_v54 }
  0xee   : > { %v607_v59 = vpop.f32.mrb[4].mxu0  ;;  %v743_v63 = vpop.f32.mrb[4].mxu1 }
  0xef   : > { %1259 = vst.msk [vmem:[%s2089_s28] sm:$0xf] %vm1258_vm2, %v1556_v55  ;;  %v1557_v60 = vpack.c.bf16 %v929_v56, %v929_v56  ;;  %v608_v61 = vadd.f32 %v2078_v36, %v607_v59  ;;  %v1667_v62 = vpop.f32.mrb[5].mxu0  ;;  %1293 = vst.msk [vmem:[%s2089_s28 + $0x88] sm:$0xf] %vm1258_vm2, %v1590_v57  ;;  %v1591_v0 = vpack.c.bf16 %v963_v58, %v963_v58  ;;  %v1735_v3 = vpop.f32.mrb[5].mxu1 }
  0xf0   : > { %v610_v1 = vpop.f32.mrb[6].mxu0  ;;  %v744_v2 = vadd.f32 %v2078_v36, %v743_v63  ;;  %v746_v7 = vpop.f32.mrb[6].mxu1 }
  0xf1   : > { %1260 = vst.msk [vmem:[%s2089_s28 + $0x4] sm:$0xf] %vm1258_vm2, %v1557_v60  ;;  %v864_v4 = vmul.f32 0.1, %v608_v61  ;;  %v611_v5 = vadd.f32 %v2078_v36, %v610_v1  ;;  %v1668_v6 = vpop.f32.mrb[7].mxu0  ;;  %v747_v9 = vadd.f32 %v2078_v36, %v746_v7  ;;  %v1736_v10 = vpop.f32.mrb[7].mxu1 }
  0xf2   : > { %1294 = vst.msk [vmem:[%s2089_s28 + $0x8c] sm:$0xf] %vm1258_vm2, %v1591_v0  ;;  %v898_v8 = vmul.f32 0.1, %v744_v2 }
  0xf3   : > { %v930_v11 = vmax.f32 %v608_v61, %v864_v4  ;;  %v865_v12 = vmul.f32 0.1, %v611_v5  ;;  %v899_v14 = vmul.f32 0.1, %v747_v9 }
  0xf4   : > { %v964_v13 = vmax.f32 %v744_v2, %v898_v8 }
  0xf5   : > { %v1558_v15 = vpack.c.bf16 %v930_v11, %v930_v11  ;;  %v931_v16 = vmax.f32 %v611_v5, %v865_v12  ;;  %v965_v18 = vmax.f32 %v747_v9, %v899_v14 }
  0xf6   : > { %v1592_v17 = vpack.c.bf16 %v964_v13, %v964_v13  ;;  %v615_v19 = vpop.f32.mrb[8].mxu0  ;;  %v751_v23 = vpop.f32.mrb[8].mxu1 }
  0xf7   : > { %1261 = vst.msk [vmem:[%s2089_s28 + $0x8] sm:$0xf] %vm1258_vm2, %v1558_v15  ;;  %v1559_v20 = vpack.c.bf16 %v931_v16, %v931_v16  ;;  %v616_v21 = vadd.f32 %v2078_v36, %v615_v19  ;;  %v1671_v22 = vpop.f32.mrb[9].mxu0  ;;  %v1593_v24 = vpack.c.bf16 %v965_v18, %v965_v18  ;;  %v752_v26 = vadd.f32 %v2078_v36, %v751_v23  ;;  %v1739_v27 = vpop.f32.mrb[9].mxu1 }
  0xf8   : > { %1295 = vst.msk [vmem:[%s2089_s28 + $0x90] sm:$0xf] %vm1258_vm2, %v1592_v17  ;;  %v618_v25 = vpop.f32.mrb[10].mxu0  ;;  %v754_v31 = vpop.f32.mrb[10].mxu1 }
  0xf9   : > { %1262 = vst.msk [vmem:[%s2089_s28 + $0xc] sm:$0xf] %vm1258_vm2, %v1559_v20  ;;  %v866_v28 = vmul.f32 0.1, %v616_v21  ;;  %v619_v29 = vadd.f32 %v2078_v36, %v618_v25  ;;  %v1672_v30 = vpop.f32.mrb[11].mxu0  ;;  %v755_v33 = vadd.f32 %v2078_v36, %v754_v31  ;;  %v1740_v34 = vpop.f32.mrb[11].mxu1 }
  0xfa   : > { %1296 = vst.msk [vmem:[%s2089_s28 + $0x94] sm:$0xf] %vm1258_vm2, %v1593_v24  ;;  %v900_v32 = vmul.f32 0.1, %v752_v26 }
  0xfb   : > { %v932_v35 = vmax.f32 %v616_v21, %v866_v28  ;;  %v867_v37 = vmul.f32 0.1, %v619_v29  ;;  %v901_v39 = vmul.f32 0.1, %v755_v33 }
  0xfc   : > { %v966_v38 = vmax.f32 %v752_v26, %v900_v32 }
  0xfd   : > { %v1560_v40 = vpack.c.bf16 %v932_v35, %v932_v35  ;;  %v933_v41 = vmax.f32 %v619_v29, %v867_v37  ;;  %v967_v43 = vmax.f32 %v755_v33, %v901_v39 }
  0xfe   : > { %v1594_v42 = vpack.c.bf16 %v966_v38, %v966_v38  ;;  %v623_v44 = vpop.f32.mrb[12].mxu0  ;;  %v759_v48 = vpop.f32.mrb[12].mxu1 }
  0xff   : > { %1263 = vst.msk [vmem:[%s2089_s28 + $0x10] sm:$0xf] %vm1258_vm2, %v1560_v40  ;;  %v1561_v45 = vpack.c.bf16 %v933_v41, %v933_v41  ;;  %v624_v46 = vadd.f32 %v2078_v36, %v623_v44  ;;  %v1675_v47 = vpop.f32.mrb[13].mxu0  ;;  %v1595_v49 = vpack.c.bf16 %v967_v43, %v967_v43  ;;  %v760_v51 = vadd.f32 %v2078_v36, %v759_v48  ;;  %v1743_v52 = vpop.f32.mrb[13].mxu1 }
 0x100   : > { %1297 = vst.msk [vmem:[%s2089_s28 + $0x98] sm:$0xf] %vm1258_vm2, %v1594_v42  ;;  %v626_v50 = vpop.f32.mrb[14].mxu0  ;;  %v762_v56 = vpop.f32.mrb[14].mxu1 }
 0x101   : > { %1264 = vst.msk [vmem:[%s2089_s28 + $0x14] sm:$0xf] %vm1258_vm2, %v1561_v45  ;;  %v868_v53 = vmul.f32 0.1, %v624_v46  ;;  %v627_v54 = vadd.f32 %v2078_v36, %v626_v50  ;;  %v1676_v55 = vpop.f32.mrb[15].mxu0  ;;  %v763_v58 = vadd.f32 %v2078_v36, %v762_v56  ;;  %v1744_v59 = vpop.f32.mrb[15].mxu1 }
 0x102   : > { %1298 = vst.msk [vmem:[%s2089_s28 + $0x9c] sm:$0xf] %vm1258_vm2, %v1595_v49  ;;  %v902_v57 = vmul.f32 0.1, %v760_v51 }
 0x103   : > { %v934_v60 = vmax.f32 %v624_v46, %v868_v53  ;;  %v869_v61 = vmul.f32 0.1, %v627_v54  ;;  %v903_v63 = vmul.f32 0.1, %v763_v58 }
 0x104   : > { %v968_v62 = vmax.f32 %v760_v51, %v902_v57 }
 0x105   : > { %v1562_v0 = vpack.c.bf16 %v934_v60, %v934_v60  ;;  %v935_v1 = vmax.f32 %v627_v54, %v869_v61  ;;  %v969_v3 = vmax.f32 %v763_v58, %v903_v63 }
 0x106   : > { %v1596_v2 = vpack.c.bf16 %v968_v62, %v968_v62  ;;  %v631_v4 = vpop.f32.mrb[16].mxu0  ;;  %v767_v8 = vpop.f32.mrb[16].mxu1 }
 0x107   : > { %1265 = vst.msk [vmem:[%s2089_s28 + $0x18] sm:$0xf] %vm1258_vm2, %v1562_v0  ;;  %v1563_v5 = vpack.c.bf16 %v935_v1, %v935_v1  ;;  %v632_v6 = vadd.f32 %v2078_v36, %v631_v4  ;;  %v1679_v7 = vpop.f32.mrb[17].mxu0  ;;  %v1597_v9 = vpack.c.bf16 %v969_v3, %v969_v3  ;;  %v768_v11 = vadd.f32 %v2078_v36, %v767_v8  ;;  %v1747_v12 = vpop.f32.mrb[17].mxu1 }
 0x108   : > { %1299 = vst.msk [vmem:[%s2089_s28 + $0xa0] sm:$0xf] %vm1258_vm2, %v1596_v2  ;;  %v634_v10 = vpop.f32.mrb[18].mxu0  ;;  %v770_v16 = vpop.f32.mrb[18].mxu1 }
 0x109   : > { %1266 = vst.msk [vmem:[%s2089_s28 + $0x1c] sm:$0xf] %vm1258_vm2, %v1563_v5  ;;  %v870_v13 = vmul.f32 0.1, %v632_v6  ;;  %v635_v14 = vadd.f32 %v2078_v36, %v634_v10  ;;  %v1680_v15 = vpop.f32.mrb[19].mxu0  ;;  %v771_v18 = vadd.f32 %v2078_v36, %v770_v16  ;;  %v1748_v19 = vpop.f32.mrb[19].mxu1 }
 0x10a   : > { %1300 = vst.msk [vmem:[%s2089_s28 + $0xa4] sm:$0xf] %vm1258_vm2, %v1597_v9  ;;  %v904_v17 = vmul.f32 0.1, %v768_v11 }
 0x10b   : > { %v936_v20 = vmax.f32 %v632_v6, %v870_v13  ;;  %v871_v21 = vmul.f32 0.1, %v635_v14  ;;  %v905_v23 = vmul.f32 0.1, %v771_v18 }
 0x10c   : > { %v970_v22 = vmax.f32 %v768_v11, %v904_v17 }
 0x10d   : > { %v1564_v24 = vpack.c.bf16 %v936_v20, %v936_v20  ;;  %v937_v25 = vmax.f32 %v635_v14, %v871_v21  ;;  %v971_v27 = vmax.f32 %v771_v18, %v905_v23 }
 0x10e   : > { %v1598_v26 = vpack.c.bf16 %v970_v22, %v970_v22  ;;  %v639_v28 = vpop.f32.mrb[20].mxu0  ;;  %v775_v32 = vpop.f32.mrb[20].mxu1 }
 0x10f   : > { %1267 = vst.msk [vmem:[%s2089_s28 + $0x20] sm:$0xf] %vm1258_vm2, %v1564_v24  ;;  %v1565_v29 = vpack.c.bf16 %v937_v25, %v937_v25  ;;  %v640_v30 = vadd.f32 %v2078_v36, %v639_v28  ;;  %v1683_v31 = vpop.f32.mrb[21].mxu0  ;;  %v1599_v33 = vpack.c.bf16 %v971_v27, %v971_v27  ;;  %v776_v35 = vadd.f32 %v2078_v36, %v775_v32  ;;  %v1751_v37 = vpop.f32.mrb[21].mxu1 }
 0x110   : > { %1301 = vst.msk [vmem:[%s2089_s28 + $0xa8] sm:$0xf] %vm1258_vm2, %v1598_v26  ;;  %v642_v34 = vpop.f32.mrb[22].mxu0  ;;  %v778_v41 = vpop.f32.mrb[22].mxu1 }
 0x111   : > { %1268 = vst.msk [vmem:[%s2089_s28 + $0x24] sm:$0xf] %vm1258_vm2, %v1565_v29  ;;  %v872_v38 = vmul.f32 0.1, %v640_v30  ;;  %v643_v39 = vadd.f32 %v2078_v36, %v642_v34  ;;  %v1684_v40 = vpop.f32.mrb[23].mxu0  ;;  %v779_v43 = vadd.f32 %v2078_v36, %v778_v41  ;;  %v1752_v44 = vpop.f32.mrb[23].mxu1 }
 0x112   : > { %1302 = vst.msk [vmem:[%s2089_s28 + $0xac] sm:$0xf] %vm1258_vm2, %v1599_v33  ;;  %v906_v42 = vmul.f32 0.1, %v776_v35 }
 0x113   : > { %v938_v45 = vmax.f32 %v640_v30, %v872_v38  ;;  %v873_v46 = vmul.f32 0.1, %v643_v39  ;;  %v907_v48 = vmul.f32 0.1, %v779_v43 }
 0x114   : > { %v972_v47 = vmax.f32 %v776_v35, %v906_v42 }
 0x115   : > { %v1566_v49 = vpack.c.bf16 %v938_v45, %v938_v45  ;;  %v939_v50 = vmax.f32 %v643_v39, %v873_v46  ;;  %v973_v52 = vmax.f32 %v779_v43, %v907_v48 }
 0x116   : > { %v1600_v51 = vpack.c.bf16 %v972_v47, %v972_v47  ;;  %v647_v53 = vpop.f32.mrb[24].mxu0  ;;  %v783_v57 = vpop.f32.mrb[24].mxu1 }
 0x117   : > { %1269 = vst.msk [vmem:[%s2089_s28 + $0x28] sm:$0xf] %vm1258_vm2, %v1566_v49  ;;  %v1567_v54 = vpack.c.bf16 %v939_v50, %v939_v50  ;;  %v648_v55 = vadd.f32 %v2078_v36, %v647_v53  ;;  %v1687_v56 = vpop.f32.mrb[25].mxu0  ;;  %v1601_v58 = vpack.c.bf16 %v973_v52, %v973_v52  ;;  %v784_v60 = vadd.f32 %v2078_v36, %v783_v57  ;;  %v1755_v61 = vpop.f32.mrb[25].mxu1 }
 0x118   : > { %1303 = vst.msk [vmem:[%s2089_s28 + $0xb0] sm:$0xf] %vm1258_vm2, %v1600_v51  ;;  %v650_v59 = vpop.f32.mrb[26].mxu0  ;;  %v786_v1 = vpop.f32.mrb[26].mxu1 }
 0x119   : > { %1270 = vst.msk [vmem:[%s2089_s28 + $0x2c] sm:$0xf] %vm1258_vm2, %v1567_v54  ;;  %v874_v62 = vmul.f32 0.1, %v648_v55  ;;  %v651_v63 = vadd.f32 %v2078_v36, %v650_v59  ;;  %v1688_v0 = vpop.f32.mrb[27].mxu0  ;;  %v787_v3 = vadd.f32 %v2078_v36, %v786_v1  ;;  %v1756_v4 = vpop.f32.mrb[27].mxu1 }
 0x11a   : > { %1304 = vst.msk [vmem:[%s2089_s28 + $0xb4] sm:$0xf] %vm1258_vm2, %v1601_v58  ;;  %v908_v2 = vmul.f32 0.1, %v784_v60 }
 0x11b   : > { %v940_v5 = vmax.f32 %v648_v55, %v874_v62  ;;  %v875_v6 = vmul.f32 0.1, %v651_v63  ;;  %v909_v8 = vmul.f32 0.1, %v787_v3 }
 0x11c   : > { %v974_v7 = vmax.f32 %v784_v60, %v908_v2 }
 0x11d   : > { %v1568_v9 = vpack.c.bf16 %v940_v5, %v940_v5  ;;  %v941_v10 = vmax.f32 %v651_v63, %v875_v6  ;;  %v975_v12 = vmax.f32 %v787_v3, %v909_v8 }
 0x11e   : > { %v1602_v11 = vpack.c.bf16 %v974_v7, %v974_v7  ;;  %v655_v13 = vpop.f32.mrb[28].mxu0  ;;  %v791_v17 = vpop.f32.mrb[28].mxu1 }
 0x11f   : > { %1271 = vst.msk [vmem:[%s2089_s28 + $0x30] sm:$0xf] %vm1258_vm2, %v1568_v9  ;;  %v1569_v14 = vpack.c.bf16 %v941_v10, %v941_v10  ;;  %v656_v15 = vadd.f32 %v2078_v36, %v655_v13  ;;  %v1691_v16 = vpop.f32.mrb[29].mxu0  ;;  %v1603_v18 = vpack.c.bf16 %v975_v12, %v975_v12  ;;  %v792_v20 = vadd.f32 %v2078_v36, %v791_v17  ;;  %v1759_v21 = vpop.f32.mrb[29].mxu1 }
 0x120   : > { %1305 = vst.msk [vmem:[%s2089_s28 + $0xb8] sm:$0xf] %vm1258_vm2, %v1602_v11  ;;  %v658_v19 = vpop.f32.mrb[30].mxu0  ;;  %v794_v25 = vpop.f32.mrb[30].mxu1 }
 0x121   : > { %1272 = vst.msk [vmem:[%s2089_s28 + $0x34] sm:$0xf] %vm1258_vm2, %v1569_v14  ;;  %v876_v22 = vmul.f32 0.1, %v656_v15  ;;  %v659_v23 = vadd.f32 %v2078_v36, %v658_v19  ;;  %v1692_v24 = vpop.f32.mrb[31].mxu0  ;;  %v795_v27 = vadd.f32 %v2078_v36, %v794_v25  ;;  %v1760_v28 = vpop.f32.mrb[31].mxu1 }
 0x122   : > { %1306 = vst.msk [vmem:[%s2089_s28 + $0xbc] sm:$0xf] %vm1258_vm2, %v1603_v18  ;;  %v910_v26 = vmul.f32 0.1, %v792_v20 }
 0x123   : > { %v942_v29 = vmax.f32 %v656_v15, %v876_v22  ;;  %v877_v30 = vmul.f32 0.1, %v659_v23  ;;  %v911_v32 = vmul.f32 0.1, %v795_v27 }
 0x124   : > { %v976_v31 = vmax.f32 %v792_v20, %v910_v26 }
 0x125   : > { %v1570_v33 = vpack.c.bf16 %v942_v29, %v942_v29  ;;  %v943_v34 = vmax.f32 %v659_v23, %v877_v30  ;;  %v977_v37 = vmax.f32 %v795_v27, %v911_v32 }
 0x126   : > { %v1604_v35 = vpack.c.bf16 %v976_v31, %v976_v31  ;;  %v663_v38 = vpop.f32.mrb[32].mxu0  ;;  %v799_v42 = vpop.f32.mrb[32].mxu1 }
 0x127   : > { %1273 = vst.msk [vmem:[%s2089_s28 + $0x38] sm:$0xf] %vm1258_vm2, %v1570_v33  ;;  %v1571_v39 = vpack.c.bf16 %v943_v34, %v943_v34  ;;  %v664_v40 = vadd.f32 %v2078_v36, %v663_v38  ;;  %v1695_v41 = vpop.f32.mrb[33].mxu0  ;;  %v1605_v43 = vpack.c.bf16 %v977_v37, %v977_v37  ;;  %v800_v45 = vadd.f32 %v2078_v36, %v799_v42  ;;  %v1763_v46 = vpop.f32.mrb[33].mxu1 }
 0x128   : > { %1307 = vst.msk [vmem:[%s2089_s28 + $0xc0] sm:$0xf] %vm1258_vm2, %v1604_v35  ;;  %v666_v44 = vpop.f32.mrb[34].mxu0  ;;  %v802_v50 = vpop.f32.mrb[34].mxu1 }
 0x129   : > { %1274 = vst.msk [vmem:[%s2089_s28 + $0x3c] sm:$0xf] %vm1258_vm2, %v1571_v39  ;;  %v878_v47 = vmul.f32 0.1, %v664_v40  ;;  %v667_v48 = vadd.f32 %v2078_v36, %v666_v44  ;;  %v1696_v49 = vpop.f32.mrb[35].mxu0  ;;  %v803_v52 = vadd.f32 %v2078_v36, %v802_v50  ;;  %v1764_v53 = vpop.f32.mrb[35].mxu1 }
 0x12a   : > { %1308 = vst.msk [vmem:[%s2089_s28 + $0xc4] sm:$0xf] %vm1258_vm2, %v1605_v43  ;;  %v912_v51 = vmul.f32 0.1, %v800_v45 }
 0x12b   : > { %v944_v54 = vmax.f32 %v664_v40, %v878_v47  ;;  %v879_v55 = vmul.f32 0.1, %v667_v48  ;;  %v913_v57 = vmul.f32 0.1, %v803_v52 }
 0x12c   : > { %v978_v56 = vmax.f32 %v800_v45, %v912_v51 }
 0x12d   : > { %v1572_v58 = vpack.c.bf16 %v944_v54, %v944_v54  ;;  %v945_v59 = vmax.f32 %v667_v48, %v879_v55  ;;  %v979_v61 = vmax.f32 %v803_v52, %v913_v57 }
 0x12e   : > { %v1606_v60 = vpack.c.bf16 %v978_v56, %v978_v56  ;;  %v671_v62 = vpop.f32.mrb[36].mxu0  ;;  %v807_v2 = vpop.f32.mrb[36].mxu1 }
 0x12f   : > { %1275 = vst.msk [vmem:[%s2089_s28 + $0x40] sm:$0xf] %vm1258_vm2, %v1572_v58  ;;  %v1573_v63 = vpack.c.bf16 %v945_v59, %v945_v59  ;;  %v672_v0 = vadd.f32 %v2078_v36, %v671_v62  ;;  %v1699_v1 = vpop.f32.mrb[37].mxu0  ;;  %v1607_v3 = vpack.c.bf16 %v979_v61, %v979_v61  ;;  %v808_v5 = vadd.f32 %v2078_v36, %v807_v2  ;;  %v1767_v6 = vpop.f32.mrb[37].mxu1 }
 0x130   : > { %1309 = vst.msk [vmem:[%s2089_s28 + $0xc8] sm:$0xf] %vm1258_vm2, %v1606_v60  ;;  %v674_v4 = vpop.f32.mrb[38].mxu0  ;;  %v810_v10 = vpop.f32.mrb[38].mxu1 }
 0x131   : > { %1276 = vst.msk [vmem:[%s2089_s28 + $0x44] sm:$0xf] %vm1258_vm2, %v1573_v63  ;;  %v880_v7 = vmul.f32 0.1, %v672_v0  ;;  %v675_v8 = vadd.f32 %v2078_v36, %v674_v4  ;;  %v1700_v9 = vpop.f32.mrb[39].mxu0  ;;  %v811_v12 = vadd.f32 %v2078_v36, %v810_v10  ;;  %v1768_v13 = vpop.f32.mrb[39].mxu1 }
 0x132   : > { %1310 = vst.msk [vmem:[%s2089_s28 + $0xcc] sm:$0xf] %vm1258_vm2, %v1607_v3  ;;  %v914_v11 = vmul.f32 0.1, %v808_v5 }
 0x133   : > { %v946_v14 = vmax.f32 %v672_v0, %v880_v7  ;;  %v881_v15 = vmul.f32 0.1, %v675_v8  ;;  %v915_v17 = vmul.f32 0.1, %v811_v12 }
 0x134   : > { %v980_v16 = vmax.f32 %v808_v5, %v914_v11 }
 0x135   : > { %v1574_v18 = vpack.c.bf16 %v946_v14, %v946_v14  ;;  %v947_v19 = vmax.f32 %v675_v8, %v881_v15  ;;  %v981_v21 = vmax.f32 %v811_v12, %v915_v17 }
 0x136   : > { %v1608_v20 = vpack.c.bf16 %v980_v16, %v980_v16  ;;  %v679_v22 = vpop.f32.mrb[40].mxu0  ;;  %v815_v26 = vpop.f32.mrb[40].mxu1 }
 0x137   : > { %1277 = vst.msk [vmem:[%s2089_s28 + $0x48] sm:$0xf] %vm1258_vm2, %v1574_v18  ;;  %v1575_v23 = vpack.c.bf16 %v947_v19, %v947_v19  ;;  %v680_v24 = vadd.f32 %v2078_v36, %v679_v22  ;;  %v1703_v25 = vpop.f32.mrb[41].mxu0  ;;  %v1609_v27 = vpack.c.bf16 %v981_v21, %v981_v21  ;;  %v816_v29 = vadd.f32 %v2078_v36, %v815_v26  ;;  %v1771_v30 = vpop.f32.mrb[41].mxu1 }
 0x138   : > { %1311 = vst.msk [vmem:[%s2089_s28 + $0xd0] sm:$0xf] %vm1258_vm2, %v1608_v20  ;;  %v682_v28 = vpop.f32.mrb[42].mxu0  ;;  %v818_v34 = vpop.f32.mrb[42].mxu1 }
 0x139   : > { %1278 = vst.msk [vmem:[%s2089_s28 + $0x4c] sm:$0xf] %vm1258_vm2, %v1575_v23  ;;  %v882_v31 = vmul.f32 0.1, %v680_v24  ;;  %v683_v32 = vadd.f32 %v2078_v36, %v682_v28  ;;  %v1704_v33 = vpop.f32.mrb[43].mxu0  ;;  %v819_v37 = vadd.f32 %v2078_v36, %v818_v34  ;;  %v1772_v38 = vpop.f32.mrb[43].mxu1 }
 0x13a   : > { %1312 = vst.msk [vmem:[%s2089_s28 + $0xd4] sm:$0xf] %vm1258_vm2, %v1609_v27  ;;  %v916_v35 = vmul.f32 0.1, %v816_v29 }
 0x13b   : > { %v948_v39 = vmax.f32 %v680_v24, %v882_v31  ;;  %v883_v40 = vmul.f32 0.1, %v683_v32  ;;  %v917_v42 = vmul.f32 0.1, %v819_v37 }
 0x13c   : > { %v982_v41 = vmax.f32 %v816_v29, %v916_v35 }
 0x13d   : > { %v1576_v43 = vpack.c.bf16 %v948_v39, %v948_v39  ;;  %v949_v44 = vmax.f32 %v683_v32, %v883_v40  ;;  %v983_v46 = vmax.f32 %v819_v37, %v917_v42 }
 0x13e   : > { %v1610_v45 = vpack.c.bf16 %v982_v41, %v982_v41  ;;  %v687_v47 = vpop.f32.mrb[44].mxu0  ;;  %v823_v51 = vpop.f32.mrb[44].mxu1 }
 0x13f   : > { %1279 = vst.msk [vmem:[%s2089_s28 + $0x50] sm:$0xf] %vm1258_vm2, %v1576_v43  ;;  %v1577_v48 = vpack.c.bf16 %v949_v44, %v949_v44  ;;  %v688_v49 = vadd.f32 %v2078_v36, %v687_v47  ;;  %v1707_v50 = vpop.f32.mrb[45].mxu0  ;;  %v1611_v52 = vpack.c.bf16 %v983_v46, %v983_v46  ;;  %v824_v54 = vadd.f32 %v2078_v36, %v823_v51  ;;  %v1775_v55 = vpop.f32.mrb[45].mxu1 }
 0x140   : > { %1313 = vst.msk [vmem:[%s2089_s28 + $0xd8] sm:$0xf] %vm1258_vm2, %v1610_v45  ;;  %v690_v53 = vpop.f32.mrb[46].mxu0  ;;  %v826_v59 = vpop.f32.mrb[46].mxu1 }
 0x141   : > { %1280 = vst.msk [vmem:[%s2089_s28 + $0x54] sm:$0xf] %vm1258_vm2, %v1577_v48  ;;  %v884_v56 = vmul.f32 0.1, %v688_v49  ;;  %v691_v57 = vadd.f32 %v2078_v36, %v690_v53  ;;  %v1708_v58 = vpop.f32.mrb[47].mxu0  ;;  %v827_v61 = vadd.f32 %v2078_v36, %v826_v59  ;;  %v1776_v62 = vpop.f32.mrb[47].mxu1 }
 0x142   : > { %1314 = vst.msk [vmem:[%s2089_s28 + $0xdc] sm:$0xf] %vm1258_vm2, %v1611_v52  ;;  %v918_v60 = vmul.f32 0.1, %v824_v54 }
 0x143   : > { %v950_v63 = vmax.f32 %v688_v49, %v884_v56  ;;  %v885_v0 = vmul.f32 0.1, %v691_v57  ;;  %v919_v2 = vmul.f32 0.1, %v827_v61 }
 0x144   : > { %v984_v1 = vmax.f32 %v824_v54, %v918_v60 }
 0x145   : > { %v1578_v3 = vpack.c.bf16 %v950_v63, %v950_v63  ;;  %v951_v4 = vmax.f32 %v691_v57, %v885_v0  ;;  %v985_v6 = vmax.f32 %v827_v61, %v919_v2 }
 0x146   : > { %v1612_v5 = vpack.c.bf16 %v984_v1, %v984_v1  ;;  %v695_v7 = vpop.f32.mrb[48].mxu0  ;;  %v831_v11 = vpop.f32.mrb[48].mxu1 }
 0x147   : > { %1281 = vst.msk [vmem:[%s2089_s28 + $0x58] sm:$0xf] %vm1258_vm2, %v1578_v3  ;;  %v1579_v8 = vpack.c.bf16 %v951_v4, %v951_v4  ;;  %v696_v9 = vadd.f32 %v2078_v36, %v695_v7  ;;  %v1711_v10 = vpop.f32.mrb[49].mxu0  ;;  %v1613_v12 = vpack.c.bf16 %v985_v6, %v985_v6  ;;  %v832_v14 = vadd.f32 %v2078_v36, %v831_v11  ;;  %v1779_v15 = vpop.f32.mrb[49].mxu1 }
 0x148   : > { %1315 = vst.msk [vmem:[%s2089_s28 + $0xe0] sm:$0xf] %vm1258_vm2, %v1612_v5  ;;  %v698_v13 = vpop.f32.mrb[50].mxu0  ;;  %v834_v19 = vpop.f32.mrb[50].mxu1 }
 0x149   : > { %1282 = vst.msk [vmem:[%s2089_s28 + $0x5c] sm:$0xf] %vm1258_vm2, %v1579_v8  ;;  %v886_v16 = vmul.f32 0.1, %v696_v9  ;;  %v699_v17 = vadd.f32 %v2078_v36, %v698_v13  ;;  %v1712_v18 = vpop.f32.mrb[51].mxu0  ;;  %v835_v21 = vadd.f32 %v2078_v36, %v834_v19  ;;  %v1780_v22 = vpop.f32.mrb[51].mxu1 }
 0x14a   : > { %1316 = vst.msk [vmem:[%s2089_s28 + $0xe4] sm:$0xf] %vm1258_vm2, %v1613_v12  ;;  %v920_v20 = vmul.f32 0.1, %v832_v14 }
 0x14b   : > { %v952_v23 = vmax.f32 %v696_v9, %v886_v16  ;;  %v887_v24 = vmul.f32 0.1, %v699_v17  ;;  %v921_v26 = vmul.f32 0.1, %v835_v21 }
 0x14c   : > { %v986_v25 = vmax.f32 %v832_v14, %v920_v20 }
 0x14d   : > { %v1580_v27 = vpack.c.bf16 %v952_v23, %v952_v23  ;;  %v953_v28 = vmax.f32 %v699_v17, %v887_v24  ;;  %v987_v30 = vmax.f32 %v835_v21, %v921_v26 }
 0x14e   : > { %v1614_v29 = vpack.c.bf16 %v986_v25, %v986_v25  ;;  %v703_v31 = vpop.f32.mrb[52].mxu0  ;;  %v839_v35 = vpop.f32.mrb[52].mxu1 }
 0x14f   : > { %1283 = vst.msk [vmem:[%s2089_s28 + $0x60] sm:$0xf] %vm1258_vm2, %v1580_v27  ;;  %v1581_v32 = vpack.c.bf16 %v953_v28, %v953_v28  ;;  %v704_v33 = vadd.f32 %v2078_v36, %v703_v31  ;;  %v1715_v34 = vpop.f32.mrb[53].mxu0  ;;  %v1615_v37 = vpack.c.bf16 %v987_v30, %v987_v30  ;;  %v840_v39 = vadd.f32 %v2078_v36, %v839_v35  ;;  %v1783_v40 = vpop.f32.mrb[53].mxu1 }
 0x150   : > { %1317 = vst.msk [vmem:[%s2089_s28 + $0xe8] sm:$0xf] %vm1258_vm2, %v1614_v29  ;;  %v706_v38 = vpop.f32.mrb[54].mxu0  ;;  %v842_v44 = vpop.f32.mrb[54].mxu1 }
 0x151   : > { %1284 = vst.msk [vmem:[%s2089_s28 + $0x64] sm:$0xf] %vm1258_vm2, %v1581_v32  ;;  %v888_v41 = vmul.f32 0.1, %v704_v33  ;;  %v707_v42 = vadd.f32 %v2078_v36, %v706_v38  ;;  %v1716_v43 = vpop.f32.mrb[55].mxu0  ;;  %v843_v46 = vadd.f32 %v2078_v36, %v842_v44  ;;  %v1784_v47 = vpop.f32.mrb[55].mxu1 }
 0x152   : > { %1318 = vst.msk [vmem:[%s2089_s28 + $0xec] sm:$0xf] %vm1258_vm2, %v1615_v37  ;;  %v922_v45 = vmul.f32 0.1, %v840_v39 }
 0x153   : > { %v954_v48 = vmax.f32 %v704_v33, %v888_v41  ;;  %v889_v49 = vmul.f32 0.1, %v707_v42  ;;  %v923_v51 = vmul.f32 0.1, %v843_v46 }
 0x154   : > { %v988_v50 = vmax.f32 %v840_v39, %v922_v45 }
 0x155   : > { %v1582_v52 = vpack.c.bf16 %v954_v48, %v954_v48  ;;  %v955_v53 = vmax.f32 %v707_v42, %v889_v49  ;;  %v989_v55 = vmax.f32 %v843_v46, %v923_v51 }
 0x156   : > { %v1616_v54 = vpack.c.bf16 %v988_v50, %v988_v50  ;;  %v711_v56 = vpop.f32.mrb[56].mxu0  ;;  %v847_v60 = vpop.f32.mrb[56].mxu1 }
 0x157   : > { %1285 = vst.msk [vmem:[%s2089_s28 + $0x68] sm:$0xf] %vm1258_vm2, %v1582_v52  ;;  %v1583_v57 = vpack.c.bf16 %v955_v53, %v955_v53  ;;  %v712_v58 = vadd.f32 %v2078_v36, %v711_v56  ;;  %v1719_v59 = vpop.f32.mrb[57].mxu0  ;;  %v1617_v61 = vpack.c.bf16 %v989_v55, %v989_v55  ;;  %v848_v63 = vadd.f32 %v2078_v36, %v847_v60  ;;  %v1787_v0 = vpop.f32.mrb[57].mxu1 }
 0x158   : > { %1319 = vst.msk [vmem:[%s2089_s28 + $0xf0] sm:$0xf] %vm1258_vm2, %v1616_v54  ;;  %v714_v62 = vpop.f32.mrb[58].mxu0  ;;  %v850_v4 = vpop.f32.mrb[58].mxu1 }
 0x159   : > { %1286 = vst.msk [vmem:[%s2089_s28 + $0x6c] sm:$0xf] %vm1258_vm2, %v1583_v57  ;;  %v890_v1 = vmul.f32 0.1, %v712_v58  ;;  %v715_v2 = vadd.f32 %v2078_v36, %v714_v62  ;;  %v1720_v3 = vpop.f32.mrb[59].mxu0  ;;  %v851_v6 = vadd.f32 %v2078_v36, %v850_v4  ;;  %v1788_v7 = vpop.f32.mrb[59].mxu1 }
 0x15a   : > { %1320 = vst.msk [vmem:[%s2089_s28 + $0xf4] sm:$0xf] %vm1258_vm2, %v1617_v61  ;;  %v924_v5 = vmul.f32 0.1, %v848_v63 }
 0x15b   : > { %v956_v8 = vmax.f32 %v712_v58, %v890_v1  ;;  %v891_v9 = vmul.f32 0.1, %v715_v2  ;;  %v925_v11 = vmul.f32 0.1, %v851_v6 }
 0x15c   : > { %v990_v10 = vmax.f32 %v848_v63, %v924_v5 }
 0x15d   : > { %v1584_v12 = vpack.c.bf16 %v956_v8, %v956_v8  ;;  %v957_v13 = vmax.f32 %v715_v2, %v891_v9  ;;  %v991_v15 = vmax.f32 %v851_v6, %v925_v11 }
 0x15e   : > { %v1618_v14 = vpack.c.bf16 %v990_v10, %v990_v10  ;;  %v719_v16 = vpop.f32.mrb[60].mxu0  ;;  %v855_v20 = vpop.f32.mrb[60].mxu1 }
 0x15f   : > { %1287 = vst.msk [vmem:[%s2089_s28 + $0x70] sm:$0xf] %vm1258_vm2, %v1584_v12  ;;  %v1585_v17 = vpack.c.bf16 %v957_v13, %v957_v13  ;;  %v720_v18 = vadd.f32 %v2078_v36, %v719_v16  ;;  %v1723_v19 = vpop.f32.mrb[61].mxu0  ;;  %v1619_v21 = vpack.c.bf16 %v991_v15, %v991_v15  ;;  %v856_v23 = vadd.f32 %v2078_v36, %v855_v20  ;;  %v1791_v24 = vpop.f32.mrb[61].mxu1 }
 0x160   : > { %1321 = vst.msk [vmem:[%s2089_s28 + $0xf8] sm:$0xf] %vm1258_vm2, %v1618_v14  ;;  %v722_v22 = vpop.f32.mrb[62].mxu0  ;;  %v858_v28 = vpop.f32.mrb[62].mxu1 }
 0x161   : > { %1288 = vst.msk [vmem:[%s2089_s28 + $0x74] sm:$0xf] %vm1258_vm2, %v1585_v17  ;;  %v892_v25 = vmul.f32 0.1, %v720_v18  ;;  %v723_v26 = vadd.f32 %v2078_v36, %v722_v22  ;;  %v1724_v27 = vpop.f32.mrb[63].mxu0  ;;  %v859_v30 = vadd.f32 %v2078_v36, %v858_v28  ;;  %v1792_v31 = vpop.f32.mrb[63].mxu1 }
 0x162   : > { %1322 = vst.msk [vmem:[%s2089_s28 + $0xfc] sm:$0xf] %vm1258_vm2, %v1619_v21  ;;  %v926_v29 = vmul.f32 0.1, %v856_v23 }
 0x163   : > { %v958_v32 = vmax.f32 %v720_v18, %v892_v25  ;;  %v893_v33 = vmul.f32 0.1, %v723_v26  ;;  %v927_v35 = vmul.f32 0.1, %v859_v30 }
 0x164   : > { %v992_v34 = vmax.f32 %v856_v23, %v926_v29 }
 0x165   : > { %v1586_v37 = vpack.c.bf16 %v958_v32, %v958_v32  ;;  %v959_v38 = vmax.f32 %v723_v26, %v893_v33  ;;  %v993_v40 = vmax.f32 %v859_v30, %v927_v35 }
 0x166   : > { %v1620_v39 = vpack.c.bf16 %v992_v34, %v992_v34  ;;  %v727_v41 = vpop.f32.mrb[64].mxu0 }
 0x167   : > { %1289 = vst.msk [vmem:[%s2089_s28 + $0x78] sm:$0xf] %vm1258_vm2, %v1586_v37  ;;  %v1587_v42 = vpack.c.bf16 %v959_v38, %v959_v38  ;;  %v728_v43 = vadd.f32 %v2078_v36, %v727_v41  ;;  %v1727_v44 = vpop.f32.mrb[65].mxu0  ;;  %v1621_v45 = vpack.c.bf16 %v993_v40, %v993_v40 }
 0x168   : > { %1323 = vst.msk [vmem:[%s2089_s28 + $0x100] sm:$0xf] %vm1258_vm2, %v1620_v39  ;;  %v730_v46 = vpop.f32.mrb[66].mxu0 }
 0x169   : > { %1290 = vst.msk [vmem:[%s2089_s28 + $0x7c] sm:$0xf] %vm1258_vm2, %v1587_v42  ;;  %v894_v47 = vmul.f32 0.1, %v728_v43  ;;  %v731_v48 = vadd.f32 %v2078_v36, %v730_v46  ;;  %v1728_v49 = vpop.f32.mrb[67].mxu0 }
 0x16a   : > { %1324 = vst.msk [vmem:[%s2089_s28 + $0x104] sm:$0xf] %vm1258_vm2, %v1621_v45 }
 0x16b   : > { %v960_v50 = vmax.f32 %v728_v43, %v894_v47  ;;  %v895_v51 = vmul.f32 0.1, %v731_v48 }
 0x16d   : > { %v1588_v52 = vpack.c.bf16 %v960_v50, %v960_v50  ;;  %v961_v53 = vmax.f32 %v731_v48, %v895_v51 }
 0x16f   : > { %1291 = vst.msk [vmem:[%s2089_s28 + $0x80] sm:$0xf] %vm1258_vm2, %v1588_v52  ;;  %v1589_v54 = vpack.c.bf16 %v961_v53, %v961_v53 }
 0x171   : > { %1292 = vst.msk [vmem:[%s2089_s28 + $0x84] sm:$0xf] %vm1258_vm2, %v1589_v54 }
 0x172 PF: > { %s13_s14 = sadd.s32 1, %s1881_s14   ;;  %s2298_s12 = smov %s1877_s13 }
 0x173   : > { %p10_p5 = scmp.ge.s32.totalorder %s13_s14, 4   ;;  %s2299_s13 = smov %s2301_s15 }
 0x175   :  { %12 = sbr.rel (!%p10_p5) target bundleno = 2 (0x2), region = 62 }

// kernel: unet1x3_forward.9
= control target key start
LH: loop header
LB: loop body
LE: loop exit
PB: predicated region body
PF: predicated region fallthrough
CT: control target
= control target key end

     0   :  { %s4048_s18 = smov 0   ;;  %s4050_s19 = smov 0   ;;  %s5126_s0 = inlined_call_operand.vmem [shape: bf16[2,528,32], index: 0, kind: input, shape index: {}, may-alias: {0,1,2}]   ;;  %s5127_s1 = inlined_call_operand.vmem [shape: bf16[2,528,32], index: 1, kind: input, shape index: {}, may-alias: {0,1,2}]   ;;  %s5128_s2 = inlined_call_operand.vmem [shape: bf16[2,528,32], index: 2, kind: input, shape index: {}, may-alias: {0,1,2}]   ;;  %s5129_s3 = inlined_call_operand.vmem [shape: bf16[3,96,64], index: 3, kind: input, shape index: {}]   ;;  %s5130_s4 = inlined_call_operand.vmem [shape: f32[1,64], index: 4, kind: input, shape index: {}]   ;;  %s5131_s5 = inlined_call_operand.vmem [shape: bf16[2,480,64], index: 5, kind: output, shape index: {}]  }
   0x1   :  { %s4052_s20 = smov 0  }
   0x2 LB: > { %s27_s21 = sadd.s32 1, %s4009_s19  ;;  %p3150_p0 = scmp.ge.s32.totalorder %s4013_s20, 1  ;;  %s4013_s20 = sphi %s4052_s20, %s15_s20   ;;  %s4009_s19 = sphi %s4050_s19, %s5133_s19   ;;  %s4005_s18 = sphi %s4048_s18, %s5132_s18  }
   0x3   : > { %p29_p1 = scmp.ge.s32.totalorder %s27_s21, 2  ;;  %p286_p2 = scmp.lt.s32.totalorder %s4013_s20, 3 }
   0x5   : > { %s5135_s21 = smov (%p29_p1, %s27_s21), 0  ;;  %p287_p3 = pnand %p3150_p0, %p286_p2 }
   0x6   : > { %p358_p4 = scmp.lt.s32.totalorder (!%p287_p3), %s4005_s18, 1  ;;  %v4069_v0 = vld [vmem:[%s5129_s3] sm:$0xff] (!%p287_p3)   ;;  %v3963_v1 = vld [vmem:[%s5129_s3 + $0x8] sm:$0xff] (!%p287_p3)   ;;  %v3966_v2 = vld [vmem:[%s5129_s3 + $0x10] sm:$0xff] (!%p287_p3)   ;;  %vm992_vm0 = vcmask (!%p287_p3), 1046528   ;;  %s4015_s13 = smov (!%p287_p3), 64  }
   0x7   : > { %290 = sbr.rel (%p287_p3) target bundleno = 552 (0x228), region = 40  ;;  %3628 = vmatprep.subr.bf16.mxu0 (!%p287_p3), %v4069_v0  ;;  %v3967_v3 = vld [vmem:[%s5129_s3 + $0x30] sm:$0xff] (!%p287_p3)   ;;  %v3968_v4 = vld [vmem:[%s5129_s3 + $0x18] sm:$0xff] (!%p287_p3)   ;;  %vm656_vm1 = vsmask.f32 (!%p287_p3), 7424  ;;  %s4016_s14 = smov (!%p287_p3), 32  }
   0x8   : > { %3629 = vmatpush3.bf16.msra.mxu0 (!%p287_p3), %v4069_v0  ;;  %3556 = vmatprep.subr.bf16.mxu1 (!%p287_p3), %v3967_v3  ;;  %v3971_v5 = vld [vmem:[%s5129_s3 + $0x38] sm:$0xff] (!%p287_p3)   ;;  %vm652_vm2 = vcmask (!%p287_p3), 1043456   ;;  %vm1126_vm3 = vcmask (!%p287_p3), 261120   ;;  %vm1193_vm4 = vcmask (!%p287_p3), 523264   ;;  %vm1414_vm5 = vcmask (!%p287_p3), 785408  }
   0x9   : > { %3630 = vmatprep.subr.bf16.mxu0 (!%p287_p3), %v3963_v1  ;;  %3557 = vmatpush3.bf16.msra.mxu1 (!%p287_p3), %v3967_v3  ;;  %vm2962_vm6 = vcmask (!%p287_p3), 519168  }
   0xa   : > { %3558 = vmatprep.subr.bf16.mxu1 (!%p287_p3), %v3971_v5 }
   0xc   : > { %3631 = vmatpush3.bf16.msra.mxu0 (!%p287_p3), %v3963_v1 }
   0xd   : > { %3632 = vmatprep.subr.bf16.mxu0 (!%p287_p3), %v3966_v2  ;;  %3559 = vmatpush3.bf16.msra.mxu1 (!%p287_p3), %v3971_v5 }
   0xe   : > { %s5137_s18 = smov (!%p358_p4, %s4005_s18), 1 }
   0xf   : > { %s4082_s28 = smul.u32 264, %s5137_s18 }
  0x10   : > { %3633 = vmatpush3.bf16.msra.mxu0 %v3966_v2  ;;  %s3906_s23 = smul.u32 240, %s5137_s18 }
  0x11   : > { %s4091_s8 = scalar_lea.vmem %s5126_s0, %s4082_s28  ;;  %3634 = vmatprep.subr.bf16.mxu0 %v3968_v4  ;;  %s3385_s15 = sadd.s32 240, %s4082_s28 }
  0x12   : > { %v4100_v6 = vld [vmem:[%s4091_s8] sm:$0xff]   ;;  %v4103_v7 = vld [vmem:[%s4091_s8 + $0x8] sm:$0xff]   ;;  %v4106_v8 = vld [vmem:[%s4091_s8 + $0x10] sm:$0xff]   ;;  %s4224_s22 = scalar_lea.vmem %s5127_s1, %s3385_s15  ;;  %s3387_s25 = sadd.s32 252, %s4082_s28 }
  0x13   : > { %v993_v9 = vrot.slane %v4100_v6, 1  ;;  %v994_v10 = vrot.slane %v4103_v7, 1  ;;  %v658_v11 = vshrl.u32 %v4100_v6, 16  ;;  %v660_v12 = vshll.u32 %v4100_v6, 16  ;;  %v4118_v19 = vld [vmem:[%s4091_s8 + $0x18] sm:$0xff]   ;;  %v4122_v22 = vld [vmem:[%s4091_s8 + $0x20] sm:$0xff]   ;;  %s4260_s7 = scalar_lea.vmem %s5128_s2, %s3387_s25  ;;  %s4914_s18 = scalar_lea.vmem %s5131_s5, %s3906_s23 }
  0x14   : > { %v665_v13 = vshll.u32 %v4103_v7, 16  ;;  %v996_v14 = vrot.slane %v4106_v8, 1  ;;  %v669_v15 = vshrl.u32 %v4103_v7, 16  ;;  %v673_v16 = vshll.u32 %v4106_v8, 16  ;;  %v4129_v28 = vld [vmem:[%s4091_s8 + $0x28] sm:$0xff]   ;;  %3635 = vmatpush3.bf16.msra.mxu0 %v3968_v4  ;;  %v4135_v34 = vld [vmem:[%s4091_s8 + $0x30] sm:$0xff]  }
  0x15   : > { %v995_v17 = vsel %vm992_vm0, %v993_v9, %v994_v10  ;;  %v662_v18 = vrot.slane %v660_v12, 1  ;;  %v677_v23 = vshrl.u32 %v4106_v8, 16  ;;  %v681_v26 = vshll.u32 %v4118_v19, 16  ;;  %v4145_v44 = vld [vmem:[%s4091_s8 + $0x38] sm:$0xff]   ;;  %v4154_v51 = vld [vmem:[%s4091_s8 + $0x40] sm:$0xff]   ;;  %v4164_v57 = vld [vmem:[%s4091_s8 + $0x48] sm:$0xff]  }
  0x16   : > { %1060 = vrot.lane.b32.xlu1 %v995_v17, %s4015_s13  ;;  %v667_v20 = vrot.slane %v665_v13, 1  ;;  %v675_v21 = vrot.slane %v673_v16, 1  ;;  %v997_v25 = vsel %vm992_vm0, %v994_v10, %v996_v14  ;;  %v685_v27 = vshrl.u32 %v4118_v19, 16  ;;  %v4174_v4 = vld [vmem:[%s4091_s8 + $0x50] sm:$0xff]   ;;  %v4184_v13 = vld [vmem:[%s4091_s8 + $0x58] sm:$0xff]  }
  0x17   : > { %v663_v24 = vor.u32 %v662_v18, %v658_v11  ;;  %v689_v30 = vshll.u32 %v4122_v22, 16  ;;  %v683_v32 = vrot.slane %v681_v26, 1  ;;  %v998_v33 = vrot.slane %v4118_v19, 1 }
  0x18   : > { %v671_v29 = vor.u32 %v669_v15, %v667_v20  ;;  %v697_v35 = vshll.u32 %v4129_v28, 16  ;;  %v679_v38 = vor.u32 %v677_v23, %v675_v21  ;;  %v1000_v39 = vrot.slane %v4122_v22, 1 }
  0x19   : > { %v668_v31 = vsel %vm656_vm1, %v663_v24, %v667_v20  ;;  %v691_v37 = vrot.slane %v689_v30, 1  ;;  %v687_v40 = vor.u32 %v685_v27, %v683_v32  ;;  %v701_v42 = vshrl.u32 %v4129_v28, 16 }
  0x1a   : > { %924 = vrot.lane.b32.xlu0 %v668_v31, %s4016_s14  ;;  %1062 = vrot.lane.b32.xlu1 %v997_v25, %s4015_s13  ;;  %v676_v36 = vsel %vm656_vm1, %v671_v29, %v675_v21  ;;  %v699_v41 = vrot.slane %v697_v35, 1  ;;  %v705_v43 = vshll.u32 %v4135_v34, 16  ;;  %v684_v46 = vsel %vm656_vm1, %v679_v38, %v683_v32  ;;  %v4194_v25 = vld [vmem:[%s4091_s8 + $0x60] sm:$0xff]   ;;  %v4204_v32 = vld [vmem:[%s4091_s8 + $0x68] sm:$0xff]  }
  0x1b   : > { %v692_v45 = vsel %vm656_vm1, %v687_v40, %v691_v37  ;;  %v1001_v47 = vsel %vm992_vm0, %v998_v33, %v1000_v39  ;;  %v693_v50 = vshrl.u32 %v4122_v22, 16  ;;  %v713_v52 = vshll.u32 %v4145_v44, 16 }
  0x1c   : > { %v703_v48 = vor.u32 %v701_v42, %v699_v41  ;;  %v707_v49 = vrot.slane %v705_v43, 1  ;;  %v999_v53 = vsel %vm992_vm0, %v996_v14, %v998_v33  ;;  %v1002_v54 = vrot.slane %v4129_v28, 1  ;;  %v4215_v43 = vld [vmem:[%s4091_s8 + $0x70] sm:$0xff]  }
  0x1d   : > { %v1004_v55 = vrot.slane %v4135_v34, 1  ;;  %v717_v56 = vshrl.u32 %v4145_v44, 16  ;;  %v695_v59 = vor.u32 %v693_v50, %v691_v37  ;;  %v715_v60 = vrot.slane %v713_v52, 1 }
  0x1e   : > { %926 = vrot.lane.b32.xlu0 %v676_v36, %s4016_s14  ;;  %930 = vrot.lane.b32.xlu1 %v692_v45, %s4016_s14  ;;  %v708_v58 = vsel %vm656_vm1, %v703_v48, %v707_v49  ;;  %v721_v61 = vshll.u32 %v4154_v51, 16  ;;  %v709_v63 = vshrl.u32 %v4135_v34, 16  ;;  %v729_v5 = vshll.u32 %v4164_v57, 16 }
  0x1f   : > { %v1005_v62 = vsel %vm992_vm0, %v1002_v54, %v1004_v55  ;;  %v700_v1 = vsel %vm656_vm1, %v695_v59, %v699_v41  ;;  %v719_v2 = vor.u32 %v717_v56, %v715_v60  ;;  %v1003_v9 = vsel %vm992_vm0, %v1000_v39, %v1002_v54  ;;  %v4248_v59 = vld [vmem:[%s5129_s3 + $0x28] sm:$0xff]  }
  0x20   : > { %v723_v3 = vrot.slane %v721_v61, 1  ;;  %v1006_v10 = vrot.slane %v4145_v44, 1  ;;  %v1008_v11 = vrot.slane %v4154_v51, 1  ;;  %v733_v12 = vshrl.u32 %v4164_v57, 16 }
  0x21   : > { %v711_v15 = vor.u32 %v709_v63, %v707_v49  ;;  %v731_v16 = vrot.slane %v729_v5, 1  ;;  %v737_v17 = vshll.u32 %v4174_v4, 16  ;;  %v725_v20 = vshrl.u32 %v4154_v51, 16  ;;  %v3978_v63 = vld [vmem:[%s5129_s3 + $0x48] sm:$0xff]  }
  0x22   : > { %928 = vrot.lane.b32.xlu0 %v684_v46, %s4016_s14  ;;  %1066 = vrot.lane.b32.xlu1 %v1001_v47, %s4015_s13  ;;  %v724_v14 = vsel %vm656_vm1, %v719_v2, %v723_v3  ;;  %v1009_v18 = vsel %vm992_vm0, %v1006_v10, %v1008_v11  ;;  %v745_v26 = vshll.u32 %v4184_v13, 16  ;;  %v1007_v27 = vsel %vm992_vm0, %v1004_v55, %v1006_v10  ;;  %v4219_v46 = vld [vmem:[%s4091_s8 + $0x78] sm:$0xff]   ;;  %v4229_v47 = vld [vmem:[%s5129_s3 + $0x20] sm:$0xff]  }
  0x23   : > { %v716_v21 = vsel %vm656_vm1, %v711_v15, %v715_v60  ;;  %v735_v23 = vor.u32 %v733_v12, %v731_v16  ;;  %v739_v24 = vrot.slane %v737_v17, 1  ;;  %v1010_v29 = vrot.slane %v4164_v57, 1  ;;  %3636 = vmatprep.subr.bf16.mxu0 %v4229_v47  ;;  %v4251_v60 = vld [vmem:[%s4091_s8 + $0x80] sm:$0xff]   ;;  %v4275_v12 = vld [vmem:[%s4091_s8 + $0x88] sm:$0xff]  }
  0x24   : > { %v1012_v30 = vrot.slane %v4174_v4, 1  ;;  %v749_v31 = vshrl.u32 %v4184_v13, 16  ;;  %v727_v35 = vor.u32 %v725_v20, %v723_v3  ;;  %v747_v36 = vrot.slane %v745_v26, 1  ;;  %3637 = vmatpush3.bf16.msra.mxu0 %v4229_v47  ;;  %v3975_v20 = vld [vmem:[%s4224_s22 + $0x8] ss:$0 sps:$4 sm:$0xff]   ;;  %v4293_v26 = vld [vmem:[%s4091_s8 + $0x90] sm:$0xff]  }
  0x25   : > { %v740_v33 = vsel %vm656_vm1, %v735_v23, %v739_v24  ;;  %v753_v37 = vshll.u32 %v4194_v25, 16  ;;  %v741_v39 = vshrl.u32 %v4174_v4, 16  ;;  %v761_v45 = vshll.u32 %v4204_v32, 16  ;;  %3638 = vmatprep.subr.bf16.mxu0 %v4248_v59  ;;  %v3979_v23 = vld [vmem:[%s5129_s3 + $0x50] sm:$0xff]  }
  0x26   : > { %1064 = vrot.lane.b32.xlu0 %v999_v53, %s4015_s13  ;;  %934 = vrot.lane.b32.xlu1 %v708_v58, %s4016_s14  ;;  %v1013_v38 = vsel %vm992_vm0, %v1010_v29, %v1012_v30  ;;  %v732_v40 = vsel %vm656_vm1, %v727_v35, %v731_v16  ;;  %v751_v41 = vor.u32 %v749_v31, %v747_v36  ;;  %v1014_v50 = vrot.slane %v4184_v13, 1  ;;  %v3973_v58 = vld [vmem:[%s5129_s3 + $0x40] sm:$0xff]  }
  0x27   : > { %v755_v42 = vrot.slane %v753_v37, 1  ;;  %v1011_v48 = vsel %vm992_vm0, %v1008_v11, %v1010_v29  ;;  %v743_v49 = vor.u32 %v741_v39, %v739_v24  ;;  %v1016_v52 = vrot.slane %v4194_v25, 1  ;;  %3560 = vmatprep.subr.bf16.mxu1 %v3973_v58  ;;  %v4290_v24 = vld [vmem:[%s5129_s3 + $0x60] sm:$0xff]  }
  0x28   : > { %v763_v54 = vrot.slane %v761_v45, 1  ;;  %v765_v55 = vshrl.u32 %v4204_v32, 16  ;;  %v769_v56 = vshll.u32 %v4215_v43, 16  ;;  %v757_v61 = vshrl.u32 %v4194_v25, 16  ;;  %3561 = vmatpush3.bf16.msra.mxu1 %v3973_v58  ;;  %3639 = vmatpush3.bf16.msra.mxu0 %v4248_v59  ;;  %v4328_v58 = vld [vmem:[%s4091_s8 + $0xa0] sm:$0xff]  }
  0x29   : > { %v756_v53 = vsel %vm656_vm1, %v751_v41, %v755_v42  ;;  %v1017_v2 = vsel %vm992_vm0, %v1014_v50, %v1016_v52  ;;  %3562 = vmatprep.subr.bf16.mxu1 %v3978_v63  ;;  %v1020_v10 = vrot.slane %v4215_v43, 1  ;;  %v781_v11 = vshrl.u32 %v4219_v46, 16  ;;  %3700 = vmatprep.subr.bf16.mxu0 %v4290_v24 }
  0x2a   : > { %932 = vrot.lane.b32.xlu0 %v700_v1, %s4016_s14  ;;  %1070 = vrot.lane.b32.xlu1 %v1005_v62, %s4015_s13  ;;  %v777_v62 = vshll.u32 %v4219_v46, 16  ;;  %v748_v1 = vsel %vm656_vm1, %v743_v49, %v747_v36  ;;  %v767_v3 = vor.u32 %v765_v55, %v763_v54  ;;  %v771_v5 = vrot.slane %v769_v56, 1  ;;  %v3981_v36 = vld [vmem:[%s5129_s3 + $0x58] sm:$0xff]  }
  0x2b   : > { %v785_v16 = vshll.u32 %v4251_v60, 16  ;;  %v1015_v17 = vsel %vm992_vm0, %v1012_v30, %v1014_v50  ;;  %v773_v30 = vshrl.u32 %v4215_v43, 16  ;;  %v793_v35 = vshll.u32 %v4275_v12, 16 }
  0x2c   : > { %v779_v15 = vrot.slane %v777_v62, 1  ;;  %3563 = vmatpush3.bf16.msra.mxu1 %v3978_v63  ;;  %v1022_v39 = vrot.slane %v4219_v46, 1  ;;  %v797_v41 = vshrl.u32 %v4275_v12, 16  ;;  %v801_v50 = vshll.u32 %v4293_v26, 16 }
  0x2d   : > { %3564 = vmatprep.subr.bf16.mxu1 %v3979_v23  ;;  %v795_v49 = vrot.slane %v793_v35, 1  ;;  %v1026_v63 = vrot.slane %v4275_v12, 1 }
  0x2e   : > { %1068 = vrot.lane.b32.xlu0 %v1003_v9, %s4015_s13  ;;  %938 = vrot.lane.b32.xlu1 %v724_v14, %s4016_s14  ;;  %v1018_v9 = vrot.slane %v4204_v32, 1  ;;  %v759_v14 = vor.u32 %v757_v61, %v755_v42  ;;  %v783_v31 = vor.u32 %v781_v11, %v779_v15  ;;  %v4314_v42 = vld [vmem:[%s4091_s8 + $0x98] sm:$0xff]   ;;  %v803_v56 = vrot.slane %v801_v50, 1  ;;  %v4340_v11 = vld [vmem:[%s4091_s8 + $0xa8] sm:$0xff]  }
  0x2f   : > { %v809_v61 = vshll.u32 %v4314_v42, 16 }
  0x30   : > { %v1021_v29 = vsel %vm992_vm0, %v1018_v9, %v1020_v10  ;;  %3565 = vmatpush3.bf16.msra.mxu1 %v3979_v23  ;;  %v1019_v45 = vsel %vm992_vm0, %v1016_v52, %v1018_v9  ;;  %v799_v52 = vor.u32 %v797_v41, %v795_v49  ;;  %v817_v9 = vshll.u32 %v4328_v58, 16 }
  0x31   : > { %3566 = vmatprep.subr.bf16.mxu1 %v3981_v36 }
  0x32   : > { %936 = vrot.lane.b32.xlu0 %v716_v21, %s4016_s14  ;;  %1074 = vrot.lane.b32.xlu1 %v1009_v18, %s4015_s13  ;;  %v772_v18 = vsel %vm656_vm1, %v767_v3, %v771_v5  ;;  %v3976_v21 = vld [vmem:[%s4260_s7] ss:$0 sps:$4 sm:$0xff]   ;;  %v811_v3 = vrot.slane %v809_v61, 1 }
  0x33   : > { %v4306_v37 = vsel %vm652_vm2, %v3975_v20, %v3976_v21  ;;  %v825_v20 = vshll.u32 %v4340_v11, 16 }
  0x34   : > { %3567 = vmatpush3.bf16.msra.mxu1 %v3981_v36  ;;  %v4360_v36 = vld [vmem:[%s4091_s8 + $0xb8] sm:$0xff]  }
  0x35   : > { %3772 = vmatprep.subr.bf16.mxu1 %v4069_v0  ;;  %v1023_v0 = vsel %vm992_vm0, %v1020_v10, %v1022_v39  ;;  %v845_v61 = vshrl.u32 %v4360_v36, 16 }
  0x36   : > { %1072 = vrot.lane.b32.xlu0 %v1007_v27, %s4015_s13  ;;  %942 = vrot.lane.b32.xlu1 %v740_v33, %s4016_s14  ;;  %v764_v27 = vsel %vm656_vm1, %v759_v14, %v763_v54  ;;  %v787_v33 = vrot.slane %v785_v16, 1  ;;  %v789_v54 = vshrl.u32 %v4251_v60, 16  ;;  %v805_v14 = vshrl.u32 %v4293_v26, 16 }
  0x38   : > { %v791_v62 = vor.u32 %v789_v54, %v787_v33  ;;  %v807_v23 = vor.u32 %v805_v14, %v803_v56  ;;  %v1034_v54 = vrot.slane %v4340_v11, 1 }
  0x3a   : > { %940 = vrot.lane.b32.xlu0 %v732_v40, %s4016_s14  ;;  %1078 = vrot.lane.b32.xlu1 %v1013_v38, %s4015_s13  ;;  %v775_v38 = vor.u32 %v773_v30, %v771_v5  ;;  %v1024_v40 = vrot.slane %v4251_v60, 1  ;;  %v813_v5 = vshrl.u32 %v4314_v42, 16  ;;  %v796_v10 = vsel %vm656_vm1, %v791_v62, %v795_v49  ;;  %v4380_v62 = vld [vmem:[%s4091_s8 + $0xc8] sm:$0xff]  }
  0x3b   : > { %v841_v49 = vshll.u32 %v4360_v36, 16 }
  0x3c   : > { %v1025_v55 = vsel %vm992_vm0, %v1022_v39, %v1024_v40  ;;  %v815_v16 = vor.u32 %v813_v5, %v811_v3  ;;  %v1027_v21 = vsel %vm992_vm0, %v1024_v40, %v1026_v63  ;;  %v821_v39 = vshrl.u32 %v4328_v58, 16 }
  0x3e   : > { %1076 = vrot.lane.b32.xlu0 %v1011_v48, %s4015_s13  ;;  %946 = vrot.lane.b32.xlu1 %v756_v53, %s4016_s14  ;;  %v788_v48 = vsel %vm656_vm1, %v783_v31, %v787_v33  ;;  %v780_v53 = vsel %vm656_vm1, %v775_v38, %v779_v15  ;;  %v827_v31 = vrot.slane %v825_v20, 1  ;;  %v829_v33 = vshrl.u32 %v4340_v11, 16 }
  0x3f   : > { %v812_v38 = vsel %vm656_vm1, %v807_v23, %v811_v3  ;;  %v861_v23 = vshrl.u32 %v4380_v62, 16 }
  0x40   : > { %v831_v41 = vor.u32 %v829_v33, %v827_v31 }
  0x42   : > { %944 = vrot.lane.b32.xlu0 %v748_v1, %s4016_s14  ;;  %1082 = vrot.lane.b32.xlu1 %v1017_v2, %s4015_s13  ;;  %v1028_v1 = vrot.slane %v4293_v26, 1  ;;  %v804_v2 = vsel %vm656_vm1, %v799_v52, %v803_v56  ;;  %v843_v56 = vrot.slane %v841_v49, 1  ;;  %v1042_v49 = vrot.slane %v4380_v62, 1 }
  0x44   : > { %v1029_v15 = vsel %vm992_vm0, %v1026_v63, %v1028_v1  ;;  %v847_v3 = vor.u32 %v845_v61, %v843_v56  ;;  %v4420_v61 = vld [vmem:[%s4091_s8 + $0xe8] sm:$0xff]  }
  0x46   : > { %1080 = vrot.lane.b32.xlu0 %v1015_v17, %s4015_s13  ;;  %950 = vrot.lane.b32.xlu1 %v772_v18, %s4016_s14  ;;  %v819_v17 = vrot.slane %v817_v9, 1  ;;  %v4348_v18 = vld [vmem:[%s4091_s8 + $0xb0] sm:$0xff]  }
  0x47   : > { %v833_v35 = vshll.u32 %v4348_v18, 16  ;;  %v4388_v9 = vld [vmem:[%s4091_s8 + $0xd0] sm:$0xff]  }
  0x48   : > { %v820_v30 = vsel %vm656_vm1, %v815_v16, %v819_v17  ;;  %v1038_v16 = vrot.slane %v4360_v36, 1 }
  0x4a   : > { %948 = vrot.lane.b32.xlu0 %v764_v27, %s4016_s14  ;;  %1086 = vrot.lane.b32.xlu1 %v1021_v29, %s4015_s13  ;;  %v1030_v27 = vrot.slane %v4314_v42, 1  ;;  %v1032_v29 = vrot.slane %v4328_v58, 1 }
  0x4c   : > { %v1033_v40 = vsel %vm992_vm0, %v1030_v27, %v1032_v29  ;;  %v1031_v50 = vsel %vm992_vm0, %v1028_v1, %v1030_v27  ;;  %v837_v1 = vshrl.u32 %v4348_v18, 16  ;;  %v1035_v14 = vsel %vm992_vm0, %v1032_v29, %v1034_v54 }
  0x4d   : > { %v865_v27 = vshll.u32 %v4388_v9, 16 }
  0x4e   : > { %1084 = vrot.lane.b32.xlu0 %v1019_v45, %s4015_s13  ;;  %954 = vrot.lane.b32.xlu1 %v788_v48, %s4016_s14  ;;  %v835_v45 = vrot.slane %v833_v35, 1  ;;  %v4368_v48 = vld [vmem:[%s4091_s8 + $0xc0] sm:$0xff]  }
  0x50   : > { %v836_v52 = vsel %vm656_vm1, %v831_v41, %v835_v45 }
  0x52   : > { %952 = vrot.lane.b32.xlu0 %v780_v53, %s4016_s14  ;;  %1090 = vrot.lane.b32.xlu1 %v1025_v55, %s4015_s13  ;;  %v823_v53 = vor.u32 %v821_v39, %v819_v17  ;;  %v1036_v55 = vrot.slane %v4348_v18, 1  ;;  %v1040_v17 = vrot.slane %v4368_v48, 1  ;;  %v4408_v39 = vld [vmem:[%s4091_s8 + $0xe0] sm:$0xff]  }
  0x54   : > { %v1037_v63 = vsel %vm992_vm0, %v1034_v54, %v1036_v55  ;;  %v1041_v29 = vsel %vm992_vm0, %v1038_v16, %v1040_v17  ;;  %v1039_v41 = vsel %vm992_vm0, %v1036_v55, %v1038_v16  ;;  %v1048_v16 = vrot.slane %v4408_v39, 1 }
  0x56   : > { %1088 = vrot.lane.b32.xlu0 %v1023_v0, %s4015_s13  ;;  %958 = vrot.lane.b32.xlu1 %v804_v2, %s4016_s14  ;;  %v849_v0 = vshll.u32 %v4368_v48, 16  ;;  %v828_v2 = vsel %vm656_vm1, %v823_v53, %v827_v31  ;;  %v853_v31 = vshrl.u32 %v4368_v48, 16 }
  0x58   : > { %v851_v5 = vrot.slane %v849_v0, 1  ;;  %v869_v0 = vshrl.u32 %v4388_v9, 16 }
  0x5a   : > { %956 = vrot.lane.b32.xlu0 %v796_v10, %s4016_s14  ;;  %1094 = vrot.lane.b32.xlu1 %v1029_v15, %s4015_s13  ;;  %v857_v10 = vshll.u32 %v4380_v62, 16  ;;  %v839_v15 = vor.u32 %v837_v1, %v835_v45  ;;  %v852_v20 = vsel %vm656_vm1, %v847_v3, %v851_v5  ;;  %v855_v45 = vor.u32 %v853_v31, %v851_v5  ;;  %v4428_v3 = vld [vmem:[%s4224_s22] sm:$0xff]  }
  0x5b   : > { %v889_v5 = vshll.u32 %v4420_v61, 16 }
  0x5c   : > { %v844_v33 = vsel %vm656_vm1, %v839_v15, %v843_v56  ;;  %v881_v56 = vshll.u32 %v4408_v39, 16 }
  0x5e   : > { %1092 = vrot.lane.b32.xlu0 %v1027_v21, %s4015_s13  ;;  %962 = vrot.lane.b32.xlu1 %v820_v30, %s4016_s14  ;;  %v859_v21 = vrot.slane %v857_v10, 1  ;;  %v4400_v30 = vld [vmem:[%s4091_s8 + $0xd8] sm:$0xff]   ;;  %v1043_v10 = vsel %vm992_vm0, %v1040_v17, %v1042_v49  ;;  %v885_v17 = vshrl.u32 %v4408_v39, 16 }
  0x5f   : > { %v1046_v15 = vrot.slane %v4400_v30, 1 }
  0x60   : > { %v863_v35 = vor.u32 %v861_v23, %v859_v21  ;;  %v893_v23 = vshrl.u32 %v4420_v61, 16 }
  0x62   : > { %960 = vrot.lane.b32.xlu0 %v812_v38, %s4016_s14  ;;  %1098 = vrot.lane.b32.xlu1 %v1033_v40, %s4015_s13  ;;  %v867_v38 = vrot.slane %v865_v27, 1  ;;  %v873_v40 = vshll.u32 %v4400_v30, 16  ;;  %v897_v27 = vshll.u32 %v4428_v3, 16 }
  0x64   : > { %v868_v53 = vsel %vm656_vm1, %v863_v35, %v867_v38  ;;  %v875_v54 = vrot.slane %v873_v40, 1  ;;  %v899_v35 = vrot.slane %v897_v27, 1  ;;  %v904_v40 = vshll.u32 %v4306_v37, 16 }
  0x66   : > { %1096 = vrot.lane.b32.xlu0 %v1031_v50, %s4015_s13  ;;  %966 = vrot.lane.b32.xlu1 %v836_v52, %s4016_s14  ;;  %v1044_v50 = vrot.slane %v4388_v9, 1  ;;  %v877_v52 = vshrl.u32 %v4400_v30, 16 }
  0x68   : > { %v1045_v55 = vsel %vm992_vm0, %v1042_v49, %v1044_v50  ;;  %v879_v1 = vor.u32 %v877_v52, %v875_v54  ;;  %v1050_v49 = vrot.slane %v4420_v61, 1 }
  0x6a   : > { %964 = vrot.lane.b32.xlu0 %v828_v2, %s4016_s14  ;;  %1102 = vrot.lane.b32.xlu1 %v1037_v63, %s4015_s13  ;;  %v860_v63 = vsel %vm656_vm1, %v855_v45, %v859_v21  ;;  %v883_v2 = vrot.slane %v881_v56, 1  ;;  %v891_v21 = vrot.slane %v889_v5, 1  ;;  %v908_v56 = vshrl.u32 %v4306_v37, 16 }
  0x6c   : > { %v887_v45 = vor.u32 %v885_v17, %v883_v2 }
  0x6e   : > { %1100 = vrot.lane.b32.xlu0 %v1035_v14, %s4015_s13  ;;  %970 = vrot.lane.b32.xlu1 %v852_v20, %s4016_s14  ;;  %v871_v14 = vor.u32 %v869_v0, %v867_v38  ;;  %v884_v20 = vsel %vm656_vm1, %v879_v1, %v883_v2  ;;  %v4445_v38 = vld [vmem:[%s4260_s7 + $0x4] sm:$0xff]   ;;  %v901_v0 = vshrl.u32 %v4428_v3, 16 }
  0x70   : > { %v876_v31 = vsel %vm656_vm1, %v871_v14, %v875_v54  ;;  %v906_v54 = vrot.slane %v904_v40, 1 }
  0x72   : > { %968 = vrot.lane.b32.xlu0 %v844_v33, %s4016_s14  ;;  %1106 = vrot.lane.b32.xlu1 %v1041_v29, %s4015_s13  ;;  %v1049_v29 = vsel %vm992_vm0, %v1046_v15, %v1048_v16  ;;  %v895_v33 = vor.u32 %v893_v23, %v891_v21  ;;  %v910_v1 = vor.u32 %v908_v56, %v906_v54 }
  0x74   : > { %v900_v52 = vsel %vm656_vm1, %v895_v33, %v899_v35  ;;  %v916_v33 = vshrl.u32 %v4445_v38, 16 }
  0x76   : > { %1104 = vrot.lane.b32.xlu0 %v1039_v41, %s4015_s13  ;;  %974 = vrot.lane.b32.xlu1 %v868_v53, %s4016_s14  ;;  %v1047_v41 = vsel %vm992_vm0, %v1044_v50, %v1046_v15  ;;  %v1052_v53 = vrot.slane %v4428_v3, 1  ;;  %v892_v50 = vsel %vm656_vm1, %v887_v45, %v891_v21  ;;  %v903_v15 = vor.u32 %v901_v0, %v899_v35 }
  0x77   : > { %v1056_v21 = vrot.slane %v4445_v38, 1  ;;  %v4017_v35 = vmov 0  }
  0x78   : > { %v922_v40 = vrot.slane %v4017_v35, 1 }
  0x7a   : > { %972 = vrot.lane.b32.xlu0 %v860_v63, %s4016_s14  ;;  %1110 = vrot.lane.b32.xlu1 %v1045_v55, %s4015_s13  ;;  %v912_v55 = vshll.u32 %v4445_v38, 16  ;;  %v1053_v63 = vsel %vm992_vm0, %v1050_v49, %v1052_v53 }
  0x7c   : > { %v914_v2 = vrot.slane %v912_v55, 1  ;;  %v1059_v55 = vsel %vm992_vm0, %v1056_v21, %v922_v40 }
  0x7e   : > { %1108 = vrot.lane.b32.xlu0 %v1043_v10, %s4015_s13  ;;  %978 = vrot.lane.b32.xlu1 %v884_v20, %s4016_s14  ;;  %v1051_v10 = vsel %vm992_vm0, %v1048_v16, %v1050_v49  ;;  %v915_v14 = vsel %vm656_vm1, %v910_v1, %v914_v2  ;;  %v1054_v20 = vrot.slane %v4306_v37, 1  ;;  %v907_v16 = vsel %vm656_vm1, %v903_v15, %v906_v54  ;;  %v3982_v49 = vld [vmem:[%s5129_s3 + $0x68] sm:$0xff]  }
  0x7f   : > { %v918_v56 = vor.u32 %v916_v33, %v914_v2 }
  0x80   : > { %v1055_v54 = vsel %vm992_vm0, %v1052_v53, %v1054_v20 }
  0x81   : > { %v923_v1 = vsel %vm656_vm1, %v918_v56, %v922_v40  ;;  %v3988_v40 = vld [vmem:[%s5129_s3 + $0x8] sm:$0xff]  }
  0x82   : > { %976 = vrot.lane.b32.xlu0 %v876_v31, %s4016_s14  ;;  %1114 = vrot.lane.b32.xlu1 %v1049_v29, %s4015_s13  ;;  %v1057_v31 = vsel %vm992_vm0, %v1054_v20, %v1056_v21 }
  0x86   : > { %1112 = vrot.lane.b32.xlu0 %v1047_v41, %s4015_s13  ;;  %982 = vrot.lane.b32.xlu1 %v900_v52, %s4016_s14 }
  0x88   : > { %v1061_v5 = vpop.permute.xlu1 %1060 }
  0x8a   : > { %980 = vrot.lane.b32.xlu0 %v892_v50, %s4016_s14  ;;  %1118 = vrot.lane.b32.xlu1 %v1053_v63, %s4015_s13  ;;  %v3983_v63 = vld [vmem:[%s5129_s3 + $0x70] sm:$0xff]  }
  0x8c   : > { %v925_v23 = vpop.permute.xlu0 %924  ;;  %v1063_v27 = vpop.permute.xlu1 %1062 }
  0x8d   : > { %v1128_v29 = vsel %vm1126_vm3, %v4100_v6, %v925_v23 }
  0x8e   : > { %1116 = vrot.lane.b32.xlu0 %v1051_v10, %s4015_s13  ;;  %v1195_v17 = vsel %vm1193_vm4, %v1128_v29, %v1061_v5  ;;  %986 = vrot.lane.b32.xlu1 %v915_v14, %s4016_s14  ;;  %v3984_v10 = vld [vmem:[%s5129_s3 + $0x78] sm:$0xff]  }
  0x8f   : > { %3640 = vmatprep.mubr.msk.bf16.mxu0 %vm1414_vm5, %v1195_v17  ;;  %v3985_v17 = vld [vmem:[%s5129_s3 + $0x80] sm:$0xff]  }
  0x90   : > { %v927_v41 = vpop.permute.xlu0 %926  ;;  %v931_v45 = vpop.permute.xlu1 %930 }
  0x91   : > { %v1130_v6 = vsel %vm1126_vm3, %v4103_v7, %v927_v41  ;;  %v1134_v7 = vsel %vm1126_vm3, %v4118_v19, %v931_v45  ;;  %v3986_v45 = vld [vmem:[%s5129_s3 + $0x88] sm:$0xff]  }
  0x92   : > { %984 = vrot.lane.b32.xlu0 %v907_v16, %s4016_s14  ;;  %v1197_v52 = vsel %vm1193_vm4, %v1130_v6, %v1063_v27  ;;  %1122 = vrot.lane.b32.xlu1 %v1057_v31, %s4015_s13 }
  0x93   : > { %3641 = vmatmul.mubr.msk.bf16.vlgmr.msra.gmra.mrb[0].mxu0 %vm1414_vm5, %v1197_v52  ;;  %v1317_v14 = vrot.slane %v1197_v52, 4 }
  0x94   : > { %v929_v0 = vpop.permute.xlu0 %928  ;;  %v1067_v50 = vpop.permute.xlu1 %1066  ;;  %3701 = vmatpush3.bf16.msra.mxu0 %v4290_v24 }
  0x95   : > { %3702 = vmatprep.subr.bf16.mxu0 %v3982_v49  ;;  %v4496_v53 = vsel %vm1193_vm4, %v1134_v7, %v1067_v50  ;;  %v1132_v19 = vsel %vm1126_vm3, %v4106_v8, %v929_v0  ;;  %v3989_v7 = vld [vmem:[%s5129_s3 + $0x10] sm:$0xff]  }
  0x96   : > { %1120 = vrot.lane.b32.xlu0 %v1055_v54, %s4015_s13  ;;  %1124 = vrot.lane.b32.xlu1 %v1059_v55, %s4015_s13  ;;  %v1320_v15 = vrot.slane %v4496_v53, 4 }
  0x98   : > { %v1065_v2 = vpop.permute.xlu0 %1064  ;;  %v935_v5 = vpop.permute.xlu1 %934  ;;  %3703 = vmatpush3.bf16.msra.mxu0 %v3982_v49 }
  0x99   : > { %v1199_v24 = vsel %vm1193_vm4, %v1132_v19, %v1065_v2  ;;  %3704 = vmatprep.subr.bf16.mxu0 %v3983_v63  ;;  %v1138_v8 = vsel %vm1126_vm3, %v4129_v28, %v935_v5  ;;  %v3987_v28 = vld [vmem:[%s5129_s3] sm:$0xff]  }
  0x9a   : > { %v1318_v20 = vrot.slane %v1199_v24, 4  ;;  %3644 = vmatprep.mubr.msk.bf16.mxu0 %vm1414_vm5, %v1199_v24  ;;  %988 = vrot.lane.b32.xlu0 %v923_v1, %s4016_s14  ;;  %v3990_v1 = vld [vmem:[%s5129_s3 + $0x18] sm:$0xff]  }
  0x9b   : > { %3645 = vmatmul.mubr.msk.bf16.gmra.mrb[4].mxu0 %vm1414_vm5, %v4496_v53 }
  0x9c   : > { %v933_v21 = vpop.permute.xlu0 %932  ;;  %v1319_v23 = vsel %vm652_vm2, %v1317_v14, %v1318_v20  ;;  %v1071_v27 = vpop.permute.xlu1 %1070  ;;  %v1321_v29 = vsel %vm652_vm2, %v1318_v20, %v1320_v15  ;;  %3705 = vmatpush3.bf16.msra.mxu0 %v3983_v63 }
  0x9d   : > { %3568 = vmatprep.mubr.msk.bf16.mxu1 %vm1414_vm5, %v1319_v23  ;;  %3706 = vmatprep.subr.bf16.mxu0 %v3984_v10  ;;  %v4520_v16 = vsel %vm1193_vm4, %v1138_v8, %v1071_v27  ;;  %v1136_v31 = vsel %vm1126_vm3, %v4122_v22, %v933_v21 }
  0x9e   : > { %3569 = vmatmul.mubr.msk.bf16.vlgmr.msra.gmra.mrb[0].mxu1 %vm1414_vm5, %v1321_v29  ;;  %v1324_v6 = vrot.slane %v4520_v16, 4 }
  0x9f   : > { %3778 = vmatpush3.bf16.msra.mxu1 %v3987_v28 }
  0xa0   : > { %v1069_v33 = vpop.permute.xlu0 %1068  ;;  %v939_v35 = vpop.permute.xlu1 %938  ;;  %3773 = vmatprep.subr.bf16.mxu1 %v3988_v40  ;;  %3707 = vmatpush3.bf16.msra.mxu0 %v3984_v10 }
  0xa1   : > { %v4531_v41 = vsel %vm1193_vm4, %v1136_v31, %v1069_v33  ;;  %3708 = vmatprep.subr.bf16.mxu0 %v3985_v17  ;;  %v1142_v49 = vsel %vm1126_vm3, %v4145_v44, %v939_v35 }
  0xa2   : > { %v1322_v22 = vrot.slane %v4531_v41, 4  ;;  %3648 = vmatprep.mubr.msk.bf16.mxu0 %vm1414_vm5, %v4531_v41 }
  0xa3   : > { %3649 = vmatmul.mubr.msk.bf16.gmra.mrb[8].mxu0 %vm1414_vm5, %v4520_v16  ;;  %3779 = vmatpush3.bf16.msra.mxu1 %v3988_v40 }
  0xa4   : > { %v937_v52 = vpop.permute.xlu0 %936  ;;  %v1323_v54 = vsel %vm652_vm2, %v1320_v15, %v1322_v22  ;;  %v1075_v56 = vpop.permute.xlu1 %1074  ;;  %v1325_v55 = vsel %vm652_vm2, %v1322_v22, %v1324_v6  ;;  %3709 = vmatpush3.bf16.msra.mxu0 %v3985_v17  ;;  %3774 = vmatprep.subr.bf16.mxu1 %v3989_v7 }
  0xa5   : > { %3572 = vmatprep.mubr.msk.bf16.mxu1 %vm1414_vm5, %v1323_v54  ;;  %3710 = vmatprep.subr.bf16.mxu0 %v3986_v45  ;;  %v4552_v0 = vsel %vm1193_vm4, %v1142_v49, %v1075_v56  ;;  %v1140_v44 = vsel %vm1126_vm3, %v4135_v34, %v937_v52 }
  0xa6   : > { %3573 = vmatmul.mubr.msk.bf16.gmra.mrb[4].mxu1 %vm1414_vm5, %v1325_v55  ;;  %v1328_v2 = vrot.slane %v4552_v0, 4 }
  0xa7   : > { %3780 = vmatpush3.bf16.msra.mxu1 %v3989_v7 }
  0xa8   : > { %v1073_v50 = vpop.permute.xlu0 %1072  ;;  %v943_v63 = vpop.permute.xlu1 %942  ;;  %3711 = vmatpush3.bf16.msra.mxu0 %v3986_v45  ;;  %3775 = vmatprep.subr.bf16.mxu1 %v3990_v1 }
  0xa9   : > { %v4560_v19 = vsel %vm1193_vm4, %v1140_v44, %v1073_v50  ;;  %v1146_v34 = vsel %vm1126_vm3, %v4164_v57, %v943_v63 }
  0xaa   : > { %v1326_v5 = vrot.slane %v4560_v19, 4  ;;  %3652 = vmatprep.mubr.msk.bf16.mxu0 %vm1414_vm5, %v4560_v19 }
  0xab   : > { %3653 = vmatmul.mubr.msk.bf16.gmra.mrb[12].mxu0 %vm1414_vm5, %v4552_v0  ;;  %3781 = vmatpush3.bf16.msra.mxu1 %v3990_v1 }
  0xac   : > { %v941_v24 = vpop.permute.xlu0 %940  ;;  %v1327_v10 = vsel %vm652_vm2, %v1324_v6, %v1326_v5  ;;  %v1079_v14 = vpop.permute.xlu1 %1078  ;;  %v1329_v15 = vsel %vm652_vm2, %v1326_v5, %v1328_v2  ;;  %3776 = vmatprep.subr.bf16.mxu1 %v4229_v47 }
  0xad   : > { %3576 = vmatprep.mubr.msk.bf16.mxu1 %vm1414_vm5, %v1327_v10  ;;  %v4576_v20 = vsel %vm1193_vm4, %v1146_v34, %v1079_v14  ;;  %v1144_v57 = vsel %vm1126_vm3, %v4154_v51, %v941_v24 }
  0xae   : > { %3577 = vmatmul.mubr.msk.bf16.gmra.mrb[8].mxu1 %vm1414_vm5, %v1329_v15  ;;  %v1332_v27 = vrot.slane %v4576_v20, 4 }
  0xaf   : > { %3782 = vmatpush3.bf16.msra.mxu1 %v4229_v47 }
  0xb0   : > { %v1077_v8 = vpop.permute.xlu0 %1076  ;;  %v947_v21 = vpop.permute.xlu1 %946  ;;  %3777 = vmatprep.subr.bf16.mxu1 %v4248_v59 }
  0xb1   : > { %v4583_v23 = vsel %vm1193_vm4, %v1144_v57, %v1077_v8  ;;  %v1150_v51 = vsel %vm1126_vm3, %v4184_v13, %v947_v21 }
  0xb2   : > { %v1330_v29 = vrot.slane %v4583_v23, 4  ;;  %3656 = vmatprep.mubr.msk.bf16.mxu0 %vm1414_vm5, %v4583_v23 }
  0xb3   : > { %3657 = vmatmul.mubr.msk.bf16.gmra.mrb[16].mxu0 %vm1414_vm5, %v4576_v20  ;;  %3783 = vmatpush3.bf16.msra.mxu1 %v4248_v59 }
  0xb4   : > { %v945_v47 = vpop.permute.xlu0 %944  ;;  %v1331_v17 = vsel %vm652_vm2, %v1328_v2, %v1330_v29  ;;  %v1083_v28 = vpop.permute.xlu1 %1082  ;;  %v1333_v31 = vsel %vm652_vm2, %v1330_v29, %v1332_v27 }
  0xb5   : > { %3580 = vmatprep.mubr.msk.bf16.mxu1 %vm1414_vm5, %v1331_v17  ;;  %v4599_v33 = vsel %vm1193_vm4, %v1150_v51, %v1083_v28  ;;  %v1148_v35 = vsel %vm1126_vm3, %v4174_v4, %v945_v47 }
  0xb6   : > { %3581 = vmatmul.mubr.msk.bf16.gmra.mrb[12].mxu1 %vm1414_vm5, %v1333_v31  ;;  %v1336_v45 = vrot.slane %v4599_v33, 4 }
  0xb8   : > { %v1081_v59 = vpop.permute.xlu0 %1080  ;;  %v951_v40 = vpop.permute.xlu1 %950 }
  0xb9   : > { %v4604_v13 = vsel %vm1193_vm4, %v1148_v35, %v1081_v59  ;;  %v1154_v22 = vsel %vm1126_vm3, %v4204_v32, %v951_v40 }
  0xba   : > { %v1334_v6 = vrot.slane %v4604_v13, 4  ;;  %3660 = vmatprep.mubr.msk.bf16.mxu0 %vm1414_vm5, %v4604_v13 }
  0xbb   : > { %3661 = vmatmul.mubr.msk.bf16.gmra.mrb[20].mxu0 %vm1414_vm5, %v4599_v33 }
  0xbc   : > { %v949_v49 = vpop.permute.xlu0 %948  ;;  %v1335_v4 = vsel %vm652_vm2, %v1332_v27, %v1334_v6  ;;  %v1087_v52 = vpop.permute.xlu1 %1086  ;;  %v1337_v54 = vsel %vm652_vm2, %v1334_v6, %v1336_v45 }
  0xbd   : > { %3584 = vmatprep.mubr.msk.bf16.mxu1 %vm1414_vm5, %v1335_v4  ;;  %v4619_v56 = vsel %vm1193_vm4, %v1154_v22, %v1087_v52  ;;  %v1152_v55 = vsel %vm1126_vm3, %v4194_v25, %v949_v49 }
  0xbe   : > { %3585 = vmatmul.mubr.msk.bf16.gmra.mrb[16].mxu1 %vm1414_vm5, %v1337_v54  ;;  %v1340_v50 = vrot.slane %v4619_v56, 4 }
  0xc0   : > { %v1085_v7 = vpop.permute.xlu0 %1084  ;;  %v955_v44 = vpop.permute.xlu1 %954 }
  0xc1   : > { %v4624_v32 = vsel %vm1193_vm4, %v1152_v55, %v1085_v7  ;;  %v1158_v1 = vsel %vm1126_vm3, %v4219_v46, %v955_v44 }
  0xc2   : > { %v1338_v63 = vrot.slane %v4624_v32, 4  ;;  %3664 = vmatprep.mubr.msk.bf16.mxu0 %vm1414_vm5, %v4624_v32 }
  0xc3   : > { %3665 = vmatmul.mubr.msk.bf16.gmra.mrb[24].mxu0 %vm1414_vm5, %v4619_v56 }
  0xc4   : > { %v953_v2 = vpop.permute.xlu0 %952  ;;  %v1339_v25 = vsel %vm652_vm2, %v1336_v45, %v1338_v63  ;;  %v1091_v5 = vpop.permute.xlu1 %1090  ;;  %v1341_v34 = vsel %vm652_vm2, %v1338_v63, %v1340_v50 }
  0xc5   : > { %3588 = vmatprep.mubr.msk.bf16.mxu1 %vm1414_vm5, %v1339_v25  ;;  %v4639_v24 = vsel %vm1193_vm4, %v1158_v1, %v1091_v5  ;;  %v1156_v10 = vsel %vm1126_vm3, %v4215_v43, %v953_v2 }
  0xc6   : > { %3589 = vmatmul.mubr.msk.bf16.gmra.mrb[20].mxu1 %vm1414_vm5, %v1341_v34  ;;  %v1344_v57 = vrot.slane %v4639_v24, 4 }
  0xc8   : > { %v1089_v14 = vpop.permute.xlu0 %1088  ;;  %v959_v15 = vpop.permute.xlu1 %958 }
  0xc9   : > { %v4644_v46 = vsel %vm1193_vm4, %v1156_v10, %v1089_v14  ;;  %v1162_v21 = vsel %vm1126_vm3, %v4275_v12, %v959_v15 }
  0xca   : > { %v1342_v8 = vrot.slane %v4644_v46, 4  ;;  %3668 = vmatprep.mubr.msk.bf16.mxu0 %vm1414_vm5, %v4644_v46 }
  0xcb   : > { %3669 = vmatmul.mubr.msk.bf16.gmra.mrb[28].mxu0 %vm1414_vm5, %v4639_v24 }
  0xcc   : > { %3712 = vmatprep.mubr.msk.bf16.mxu0 %vm1414_vm5, %v4496_v53  ;;  %v957_v43 = vpop.permute.xlu0 %956  ;;  %v1343_v27 = vsel %vm652_vm2, %v1340_v50, %v1342_v8  ;;  %v1095_v29 = vpop.permute.xlu1 %1094  ;;  %v1345_v51 = vsel %vm652_vm2, %v1342_v8, %v1344_v57 }
  0xcd   : > { %3592 = vmatprep.mubr.msk.bf16.mxu1 %vm1414_vm5, %v1343_v27  ;;  %v4661_v47 = vsel %vm1193_vm4, %v1162_v21, %v1095_v29  ;;  %v1160_v17 = vsel %vm1126_vm3, %v4251_v60, %v957_v43 }
  0xce   : > { %3593 = vmatmul.mubr.msk.bf16.gmra.mrb[24].mxu1 %vm1414_vm5, %v1345_v51  ;;  %v1348_v31 = vrot.slane %v4661_v47, 4 }
  0xd0   : > { %v1093_v12 = vpop.permute.xlu0 %1092  ;;  %v963_v28 = vpop.permute.xlu1 %962 }
  0xd1   : > { %v4666_v53 = vsel %vm1193_vm4, %v1160_v17, %v1093_v12  ;;  %v1166_v59 = vsel %vm1126_vm3, %v4314_v42, %v963_v28 }
  0xd2   : > { %v1346_v35 = vrot.slane %v4666_v53, 4 }
  0xd3   : > { %3713 = vmatmul.mubr.msk.bf16.vlgmr.msra.gmra.mrb[0].mxu0 %vm1414_vm5, %v4531_v41 }
  0xd4   : > { %3716 = vmatprep.mubr.msk.bf16.mxu0 %vm1414_vm5, %v4520_v16  ;;  %v961_v40 = vpop.permute.xlu0 %960  ;;  %v1347_v60 = vsel %vm652_vm2, %v1344_v57, %v1346_v35  ;;  %v1099_v45 = vpop.permute.xlu1 %1098  ;;  %v1349_v6 = vsel %vm652_vm2, %v1346_v35, %v1348_v31 }
  0xd5   : > { %3596 = vmatprep.mubr.msk.bf16.mxu1 %vm1414_vm5, %v1347_v60  ;;  %v4681_v22 = vsel %vm1193_vm4, %v1166_v59, %v1099_v45  ;;  %v1164_v41 = vsel %vm1126_vm3, %v4293_v26, %v961_v40 }
  0xd6   : > { %3597 = vmatmul.mubr.msk.bf16.gmra.mrb[28].mxu1 %vm1414_vm5, %v1349_v6  ;;  %v1352_v4 = vrot.slane %v4681_v22, 4 }
  0xd8   : > { %v1097_v42 = vpop.permute.xlu0 %1096  ;;  %v967_v49 = vpop.permute.xlu1 %966 }
  0xd9   : > { %v4686_v16 = vsel %vm1193_vm4, %v1164_v41, %v1097_v42  ;;  %v1170_v54 = vsel %vm1126_vm3, %v4340_v11, %v967_v49 }
  0xda   : > { %v1350_v52 = vrot.slane %v4686_v16, 4 }
  0xdb   : > { %3717 = vmatmul.mubr.msk.bf16.gmra.mrb[4].mxu0 %vm1414_vm5, %v4560_v19 }
  0xdc   : > { %3720 = vmatprep.mubr.msk.bf16.mxu0 %vm1414_vm5, %v4552_v0  ;;  %v965_v55 = vpop.permute.xlu0 %964  ;;  %v1351_v26 = vsel %vm652_vm2, %v1348_v31, %v1350_v52  ;;  %v1103_v7 = vpop.permute.xlu1 %1102  ;;  %v1353_v44 = vsel %vm652_vm2, %v1350_v52, %v1352_v4 }
  0xdd   : > { %3600 = vmatprep.mubr.msk.bf16.mxu1 %vm1414_vm5, %v1351_v26  ;;  %v4701_v50 = vsel %vm1193_vm4, %v1170_v54, %v1103_v7  ;;  %v1168_v19 = vsel %vm1126_vm3, %v4328_v58, %v965_v55 }
  0xde   : > { %3601 = vmatmul.mubr.msk.bf16.gmra.mrb[32].mxu1 %vm1414_vm5, %v1353_v44  ;;  %v1356_v1 = vrot.slane %v4701_v50, 4 }
  0xe0   : > { %v1101_v11 = vpop.permute.xlu0 %1100  ;;  %v971_v63 = vpop.permute.xlu1 %970 }
  0xe1   : > { %v4706_v0 = vsel %vm1193_vm4, %v1168_v19, %v1101_v11  ;;  %v1174_v25 = vsel %vm1126_vm3, %v4360_v36, %v971_v63 }
  0xe2   : > { %v1354_v2 = vrot.slane %v4706_v0, 4 }
  0xe3   : > { %3721 = vmatmul.mubr.msk.bf16.gmra.mrb[8].mxu0 %vm1414_vm5, %v4583_v23 }
  0xe4   : > { %3724 = vmatprep.mubr.msk.bf16.mxu0 %vm1414_vm5, %v4576_v20  ;;  %v969_v5 = vpop.permute.xlu0 %968  ;;  %v1355_v58 = vsel %vm652_vm2, %v1352_v4, %v1354_v2  ;;  %v1107_v34 = vpop.permute.xlu1 %1106  ;;  %v1357_v10 = vsel %vm652_vm2, %v1354_v2, %v1356_v1 }
  0xe5   : > { %3604 = vmatprep.mubr.msk.bf16.mxu1 %vm1414_vm5, %v1355_v58  ;;  %v4721_v14 = vsel %vm1193_vm4, %v1174_v25, %v1107_v34  ;;  %v1172_v23 = vsel %vm1126_vm3, %v4348_v18, %v969_v5 }
  0xe6   : > { %3605 = vmatmul.mubr.msk.bf16.gmra.mrb[36].mxu1 %vm1414_vm5, %v1357_v10  ;;  %v1360_v57 = vrot.slane %v4721_v14, 4 }
  0xe8   : > { %v1105_v36 = vpop.permute.xlu0 %1104  ;;  %v975_v15 = vpop.permute.xlu1 %974 }
  0xe9   : > { %v4726_v20 = vsel %vm1193_vm4, %v1172_v23, %v1105_v36  ;;  %v1178_v21 = vsel %vm1126_vm3, %v4380_v62, %v975_v15 }
  0xea   : > { %v1358_v8 = vrot.slane %v4726_v20, 4 }
  0xeb   : > { %3725 = vmatmul.mubr.msk.bf16.gmra.mrb[12].mxu0 %vm1414_vm5, %v4604_v13 }
  0xec   : > { %3728 = vmatprep.mubr.msk.bf16.mxu0 %vm1414_vm5, %v4599_v33  ;;  %v973_v43 = vpop.permute.xlu0 %972  ;;  %v1359_v18 = vsel %vm652_vm2, %v1356_v1, %v1358_v8  ;;  %v1111_v27 = vpop.permute.xlu1 %1110  ;;  %v1361_v29 = vsel %vm652_vm2, %v1358_v8, %v1360_v57 }
  0xed   : > { %3608 = vmatprep.mubr.msk.bf16.mxu1 %vm1414_vm5, %v1359_v18  ;;  %v4741_v51 = vsel %vm1193_vm4, %v1178_v21, %v1111_v27  ;;  %v1176_v13 = vsel %vm1126_vm3, %v4368_v48, %v973_v43 }
  0xee   : > { %3609 = vmatmul.mubr.msk.bf16.gmra.mrb[40].mxu1 %vm1414_vm5, %v1361_v29  ;;  %v1364_v12 = vrot.slane %v4741_v51, 4 }
  0xf0   : > { %v1109_v62 = vpop.permute.xlu0 %1108  ;;  %v979_v17 = vpop.permute.xlu1 %978 }
  0xf1   : > { %v4746_v33 = vsel %vm1193_vm4, %v1176_v13, %v1109_v62  ;;  %v1182_v31 = vsel %vm1126_vm3, %v4400_v30, %v979_v17 }
  0xf2   : > { %v1362_v28 = vrot.slane %v4746_v33, 4 }
  0xf3   : > { %3729 = vmatmul.mubr.msk.bf16.gmra.mrb[16].mxu0 %vm1414_vm5, %v4624_v32 }
  0xf4   : > { %3732 = vmatprep.mubr.msk.bf16.mxu0 %vm1414_vm5, %v4619_v56  ;;  %v977_v35 = vpop.permute.xlu0 %976  ;;  %v1363_v48 = vsel %vm652_vm2, %v1360_v57, %v1362_v28  ;;  %v1115_v59 = vpop.permute.xlu1 %1114  ;;  %v1365_v40 = vsel %vm652_vm2, %v1362_v28, %v1364_v12 }
  0xf5   : > { %3612 = vmatprep.mubr.msk.bf16.mxu1 %vm1414_vm5, %v1363_v48  ;;  %v4761_v60 = vsel %vm1193_vm4, %v1182_v31, %v1115_v59  ;;  %v1180_v32 = vsel %vm1126_vm3, %v4388_v9, %v977_v35 }
  0xf6   : > { %3613 = vmatmul.mubr.msk.bf16.gmra.mrb[44].mxu1 %vm1414_vm5, %v1365_v40  ;;  %v1368_v6 = vrot.slane %v4761_v60, 4 }
  0xf8   : > { %v1113_v30 = vpop.permute.xlu0 %1112  ;;  %v983_v45 = vpop.permute.xlu1 %982 }
  0xf9   : > { %v1247_v56 = vsel %vm1193_vm4, %v1180_v32, %v1113_v30  ;;  %v1186_v42 = vsel %vm1126_vm3, %v4420_v61, %v983_v45  ;;  %v4896_v32 = vld [vmem:[%s5130_s4] ss:$0 sm:$0xff] }
  0xfa   : > { %v1366_v41 = vrot.slane %v1247_v56, 4 }
  0xfb   : > { %3733 = vmatmul.mubr.msk.bf16.gmra.mrb[20].mxu0 %vm1414_vm5, %v4644_v46 }
  0xfc   : > { %3736 = vmatprep.mubr.msk.bf16.mxu0 %vm1414_vm5, %v4639_v24  ;;  %v981_v49 = vpop.permute.xlu0 %980  ;;  %v1367_v4 = vsel %vm652_vm2, %v1364_v12, %v1366_v41  ;;  %v1119_v9 = vpop.permute.xlu1 %1118  ;;  %v1369_v52 = vsel %vm652_vm2, %v1366_v41, %v1368_v6 }
  0xfd   : > { %3616 = vmatprep.mubr.msk.bf16.mxu1 %vm1414_vm5, %v1367_v4  ;;  %v1253_v54 = vsel %vm1193_vm4, %v1186_v42, %v1119_v9  ;;  %v1184_v46 = vsel %vm1126_vm3, %v4408_v39, %v981_v49 }
  0xfe   : > { %3617 = vmatmul.mubr.msk.bf16.gmra.mrb[48].mxu1 %vm1414_vm5, %v1369_v52  ;;  %v1372_v24 = vrot.slane %v1253_v54, 4 }
 0x100   : > { %v1117_v55 = vpop.permute.xlu0 %1116  ;;  %v987_v61 = vpop.permute.xlu1 %986 }
 0x101   : > { %v1251_v26 = vsel %vm1193_vm4, %v1184_v46, %v1117_v55  ;;  %v1190_v44 = vsel %vm1126_vm3, %v4306_v37, %v987_v61 }
 0x102   : > { %v1370_v7 = vrot.slane %v1251_v26, 4 }
 0x103   : > { %3737 = vmatmul.mubr.msk.bf16.gmra.mrb[24].mxu0 %vm1414_vm5, %v4666_v53 }
 0x104   : > { %3740 = vmatprep.mubr.msk.bf16.mxu0 %vm1414_vm5, %v4661_v47  ;;  %v985_v19 = vpop.permute.xlu0 %984  ;;  %v1371_v11 = vsel %vm652_vm2, %v1368_v6, %v1370_v7  ;;  %v1123_v63 = vpop.permute.xlu1 %1122  ;;  %v1373_v39 = vsel %vm652_vm2, %v1370_v7, %v1372_v24 }
 0x105   : > { %3620 = vmatprep.mubr.msk.bf16.mxu1 %vm1414_vm5, %v1371_v11  ;;  %v1257_v1 = vsel %vm1193_vm4, %v1190_v44, %v1123_v63  ;;  %v1188_v2 = vsel %vm1126_vm3, %v4428_v3, %v985_v19 }
 0x106   : > { %3621 = vmatmul.mubr.msk.bf16.gmra.mrb[52].mxu1 %vm1414_vm5, %v1373_v39  ;;  %v1376_v5 = vrot.slane %v1257_v1, 4 }
 0x108   : > { %v1121_v25 = vpop.permute.xlu0 %1120 }
 0x109   : > { %v1255_v37 = vsel %vm1193_vm4, %v1188_v2, %v1121_v25 }
 0x10a   : > { %v1374_v58 = vrot.slane %v1255_v37, 4 }
 0x10b   : > { %3741 = vmatmul.mubr.msk.bf16.gmra.mrb[28].mxu0 %vm1414_vm5, %v4686_v16 }
 0x10c   : > { %3744 = vmatprep.mubr.msk.bf16.mxu0 %vm1414_vm5, %v4681_v22  ;;  %v1375_v34 = vsel %vm652_vm2, %v1372_v24, %v1374_v58  ;;  %v1377_v10 = vsel %vm652_vm2, %v1374_v58, %v1376_v5  ;;  %v989_v3 = vpop.permute.xlu0 %988 }
 0x10d   : > { %3624 = vmatprep.mubr.msk.bf16.mxu1 %vm1414_vm5, %v1375_v34 }
 0x10e   : > { %3625 = vmatmul.mubr.msk.bf16.gmra.mrb[56].mxu1 %vm1414_vm5, %v1377_v10 }
 0x10f   : > { %3672 = vmatprep.mubr.msk.bf16.mxu1 %vm1414_vm5, %v4666_v53  ;;  %v1125_v53 = vpop.permute.xlu1 %1124 }
 0x113   : > { %3745 = vmatmul.mubr.msk.bf16.gmra.mrb[32].mxu0 %vm1414_vm5, %v4706_v0 }
 0x114   : > { %3748 = vmatprep.mubr.msk.bf16.mxu0 %vm1414_vm5, %v4701_v50 }
 0x116   : > { %3673 = vmatmul.mubr.msk.bf16.vlgmr.msra.gmra.mrb[32].mxu1 %vm1414_vm5, %v4661_v47  ;;  %v1192_v47 = vsel %vm1126_vm3, %v4445_v38, %v989_v3 }
 0x117   : > { %3676 = vmatprep.mubr.msk.bf16.mxu1 %vm1414_vm5, %v4686_v16 }
 0x11b   : > { %3749 = vmatmul.mubr.msk.bf16.gmra.mrb[36].mxu0 %vm1414_vm5, %v4726_v20 }
 0x11c   : > { %3752 = vmatprep.mubr.msk.bf16.mxu0 %vm1414_vm5, %v4721_v14 }
 0x11e   : > { %3677 = vmatmul.mubr.msk.bf16.gmra.mrb[36].mxu1 %vm1414_vm5, %v4681_v22  ;;  %v1259_v22 = vsel %vm1193_vm4, %v1192_v47, %v1125_v53 }
 0x11f   : > { %3680 = vmatprep.mubr.msk.bf16.mxu1 %vm1414_vm5, %v4706_v0 }
 0x123   : > { %3753 = vmatmul.mubr.msk.bf16.gmra.mrb[40].mxu0 %vm1414_vm5, %v4746_v33 }
 0x124   : > { %3756 = vmatprep.mubr.msk.bf16.mxu0 %vm1414_vm5, %v4741_v51 }
 0x126   : > { %3681 = vmatmul.mubr.msk.bf16.gmra.mrb[40].mxu1 %vm1414_vm5, %v4701_v50 }
 0x127   : > { %3684 = vmatprep.mubr.msk.bf16.mxu1 %vm1414_vm5, %v4726_v20 }
 0x12b   : > { %3757 = vmatmul.mubr.msk.bf16.gmra.mrb[44].mxu0 %vm1414_vm5, %v1247_v56 }
 0x12c   : > { %3760 = vmatprep.mubr.msk.bf16.mxu0 %vm1414_vm5, %v4761_v60 }
 0x12e   : > { %3685 = vmatmul.mubr.msk.bf16.gmra.mrb[44].mxu1 %vm1414_vm5, %v4721_v14 }
 0x12f   : > { %3688 = vmatprep.mubr.msk.bf16.mxu1 %vm1414_vm5, %v4746_v33 }
 0x133   : > { %3761 = vmatmul.mubr.msk.bf16.gmra.mrb[48].mxu0 %vm1414_vm5, %v1251_v26 }
 0x134   : > { %3764 = vmatprep.mubr.msk.bf16.mxu0 %vm1414_vm5, %v1253_v54 }
 0x136   : > { %3689 = vmatmul.mubr.msk.bf16.gmra.mrb[48].mxu1 %vm1414_vm5, %v4741_v51 }
 0x137   : > { %3692 = vmatprep.mubr.msk.bf16.mxu1 %vm1414_vm5, %v1247_v56 }
 0x13b   : > { %3765 = vmatmul.mubr.msk.bf16.gmra.mrb[52].mxu0 %vm1414_vm5, %v1255_v37 }
 0x13c   : > { %3768 = vmatprep.mubr.msk.bf16.mxu0 %vm1414_vm5, %v1257_v1 }
 0x13e   : > { %3693 = vmatmul.mubr.msk.bf16.gmra.mrb[52].mxu1 %vm1414_vm5, %v4761_v60 }
 0x13f   : > { %3696 = vmatprep.mubr.msk.bf16.mxu1 %vm1414_vm5, %v1251_v26 }
 0x143   : > { %3769 = vmatmul.mubr.msk.bf16.gmra.mrb[56].mxu0 %vm1414_vm5, %v1259_v22 }
 0x146   : > { %3697 = vmatmul.mubr.msk.bf16.gmra.mrb[56].mxu1 %vm1414_vm5, %v1253_v54 }
 0x171   : > { %v3570_v16 = vpop.f32.mrb[0].mxu1 }
 0x172   : > { %v1539_v50 = vpop.f32.mrb[1].mxu1 }
 0x173   : > { %v3571_v0 = vpop.f32.mrb[2].mxu1 }
 0x174   : > { %v1542_v14 = vpop.f32.mrb[3].mxu1 }
 0x179   : > { %v3574_v23 = vpop.f32.mrb[4].mxu1 }
 0x17a   : > { %v1555_v36 = vpop.f32.mrb[5].mxu1 }
 0x17b   : > { %v3575_v15 = vpop.f32.mrb[6].mxu1 }
 0x17c   : > { %v4851_v38 = vpop.f32.mrb[7].mxu1 }
 0x181   : > { %v4853_v20 = vpop.f32.mrb[8].mxu1 }
 0x182   : > { %v4855_v57 = vpop.f32.mrb[9].mxu1 }
 0x183   : > { %v4857_v8 = vpop.f32.mrb[10].mxu1 }
 0x184   : > { %v4859_v21 = vpop.f32.mrb[11].mxu1 }
 0x189   : > { %v4861_v43 = vpop.f32.mrb[12].mxu1 }
 0x18a   : > { %v4863_v18 = vpop.f32.mrb[13].mxu1 }
 0x18b   : > { %v4865_v27 = vpop.f32.mrb[14].mxu1 }
 0x18c   : > { %v4867_v29 = vpop.f32.mrb[15].mxu1 }
 0x191   : > { %v4869_v51 = vpop.f32.mrb[16].mxu1 }
 0x192   : > { %v4871_v13 = vpop.f32.mrb[17].mxu1 }
 0x193   : > { %v4873_v62 = vpop.f32.mrb[18].mxu1 }
 0x194   : > { %v4875_v17 = vpop.f32.mrb[19].mxu1 }
 0x199   : > { %v4877_v33 = vpop.f32.mrb[20].mxu1 }
 0x19a   : > { %v4879_v12 = vpop.f32.mrb[21].mxu1 }
 0x19b   : > { %v4881_v28 = vpop.f32.mrb[22].mxu1 }
 0x19c   : > { %v4883_v31 = vpop.f32.mrb[23].mxu1 }
 0x1a1   : > { %v4885_v35 = vpop.f32.mrb[24].mxu1 }
 0x1a2   : > { %v4887_v48 = vpop.f32.mrb[25].mxu1 }
 0x1a3   : > { %v4889_v59 = vpop.f32.mrb[26].mxu1 }
 0x1a4   : > { %v4891_v40 = vpop.f32.mrb[27].mxu1 }
 0x1a6   : > { %v3714_v60 = vpop.f32.mrb[0].mxu0 }
 0x1a7   : > { %v3784_v30 = vadd.f32 %v3714_v60, %v3570_v16  ;;  %v2236_v45 = vpop.f32.mrb[1].mxu0 }
 0x1a8   : > { %v3785_v56 = vadd.f32 %v2236_v45, %v1539_v50  ;;  %v3715_v6 = vpop.f32.mrb[2].mxu0 }
 0x1a9   : > { %v2544_v41 = vadd.f32 %v3784_v30, %v4896_v32  ;;  %v3786_v42 = vadd.f32 %v3715_v6, %v3571_v0  ;;  %v4899_v49 = vpop.f32.mrb[28].mxu1  ;;  %v2239_v4 = vpop.f32.mrb[3].mxu0 }
 0x1aa   : > { %v2542_v9 = vadd.f32 %v3785_v56, %v4896_v32  ;;  %v3787_v52 = vadd.f32 %v2239_v4, %v1542_v14  ;;  %v4903_v54 = vpop.f32.mrb[29].mxu1 }
 0x1ab   : > { %v2604_v46 = vmul.f32 0.1, %v2544_v41  ;;  %v2545_v55 = vadd.f32 %v3786_v42, %v4896_v32  ;;  %v4906_v61 = vpop.f32.mrb[30].mxu1 }
 0x1ac   : > { %v2602_v26 = vmul.f32 0.1, %v2542_v9  ;;  %v2543_v24 = vadd.f32 %v3787_v52, %v4896_v32  ;;  %v4909_v7 = vpop.f32.mrb[31].mxu1 }
 0x1ad   : > { %v2664_v44 = vmax.f32 %v2544_v41, %v2604_v46  ;;  %v2605_v19 = vmul.f32 0.1, %v2545_v55 }
 0x1ae   : > { %v2662_v11 = vmax.f32 %v2542_v9, %v2602_v26  ;;  %v2603_v63 = vmul.f32 0.1, %v2543_v24  ;;  %v3718_v39 = vpop.f32.mrb[4].mxu0 }
 0x1af   : > { %v3390_v1 = vpack.c.bf16 %v2664_v44, %v2664_v44  ;;  %v2665_v2 = vmax.f32 %v2545_v55, %v2605_v19  ;;  %v3788_v25 = vadd.f32 %v3718_v39, %v3574_v23  ;;  %v2252_v37 = vpop.f32.mrb[5].mxu0 }
 0x1b0   : > { %v3388_v5 = vpack.c.bf16 %v2662_v11, %v2662_v11  ;;  %v2663_v58 = vmax.f32 %v2543_v24, %v2603_v63  ;;  %v3789_v34 = vadd.f32 %v2252_v37, %v1555_v36  ;;  %v3719_v10 = vpop.f32.mrb[6].mxu0 }
 0x1b1   : > { %2965 = vst.msk [vmem:[%s4914_s18 + $0x8] sm:$0xf] %vm2962_vm6, %v3390_v1  ;;  %v3391_v3 = vpack.c.bf16 %v2665_v2, %v2665_v2  ;;  %v2548_v47 = vadd.f32 %v3788_v25, %v4896_v32  ;;  %v3790_v53 = vadd.f32 %v3719_v10, %v3575_v15  ;;  %v2255_v22 = vpop.f32.mrb[7].mxu0 }
 0x1b2   : > { %2963 = vst.msk [vmem:[%s4914_s18] sm:$0xf] %vm2962_vm6, %v3388_v5  ;;  %v3389_v16 = vpack.c.bf16 %v2663_v58, %v2663_v58  ;;  %v2546_v50 = vadd.f32 %v3789_v34, %v4896_v32  ;;  %v3791_v0 = vadd.f32 %v2255_v22, %v4851_v38 }
 0x1b3   : > { %2966 = vst.msk [vmem:[%s4914_s18 + $0xc] sm:$0xf] %vm2962_vm6, %v3391_v3  ;;  %v2608_v14 = vmul.f32 0.1, %v2548_v47  ;;  %v2549_v23 = vadd.f32 %v3790_v53, %v4896_v32 }
 0x1b4   : > { %2964 = vst.msk [vmem:[%s4914_s18 + $0x4] sm:$0xf] %vm2962_vm6, %v3389_v16  ;;  %v2606_v36 = vmul.f32 0.1, %v2546_v50  ;;  %v2547_v60 = vadd.f32 %v3791_v0, %v4896_v32 }
 0x1b5   : > { %v2668_v15 = vmax.f32 %v2548_v47, %v2608_v14  ;;  %v2609_v30 = vmul.f32 0.1, %v2549_v23 }
 0x1b6   : > { %v2666_v45 = vmax.f32 %v2546_v50, %v2606_v36  ;;  %v2607_v56 = vmul.f32 0.1, %v2547_v60  ;;  %v3722_v6 = vpop.f32.mrb[8].mxu0 }
 0x1b7   : > { %v3394_v41 = vpack.c.bf16 %v2668_v15, %v2668_v15  ;;  %v2669_v42 = vmax.f32 %v2549_v23, %v2609_v30  ;;  %v3792_v38 = vadd.f32 %v3722_v6, %v4853_v20  ;;  %v2268_v4 = vpop.f32.mrb[9].mxu0 }
 0x1b8   : > { %v3392_v9 = vpack.c.bf16 %v2666_v45, %v2666_v45  ;;  %v2667_v52 = vmax.f32 %v2547_v60, %v2607_v56  ;;  %v3793_v46 = vadd.f32 %v2268_v4, %v4855_v57  ;;  %v3723_v55 = vpop.f32.mrb[10].mxu0 }
 0x1b9   : > { %2969 = vst.msk [vmem:[%s4914_s18 + $0x18] sm:$0xf] %vm2962_vm6, %v3394_v41  ;;  %v3395_v26 = vpack.c.bf16 %v2669_v42, %v2669_v42  ;;  %v2552_v24 = vadd.f32 %v3792_v38, %v4896_v32  ;;  %v3794_v44 = vadd.f32 %v3723_v55, %v4857_v8  ;;  %v2271_v19 = vpop.f32.mrb[11].mxu0 }
 0x1ba   : > { %2967 = vst.msk [vmem:[%s4914_s18 + $0x10] sm:$0xf] %vm2962_vm6, %v3392_v9  ;;  %v3393_v11 = vpack.c.bf16 %v2667_v52, %v2667_v52  ;;  %v2550_v20 = vadd.f32 %v3793_v46, %v4896_v32  ;;  %v3795_v63 = vadd.f32 %v2271_v19, %v4859_v21 }
 0x1bb   : > { %2970 = vst.msk [vmem:[%s4914_s18 + $0x1c] sm:$0xf] %vm2962_vm6, %v3395_v26  ;;  %v2612_v39 = vmul.f32 0.1, %v2552_v24  ;;  %v2553_v57 = vadd.f32 %v3794_v44, %v4896_v32 }
 0x1bc   : > { %2968 = vst.msk [vmem:[%s4914_s18 + $0x14] sm:$0xf] %vm2962_vm6, %v3393_v11  ;;  %v2610_v1 = vmul.f32 0.1, %v2550_v20  ;;  %v2551_v2 = vadd.f32 %v3795_v63, %v4896_v32 }
 0x1bd   : > { %v2672_v8 = vmax.f32 %v2552_v24, %v2612_v39  ;;  %v2613_v25 = vmul.f32 0.1, %v2553_v57 }
 0x1be   : > { %v2670_v37 = vmax.f32 %v2550_v20, %v2610_v1  ;;  %v2611_v5 = vmul.f32 0.1, %v2551_v2  ;;  %v3726_v58 = vpop.f32.mrb[12].mxu0 }
 0x1bf   : > { %v3398_v34 = vpack.c.bf16 %v2672_v8, %v2672_v8  ;;  %v2673_v10 = vmax.f32 %v2553_v57, %v2613_v25  ;;  %v3796_v21 = vadd.f32 %v3726_v58, %v4861_v43  ;;  %v2284_v3 = vpop.f32.mrb[13].mxu0 }
 0x1c0   : > { %v3396_v47 = vpack.c.bf16 %v2670_v37, %v2670_v37  ;;  %v2671_v53 = vmax.f32 %v2551_v2, %v2611_v5  ;;  %v3797_v22 = vadd.f32 %v2284_v3, %v4863_v18  ;;  %v3727_v16 = vpop.f32.mrb[14].mxu0 }
 0x1c1   : > { %2973 = vst.msk [vmem:[%s4914_s18 + $0x28] sm:$0xf] %vm2962_vm6, %v3398_v34  ;;  %v3399_v50 = vpack.c.bf16 %v2673_v10, %v2673_v10  ;;  %v2556_v0 = vadd.f32 %v3796_v21, %v4896_v32  ;;  %v3798_v14 = vadd.f32 %v3727_v16, %v4865_v27  ;;  %v2287_v23 = vpop.f32.mrb[15].mxu0 }
 0x1c2   : > { %2971 = vst.msk [vmem:[%s4914_s18 + $0x20] sm:$0xf] %vm2962_vm6, %v3396_v47  ;;  %v3397_v36 = vpack.c.bf16 %v2671_v53, %v2671_v53  ;;  %v2554_v43 = vadd.f32 %v3797_v22, %v4896_v32  ;;  %v3799_v60 = vadd.f32 %v2287_v23, %v4867_v29 }
 0x1c3   : > { %2974 = vst.msk [vmem:[%s4914_s18 + $0x2c] sm:$0xf] %vm2962_vm6, %v3399_v50  ;;  %v2616_v15 = vmul.f32 0.1, %v2556_v0  ;;  %v2557_v18 = vadd.f32 %v3798_v14, %v4896_v32 }
 0x1c4   : > { %2972 = vst.msk [vmem:[%s4914_s18 + $0x24] sm:$0xf] %vm2962_vm6, %v3397_v36  ;;  %v2614_v30 = vmul.f32 0.1, %v2554_v43  ;;  %v2555_v45 = vadd.f32 %v3799_v60, %v4896_v32 }
 0x1c5   : > { %v2676_v27 = vmax.f32 %v2556_v0, %v2616_v15  ;;  %v2617_v56 = vmul.f32 0.1, %v2557_v18 }
 0x1c6   : > { %v2674_v6 = vmax.f32 %v2554_v43, %v2614_v30  ;;  %v2615_v41 = vmul.f32 0.1, %v2555_v45  ;;  %v3730_v42 = vpop.f32.mrb[16].mxu0 }
 0x1c7   : > { %v3402_v38 = vpack.c.bf16 %v2676_v27, %v2676_v27  ;;  %v2677_v4 = vmax.f32 %v2557_v18, %v2617_v56  ;;  %v3800_v29 = vadd.f32 %v3730_v42, %v4869_v51  ;;  %v2300_v9 = vpop.f32.mrb[17].mxu0 }
 0x1c8   : > { %v3400_v52 = vpack.c.bf16 %v2674_v6, %v2674_v6  ;;  %v2675_v46 = vmax.f32 %v2555_v45, %v2615_v41  ;;  %v3801_v55 = vadd.f32 %v2300_v9, %v4871_v13  ;;  %v3731_v26 = vpop.f32.mrb[18].mxu0 }
 0x1c9   : > { %2977 = vst.msk [vmem:[%s4914_s18 + $0x38] sm:$0xf] %vm2962_vm6, %v3402_v38  ;;  %v3403_v24 = vpack.c.bf16 %v2677_v4, %v2677_v4  ;;  %v2560_v44 = vadd.f32 %v3800_v29, %v4896_v32  ;;  %v3802_v19 = vadd.f32 %v3731_v26, %v4873_v62  ;;  %v2303_v11 = vpop.f32.mrb[19].mxu0 }
 0x1ca   : > { %2975 = vst.msk [vmem:[%s4914_s18 + $0x30] sm:$0xf] %vm2962_vm6, %v3400_v52  ;;  %v3401_v20 = vpack.c.bf16 %v2675_v46, %v2675_v46  ;;  %v2558_v51 = vadd.f32 %v3801_v55, %v4896_v32  ;;  %v3803_v63 = vadd.f32 %v2303_v11, %v4875_v17 }
 0x1cb   : > { %2978 = vst.msk [vmem:[%s4914_s18 + $0x3c] sm:$0xf] %vm2962_vm6, %v3403_v24  ;;  %v2620_v39 = vmul.f32 0.1, %v2560_v44  ;;  %v2561_v13 = vadd.f32 %v3802_v19, %v4896_v32 }
 0x1cc   : > { %2976 = vst.msk [vmem:[%s4914_s18 + $0x34] sm:$0xf] %vm2962_vm6, %v3401_v20  ;;  %v2618_v57 = vmul.f32 0.1, %v2558_v51  ;;  %v2559_v1 = vadd.f32 %v3803_v63, %v4896_v32 }
 0x1cd   : > { %v2680_v62 = vmax.f32 %v2560_v44, %v2620_v39  ;;  %v2621_v2 = vmul.f32 0.1, %v2561_v13 }
 0x1ce   : > { %v2678_v8 = vmax.f32 %v2558_v51, %v2618_v57  ;;  %v2619_v25 = vmul.f32 0.1, %v2559_v1  ;;  %v3734_v37 = vpop.f32.mrb[20].mxu0 }
 0x1cf   : > { %v3406_v5 = vpack.c.bf16 %v2680_v62, %v2680_v62  ;;  %v2681_v58 = vmax.f32 %v2561_v13, %v2621_v2  ;;  %v3804_v17 = vadd.f32 %v3734_v37, %v4877_v33  ;;  %v2316_v34 = vpop.f32.mrb[21].mxu0 }
 0x1d0   : > { %v3404_v10 = vpack.c.bf16 %v2678_v8, %v2678_v8  ;;  %v2679_v21 = vmax.f32 %v2559_v1, %v2619_v25  ;;  %v3805_v3 = vadd.f32 %v2316_v34, %v4879_v12  ;;  %v3735_v47 = vpop.f32.mrb[22].mxu0 }
 0x1d1   : > { %2981 = vst.msk [vmem:[%s4914_s18 + $0x48] sm:$0xf] %vm2962_vm6, %v3406_v5  ;;  %v3407_v53 = vpack.c.bf16 %v2681_v58, %v2681_v58  ;;  %v2564_v22 = vadd.f32 %v3804_v17, %v4896_v32  ;;  %v3806_v16 = vadd.f32 %v3735_v47, %v4881_v28  ;;  %v2319_v50 = vpop.f32.mrb[23].mxu0 }
 0x1d2   : > { %2979 = vst.msk [vmem:[%s4914_s18 + $0x40] sm:$0xf] %vm2962_vm6, %v3404_v10  ;;  %v3405_v0 = vpack.c.bf16 %v2679_v21, %v2679_v21  ;;  %v2562_v33 = vadd.f32 %v3805_v3, %v4896_v32  ;;  %v3807_v14 = vadd.f32 %v2319_v50, %v4883_v31 }
 0x1d3   : > { %2982 = vst.msk [vmem:[%s4914_s18 + $0x4c] sm:$0xf] %vm2962_vm6, %v3407_v53  ;;  %v2624_v23 = vmul.f32 0.1, %v2564_v22  ;;  %v2565_v12 = vadd.f32 %v3806_v16, %v4896_v32 }
 0x1d4   : > { %2980 = vst.msk [vmem:[%s4914_s18 + $0x44] sm:$0xf] %vm2962_vm6, %v3405_v0  ;;  %v2622_v36 = vmul.f32 0.1, %v2562_v33  ;;  %v2563_v43 = vadd.f32 %v3807_v14, %v4896_v32 }
 0x1d5   : > { %v2684_v28 = vmax.f32 %v2564_v22, %v2624_v23  ;;  %v2625_v60 = vmul.f32 0.1, %v2565_v12 }
 0x1d6   : > { %v2682_v15 = vmax.f32 %v2562_v33, %v2622_v36  ;;  %v2623_v18 = vmul.f32 0.1, %v2563_v43  ;;  %v3738_v30 = vpop.f32.mrb[24].mxu0 }
 0x1d7   : > { %v3410_v45 = vpack.c.bf16 %v2684_v28, %v2684_v28  ;;  %v2685_v27 = vmax.f32 %v2565_v12, %v2625_v60  ;;  %v3808_v31 = vadd.f32 %v3738_v30, %v4885_v35  ;;  %v2332_v56 = vpop.f32.mrb[25].mxu0 }
 0x1d8   : > { %v3408_v6 = vpack.c.bf16 %v2682_v15, %v2682_v15  ;;  %v2683_v41 = vmax.f32 %v2563_v43, %v2623_v18  ;;  %v3809_v42 = vadd.f32 %v2332_v56, %v4887_v48  ;;  %v3739_v38 = vpop.f32.mrb[26].mxu0 }
 0x1d9   : > { %2985 = vst.msk [vmem:[%s4914_s18 + $0x58] sm:$0xf] %vm2962_vm6, %v3410_v45  ;;  %v3411_v4 = vpack.c.bf16 %v2685_v27, %v2685_v27  ;;  %v2568_v29 = vadd.f32 %v3808_v31, %v4896_v32  ;;  %v3810_v9 = vadd.f32 %v3739_v38, %v4889_v59  ;;  %v2335_v52 = vpop.f32.mrb[27].mxu0 }
 0x1da   : > { %2983 = vst.msk [vmem:[%s4914_s18 + $0x50] sm:$0xf] %vm2962_vm6, %v3408_v6  ;;  %v3409_v46 = vpack.c.bf16 %v2683_v41, %v2683_v41  ;;  %v2566_v35 = vadd.f32 %v3809_v42, %v4896_v32  ;;  %v3811_v55 = vadd.f32 %v2335_v52, %v4891_v40 }
 0x1db   : > { %2986 = vst.msk [vmem:[%s4914_s18 + $0x5c] sm:$0xf] %vm2962_vm6, %v3411_v4  ;;  %v2628_v26 = vmul.f32 0.1, %v2568_v29  ;;  %v2569_v48 = vadd.f32 %v3810_v9, %v4896_v32 }
 0x1dc   : > { %2984 = vst.msk [vmem:[%s4914_s18 + $0x54] sm:$0xf] %vm2962_vm6, %v3409_v46  ;;  %v2626_v24 = vmul.f32 0.1, %v2566_v35  ;;  %v2567_v44 = vadd.f32 %v3811_v55, %v4896_v32 }
 0x1dd   : > { %v2688_v59 = vmax.f32 %v2568_v29, %v2628_v26  ;;  %v2629_v19 = vmul.f32 0.1, %v2569_v48 }
 0x1de   : > { %v2686_v11 = vmax.f32 %v2566_v35, %v2626_v24  ;;  %v2627_v20 = vmul.f32 0.1, %v2567_v44  ;;  %v3742_v51 = vpop.f32.mrb[28].mxu0 }
 0x1df   : > { %v3414_v63 = vpack.c.bf16 %v2688_v59, %v2688_v59  ;;  %v2689_v39 = vmax.f32 %v2569_v48, %v2629_v19  ;;  %v3812_v40 = vadd.f32 %v3742_v51, %v4899_v49  ;;  %v2348_v13 = vpop.f32.mrb[29].mxu0 }
 0x1e0   : > { %v3412_v57 = vpack.c.bf16 %v2686_v11, %v2686_v11  ;;  %v2687_v1 = vmax.f32 %v2567_v44, %v2627_v20  ;;  %v3813_v62 = vadd.f32 %v2348_v13, %v4903_v54  ;;  %v3743_v2 = vpop.f32.mrb[30].mxu0 }
 0x1e1   : > { %2989 = vst.msk [vmem:[%s4914_s18 + $0x68] sm:$0xf] %vm2962_vm6, %v3414_v63  ;;  %v3415_v8 = vpack.c.bf16 %v2689_v39, %v2689_v39  ;;  %v2572_v25 = vadd.f32 %v3812_v40, %v4896_v32  ;;  %v3814_v37 = vadd.f32 %v3743_v2, %v4906_v61  ;;  %v2351_v5 = vpop.f32.mrb[31].mxu0 }
 0x1e2   : > { %2987 = vst.msk [vmem:[%s4914_s18 + $0x60] sm:$0xf] %vm2962_vm6, %v3412_v57  ;;  %v3413_v58 = vpack.c.bf16 %v2687_v1, %v2687_v1  ;;  %v2570_v49 = vadd.f32 %v3813_v62, %v4896_v32  ;;  %v3815_v17 = vadd.f32 %v2351_v5, %v4909_v7 }
 0x1e3   : > { %2990 = vst.msk [vmem:[%s4914_s18 + $0x6c] sm:$0xf] %vm2962_vm6, %v3415_v8  ;;  %v2632_v34 = vmul.f32 0.1, %v2572_v25  ;;  %v2573_v54 = vadd.f32 %v3814_v37, %v4896_v32 }
 0x1e4   : > { %2988 = vst.msk [vmem:[%s4914_s18 + $0x64] sm:$0xf] %vm2962_vm6, %v3413_v58  ;;  %v2630_v10 = vmul.f32 0.1, %v2570_v49  ;;  %v2571_v21 = vadd.f32 %v3815_v17, %v4896_v32 }
 0x1e5   : > { %v2692_v61 = vmax.f32 %v2572_v25, %v2632_v34  ;;  %v2633_v3 = vmul.f32 0.1, %v2573_v54 }
 0x1e6   : > { %v2690_v47 = vmax.f32 %v2570_v49, %v2630_v10  ;;  %v2631_v53 = vmul.f32 0.1, %v2571_v21  ;;  %v3746_v22 = vpop.f32.mrb[32].mxu0 }
 0x1e7   : > { %v3418_v16 = vpack.c.bf16 %v2692_v61, %v2692_v61  ;;  %v2693_v7 = vmax.f32 %v2573_v54, %v2633_v3  ;;  %v2364_v50 = vpop.f32.mrb[33].mxu0 }
 0x1e8   : > { %v3416_v0 = vpack.c.bf16 %v2690_v47, %v2690_v47  ;;  %v2691_v33 = vmax.f32 %v2571_v21, %v2631_v53  ;;  %v3747_v14 = vpop.f32.mrb[34].mxu0 }
 0x1e9   : > { %2993 = vst.msk [vmem:[%s4914_s18 + $0x78] sm:$0xf] %vm2962_vm6, %v3418_v16  ;;  %v3419_v23 = vpack.c.bf16 %v2693_v7, %v2693_v7  ;;  %v3674_v12 = vpop.f32.mrb[32].mxu1  ;;  %v2367_v36 = vpop.f32.mrb[35].mxu0 }
 0x1ea   : > { %2991 = vst.msk [vmem:[%s4914_s18 + $0x70] sm:$0xf] %vm2962_vm6, %v3416_v0  ;;  %v3417_v43 = vpack.c.bf16 %v2691_v33, %v2691_v33  ;;  %v3816_v28 = vadd.f32 %v3746_v22, %v3674_v12  ;;  %v2036_v60 = vpop.f32.mrb[33].mxu1 }
 0x1eb   : > { %2994 = vst.msk [vmem:[%s4914_s18 + $0x7c] sm:$0xf] %vm2962_vm6, %v3419_v23  ;;  %v3817_v15 = vadd.f32 %v2364_v50, %v2036_v60  ;;  %v3675_v18 = vpop.f32.mrb[34].mxu1 }
 0x1ec   : > { %2992 = vst.msk [vmem:[%s4914_s18 + $0x74] sm:$0xf] %vm2962_vm6, %v3417_v43  ;;  %v2576_v30 = vadd.f32 %v3816_v28, %v4896_v32  ;;  %v3818_v45 = vadd.f32 %v3747_v14, %v3675_v18  ;;  %v2039_v27 = vpop.f32.mrb[35].mxu1 }
 0x1ed   : > { %v2574_v31 = vadd.f32 %v3817_v15, %v4896_v32  ;;  %v3819_v56 = vadd.f32 %v2367_v36, %v2039_v27 }
 0x1ee   : > { %v2636_v6 = vmul.f32 0.1, %v2576_v30  ;;  %v2577_v41 = vadd.f32 %v3818_v45, %v4896_v32  ;;  %v3750_v42 = vpop.f32.mrb[36].mxu0 }
 0x1ef   : > { %v2634_v38 = vmul.f32 0.1, %v2574_v31  ;;  %v2575_v4 = vadd.f32 %v3819_v56, %v4896_v32  ;;  %v2380_v29 = vpop.f32.mrb[37].mxu0 }
 0x1f0   : > { %v2696_v9 = vmax.f32 %v2576_v30, %v2636_v6  ;;  %v2637_v52 = vmul.f32 0.1, %v2577_v41  ;;  %v3751_v46 = vpop.f32.mrb[38].mxu0 }
 0x1f1   : > { %v2694_v35 = vmax.f32 %v2574_v31, %v2634_v38  ;;  %v2635_v55 = vmul.f32 0.1, %v2575_v4  ;;  %v3678_v26 = vpop.f32.mrb[36].mxu1  ;;  %v2383_v48 = vpop.f32.mrb[39].mxu0 }
 0x1f2   : > { %v3422_v24 = vpack.c.bf16 %v2696_v9, %v2696_v9  ;;  %v2697_v44 = vmax.f32 %v2577_v41, %v2637_v52  ;;  %v3820_v59 = vadd.f32 %v3750_v42, %v3678_v26  ;;  %v2052_v19 = vpop.f32.mrb[37].mxu1 }
 0x1f3   : > { %v3420_v11 = vpack.c.bf16 %v2694_v35, %v2694_v35  ;;  %v2695_v20 = vmax.f32 %v2575_v4, %v2635_v55  ;;  %v3821_v51 = vadd.f32 %v2380_v29, %v2052_v19  ;;  %v3679_v63 = vpop.f32.mrb[38].mxu1 }
 0x1f4   : > { %2997 = vst.msk [vmem:[%s4914_s18 + $0x88] sm:$0xf] %vm2962_vm6, %v3422_v24  ;;  %v3423_v39 = vpack.c.bf16 %v2697_v44, %v2697_v44  ;;  %v2580_v40 = vadd.f32 %v3820_v59, %v4896_v32  ;;  %v3822_v13 = vadd.f32 %v3751_v46, %v3679_v63  ;;  %v2055_v57 = vpop.f32.mrb[39].mxu1 }
 0x1f5   : > { %2995 = vst.msk [vmem:[%s4914_s18 + $0x80] sm:$0xf] %vm2962_vm6, %v3420_v11  ;;  %v3421_v1 = vpack.c.bf16 %v2695_v20, %v2695_v20  ;;  %v2578_v62 = vadd.f32 %v3821_v51, %v4896_v32  ;;  %v3823_v2 = vadd.f32 %v2383_v48, %v2055_v57 }
 0x1f6   : > { %2998 = vst.msk [vmem:[%s4914_s18 + $0x8c] sm:$0xf] %vm2962_vm6, %v3423_v39  ;;  %v2640_v8 = vmul.f32 0.1, %v2580_v40  ;;  %v2581_v25 = vadd.f32 %v3822_v13, %v4896_v32  ;;  %v3754_v37 = vpop.f32.mrb[40].mxu0 }
 0x1f7   : > { %2996 = vst.msk [vmem:[%s4914_s18 + $0x84] sm:$0xf] %vm2962_vm6, %v3421_v1  ;;  %v2638_v5 = vmul.f32 0.1, %v2578_v62  ;;  %v2579_v58 = vadd.f32 %v3823_v2, %v4896_v32  ;;  %v2396_v49 = vpop.f32.mrb[41].mxu0 }
 0x1f8   : > { %v2700_v17 = vmax.f32 %v2580_v40, %v2640_v8  ;;  %v2641_v34 = vmul.f32 0.1, %v2581_v25  ;;  %v3755_v54 = vpop.f32.mrb[42].mxu0 }
 0x1f9   : > { %v2698_v10 = vmax.f32 %v2578_v62, %v2638_v5  ;;  %v2639_v21 = vmul.f32 0.1, %v2579_v58  ;;  %v3682_v61 = vpop.f32.mrb[40].mxu1  ;;  %v2399_v3 = vpop.f32.mrb[43].mxu0 }
 0x1fa   : > { %v3426_v47 = vpack.c.bf16 %v2700_v17, %v2700_v17  ;;  %v2701_v53 = vmax.f32 %v2581_v25, %v2641_v34  ;;  %v3824_v22 = vadd.f32 %v3754_v37, %v3682_v61  ;;  %v2068_v16 = vpop.f32.mrb[41].mxu1 }
 0x1fb   : > { %v3424_v7 = vpack.c.bf16 %v2698_v10, %v2698_v10  ;;  %v2699_v50 = vmax.f32 %v2579_v58, %v2639_v21  ;;  %v3825_v0 = vadd.f32 %v2396_v49, %v2068_v16  ;;  %v3683_v33 = vpop.f32.mrb[42].mxu1 }
 0x1fc   : > { %3001 = vst.msk [vmem:[%s4914_s18 + $0x98] sm:$0xf] %vm2962_vm6, %v3426_v47  ;;  %v3427_v14 = vpack.c.bf16 %v2701_v53, %v2701_v53  ;;  %v2584_v23 = vadd.f32 %v3824_v22, %v4896_v32  ;;  %v3826_v12 = vadd.f32 %v3755_v54, %v3683_v33  ;;  %v2071_v36 = vpop.f32.mrb[43].mxu1 }
 0x1fd   : > { %2999 = vst.msk [vmem:[%s4914_s18 + $0x90] sm:$0xf] %vm2962_vm6, %v3424_v7  ;;  %v3425_v43 = vpack.c.bf16 %v2699_v50, %v2699_v50  ;;  %v2582_v28 = vadd.f32 %v3825_v0, %v4896_v32  ;;  %v3827_v60 = vadd.f32 %v2399_v3, %v2071_v36 }
 0x1fe   : > { %3002 = vst.msk [vmem:[%s4914_s18 + $0x9c] sm:$0xf] %vm2962_vm6, %v3427_v14  ;;  %v2644_v15 = vmul.f32 0.1, %v2584_v23  ;;  %v2585_v18 = vadd.f32 %v3826_v12, %v4896_v32  ;;  %v3758_v30 = vpop.f32.mrb[44].mxu0 }
 0x1ff   : > { %3000 = vst.msk [vmem:[%s4914_s18 + $0x94] sm:$0xf] %vm2962_vm6, %v3425_v43  ;;  %v2642_v45 = vmul.f32 0.1, %v2582_v28  ;;  %v2583_v27 = vadd.f32 %v3827_v60, %v4896_v32  ;;  %v2412_v31 = vpop.f32.mrb[45].mxu0 }
 0x200   : > { %v2704_v56 = vmax.f32 %v2584_v23, %v2644_v15  ;;  %v2645_v6 = vmul.f32 0.1, %v2585_v18  ;;  %v3759_v41 = vpop.f32.mrb[46].mxu0 }
 0x201   : > { %v2702_v42 = vmax.f32 %v2582_v28, %v2642_v45  ;;  %v2643_v38 = vmul.f32 0.1, %v2583_v27  ;;  %v3686_v4 = vpop.f32.mrb[44].mxu1  ;;  %v2415_v29 = vpop.f32.mrb[47].mxu0 }
 0x202   : > { %v3430_v9 = vpack.c.bf16 %v2704_v56, %v2704_v56  ;;  %v2705_v52 = vmax.f32 %v2585_v18, %v2645_v6  ;;  %v3828_v46 = vadd.f32 %v3758_v30, %v3686_v4  ;;  %v2084_v35 = vpop.f32.mrb[45].mxu1 }
 0x203   : > { %v3428_v55 = vpack.c.bf16 %v2702_v42, %v2702_v42  ;;  %v2703_v26 = vmax.f32 %v2583_v27, %v2643_v38  ;;  %v3829_v48 = vadd.f32 %v2412_v31, %v2084_v35  ;;  %v3687_v24 = vpop.f32.mrb[46].mxu1 }
 0x204   : > { %3005 = vst.msk [vmem:[%s4914_s18 + $0xa8] sm:$0xf] %vm2962_vm6, %v3430_v9  ;;  %v3431_v44 = vpack.c.bf16 %v2705_v52, %v2705_v52  ;;  %v2588_v59 = vadd.f32 %v3828_v46, %v4896_v32  ;;  %v3830_v19 = vadd.f32 %v3759_v41, %v3687_v24  ;;  %v2087_v11 = vpop.f32.mrb[47].mxu1 }
 0x205   : > { %3003 = vst.msk [vmem:[%s4914_s18 + $0xa0] sm:$0xf] %vm2962_vm6, %v3428_v55  ;;  %v3429_v20 = vpack.c.bf16 %v2703_v26, %v2703_v26  ;;  %v2586_v51 = vadd.f32 %v3829_v48, %v4896_v32  ;;  %v3831_v63 = vadd.f32 %v2415_v29, %v2087_v11 }
 0x206   : > { %3006 = vst.msk [vmem:[%s4914_s18 + $0xac] sm:$0xf] %vm2962_vm6, %v3431_v44  ;;  %v2648_v39 = vmul.f32 0.1, %v2588_v59  ;;  %v2589_v40 = vadd.f32 %v3830_v19, %v4896_v32  ;;  %v3762_v13 = vpop.f32.mrb[48].mxu0 }
 0x207   : > { %3004 = vst.msk [vmem:[%s4914_s18 + $0xa4] sm:$0xf] %vm2962_vm6, %v3429_v20  ;;  %v2646_v57 = vmul.f32 0.1, %v2586_v51  ;;  %v2587_v1 = vadd.f32 %v3831_v63, %v4896_v32  ;;  %v2428_v62 = vpop.f32.mrb[49].mxu0 }
 0x208   : > { %v2708_v2 = vmax.f32 %v2588_v59, %v2648_v39  ;;  %v2649_v8 = vmul.f32 0.1, %v2589_v40  ;;  %v3763_v25 = vpop.f32.mrb[50].mxu0 }
 0x209   : > { %v2706_v37 = vmax.f32 %v2586_v51, %v2646_v57  ;;  %v2647_v5 = vmul.f32 0.1, %v2587_v1  ;;  %v3690_v58 = vpop.f32.mrb[48].mxu1  ;;  %v2431_v49 = vpop.f32.mrb[51].mxu0 }
 0x20a   : > { %v3434_v17 = vpack.c.bf16 %v2708_v2, %v2708_v2  ;;  %v2709_v34 = vmax.f32 %v2589_v40, %v2649_v8  ;;  %v3832_v54 = vadd.f32 %v3762_v13, %v3690_v58  ;;  %v2100_v10 = vpop.f32.mrb[49].mxu1 }
 0x20b   : > { %v3432_v21 = vpack.c.bf16 %v2706_v37, %v2706_v37  ;;  %v2707_v61 = vmax.f32 %v2587_v1, %v2647_v5  ;;  %v3833_v3 = vadd.f32 %v2428_v62, %v2100_v10  ;;  %v3691_v47 = vpop.f32.mrb[50].mxu1 }
 0x20c   : > { %3009 = vst.msk [vmem:[%s4914_s18 + $0xb8] sm:$0xf] %vm2962_vm6, %v3434_v17  ;;  %v3435_v53 = vpack.c.bf16 %v2709_v34, %v2709_v34  ;;  %v2592_v22 = vadd.f32 %v3832_v54, %v4896_v32  ;;  %v3834_v16 = vadd.f32 %v3763_v25, %v3691_v47  ;;  %v2103_v7 = vpop.f32.mrb[51].mxu1 }
 0x20d   : > { %3007 = vst.msk [vmem:[%s4914_s18 + $0xb0] sm:$0xf] %vm2962_vm6, %v3432_v21  ;;  %v3433_v50 = vpack.c.bf16 %v2707_v61, %v2707_v61  ;;  %v2590_v0 = vadd.f32 %v3833_v3, %v4896_v32  ;;  %v3835_v33 = vadd.f32 %v2431_v49, %v2103_v7 }
 0x20e   : > { %3010 = vst.msk [vmem:[%s4914_s18 + $0xbc] sm:$0xf] %vm2962_vm6, %v3435_v53  ;;  %v2652_v14 = vmul.f32 0.1, %v2592_v22  ;;  %v2593_v23 = vadd.f32 %v3834_v16, %v4896_v32  ;;  %v3766_v12 = vpop.f32.mrb[52].mxu0 }
 0x20f   : > { %3008 = vst.msk [vmem:[%s4914_s18 + $0xb4] sm:$0xf] %vm2962_vm6, %v3433_v50  ;;  %v2650_v36 = vmul.f32 0.1, %v2590_v0  ;;  %v2591_v43 = vadd.f32 %v3835_v33, %v4896_v32  ;;  %v2444_v28 = vpop.f32.mrb[53].mxu0 }
 0x210   : > { %v2712_v60 = vmax.f32 %v2592_v22, %v2652_v14  ;;  %v2653_v15 = vmul.f32 0.1, %v2593_v23  ;;  %v3767_v18 = vpop.f32.mrb[54].mxu0 }
 0x211   : > { %v2710_v30 = vmax.f32 %v2590_v0, %v2650_v36  ;;  %v2651_v45 = vmul.f32 0.1, %v2591_v43  ;;  %v3694_v27 = vpop.f32.mrb[52].mxu1  ;;  %v2447_v31 = vpop.f32.mrb[55].mxu0 }
 0x212   : > { %v3438_v56 = vpack.c.bf16 %v2712_v60, %v2712_v60  ;;  %v2713_v6 = vmax.f32 %v2593_v23, %v2653_v15  ;;  %v3836_v41 = vadd.f32 %v3766_v12, %v3694_v27  ;;  %v2116_v42 = vpop.f32.mrb[53].mxu1 }
 0x213   : > { %v3436_v38 = vpack.c.bf16 %v2710_v30, %v2710_v30  ;;  %v2711_v4 = vmax.f32 %v2591_v43, %v2651_v45  ;;  %v3837_v29 = vadd.f32 %v2444_v28, %v2116_v42  ;;  %v3695_v9 = vpop.f32.mrb[54].mxu1 }
 0x214   : > { %3013 = vst.msk [vmem:[%s4914_s18 + $0xc8] sm:$0xf] %vm2962_vm6, %v3438_v56  ;;  %v3439_v52 = vpack.c.bf16 %v2713_v6, %v2713_v6  ;;  %v2596_v46 = vadd.f32 %v3836_v41, %v4896_v32  ;;  %v3838_v35 = vadd.f32 %v3767_v18, %v3695_v9  ;;  %v2119_v55 = vpop.f32.mrb[55].mxu1 }
 0x215   : > { %3011 = vst.msk [vmem:[%s4914_s18 + $0xc0] sm:$0xf] %vm2962_vm6, %v3436_v38  ;;  %v3437_v26 = vpack.c.bf16 %v2711_v4, %v2711_v4  ;;  %v2594_v48 = vadd.f32 %v3837_v29, %v4896_v32  ;;  %v3839_v24 = vadd.f32 %v2447_v31, %v2119_v55 }
 0x216   : > { %3014 = vst.msk [vmem:[%s4914_s18 + $0xcc] sm:$0xf] %vm2962_vm6, %v3439_v52  ;;  %v2656_v44 = vmul.f32 0.1, %v2596_v46  ;;  %v2597_v59 = vadd.f32 %v3838_v35, %v4896_v32  ;;  %v3770_v19 = vpop.f32.mrb[56].mxu0 }
 0x217   : > { %3012 = vst.msk [vmem:[%s4914_s18 + $0xc4] sm:$0xf] %vm2962_vm6, %v3437_v26  ;;  %v2654_v11 = vmul.f32 0.1, %v2594_v48  ;;  %v2595_v20 = vadd.f32 %v3839_v24, %v4896_v32  ;;  %v2460_v51 = vpop.f32.mrb[57].mxu0 }
 0x218   : > { %v2716_v63 = vmax.f32 %v2596_v46, %v2656_v44  ;;  %v2657_v39 = vmul.f32 0.1, %v2597_v59  ;;  %v3771_v40 = vpop.f32.mrb[58].mxu0 }
 0x219   : > { %v2714_v13 = vmax.f32 %v2594_v48, %v2654_v11  ;;  %v2655_v57 = vmul.f32 0.1, %v2595_v20  ;;  %v3698_v1 = vpop.f32.mrb[56].mxu1  ;;  %v2463_v62 = vpop.f32.mrb[59].mxu0 }
 0x21a   : > { %v3442_v2 = vpack.c.bf16 %v2716_v63, %v2716_v63  ;;  %v2717_v8 = vmax.f32 %v2597_v59, %v2657_v39  ;;  %v3840_v25 = vadd.f32 %v3770_v19, %v3698_v1  ;;  %v2132_v37 = vpop.f32.mrb[57].mxu1 }
 0x21b   : > { %v3440_v5 = vpack.c.bf16 %v2714_v13, %v2714_v13  ;;  %v2715_v58 = vmax.f32 %v2595_v20, %v2655_v57  ;;  %v3841_v49 = vadd.f32 %v2460_v51, %v2132_v37  ;;  %v3699_v17 = vpop.f32.mrb[58].mxu1 }
 0x21c   : > { %3017 = vst.msk [vmem:[%s4914_s18 + $0xd8] sm:$0xf] %vm2962_vm6, %v3442_v2  ;;  %v3443_v34 = vpack.c.bf16 %v2717_v8, %v2717_v8  ;;  %v2600_v54 = vadd.f32 %v3840_v25, %v4896_v32  ;;  %v3842_v10 = vadd.f32 %v3771_v40, %v3699_v17  ;;  %v2135_v21 = vpop.f32.mrb[59].mxu1 }
 0x21d   : > { %3015 = vst.msk [vmem:[%s4914_s18 + $0xd0] sm:$0xf] %vm2962_vm6, %v3440_v5  ;;  %v3441_v61 = vpack.c.bf16 %v2715_v58, %v2715_v58  ;;  %v2598_v3 = vadd.f32 %v3841_v49, %v4896_v32  ;;  %v3843_v47 = vadd.f32 %v2463_v62, %v2135_v21 }
 0x21e   : > { %3018 = vst.msk [vmem:[%s4914_s18 + $0xdc] sm:$0xf] %vm2962_vm6, %v3443_v34  ;;  %v2660_v53 = vmul.f32 0.1, %v2600_v54  ;;  %v2601_v22 = vadd.f32 %v3842_v10, %v4896_v32 }
 0x21f   : > { %3016 = vst.msk [vmem:[%s4914_s18 + $0xd4] sm:$0xf] %vm2962_vm6, %v3441_v61  ;;  %v2658_v16 = vmul.f32 0.1, %v2598_v3  ;;  %v2599_v7 = vadd.f32 %v3843_v47, %v4896_v32 }
 0x220   : > { %v2720_v50 = vmax.f32 %v2600_v54, %v2660_v53  ;;  %v2661_v0 = vmul.f32 0.1, %v2601_v22 }
 0x221   : > { %v2718_v33 = vmax.f32 %v2598_v3, %v2658_v16  ;;  %v2659_v14 = vmul.f32 0.1, %v2599_v7 }
 0x222   : > { %v3446_v23 = vpack.c.bf16 %v2720_v50, %v2720_v50  ;;  %v2721_v12 = vmax.f32 %v2601_v22, %v2661_v0 }
 0x223   : > { %v3444_v36 = vpack.c.bf16 %v2718_v33, %v2718_v33  ;;  %v2719_v43 = vmax.f32 %v2599_v7, %v2659_v14 }
 0x224   : > { %3021 = vst.msk [vmem:[%s4914_s18 + $0xe8] sm:$0xf] %vm2962_vm6, %v3446_v23  ;;  %v3447_v28 = vpack.c.bf16 %v2721_v12, %v2721_v12 }
 0x225   : > { %3019 = vst.msk [vmem:[%s4914_s18 + $0xe0] sm:$0xf] %vm2962_vm6, %v3444_v36  ;;  %v3445_v60 = vpack.c.bf16 %v2719_v43, %v2719_v43 }
 0x226   : > { %3022 = vst.msk [vmem:[%s4914_s18 + $0xec] sm:$0xf] %vm2962_vm6, %v3447_v28 }
 0x227   : > { %3020 = vst.msk [vmem:[%s4914_s18 + $0xe4] sm:$0xf] %vm2962_vm6, %v3445_v60 }
 0x228 PF: > { %s15_s20 = sadd.s32 1, %s4013_s20   ;;  %s5132_s18 = smov %s4009_s19 }
 0x229   : > { %p12_p5 = scmp.ge.s32.totalorder %s15_s20, 4   ;;  %s5133_s19 = smov %s5135_s21 }
 0x22b   :  { %14 = sbr.rel (!%p12_p5) target bundleno = 2 (0x2), region = 78 }

// kernel: unet1x3_forward.10
= control target key start
LH: loop header
LB: loop body
LE: loop exit
PB: predicated region body
PF: predicated region fallthrough
CT: control target
= control target key end

     0   :  { %s1107_s12 = smov 0   ;;  %s1109_s13 = smov 0   ;;  %s1281_s0 = inlined_call_operand.vmem [shape: bf16[2,160,256], index: 0, kind: input, shape index: {}]   ;;  %s1282_s1 = inlined_call_operand.vmem [shape: bf16[256,64], index: 1, kind: input, shape index: {}]   ;;  %s1283_s2 = inlined_call_operand.vmem [shape: f32[1,64], index: 2, kind: input, shape index: {}]   ;;  %s1284_s3 = inlined_call_operand.vmem [shape: bf16[2,160,64], index: 3, kind: output, shape index: {}]  }
   0x1   :  { %s1111_s14 = smov 0  }
   0x2 LB: > { %s25_s15 = sadd.s32 1, %s1081_s13  ;;  %p817_p0 = scmp.ge.s32.totalorder %s1085_s14, 1  ;;  %s1085_s14 = sphi %s1111_s14, %s13_s14   ;;  %s1081_s13 = sphi %s1109_s13, %s1286_s13   ;;  %s1077_s12 = sphi %s1107_s12, %s1285_s12  }
   0x3   : > { %p27_p1 = scmp.ge.s32.totalorder %s25_s15, 2  ;;  %p159_p2 = scmp.lt.s32.totalorder %s1085_s14, 3 }
   0x5   : > { %s1288_s15 = smov (%p27_p1, %s25_s15), 0  ;;  %p160_p3 = pnand %p817_p0, %p159_p2 }
   0x6   : > { %v1017_v0 = vld [vmem:[%s1282_s1 + $0x40] sm:$0xff] (!%p160_p3)   ;;  %v1019_v2 = vld [vmem:[%s1282_s1 + $0x48] sm:$0xff] (!%p160_p3)   ;;  %p193_p4 = scmp.lt.s32.totalorder (!%p160_p3), %s1077_s12, 1  ;;  %v1021_v4 = vld [vmem:[%s1282_s1 + $0x50] sm:$0xff] (!%p160_p3)   ;;  %vm702_vm0 = vcmask (!%p160_p3), 519168  }
   0x7   : > { %163 = sbr.rel (%p160_p3) target bundleno = 297 (0x129), region = 32  ;;  %v1018_v1 = vld [vmem:[%s1282_s1] sm:$0xff] (!%p160_p3)   ;;  %899 = vmatprep.subr.bf16.mxu0 (!%p160_p3), %v1017_v0  ;;  %975 = vmatprep.subr.bf16.mxu1 (!%p160_p3), %v1017_v0  ;;  %v1020_v3 = vld [vmem:[%s1282_s1 + $0x8] sm:$0xff] (!%p160_p3)   ;;  %v1022_v5 = vld [vmem:[%s1282_s1 + $0x10] sm:$0xff] (!%p160_p3)  }
   0x8   : > { %900 = vmatpush3.bf16.msra.mxu0 (!%p160_p3), %v1018_v1  ;;  %983 = vmatpush3.bf16.msra.mxu1 (!%p160_p3), %v1018_v1  ;;  %v1023_v6 = vld [vmem:[%s1282_s1 + $0x58] sm:$0xff] (!%p160_p3)   ;;  %v1025_v8 = vld [vmem:[%s1282_s1 + $0x60] sm:$0xff] (!%p160_p3)   ;;  %v1027_v10 = vld [vmem:[%s1282_s1 + $0x68] sm:$0xff] (!%p160_p3)  }
   0x9   : > { %901 = vmatprep.subr.bf16.mxu0 (!%p160_p3), %v1019_v2  ;;  %976 = vmatprep.subr.bf16.mxu1 (!%p160_p3), %v1019_v2  ;;  %v1024_v7 = vld [vmem:[%s1282_s1 + $0x18] sm:$0xff] (!%p160_p3)   ;;  %v1026_v9 = vld [vmem:[%s1282_s1 + $0x20] sm:$0xff] (!%p160_p3)   ;;  %v1028_v13 = vld [vmem:[%s1282_s1 + $0x28] sm:$0xff] (!%p160_p3)  }
   0xa   : > { %v1029_v14 = vld [vmem:[%s1282_s1 + $0x70] sm:$0xff] (!%p160_p3)   ;;  %v1031_v16 = vld [vmem:[%s1282_s1 + $0x78] sm:$0xff] (!%p160_p3)   ;;  %v1204_v38 = vld [vmem:[%s1283_s2] ss:$0 sm:$0xff] (!%p160_p3) }
   0xb   : > { %v1030_v15 = vld [vmem:[%s1282_s1 + $0x30] sm:$0xff] (!%p160_p3)   ;;  %v1032_v17 = vld [vmem:[%s1282_s1 + $0x38] sm:$0xff] (!%p160_p3)  }
   0xc   : > { %902 = vmatpush3.bf16.msra.mxu0 (!%p160_p3), %v1020_v3  ;;  %984 = vmatpush3.bf16.msra.mxu1 (!%p160_p3), %v1020_v3 }
   0xd   : > { %903 = vmatprep.subr.bf16.mxu0 (!%p160_p3), %v1021_v4  ;;  %977 = vmatprep.subr.bf16.mxu1 (!%p160_p3), %v1021_v4 }
   0xe   : > { %s1290_s12 = smov (!%p193_p4, %s1077_s12), 1 }
   0xf   : > { %s991_s30 = smul.u32 160, %s1290_s12 }
  0x10   : > { %904 = vmatpush3.bf16.msra.mxu0 %v1022_v5  ;;  %985 = vmatpush3.bf16.msra.mxu1 %v1022_v5  ;;  %s992_s4 = smul.u32 80, %s1290_s12 }
  0x11   : > { %905 = vmatprep.subr.bf16.mxu0 %v1023_v6  ;;  %978 = vmatprep.subr.bf16.mxu1 %v1023_v6  ;;  %s1158_s10 = scalar_lea.vmem %s1281_s0, %s991_s30 }
  0x12   : > { %v1035_v11 = vld [vmem:[%s1158_s10 + $0x4] ss:$8 sps:$4 sm:$0xff]   ;;  %v1038_v12 = vld [vmem:[%s1158_s10 + $0x54] ss:$8 sps:$4 sm:$0xff]   ;;  %v1033_v18 = vld [vmem:[%s1158_s10] ss:$8 sps:$4 sm:$0xff]   ;;  %s1214_s7 = scalar_lea.vmem %s1284_s3, %s992_s4 }
  0x13   : > { %501 = vmatprep.mubr.bf16.mxu0 %v1035_v11  ;;  %541 = vmatprep.mubr.bf16.mxu1 %v1038_v12  ;;  %v1036_v19 = vld [vmem:[%s1158_s10 + $0x50] ss:$8 sps:$4 sm:$0xff]   ;;  %v1039_v20 = vld [vmem:[%s1158_s10 + $0x14] ss:$8 sps:$4 sm:$0xff]   ;;  %v1041_v21 = vld [vmem:[%s1158_s10 + $0x64] ss:$8 sps:$4 sm:$0xff]  }
  0x14   : > { %906 = vmatpush3.bf16.msra.mxu0 %v1024_v7  ;;  %986 = vmatpush3.bf16.msra.mxu1 %v1024_v7  ;;  %v1043_v22 = vld [vmem:[%s1158_s10 + $0x10] ss:$8 sps:$4 sm:$0xff]   ;;  %v1044_v23 = vld [vmem:[%s1158_s10 + $0x60] ss:$8 sps:$4 sm:$0xff]   ;;  %v1045_v24 = vld [vmem:[%s1158_s10 + $0x24] ss:$8 sps:$4 sm:$0xff]  }
  0x15   : > { %907 = vmatprep.subr.bf16.mxu0 %v1025_v8  ;;  %979 = vmatprep.subr.bf16.mxu1 %v1025_v8  ;;  %v1047_v25 = vld [vmem:[%s1158_s10 + $0x74] ss:$8 sps:$4 sm:$0xff]   ;;  %v1049_v26 = vld [vmem:[%s1158_s10 + $0x20] ss:$8 sps:$4 sm:$0xff]   ;;  %v1050_v27 = vld [vmem:[%s1158_s10 + $0x70] ss:$8 sps:$4 sm:$0xff]  }
  0x16   : > { %v1051_v28 = vld [vmem:[%s1158_s10 + $0x34] ss:$8 sps:$4 sm:$0xff]   ;;  %v1053_v29 = vld [vmem:[%s1158_s10 + $0x84] ss:$8 sps:$4 sm:$0xff]   ;;  %v1055_v30 = vld [vmem:[%s1158_s10 + $0x30] ss:$8 sps:$4 sm:$0xff]  }
  0x17   : > { %v1056_v31 = vld [vmem:[%s1158_s10 + $0x80] ss:$8 sps:$4 sm:$0xff]   ;;  %v1057_v32 = vld [vmem:[%s1158_s10 + $0x44] ss:$8 sps:$4 sm:$0xff]   ;;  %v1059_v33 = vld [vmem:[%s1158_s10 + $0x94] ss:$8 sps:$4 sm:$0xff]  }
  0x18   : > { %908 = vmatpush3.bf16.msra.mxu0 %v1026_v9  ;;  %987 = vmatpush3.bf16.msra.mxu1 %v1026_v9  ;;  %v1061_v34 = vld [vmem:[%s1158_s10 + $0x40] ss:$8 sps:$4 sm:$0xff]   ;;  %v1062_v35 = vld [vmem:[%s1158_s10 + $0x90] ss:$8 sps:$4 sm:$0xff]  }
  0x19   : > { %909 = vmatprep.subr.bf16.mxu0 %v1027_v10  ;;  %980 = vmatprep.subr.bf16.mxu1 %v1027_v10 }
  0x1c   : > { %910 = vmatpush3.bf16.msra.mxu0 %v1028_v13  ;;  %988 = vmatpush3.bf16.msra.mxu1 %v1028_v13 }
  0x1d   : > { %911 = vmatprep.subr.bf16.mxu0 %v1029_v14  ;;  %981 = vmatprep.subr.bf16.mxu1 %v1029_v14 }
  0x20   : > { %912 = vmatpush3.bf16.msra.mxu0 %v1030_v15  ;;  %989 = vmatpush3.bf16.msra.mxu1 %v1030_v15 }
  0x21   : > { %913 = vmatprep.subr.bf16.mxu0 %v1031_v16  ;;  %982 = vmatprep.subr.bf16.mxu1 %v1031_v16 }
  0x24   : > { %914 = vmatpush3.bf16.msra.mxu0 %v1032_v17  ;;  %990 = vmatpush3.bf16.msra.mxu1 %v1032_v17 }
  0x27   : > { %502 = vmatmul.mubr.bf16.vlgmr.msra.gmra.mrb[0].mxu0 %v1033_v18  ;;  %542 = vmatmul.mubr.bf16.vlgmr.msra.gmra.mrb[0].mxu1 %v1036_v19 }
  0x28   : > { %509 = vmatprep.mubr.bf16.mxu0 %v1039_v20  ;;  %549 = vmatprep.mubr.bf16.mxu1 %v1041_v21 }
  0x2f   : > { %510 = vmatmul.mubr.bf16.gmra.mrb[4].mxu0 %v1043_v22  ;;  %550 = vmatmul.mubr.bf16.gmra.mrb[4].mxu1 %v1044_v23 }
  0x30   : > { %517 = vmatprep.mubr.bf16.mxu0 %v1045_v24  ;;  %557 = vmatprep.mubr.bf16.mxu1 %v1047_v25 }
  0x37   : > { %518 = vmatmul.mubr.bf16.gmra.mrb[8].mxu0 %v1049_v26  ;;  %558 = vmatmul.mubr.bf16.gmra.mrb[8].mxu1 %v1050_v27 }
  0x38   : > { %525 = vmatprep.mubr.bf16.mxu0 %v1051_v28  ;;  %565 = vmatprep.mubr.bf16.mxu1 %v1053_v29 }
  0x3f   : > { %526 = vmatmul.mubr.bf16.gmra.mrb[12].mxu0 %v1055_v30  ;;  %566 = vmatmul.mubr.bf16.gmra.mrb[12].mxu1 %v1056_v31 }
  0x40   : > { %533 = vmatprep.mubr.bf16.mxu0 %v1057_v32  ;;  %573 = vmatprep.mubr.bf16.mxu1 %v1059_v33 }
  0x47   : > { %534 = vmatmul.mubr.bf16.gmra.mrb[16].mxu0 %v1061_v34  ;;  %574 = vmatmul.mubr.bf16.gmra.mrb[16].mxu1 %v1062_v35 }
  0xfa   : > { %v915_v36 = vpop.f32.mrb[0].mxu0  ;;  %v945_v37 = vpop.f32.mrb[0].mxu1 }
  0xfb   : > { %v916_v39 = vpop.f32.mrb[1].mxu0  ;;  %v946_v40 = vpop.f32.mrb[1].mxu1 }
  0xfc   : > { %v917_v41 = vadd.f32 %v916_v39, %v915_v36  ;;  %v947_v42 = vadd.f32 %v946_v40, %v945_v37  ;;  %v918_v43 = vpop.f32.mrb[2].mxu0  ;;  %v948_v44 = vpop.f32.mrb[2].mxu1 }
  0xfd   : > { %v919_v45 = vpop.f32.mrb[3].mxu0  ;;  %v949_v46 = vpop.f32.mrb[3].mxu1 }
  0xfe   : > { %v504_v47 = vadd.f32 %v917_v41, %v1204_v38  ;;  %v544_v48 = vadd.f32 %v947_v42, %v1204_v38  ;;  %v920_v49 = vadd.f32 %v919_v45, %v918_v43  ;;  %v950_v50 = vadd.f32 %v949_v46, %v948_v44 }
 0x100   : > { %v582_v51 = vmul.f32 0.1, %v504_v47  ;;  %v592_v52 = vmul.f32 0.1, %v544_v48  ;;  %v507_v53 = vadd.f32 %v920_v49, %v1204_v38  ;;  %v547_v54 = vadd.f32 %v950_v50, %v1204_v38 }
 0x102   : > { %v602_v55 = vmax.f32 %v504_v47, %v582_v51  ;;  %v612_v56 = vmax.f32 %v544_v48, %v592_v52  ;;  %v583_v57 = vmul.f32 0.1, %v507_v53  ;;  %v593_v58 = vmul.f32 0.1, %v547_v54  ;;  %v921_v59 = vpop.f32.mrb[4].mxu0  ;;  %v951_v60 = vpop.f32.mrb[4].mxu1 }
 0x103   : > { %v922_v61 = vpop.f32.mrb[5].mxu0  ;;  %v952_v62 = vpop.f32.mrb[5].mxu1 }
 0x104   : > { %v879_v63 = vpack.c.bf16 %v602_v55, %v602_v55  ;;  %v889_v0 = vpack.c.bf16 %v612_v56, %v612_v56  ;;  %v603_v1 = vmax.f32 %v507_v53, %v583_v57  ;;  %v613_v2 = vmax.f32 %v547_v54, %v593_v58  ;;  %v924_v3 = vpop.f32.mrb[6].mxu0  ;;  %v954_v4 = vpop.f32.mrb[6].mxu1 }
 0x105   : > { %v923_v5 = vadd.f32 %v922_v61, %v921_v59  ;;  %v953_v6 = vadd.f32 %v952_v62, %v951_v60  ;;  %v925_v7 = vpop.f32.mrb[7].mxu0  ;;  %v955_v8 = vpop.f32.mrb[7].mxu1 }
 0x106   : > { %703 = vst.msk [vmem:[%s1214_s7] sm:$0xf] %vm702_vm0, %v879_v63  ;;  %713 = vst.msk [vmem:[%s1214_s7 + $0x28] sm:$0xf] %vm702_vm0, %v889_v0  ;;  %v880_v9 = vpack.c.bf16 %v603_v1, %v603_v1  ;;  %v890_v10 = vpack.c.bf16 %v613_v2, %v613_v2  ;;  %v926_v11 = vadd.f32 %v925_v7, %v924_v3 }
 0x107   : > { %v956_v12 = vadd.f32 %v955_v8, %v954_v4  ;;  %v512_v13 = vadd.f32 %v923_v5, %v1204_v38  ;;  %v552_v14 = vadd.f32 %v953_v6, %v1204_v38 }
 0x108   : > { %704 = vst.msk [vmem:[%s1214_s7 + $0x4] sm:$0xf] %vm702_vm0, %v880_v9  ;;  %714 = vst.msk [vmem:[%s1214_s7 + $0x2c] sm:$0xf] %vm702_vm0, %v890_v10  ;;  %v515_v15 = vadd.f32 %v926_v11, %v1204_v38 }
 0x109   : > { %v555_v16 = vadd.f32 %v956_v12, %v1204_v38  ;;  %v584_v17 = vmul.f32 0.1, %v512_v13  ;;  %v594_v18 = vmul.f32 0.1, %v552_v14 }
 0x10a   : > { %v585_v19 = vmul.f32 0.1, %v515_v15  ;;  %v927_v21 = vpop.f32.mrb[8].mxu0  ;;  %v957_v22 = vpop.f32.mrb[8].mxu1 }
 0x10b   : > { %v595_v20 = vmul.f32 0.1, %v555_v16  ;;  %v604_v23 = vmax.f32 %v512_v13, %v584_v17  ;;  %v614_v24 = vmax.f32 %v552_v14, %v594_v18  ;;  %v928_v25 = vpop.f32.mrb[9].mxu0  ;;  %v958_v26 = vpop.f32.mrb[9].mxu1 }
 0x10c   : > { %v605_v27 = vmax.f32 %v515_v15, %v585_v19  ;;  %v929_v29 = vadd.f32 %v928_v25, %v927_v21  ;;  %v959_v30 = vadd.f32 %v958_v26, %v957_v22  ;;  %v930_v31 = vpop.f32.mrb[10].mxu0  ;;  %v960_v32 = vpop.f32.mrb[10].mxu1 }
 0x10d   : > { %v615_v28 = vmax.f32 %v555_v16, %v595_v20  ;;  %v881_v33 = vpack.c.bf16 %v604_v23, %v604_v23  ;;  %v891_v34 = vpack.c.bf16 %v614_v24, %v614_v24  ;;  %v931_v35 = vpop.f32.mrb[11].mxu0  ;;  %v961_v36 = vpop.f32.mrb[11].mxu1 }
 0x10e   : > { %v882_v37 = vpack.c.bf16 %v605_v27, %v605_v27  ;;  %v520_v40 = vadd.f32 %v929_v29, %v1204_v38  ;;  %v560_v41 = vadd.f32 %v959_v30, %v1204_v38  ;;  %v932_v42 = vadd.f32 %v931_v35, %v930_v31 }
 0x10f   : > { %v892_v39 = vpack.c.bf16 %v615_v28, %v615_v28  ;;  %705 = vst.msk [vmem:[%s1214_s7 + $0x8] sm:$0xf] %vm702_vm0, %v881_v33  ;;  %715 = vst.msk [vmem:[%s1214_s7 + $0x30] sm:$0xf] %vm702_vm0, %v891_v34  ;;  %v962_v43 = vadd.f32 %v961_v36, %v960_v32 }
 0x110   : > { %706 = vst.msk [vmem:[%s1214_s7 + $0xc] sm:$0xf] %vm702_vm0, %v882_v37  ;;  %v586_v44 = vmul.f32 0.1, %v520_v40  ;;  %v596_v45 = vmul.f32 0.1, %v560_v41  ;;  %v523_v46 = vadd.f32 %v932_v42, %v1204_v38 }
 0x111   : > { %716 = vst.msk [vmem:[%s1214_s7 + $0x34] sm:$0xf] %vm702_vm0, %v892_v39  ;;  %v563_v47 = vadd.f32 %v962_v43, %v1204_v38 }
 0x112   : > { %v606_v48 = vmax.f32 %v520_v40, %v586_v44  ;;  %v616_v49 = vmax.f32 %v560_v41, %v596_v45  ;;  %v933_v50 = vpop.f32.mrb[12].mxu0  ;;  %v963_v51 = vpop.f32.mrb[12].mxu1  ;;  %v587_v52 = vmul.f32 0.1, %v523_v46 }
 0x113   : > { %v597_v53 = vmul.f32 0.1, %v563_v47  ;;  %v934_v54 = vpop.f32.mrb[13].mxu0  ;;  %v964_v55 = vpop.f32.mrb[13].mxu1 }
 0x114   : > { %v883_v56 = vpack.c.bf16 %v606_v48, %v606_v48  ;;  %v893_v57 = vpack.c.bf16 %v616_v49, %v616_v49  ;;  %v935_v58 = vadd.f32 %v934_v54, %v933_v50  ;;  %v965_v59 = vadd.f32 %v964_v55, %v963_v51  ;;  %v936_v60 = vpop.f32.mrb[14].mxu0  ;;  %v966_v61 = vpop.f32.mrb[14].mxu1 }
 0x115   : > { %v607_v62 = vmax.f32 %v523_v46, %v587_v52  ;;  %v617_v63 = vmax.f32 %v563_v47, %v597_v53  ;;  %v937_v0 = vpop.f32.mrb[15].mxu0  ;;  %v967_v1 = vpop.f32.mrb[15].mxu1 }
 0x116   : > { %707 = vst.msk [vmem:[%s1214_s7 + $0x10] sm:$0xf] %vm702_vm0, %v883_v56  ;;  %717 = vst.msk [vmem:[%s1214_s7 + $0x38] sm:$0xf] %vm702_vm0, %v893_v57  ;;  %v528_v2 = vadd.f32 %v935_v58, %v1204_v38  ;;  %v568_v3 = vadd.f32 %v965_v59, %v1204_v38  ;;  %v938_v4 = vadd.f32 %v937_v0, %v936_v60 }
 0x117   : > { %v968_v5 = vadd.f32 %v967_v1, %v966_v61  ;;  %v884_v6 = vpack.c.bf16 %v607_v62, %v607_v62  ;;  %v894_v7 = vpack.c.bf16 %v617_v63, %v617_v63 }
 0x118   : > { %v588_v8 = vmul.f32 0.1, %v528_v2  ;;  %v598_v9 = vmul.f32 0.1, %v568_v3  ;;  %v531_v10 = vadd.f32 %v938_v4, %v1204_v38 }
 0x119   : > { %v571_v11 = vadd.f32 %v968_v5, %v1204_v38  ;;  %708 = vst.msk [vmem:[%s1214_s7 + $0x14] sm:$0xf] %vm702_vm0, %v884_v6  ;;  %718 = vst.msk [vmem:[%s1214_s7 + $0x3c] sm:$0xf] %vm702_vm0, %v894_v7 }
 0x11a   : > { %v608_v12 = vmax.f32 %v528_v2, %v588_v8  ;;  %v618_v13 = vmax.f32 %v568_v3, %v598_v9  ;;  %v589_v14 = vmul.f32 0.1, %v531_v10  ;;  %v939_v16 = vpop.f32.mrb[16].mxu0  ;;  %v969_v17 = vpop.f32.mrb[16].mxu1 }
 0x11b   : > { %v599_v15 = vmul.f32 0.1, %v571_v11  ;;  %v940_v18 = vpop.f32.mrb[17].mxu0  ;;  %v970_v19 = vpop.f32.mrb[17].mxu1 }
 0x11c   : > { %v885_v20 = vpack.c.bf16 %v608_v12, %v608_v12  ;;  %v895_v21 = vpack.c.bf16 %v618_v13, %v618_v13  ;;  %v609_v22 = vmax.f32 %v531_v10, %v589_v14  ;;  %v942_v24 = vpop.f32.mrb[18].mxu0  ;;  %v972_v25 = vpop.f32.mrb[18].mxu1  ;;  %v941_v26 = vadd.f32 %v940_v18, %v939_v16 }
 0x11d   : > { %v619_v23 = vmax.f32 %v571_v11, %v599_v15  ;;  %v971_v27 = vadd.f32 %v970_v19, %v969_v17  ;;  %v943_v28 = vpop.f32.mrb[19].mxu0  ;;  %v973_v29 = vpop.f32.mrb[19].mxu1 }
 0x11e   : > { %709 = vst.msk [vmem:[%s1214_s7 + $0x18] sm:$0xf] %vm702_vm0, %v885_v20  ;;  %719 = vst.msk [vmem:[%s1214_s7 + $0x40] sm:$0xf] %vm702_vm0, %v895_v21  ;;  %v886_v30 = vpack.c.bf16 %v609_v22, %v609_v22  ;;  %v944_v32 = vadd.f32 %v943_v28, %v942_v24  ;;  %v974_v33 = vadd.f32 %v973_v29, %v972_v25 }
 0x11f   : > { %v896_v31 = vpack.c.bf16 %v619_v23, %v619_v23  ;;  %v536_v34 = vadd.f32 %v941_v26, %v1204_v38  ;;  %v576_v35 = vadd.f32 %v971_v27, %v1204_v38 }
 0x120   : > { %710 = vst.msk [vmem:[%s1214_s7 + $0x1c] sm:$0xf] %vm702_vm0, %v886_v30  ;;  %v539_v36 = vadd.f32 %v944_v32, %v1204_v38  ;;  %v579_v37 = vadd.f32 %v974_v33, %v1204_v38 }
 0x121   : > { %720 = vst.msk [vmem:[%s1214_s7 + $0x44] sm:$0xf] %vm702_vm0, %v896_v31  ;;  %v590_v39 = vmul.f32 0.1, %v536_v34  ;;  %v600_v40 = vmul.f32 0.1, %v576_v35 }
 0x122   : > { %v591_v41 = vmul.f32 0.1, %v539_v36  ;;  %v601_v42 = vmul.f32 0.1, %v579_v37 }
 0x123   : > { %v610_v43 = vmax.f32 %v536_v34, %v590_v39  ;;  %v620_v44 = vmax.f32 %v576_v35, %v600_v40 }
 0x124   : > { %v611_v45 = vmax.f32 %v539_v36, %v591_v41  ;;  %v621_v46 = vmax.f32 %v579_v37, %v601_v42 }
 0x125   : > { %v887_v47 = vpack.c.bf16 %v610_v43, %v610_v43  ;;  %v897_v48 = vpack.c.bf16 %v620_v44, %v620_v44 }
 0x126   : > { %v888_v49 = vpack.c.bf16 %v611_v45, %v611_v45  ;;  %v898_v50 = vpack.c.bf16 %v621_v46, %v621_v46 }
 0x127   : > { %711 = vst.msk [vmem:[%s1214_s7 + $0x20] sm:$0xf] %vm702_vm0, %v887_v47  ;;  %721 = vst.msk [vmem:[%s1214_s7 + $0x48] sm:$0xf] %vm702_vm0, %v897_v48 }
 0x128   : > { %712 = vst.msk [vmem:[%s1214_s7 + $0x24] sm:$0xf] %vm702_vm0, %v888_v49  ;;  %722 = vst.msk [vmem:[%s1214_s7 + $0x4c] sm:$0xf] %vm702_vm0, %v898_v50 }
 0x129 PF: > { %s13_s14 = sadd.s32 1, %s1085_s14   ;;  %s1285_s12 = smov %s1081_s13 }
 0x12a   : > { %p10_p5 = scmp.ge.s32.totalorder %s13_s14, 4   ;;  %s1286_s13 = smov %s1288_s15 }
 0x12c   :  { %12 = sbr.rel (!%p10_p5) target bundleno = 2 (0x2), region = 62 }

// kernel: tile.8
= control target key start
LH: loop header
LB: loop body
LE: loop exit
PB: predicated region body
PF: predicated region fallthrough
CT: control target
= control target key end

     0   :  { %s22_s0 = inlined_call_operand.vmem [shape: f32[64], index: 0, kind: input, shape index: {}]   ;;  %s23_s1 = inlined_call_operand.vmem [shape: f32[4,64], index: 1, kind: output, shape index: {}]  }
   0x1   :  { %v4_v0 = vld [vmem:[%s22_s0] ss:$0 sm:$0xff] }
   0x2   :  { %5 = vst [vmem:[%s23_s1] sm:$0xf] %v4_v0 }

// kernel: tile.9
= control target key start
LH: loop header
LB: loop body
LE: loop exit
PB: predicated region body
PF: predicated region fallthrough
CT: control target
= control target key end

     0   :  { %s6_s8 = smov 3  ;;  %vm8_vm0 = vcmask 523264   ;;  %s30_s9 = smov 64   ;;  %vm15_vm1 = vcmask 1048064   ;;  %s50_s0 = inlined_call_operand.vmem [shape: f32[4,64], index: 0, kind: input, shape index: {}]   ;;  %s51_s1 = inlined_call_operand.vmem [shape: f32[1,256], index: 1, kind: output, shape index: {}]  }
   0x1   :  { %v4_v0 = vld [vmem:[%s50_s0] sm:$0xf]  ;;  %s11_s0 = smov 3 }
   0x2   :  { %5 = vst [vmem:[#allocation1] sm:$0xf] %v4_v0 }
   0x9   :  { %v12_v1 = vld [vmem:[#allocation1 + $0x1] ss:$2 sm:%s11_s0]   ;;  %v7_v2 = vld [vmem:[#allocation1] ss:$2 sm:%s6_s8]  }
   0xa   :  { %13 = vrot.lane.b32.xlu0 %v12_v1, %s30_s9  ;;  %9 = vst.msk [vmem:[#allocation0] ss:$8 sm:$0x3] %vm8_vm0, %v7_v2  }
  0x7c   :  { %v14_v3 = vpop.permute.xlu0 %13  }
  0x7d   :  { %16 = vst.msk [vmem:[#allocation0] ss:$8 sm:$0x3] %vm15_vm1, %v14_v3  }
  0x84   :  { %v20_v4 = vld [vmem:[#allocation0] sm:$0x1]  ;;  %v24_v5 = vld [vmem:[#allocation0 + $0x8] sm:$0x1] }
  0x85   :  { %22 = vst [vmem:[%s51_s1] sm:$0x1] %v20_v4  ;;  %28 = vst [vmem:[%s51_s1 + $0x1] sm:$0x1] %v24_v5 }

// kernel: unet1x3_forward.11
= control target key start
LH: loop header
LB: loop body
LE: loop exit
PB: predicated region body
PF: predicated region fallthrough
CT: control target
= control target key end

     0   :  { %s1904_s18 = smov 0   ;;  %s1906_s19 = smov 0   ;;  %s2362_s0 = inlined_call_operand.vmem [shape: bf16[2,160,64], index: 0, kind: input, shape index: {}, may-alias: {0,1,2}]   ;;  %s2363_s1 = inlined_call_operand.vmem [shape: bf16[2,160,64], index: 1, kind: input, shape index: {}, may-alias: {0,1,2}]   ;;  %s2364_s2 = inlined_call_operand.vmem [shape: bf16[2,160,64], index: 2, kind: input, shape index: {}, may-alias: {0,1,2}]   ;;  %s2365_s3 = inlined_call_operand.vmem [shape: bf16[3,192,128], index: 3, kind: input, shape index: {}]   ;;  %s2366_s4 = inlined_call_operand.vmem [shape: f32[1,128], index: 4, kind: input, shape index: {}]   ;;  %s2367_s5 = inlined_call_operand.vmem [shape: bf16[2,128,128], index: 5, kind: output, shape index: {}]  }
   0x1   :  { %s1908_s20 = smov 0  }
   0x2 LB: > { %s27_s21 = sadd.s32 1, %s1866_s19  ;;  %p1538_p0 = scmp.ge.s32.totalorder %s1870_s20, 1  ;;  %s1870_s20 = sphi %s1908_s20, %s15_s20   ;;  %s1866_s19 = sphi %s1906_s19, %s2369_s19   ;;  %s1862_s18 = sphi %s1904_s18, %s2368_s18  }
   0x3   : > { %p29_p1 = scmp.ge.s32.totalorder %s27_s21, 2  ;;  %p286_p2 = scmp.lt.s32.totalorder %s1870_s20, 3 }
   0x5   : > { %s2371_s21 = smov (%p29_p1, %s27_s21), 0  ;;  %p287_p3 = pnand %p1538_p0, %p286_p2 }
   0x6   : > { %p358_p4 = scmp.lt.s32.totalorder (!%p287_p3), %s1862_s18, 1  ;;  %v1812_v0 = vld [vmem:[%s2365_s3] sm:$0xff] (!%p287_p3)   ;;  %v1872_v1 = vmov (!%p287_p3), 0   ;;  %v1814_v3 = vld [vmem:[%s2365_s3 + $0x8] sm:$0xff] (!%p287_p3)   ;;  %vm490_vm0 = vsmask.f32 (!%p287_p3), 7424 }
   0x7   : > { %290 = sbr.rel (%p287_p3) target bundleno = 459 (0x1cb), region = 40  ;;  %966 = vmatprep.subr.bf16.mxu1 (!%p287_p3), %v1872_v1  ;;  %794 = vmatprep.subr.bf16.mxu0 (!%p287_p3), %v1872_v1  ;;  %v1813_v2 = vld [vmem:[%s2365_s3 + $0x60] sm:$0xff] (!%p287_p3)   ;;  %v1815_v4 = vld [vmem:[%s2365_s3 + $0x68] sm:$0xff] (!%p287_p3)   ;;  %v1816_v5 = vld [vmem:[%s2365_s3 + $0x10] sm:$0xff] (!%p287_p3)   ;;  %v1964_v9 = vrot.slane (!%p287_p3), %v1872_v1, 1  ;;  %s1873_s25 = smov (!%p287_p3), 64  }
   0x8   : > { %967 = vmatpush1.bf16.msra.mxu1 (!%p287_p3), %v1812_v0  ;;  %795 = vmatpush1.bf16.msra.mxu0 (!%p287_p3), %v1813_v2  ;;  %v1817_v6 = vld [vmem:[%s2365_s3 + $0x70] sm:$0xff] (!%p287_p3)   ;;  %vm596_vm1 = vcmask (!%p287_p3), 1046528   ;;  %vm618_vm2 = vcmask (!%p287_p3), 523264   ;;  %v1818_v53 = vld [vmem:[%s2365_s3 + $0x18] sm:$0xff] (!%p287_p3)   ;;  %v1820_v57 = vld [vmem:[%s2365_s3 + $0x20] sm:$0xff] (!%p287_p3)  }
   0x9   : > { %968 = vmatprep.subr.bf16.mxu1 (!%p287_p3), %v1872_v1  ;;  %796 = vmatprep.subr.bf16.mxu0 (!%p287_p3), %v1872_v1  ;;  %v1819_v56 = vld [vmem:[%s2365_s3 + $0x78] sm:$0xff] (!%p287_p3)   ;;  %v1821_v63 = vld [vmem:[%s2365_s3 + $0x80] sm:$0xff] (!%p287_p3)  }
   0xc   : > { %969 = vmatpush1.bf16.msra.mxu1 (!%p287_p3), %v1814_v3  ;;  %797 = vmatpush1.bf16.msra.mxu0 (!%p287_p3), %v1815_v4 }
   0xd   : > { %970 = vmatprep.subr.bf16.mxu1 (!%p287_p3), %v1872_v1  ;;  %798 = vmatprep.subr.bf16.mxu0 (!%p287_p3), %v1872_v1 }
   0xe   : > { %s2373_s18 = smov (!%p358_p4, %s1862_s18), 1 }
   0xf   : > { %s1937_s28 = smul.u32 80, %s2373_s18  ;;  %s1685_s26 = sshll.u32 %s2373_s18, 6 }
  0x10   : > { %971 = vmatpush1.bf16.msra.mxu1 %v1816_v5  ;;  %799 = vmatpush1.bf16.msra.mxu0 %v1817_v6  ;;  %v1822_v6 = vld [vmem:[%s2365_s3 + $0x28] sm:$0xff]  }
  0x11   : > { %s1950_s10 = scalar_lea.vmem %s2362_s0, %s1937_s28  ;;  %s1682_s13 = sadd.s32 64, %s1937_s28  ;;  %972 = vmatprep.subr.bf16.mxu1 %v1872_v1  ;;  %800 = vmatprep.subr.bf16.mxu0 %v1872_v1 }
  0x12   : > { %v1957_v7 = vld [vmem:[%s1950_s10] sm:$0xff]   ;;  %v1960_v8 = vld [vmem:[%s1950_s10 + $0x8] sm:$0xff]   ;;  %v1967_v10 = vld [vmem:[%s1950_s10 + $0x10] sm:$0xff]   ;;  %s1684_s14 = sadd.s32 72, %s1937_s28  ;;  %s383_s17 = scalar_lea.vmem %s2363_s1, %s1682_s13 }
  0x13   : > { %v492_v11 = vshrl.u32 %v1957_v7, 16  ;;  %v494_v12 = vshll.u32 %v1957_v7, 16  ;;  %v499_v13 = vshll.u32 %v1960_v8, 16  ;;  %v503_v14 = vshrl.u32 %v1960_v8, 16  ;;  %v1977_v16 = vld [vmem:[%s1950_s10 + $0x18] sm:$0xff]   ;;  %v1981_v18 = vld [vmem:[%s1950_s10 + $0x20] sm:$0xff]   ;;  %s402_s24 = scalar_lea.vmem %s2364_s2, %s1684_s14  ;;  %s2321_s28 = scalar_lea.vmem %s2367_s5, %s1685_s26 }
  0x14   : > { %v507_v15 = vshll.u32 %v1967_v10, 16  ;;  %v511_v17 = vshrl.u32 %v1967_v10, 16  ;;  %v515_v22 = vshll.u32 %v1977_v16, 16  ;;  %v519_v23 = vshrl.u32 %v1977_v16, 16  ;;  %v1989_v27 = vld [vmem:[%s1950_s10 + $0x28] sm:$0xff]   ;;  %v1996_v32 = vld [vmem:[%s1950_s10 + $0x30] sm:$0xff]   ;;  %973 = vmatpush1.bf16.msra.mxu1 %v1818_v53  ;;  %801 = vmatpush1.bf16.msra.mxu0 %v1819_v56 }
  0x15   : > { %v496_v19 = vrot.slane %v494_v12, 1  ;;  %v501_v20 = vrot.slane %v499_v13, 1  ;;  %v523_v24 = vshll.u32 %v1981_v18, 16  ;;  %v527_v28 = vshrl.u32 %v1981_v18, 16  ;;  %v1999_v33 = vld [vmem:[%s1950_s10 + $0x38] sm:$0xff]   ;;  %v2013_v41 = vld [vmem:[%s383_s17] sm:$0xff]   ;;  %974 = vmatprep.subr.bf16.mxu1 %v1872_v1  ;;  %802 = vmatprep.subr.bf16.mxu0 %v1872_v1 }
  0x16   : > { %v509_v21 = vrot.slane %v507_v15, 1  ;;  %v517_v30 = vrot.slane %v515_v22, 1  ;;  %v531_v35 = vshll.u32 %v1989_v27, 16  ;;  %v535_v36 = vshrl.u32 %v1989_v27, 16  ;;  %v2021_v50 = vld [vmem:[%s402_s24] sm:$0xff]   ;;  %v1824_v22 = vld [vmem:[%s2365_s3 + $0x30] sm:$0xff]  }
  0x17   : > { %v497_v25 = vor.u32 %v496_v19, %v492_v11  ;;  %v505_v26 = vor.u32 %v503_v14, %v501_v20  ;;  %v525_v31 = vrot.slane %v523_v24, 1  ;;  %v539_v40 = vshll.u32 %v1996_v32, 16  ;;  %v1823_v14 = vld [vmem:[%s2365_s3 + $0x88] sm:$0xff]  }
  0x18   : > { %v513_v29 = vor.u32 %v511_v17, %v509_v21  ;;  %v521_v39 = vor.u32 %v519_v23, %v517_v30  ;;  %v533_v43 = vrot.slane %v531_v35, 1  ;;  %v543_v44 = vshrl.u32 %v1996_v32, 16  ;;  %975 = vmatpush1.bf16.msra.mxu1 %v1820_v57  ;;  %803 = vmatpush1.bf16.msra.mxu0 %v1821_v63  ;;  %v1832_v35 = vld [vmem:[%s2365_s3 + $0x50] sm:$0xff]   ;;  %v1841_v56 = vld [vmem:[%s2365_s3 + $0xe8] sm:$0xff]   ;;  %v1844_v63 = vld [vmem:[%s2365_s3 + $0x100] sm:$0xff]  }
  0x19   : > { %v502_v34 = vsel %vm490_vm0, %v497_v25, %v501_v20  ;;  %v510_v37 = vsel %vm490_vm0, %v505_v26, %v509_v21  ;;  %v529_v42 = vor.u32 %v527_v28, %v525_v31  ;;  %v547_v45 = vshll.u32 %v1999_v33, 16  ;;  %976 = vmatprep.subr.bf16.mxu1 %v1872_v1  ;;  %804 = vmatprep.subr.bf16.mxu0 %v1872_v1  ;;  %v1825_v25 = vld [vmem:[%s2365_s3 + $0x90] sm:$0xff]   ;;  %v1826_v26 = vld [vmem:[%s2365_s3 + $0x38] sm:$0xff]  }
  0x1a   : > { %575 = vrot.lane.b32.xlu0 %v502_v34, %s1873_s25  ;;  %v518_v38 = vsel %vm490_vm0, %v513_v29, %v517_v30  ;;  %v526_v46 = vsel %vm490_vm0, %v521_v39, %v525_v31  ;;  %v541_v47 = vrot.slane %v539_v40, 1  ;;  %v551_v48 = vshrl.u32 %v1999_v33, 16  ;;  %v1827_v28 = vld [vmem:[%s2365_s3 + $0x98] sm:$0xff]   ;;  %v1828_v29 = vld [vmem:[%s2365_s3 + $0x40] sm:$0xff]   ;;  %v1830_v31 = vld [vmem:[%s2365_s3 + $0x48] sm:$0xff]  }
  0x1b   : > { %579 = vrot.lane.b32.xlu1 %v518_v38, %s1873_s25  ;;  %v555_v49 = vshll.u32 %v2013_v41, 16  ;;  %v537_v51 = vor.u32 %v535_v36, %v533_v43  ;;  %v559_v52 = vshrl.u32 %v2013_v41, 16  ;;  %v549_v54 = vrot.slane %v547_v45, 1  ;;  %v1829_v30 = vld [vmem:[%s2365_s3 + $0xa0] sm:$0xff]   ;;  %v1831_v34 = vld [vmem:[%s2365_s3 + $0xa8] sm:$0xff]   ;;  %v1833_v36 = vld [vmem:[%s2365_s3 + $0xb0] sm:$0xff]  }
  0x1c   : > { %v563_v55 = vshll.u32 %v2021_v50, 16  ;;  %v534_v58 = vsel %vm490_vm0, %v529_v42, %v533_v43  ;;  %v545_v59 = vor.u32 %v543_v44, %v541_v47  ;;  %v567_v0 = vshrl.u32 %v2021_v50, 16  ;;  %977 = vmatpush1.bf16.msra.mxu1 %v1822_v6  ;;  %805 = vmatpush1.bf16.msra.mxu0 %v1823_v14  ;;  %v1835_v38 = vld [vmem:[%s2365_s3 + $0xb8] sm:$0xff]   ;;  %v1836_v42 = vld [vmem:[%s2365_s3 + $0xc0] sm:$0xff]   ;;  %v1837_v45 = vld [vmem:[%s2365_s3 + $0xc8] sm:$0xff]  }
  0x1d   : > { %v542_v60 = vsel %vm490_vm0, %v537_v51, %v541_v47  ;;  %v553_v61 = vor.u32 %v551_v48, %v549_v54  ;;  %v557_v62 = vrot.slane %v555_v49, 1  ;;  %v597_v3 = vrot.slane %v1957_v7, 1  ;;  %978 = vmatprep.subr.bf16.mxu1 %v1872_v1  ;;  %806 = vmatprep.subr.bf16.mxu0 %v1872_v1  ;;  %v1838_v47 = vld [vmem:[%s2365_s3 + $0xd0] sm:$0xff]   ;;  %v1839_v51 = vld [vmem:[%s2365_s3 + $0xd8] sm:$0xff]  }
  0x1e   : > { %577 = vrot.lane.b32.xlu0 %v510_v37, %s1873_s25  ;;  %v565_v2 = vrot.slane %v563_v55, 1  ;;  %v550_v4 = vsel %vm490_vm0, %v545_v59, %v549_v54  ;;  %v598_v11 = vrot.slane %v1960_v8, 1  ;;  %v600_v15 = vrot.slane %v1967_v10, 1  ;;  %v1834_v37 = vld [vmem:[%s2365_s3 + $0x58] sm:$0xff]  }
  0x1f   : > { %581 = vrot.lane.b32.xlu1 %v526_v46, %s1873_s25  ;;  %v561_v5 = vor.u32 %v559_v52, %v557_v62  ;;  %v558_v12 = vsel %vm490_vm0, %v553_v61, %v557_v62  ;;  %v602_v19 = vrot.slane %v1977_v16, 1  ;;  %v614_v39 = vrot.slane %v2021_v50, 1  ;;  %v1840_v52 = vld [vmem:[%s2365_s3 + $0xe0] sm:$0xff]   ;;  %v1843_v61 = vld [vmem:[%s2365_s3 + $0xf8] sm:$0xff]  }
  0x20   : > { %v569_v13 = vor.u32 %v567_v0, %v565_v2  ;;  %v599_v17 = vsel %vm596_vm1, %v597_v3, %v598_v11  ;;  %v601_v20 = vsel %vm596_vm1, %v598_v11, %v600_v15  ;;  %979 = vmatpush1.bf16.msra.mxu1 %v1824_v22  ;;  %807 = vmatpush1.bf16.msra.mxu0 %v1825_v25  ;;  %v604_v48 = vrot.slane %v1981_v18, 1  ;;  %v1845_v3 = vld [vmem:[%s2365_s3 + $0x108] sm:$0xff]  }
  0x21   : > { %1610 = vmatprep.mubr.msk.bf16.mxu1 %vm618_vm2, %v599_v17  ;;  %v566_v21 = vsel %vm490_vm0, %v561_v5, %v565_v2  ;;  %v2072_v23 = vsel %vm596_vm1, %v600_v15, %v602_v19  ;;  %1590 = vmatprep.mubr.msk.bf16.mxu0 %vm618_vm2, %v601_v20  ;;  %v2131_v40 = vsel %vm596_vm1, %v614_v39, %v1964_v9  ;;  %v606_v53 = vrot.slane %v1989_v27, 1  ;;  %v1846_v5 = vld [vmem:[%s2365_s3 + $0x110] sm:$0xff]  }
  0x22   : > { %583 = vrot.lane.b32.xlu0 %v534_v58, %s1873_s25  ;;  %v574_v24 = vsel %vm490_vm0, %v569_v13, %v1964_v9  ;;  %980 = vmatprep.subr.bf16.mxu1 %v1872_v1  ;;  %v2163_v49 = vsel %vm596_vm1, %v602_v19, %v604_v48  ;;  %v608_v57 = vrot.slane %v1996_v32, 1  ;;  %v1842_v58 = vld [vmem:[%s2365_s3 + $0xf0] sm:$0xff]   ;;  %v610_v62 = vrot.slane %v1999_v33, 1 }
  0x23   : > { %585 = vrot.lane.b32.xlu1 %v542_v60, %s1873_s25  ;;  %808 = vmatprep.subr.bf16.mxu0 %v1872_v1  ;;  %v2187_v55 = vsel %vm596_vm1, %v604_v48, %v606_v53 }
  0x24   : > { %981 = vmatpush1.bf16.msra.mxu1 %v1826_v26  ;;  %809 = vmatpush1.bf16.msra.mxu0 %v1827_v28  ;;  %v2210_v60 = vsel %vm596_vm1, %v606_v53, %v608_v57  ;;  %v611_v2 = vsel %vm596_vm1, %v608_v57, %v610_v62 }
  0x25   : > { %982 = vmatprep.subr.bf16.mxu1 %v1872_v1  ;;  %810 = vmatprep.subr.bf16.mxu0 %v1872_v1 }
  0x26   : > { %587 = vrot.lane.b32.xlu0 %v550_v4, %s1873_s25  ;;  %v612_v4 = vrot.slane %v2013_v41, 1 }
  0x27   : > { %589 = vrot.lane.b32.xlu1 %v558_v12, %s1873_s25  ;;  %v1847_v12 = vld [vmem:[%s2365_s3 + $0x118] sm:$0xff]  }
  0x28   : > { %983 = vmatpush1.bf16.msra.mxu1 %v1828_v29  ;;  %811 = vmatpush1.bf16.msra.mxu0 %v1829_v30  ;;  %v613_v11 = vsel %vm596_vm1, %v610_v62, %v612_v4  ;;  %v615_v14 = vsel %vm596_vm1, %v612_v4, %v614_v39 }
  0x29   : > { %984 = vmatprep.subr.bf16.mxu1 %v1872_v1  ;;  %812 = vmatprep.subr.bf16.mxu0 %v1872_v1 }
  0x2a   : > { %591 = vrot.lane.b32.xlu0 %v566_v21, %s1873_s25 }
  0x2b   : > { %593 = vrot.lane.b32.xlu1 %v574_v24, %s1873_s25 }
  0x2c   : > { %985 = vmatpush1.bf16.msra.mxu1 %v1830_v31  ;;  %813 = vmatpush1.bf16.msra.mxu0 %v1831_v34 }
  0x2d   : > { %986 = vmatprep.subr.bf16.mxu1 %v1872_v1  ;;  %814 = vmatprep.subr.bf16.mxu0 %v1872_v1 }
  0x30   : > { %987 = vmatpush1.bf16.msra.mxu1 %v1832_v35  ;;  %815 = vmatpush1.bf16.msra.mxu0 %v1833_v36 }
  0x31   : > { %988 = vmatprep.subr.bf16.mxu1 %v1872_v1  ;;  %816 = vmatprep.subr.bf16.mxu0 %v1872_v1 }
  0x34   : > { %989 = vmatpush1.bf16.msra.mxu1 %v1834_v37  ;;  %817 = vmatpush1.bf16.msra.mxu0 %v1835_v38 }
  0x35   : > { %1749 = vmatprep.subr.bf16.mxu1 %v1872_v1  ;;  %1163 = vmatprep.subr.bf16.mxu0 %v1872_v1 }
  0x8c   : > { %v576_v43 = vpop.permute.xlu0 %575 }
  0x8d   : > { %v620_v44 = vsel %vm618_vm2, %v1957_v7, %v576_v43  ;;  %v580_v7 = vpop.permute.xlu1 %579 }
  0x8e   : > { %999 = vmatmul.mubr.bf16.vlgmr.msra.gmra.mrb[0].mxu1 %v620_v44 }
  0x8f   : > { %1761 = vmatpush1.bf16.msra.mxu1 %v1836_v42  ;;  %1611 = vmatprep.mubr.msk.bf16.mxu1 %vm618_vm2, %v601_v20 }
  0x90   : > { %v578_v46 = vpop.permute.xlu0 %577  ;;  %1750 = vmatprep.subr.bf16.mxu1 %v1872_v1 }
  0x91   : > { %v623_v9 = vsel %vm618_vm2, %v1960_v8, %v578_v46  ;;  %v2155_v8 = vsel %vm618_vm2, %v1967_v10, %v580_v7  ;;  %v582_v10 = vpop.permute.xlu1 %581 }
  0x92   : > { %827 = vmatmul.mubr.bf16.vlgmr.msra.gmra.mrb[0].mxu0 %v623_v9  ;;  %v2181_v54 = vsel %vm618_vm2, %v1977_v16, %v582_v10 }
  0x93   : > { %1164 = vmatpush1.bf16.msra.mxu0 %v1836_v42  ;;  %1762 = vmatpush1.bf16.msra.mxu1 %v1837_v45 }
  0x94   : > { %1165 = vmatprep.subr.bf16.mxu0 %v1872_v1  ;;  %1591 = vmatprep.mubr.msk.bf16.mxu0 %vm618_vm2, %v2072_v23  ;;  %v584_v16 = vpop.permute.xlu0 %583 }
  0x95   : > { %1751 = vmatprep.subr.bf16.mxu1 %v1872_v1  ;;  %v2205_v59 = vsel %vm618_vm2, %v1981_v18, %v584_v16  ;;  %v586_v18 = vpop.permute.xlu1 %585 }
  0x96   : > { %1007 = vmatmul.mubr.bf16.gmra.mrb[4].mxu1 %v623_v9  ;;  %v635_v0 = vsel %vm618_vm2, %v1989_v27, %v586_v18 }
  0x97   : > { %1166 = vmatpush1.bf16.msra.mxu0 %v1837_v45  ;;  %1612 = vmatprep.mubr.msk.bf16.mxu1 %vm618_vm2, %v2072_v23 }
  0x98   : > { %1167 = vmatprep.subr.bf16.mxu0 %v1872_v1  ;;  %1763 = vmatpush1.bf16.msra.mxu1 %v1838_v47  ;;  %v588_v27 = vpop.permute.xlu0 %587 }
  0x99   : > { %1752 = vmatprep.subr.bf16.mxu1 %v1872_v1  ;;  %v638_v6 = vsel %vm618_vm2, %v1996_v32, %v588_v27  ;;  %v590_v13 = vpop.permute.xlu1 %589 }
  0x9a   : > { %835 = vmatmul.mubr.bf16.gmra.mrb[4].mxu0 %v2155_v8  ;;  %v641_v32 = vsel %vm618_vm2, %v1999_v33, %v590_v13 }
  0x9b   : > { %1168 = vmatpush1.bf16.msra.mxu0 %v1838_v47  ;;  %1592 = vmatprep.mubr.msk.bf16.mxu0 %vm618_vm2, %v2163_v49 }
  0x9c   : > { %1169 = vmatprep.subr.bf16.mxu0 %v1872_v1  ;;  %1764 = vmatpush1.bf16.msra.mxu1 %v1839_v51  ;;  %v592_v15 = vpop.permute.xlu0 %591 }
  0x9d   : > { %1753 = vmatprep.subr.bf16.mxu1 %v1872_v1  ;;  %v644_v17 = vsel %vm618_vm2, %v2013_v41, %v592_v15 }
  0x9e   : > { %1015 = vmatmul.mubr.bf16.gmra.mrb[8].mxu1 %v2155_v8 }
  0x9f   : > { %1170 = vmatpush1.bf16.msra.mxu0 %v1839_v51  ;;  %1613 = vmatprep.mubr.msk.bf16.mxu1 %vm618_vm2, %v2163_v49 }
  0xa0   : > { %1171 = vmatprep.subr.bf16.mxu0 %v1872_v1  ;;  %1765 = vmatpush1.bf16.msra.mxu1 %v1840_v52 }
  0xa1   : > { %1754 = vmatprep.subr.bf16.mxu1 %v1872_v1 }
  0xa2   : > { %843 = vmatmul.mubr.bf16.gmra.mrb[8].mxu0 %v2181_v54 }
  0xa3   : > { %1172 = vmatpush1.bf16.msra.mxu0 %v1840_v52  ;;  %1593 = vmatprep.mubr.msk.bf16.mxu0 %vm618_vm2, %v2187_v55 }
  0xa4   : > { %1173 = vmatprep.subr.bf16.mxu0 %v1872_v1  ;;  %1766 = vmatpush1.bf16.msra.mxu1 %v1841_v56 }
  0xa5   : > { %1755 = vmatprep.subr.bf16.mxu1 %v1872_v1 }
  0xa6   : > { %1023 = vmatmul.mubr.bf16.gmra.mrb[12].mxu1 %v2181_v54 }
  0xa7   : > { %1614 = vmatprep.mubr.msk.bf16.mxu1 %vm618_vm2, %v2187_v55  ;;  %1174 = vmatpush1.bf16.msra.mxu0 %v1841_v56 }
  0xa8   : > { %1175 = vmatprep.subr.bf16.mxu0 %v1872_v1  ;;  %1767 = vmatpush1.bf16.msra.mxu1 %v1842_v58 }
  0xa9   : > { %1756 = vmatprep.subr.bf16.mxu1 %v1872_v1 }
  0xaa   : > { %851 = vmatmul.mubr.bf16.gmra.mrb[12].mxu0 %v2205_v59 }
  0xab   : > { %1594 = vmatprep.mubr.msk.bf16.mxu0 %vm618_vm2, %v2210_v60  ;;  %1176 = vmatpush1.bf16.msra.mxu0 %v1842_v58 }
  0xac   : > { %1177 = vmatprep.subr.bf16.mxu0 %v1872_v1  ;;  %1768 = vmatpush1.bf16.msra.mxu1 %v1843_v61 }
  0xad   : > { %1757 = vmatprep.subr.bf16.mxu1 %v1872_v1 }
  0xae   : > { %1031 = vmatmul.mubr.bf16.gmra.mrb[16].mxu1 %v2205_v59 }
  0xaf   : > { %1615 = vmatprep.mubr.msk.bf16.mxu1 %vm618_vm2, %v2210_v60  ;;  %1178 = vmatpush1.bf16.msra.mxu0 %v1843_v61 }
  0xb0   : > { %1179 = vmatprep.subr.bf16.mxu0 %v1872_v1  ;;  %1769 = vmatpush1.bf16.msra.mxu1 %v1844_v63 }
  0xb1   : > { %1758 = vmatprep.subr.bf16.mxu1 %v1872_v1 }
  0xb2   : > { %859 = vmatmul.mubr.bf16.gmra.mrb[16].mxu0 %v635_v0 }
  0xb3   : > { %1595 = vmatprep.mubr.msk.bf16.mxu0 %vm618_vm2, %v611_v2  ;;  %1180 = vmatpush1.bf16.msra.mxu0 %v1844_v63 }
  0xb4   : > { %1181 = vmatprep.subr.bf16.mxu0 %v1872_v1  ;;  %1770 = vmatpush1.bf16.msra.mxu1 %v1845_v3 }
  0xb5   : > { %1759 = vmatprep.subr.bf16.mxu1 %v1872_v1 }
  0xb6   : > { %1039 = vmatmul.mubr.bf16.gmra.mrb[20].mxu1 %v635_v0 }
  0xb7   : > { %1616 = vmatprep.mubr.msk.bf16.mxu1 %vm618_vm2, %v611_v2  ;;  %1182 = vmatpush1.bf16.msra.mxu0 %v1845_v3 }
  0xb8   : > { %1183 = vmatprep.subr.bf16.mxu0 %v1872_v1  ;;  %1771 = vmatpush1.bf16.msra.mxu1 %v1846_v5 }
  0xb9   : > { %1760 = vmatprep.subr.bf16.mxu1 %v1872_v1 }
  0xba   : > { %867 = vmatmul.mubr.bf16.gmra.mrb[20].mxu0 %v638_v6 }
  0xbb   : > { %1596 = vmatprep.mubr.msk.bf16.mxu0 %vm618_vm2, %v613_v11  ;;  %1184 = vmatpush1.bf16.msra.mxu0 %v1846_v5 }
  0xbc   : > { %1772 = vmatpush1.bf16.msra.mxu1 %v1847_v12  ;;  %1185 = vmatprep.subr.bf16.mxu0 %v1872_v1  ;;  %v594_v1 = vpop.permute.xlu1 %593 }
  0xbd   : > { %v647_v33 = vsel %vm618_vm2, %v2021_v50, %v594_v1 }
  0xbe   : > { %1047 = vmatmul.mubr.bf16.gmra.mrb[24].mxu1 %v638_v6 }
  0xbf   : > { %1617 = vmatprep.mubr.msk.bf16.mxu1 %vm618_vm2, %v613_v11  ;;  %1186 = vmatpush1.bf16.msra.mxu0 %v1847_v12 }
  0xc2   : > { %875 = vmatmul.mubr.bf16.gmra.mrb[24].mxu0 %v641_v32 }
  0xc3   : > { %1597 = vmatprep.mubr.msk.bf16.mxu0 %vm618_vm2, %v615_v14 }
  0xc6   : > { %1055 = vmatmul.mubr.bf16.gmra.mrb[28].mxu1 %v641_v32 }
  0xc7   : > { %1658 = vmatprep.mubr.msk.bf16.mxu1 %vm618_vm2, %v611_v2 }
  0xca   : > { %883 = vmatmul.mubr.bf16.gmra.mrb[28].mxu0 %v644_v17 }
  0xcb   : > { %1654 = vmatprep.mubr.msk.bf16.mxu0 %vm618_vm2, %v2072_v23 }
  0xce   : > { %1228 = vmatmul.mubr.bf16.vlgmr.msra.gmra.mrb[32].mxu1 %v638_v6 }
  0xcf   : > { %1659 = vmatprep.mubr.msk.bf16.mxu1 %vm618_vm2, %v613_v11 }
  0xd2   : > { %1196 = vmatmul.mubr.bf16.vlgmr.msra.gmra.mrb[32].mxu0 %v2155_v8 }
  0xd3   : > { %1655 = vmatprep.mubr.msk.bf16.mxu0 %vm618_vm2, %v2163_v49 }
  0xd6   : > { %1236 = vmatmul.mubr.bf16.gmra.mrb[36].mxu1 %v641_v32 }
  0xd7   : > { %1660 = vmatprep.mubr.msk.bf16.mxu1 %vm618_vm2, %v615_v14 }
  0xda   : > { %1204 = vmatmul.mubr.bf16.gmra.mrb[36].mxu0 %v2181_v54 }
  0xdb   : > { %1656 = vmatprep.mubr.msk.bf16.mxu0 %vm618_vm2, %v2187_v55 }
  0xde   : > { %1244 = vmatmul.mubr.bf16.gmra.mrb[40].mxu1 %v644_v17 }
  0xdf   : > { %1661 = vmatprep.mubr.msk.bf16.mxu1 %vm618_vm2, %v2131_v40 }
  0xe2   : > { %1212 = vmatmul.mubr.bf16.gmra.mrb[40].mxu0 %v2205_v59 }
  0xe3   : > { %1657 = vmatprep.mubr.msk.bf16.mxu0 %vm618_vm2, %v2210_v60 }
  0xe6   : > { %1252 = vmatmul.mubr.bf16.gmra.mrb[44].mxu1 %v647_v33 }
  0xea   : > { %1220 = vmatmul.mubr.bf16.gmra.mrb[44].mxu0 %v635_v0 }
 0x161   : > { %v1000_v41 = vpop.f32.mrb[0].mxu1 }
 0x162   : > { %v1002_v19 = vpop.f32.mrb[1].mxu1 }
 0x163   : > { %v1003_v20 = vpop.f32.mrb[2].mxu1 }
 0x164   : > { %v1005_v21 = vpop.f32.mrb[3].mxu1 }
 0x165   : > { %v828_v22 = vpop.f32.mrb[0].mxu0 }
 0x166   : > { %v2282_v23 = vadd.f32 %v1000_v41, %v828_v22  ;;  %v830_v24 = vpop.f32.mrb[1].mxu0 }
 0x167   : > { %v831_v25 = vpop.f32.mrb[2].mxu0 }
 0x168   : > { %v2284_v26 = vadd.f32 %v1003_v20, %v831_v25  ;;  %v833_v28 = vpop.f32.mrb[3].mxu0 }
 0x169   : > { %v1008_v29 = vpop.f32.mrb[4].mxu1 }
 0x16a   : > { %v1010_v30 = vpop.f32.mrb[5].mxu1 }
 0x16b   : > { %v1011_v50 = vpop.f32.mrb[6].mxu1 }
 0x16c   : > { %v1013_v31 = vpop.f32.mrb[7].mxu1 }
 0x16d   : > { %v836_v34 = vpop.f32.mrb[4].mxu0 }
 0x16e   : > { %v2286_v35 = vadd.f32 %v1008_v29, %v836_v34  ;;  %v838_v36 = vpop.f32.mrb[5].mxu0 }
 0x16f   : > { %v839_v37 = vpop.f32.mrb[6].mxu0 }
 0x170   : > { %v2288_v38 = vadd.f32 %v1011_v50, %v839_v37  ;;  %v841_v39 = vpop.f32.mrb[7].mxu0 }
 0x171   : > { %v1016_v40 = vpop.f32.mrb[8].mxu1 }
 0x172   : > { %v1018_v42 = vpop.f32.mrb[9].mxu1 }
 0x173   : > { %v1019_v43 = vpop.f32.mrb[10].mxu1  ;;  %v2309_v42 = vld [vmem:[%s2366_s4] ss:$0 sm:$0xff] }
 0x174   : > { %v1021_v44 = vpop.f32.mrb[11].mxu1 }
 0x175   : > { %v844_v45 = vpop.f32.mrb[8].mxu0 }
 0x176   : > { %v2290_v46 = vadd.f32 %v1016_v40, %v844_v45  ;;  %v846_v9 = vpop.f32.mrb[9].mxu0 }
 0x177   : > { %v847_v7 = vpop.f32.mrb[10].mxu0 }
 0x178   : > { %v2292_v47 = vadd.f32 %v1019_v43, %v847_v7  ;;  %v849_v48 = vpop.f32.mrb[11].mxu0 }
 0x179   : > { %v1024_v8 = vpop.f32.mrb[12].mxu1 }
 0x17a   : > { %v1026_v49 = vpop.f32.mrb[13].mxu1 }
 0x17b   : > { %v1027_v51 = vpop.f32.mrb[14].mxu1 }
 0x17c   : > { %v1029_v10 = vpop.f32.mrb[15].mxu1 }
 0x17d   : > { %v852_v52 = vpop.f32.mrb[12].mxu0 }
 0x17e   : > { %v2294_v53 = vadd.f32 %v1024_v8, %v852_v52  ;;  %v854_v54 = vpop.f32.mrb[13].mxu0 }
 0x17f   : > { %v855_v55 = vpop.f32.mrb[14].mxu0 }
 0x180   : > { %v2296_v56 = vadd.f32 %v1027_v51, %v855_v55  ;;  %v857_v16 = vpop.f32.mrb[15].mxu0 }
 0x181   : > { %v1032_v57 = vpop.f32.mrb[16].mxu1 }
 0x182   : > { %v1034_v58 = vpop.f32.mrb[17].mxu1 }
 0x183   : > { %v1035_v59 = vpop.f32.mrb[18].mxu1 }
 0x184   : > { %v1037_v60 = vpop.f32.mrb[19].mxu1 }
 0x185   : > { %v860_v61 = vpop.f32.mrb[16].mxu0 }
 0x186   : > { %v1033_v18 = vadd.f32 %v1032_v57, %v860_v61  ;;  %v862_v62 = vpop.f32.mrb[17].mxu0 }
 0x187   : > { %v863_v63 = vpop.f32.mrb[18].mxu0 }
 0x188   : > { %v1036_v0 = vadd.f32 %v1035_v59, %v863_v63  ;;  %v865_v2 = vpop.f32.mrb[19].mxu0 }
 0x189   : > { %v1040_v3 = vpop.f32.mrb[20].mxu1 }
 0x18a   : > { %v1042_v27 = vpop.f32.mrb[21].mxu1 }
 0x18b   : > { %v1043_v4 = vpop.f32.mrb[22].mxu1 }
 0x18c   : > { %v1045_v5 = vpop.f32.mrb[23].mxu1 }
 0x18d   : > { %v868_v6 = vpop.f32.mrb[20].mxu0 }
 0x18e   : > { %v1041_v11 = vadd.f32 %v1040_v3, %v868_v6  ;;  %v870_v12 = vpop.f32.mrb[21].mxu0 }
 0x18f   : > { %v871_v13 = vpop.f32.mrb[22].mxu0 }
 0x190   : > { %v1044_v32 = vadd.f32 %v1043_v4, %v871_v13  ;;  %v873_v14 = vpop.f32.mrb[23].mxu0 }
 0x191   : > { %v1048_v15 = vpop.f32.mrb[24].mxu1 }
 0x192   : > { %v1050_v17 = vpop.f32.mrb[25].mxu1 }
 0x193   : > { %v1051_v1 = vpop.f32.mrb[26].mxu1 }
 0x194   : > { %v1053_v33 = vpop.f32.mrb[27].mxu1 }
 0x195   : > { %v876_v41 = vpop.f32.mrb[24].mxu0 }
 0x196   : > { %v2298_v19 = vadd.f32 %v1048_v15, %v876_v41  ;;  %v878_v20 = vpop.f32.mrb[25].mxu0 }
 0x197   : > { %v879_v21 = vpop.f32.mrb[26].mxu0 }
 0x198   : > { %v2300_v22 = vadd.f32 %v1051_v1, %v879_v21  ;;  %v881_v24 = vpop.f32.mrb[27].mxu0 }
 0x199   : > { %v1056_v25 = vpop.f32.mrb[28].mxu1 }
 0x19a   : > { %v1058_v28 = vpop.f32.mrb[29].mxu1 }
 0x19b   : > { %v1059_v29 = vpop.f32.mrb[30].mxu1 }
 0x19c   : > { %v1061_v30 = vpop.f32.mrb[31].mxu1 }
 0x19d   : > { %v884_v50 = vpop.f32.mrb[28].mxu0 }
 0x19e   : > { %v2302_v31 = vadd.f32 %v1056_v25, %v884_v50  ;;  %v886_v34 = vpop.f32.mrb[29].mxu0 }
 0x19f   : > { %v887_v36 = vpop.f32.mrb[30].mxu0 }
 0x1a0   : > { %v2304_v37 = vadd.f32 %v1059_v29, %v887_v36  ;;  %v889_v39 = vpop.f32.mrb[31].mxu0 }
 0x1a1   : > { %v1229_v40 = vpop.f32.mrb[32].mxu1 }
 0x1a2   : > { %v1268_v43 = vadd.f32 %v1229_v40, %v1033_v18  ;;  %v1231_v44 = vpop.f32.mrb[33].mxu1 }
 0x1a3   : > { %v1232_v45 = vpop.f32.mrb[34].mxu1 }
 0x1a4   : > { %v1291_v9 = vadd.f32 %v2309_v42, %v1268_v43  ;;  %v1269_v7 = vadd.f32 %v1232_v45, %v1036_v0  ;;  %v1234_v48 = vpop.f32.mrb[35].mxu1 }
 0x1a5   : > { %v1197_v8 = vpop.f32.mrb[32].mxu0 }
 0x1a6   : > { %v1307_v49 = vmul.f32 0.1, %v1291_v9  ;;  %v1292_v51 = vadd.f32 %v2309_v42, %v1269_v7  ;;  %v1260_v10 = vadd.f32 %v1197_v8, %v2282_v23  ;;  %v1199_v52 = vpop.f32.mrb[33].mxu0 }
 0x1a7   : > { %v1200_v54 = vpop.f32.mrb[34].mxu0 }
 0x1a8   : > { %v1308_v55 = vmul.f32 0.1, %v1292_v51  ;;  %v1283_v16 = vadd.f32 %v2309_v42, %v1260_v10  ;;  %v1261_v57 = vadd.f32 %v1200_v54, %v2284_v26  ;;  %v1202_v58 = vpop.f32.mrb[35].mxu0  ;;  %v1323_v59 = vmax.f32 %v1291_v9, %v1307_v49 }
 0x1a9   : > { %v1237_v60 = vpop.f32.mrb[36].mxu1 }
 0x1aa   : > { %v1324_v61 = vmax.f32 %v1292_v51, %v1308_v55  ;;  %v1299_v18 = vmul.f32 0.1, %v1283_v16  ;;  %v1284_v62 = vadd.f32 %v2309_v42, %v1261_v57  ;;  %v1270_v63 = vadd.f32 %v1237_v60, %v1041_v11  ;;  %v1239_v0 = vpop.f32.mrb[37].mxu1 }
 0x1ab   : > { %v1240_v23 = vpop.f32.mrb[38].mxu1 }
 0x1ac   : > { %v1725_v2 = vpack.c.bf16 %v1324_v61, %v1323_v59  ;;  %v1300_v3 = vmul.f32 0.1, %v1284_v62  ;;  %v1293_v26 = vadd.f32 %v2309_v42, %v1270_v63  ;;  %v1242_v27 = vpop.f32.mrb[39].mxu1  ;;  %v1271_v4 = vadd.f32 %v1240_v23, %v1044_v32 }
 0x1ad   : > { %v1205_v5 = vpop.f32.mrb[36].mxu0  ;;  %v1315_v6 = vmax.f32 %v1283_v16, %v1299_v18 }
 0x1ae   : > { %1745 = vst [vmem:[%s2321_s28 + $0x20] sm:$0xff] %v1725_v2   ;;  %v1316_v12 = vmax.f32 %v1284_v62, %v1300_v3  ;;  %v1262_v11 = vadd.f32 %v1205_v5, %v2286_v35  ;;  %v1207_v13 = vpop.f32.mrb[37].mxu0  ;;  %v1309_v14 = vmul.f32 0.1, %v1293_v26  ;;  %v1294_v15 = vadd.f32 %v2309_v42, %v1271_v4 }
 0x1af   : > { %v1208_v17 = vpop.f32.mrb[38].mxu0 }
 0x1b0   : > { %v1705_v1 = vpack.c.bf16 %v1316_v12, %v1315_v6  ;;  %v1285_v33 = vadd.f32 %v2309_v42, %v1262_v11  ;;  %v1263_v41 = vadd.f32 %v1208_v17, %v2288_v38  ;;  %v1210_v20 = vpop.f32.mrb[39].mxu0  ;;  %v1310_v21 = vmul.f32 0.1, %v1294_v15 }
 0x1b1   : > { %v1245_v32 = vpop.f32.mrb[40].mxu1  ;;  %v1325_v29 = vmax.f32 %v1293_v26, %v1309_v14 }
 0x1b2   : > { %1706 = vst [vmem:[%s2321_s28] sm:$0xff] %v1705_v1   ;;  %v1301_v24 = vmul.f32 0.1, %v1285_v33  ;;  %v1286_v25 = vadd.f32 %v2309_v42, %v1263_v41  ;;  %v1272_v28 = vadd.f32 %v1245_v32, %v2298_v19  ;;  %v1247_v35 = vpop.f32.mrb[41].mxu1  ;;  %v1326_v30 = vmax.f32 %v1294_v15, %v1310_v21 }
 0x1b3   : > { %v1248_v50 = vpop.f32.mrb[42].mxu1 }
 0x1b4   : > { %v1302_v34 = vmul.f32 0.1, %v1286_v25  ;;  %v1295_v36 = vadd.f32 %v2309_v42, %v1272_v28  ;;  %v1273_v39 = vadd.f32 %v1248_v50, %v2300_v22  ;;  %v1250_v38 = vpop.f32.mrb[43].mxu1  ;;  %v1730_v40 = vpack.c.bf16 %v1326_v30, %v1325_v29 }
 0x1b5   : > { %v1317_v43 = vmax.f32 %v1285_v33, %v1301_v24  ;;  %v1213_v44 = vpop.f32.mrb[40].mxu0 }
 0x1b6   : > { %v1318_v45 = vmax.f32 %v1286_v25, %v1302_v34  ;;  %v1311_v9 = vmul.f32 0.1, %v1295_v36  ;;  %v1296_v7 = vadd.f32 %v2309_v42, %v1273_v39  ;;  %v1264_v19 = vadd.f32 %v1213_v44, %v2290_v46  ;;  %v1215_v48 = vpop.f32.mrb[41].mxu0  ;;  %1746 = vst [vmem:[%s2321_s28 + $0x28] sm:$0xff] %v1730_v40  }
 0x1b7   : > { %v1216_v8 = vpop.f32.mrb[42].mxu0 }
 0x1b8   : > { %v1710_v49 = vpack.c.bf16 %v1318_v45, %v1317_v43  ;;  %v1312_v51 = vmul.f32 0.1, %v1296_v7  ;;  %v1287_v10 = vadd.f32 %v2309_v42, %v1264_v19  ;;  %v1218_v52 = vpop.f32.mrb[43].mxu0  ;;  %v1265_v22 = vadd.f32 %v1216_v8, %v2292_v47 }
 0x1b9   : > { %v1253_v54 = vpop.f32.mrb[44].mxu1  ;;  %v1327_v55 = vmax.f32 %v1295_v36, %v1311_v9 }
 0x1ba   : > { %1742 = vst [vmem:[%s2321_s28 + $0x8] sm:$0xff] %v1710_v49   ;;  %v1328_v16 = vmax.f32 %v1296_v7, %v1312_v51  ;;  %v1274_v57 = vadd.f32 %v1253_v54, %v2302_v31  ;;  %v1255_v58 = vpop.f32.mrb[45].mxu1  ;;  %v1303_v59 = vmul.f32 0.1, %v1287_v10  ;;  %v1288_v46 = vadd.f32 %v2309_v42, %v1265_v22 }
 0x1bb   : > { %v1256_v60 = vpop.f32.mrb[46].mxu1 }
 0x1bc   : > { %v1735_v61 = vpack.c.bf16 %v1328_v16, %v1327_v55  ;;  %v1297_v18 = vadd.f32 %v2309_v42, %v1274_v57  ;;  %v1275_v62 = vadd.f32 %v1256_v60, %v2304_v37  ;;  %v1258_v63 = vpop.f32.mrb[47].mxu1  ;;  %v1304_v0 = vmul.f32 0.1, %v1288_v46 }
 0x1bd   : > { %v1221_v47 = vpop.f32.mrb[44].mxu0  ;;  %v1319_v26 = vmax.f32 %v1287_v10, %v1303_v59 }
 0x1be   : > { %1747 = vst [vmem:[%s2321_s28 + $0x30] sm:$0xff] %v1735_v61   ;;  %v1313_v23 = vmul.f32 0.1, %v1297_v18  ;;  %v1298_v2 = vadd.f32 %v2309_v42, %v1275_v62  ;;  %v1266_v31 = vadd.f32 %v1221_v47, %v2294_v53  ;;  %v1223_v3 = vpop.f32.mrb[45].mxu0  ;;  %v1320_v27 = vmax.f32 %v1288_v46, %v1304_v0 }
 0x1bf   : > { %v1224_v4 = vpop.f32.mrb[46].mxu0 }
 0x1c0   : > { %v1314_v5 = vmul.f32 0.1, %v1298_v2  ;;  %v1289_v6 = vadd.f32 %v2309_v42, %v1266_v31  ;;  %v1267_v37 = vadd.f32 %v1224_v4, %v2296_v56  ;;  %v1226_v12 = vpop.f32.mrb[47].mxu0  ;;  %v1715_v11 = vpack.c.bf16 %v1320_v27, %v1319_v26 }
 0x1c1   : > { %v1329_v13 = vmax.f32 %v1297_v18, %v1313_v23 }
 0x1c2   : > { %v1330_v14 = vmax.f32 %v1298_v2, %v1314_v5  ;;  %v1305_v15 = vmul.f32 0.1, %v1289_v6  ;;  %v1290_v17 = vadd.f32 %v2309_v42, %v1267_v37  ;;  %1743 = vst [vmem:[%s2321_s28 + $0x10] sm:$0xff] %v1715_v11  }
 0x1c4   : > { %v1740_v53 = vpack.c.bf16 %v1330_v14, %v1329_v13  ;;  %v1306_v1 = vmul.f32 0.1, %v1290_v17  ;;  %v1321_v33 = vmax.f32 %v1289_v6, %v1305_v15 }
 0x1c6   : > { %1748 = vst [vmem:[%s2321_s28 + $0x38] sm:$0xff] %v1740_v53   ;;  %v1322_v41 = vmax.f32 %v1290_v17, %v1306_v1 }
 0x1c8   : > { %v1720_v20 = vpack.c.bf16 %v1322_v41, %v1321_v33 }
 0x1ca   : > { %1744 = vst [vmem:[%s2321_s28 + $0x18] sm:$0xff] %v1720_v20  }
 0x1cb PF: > { %s15_s20 = sadd.s32 1, %s1870_s20   ;;  %s2368_s18 = smov %s1866_s19 }
 0x1cc   : > { %p12_p5 = scmp.ge.s32.totalorder %s15_s20, 4   ;;  %s2369_s19 = smov %s2371_s21 }
 0x1ce   :  { %14 = sbr.rel (!%p12_p5) target bundleno = 2 (0x2), region = 78 }

// kernel: unet1x3_forward.12
= control target key start
LH: loop header
LB: loop body
LE: loop exit
PB: predicated region body
PF: predicated region fallthrough
CT: control target
= control target key end

     0   :  { %s2616_s18 = smov 0   ;;  %s2618_s19 = smov 0   ;;  %s3117_s0 = inlined_call_operand.vmem [shape: bf16[2,128,128], index: 0, kind: input, shape index: {}, may-alias: {0,1,2}]   ;;  %s3118_s1 = inlined_call_operand.vmem [shape: bf16[2,128,128], index: 1, kind: input, shape index: {}, may-alias: {0,1,2}]   ;;  %s3119_s2 = inlined_call_operand.vmem [shape: bf16[2,128,128], index: 2, kind: input, shape index: {}, may-alias: {0,1,2}]   ;;  %s3120_s3 = inlined_call_operand.vmem [shape: bf16[3,384,64], index: 3, kind: input, shape index: {}]   ;;  %s3121_s4 = inlined_call_operand.vmem [shape: f32[1,64], index: 4, kind: input, shape index: {}]   ;;  %s3122_s5 = inlined_call_operand.vmem [shape: bf16[2,96,64], index: 5, kind: output, shape index: {}]  }
   0x1   :  { %s2620_s20 = smov 0  }
   0x2 LB: > { %s27_s21 = sadd.s32 1, %s2579_s19  ;;  %p1895_p0 = scmp.ge.s32.totalorder %s2583_s20, 1  ;;  %s2583_s20 = sphi %s2620_s20, %s15_s20   ;;  %s2579_s19 = sphi %s2618_s19, %s3124_s19   ;;  %s2575_s18 = sphi %s2616_s18, %s3123_s18  }
   0x3   : > { %p29_p1 = scmp.ge.s32.totalorder %s27_s21, 2  ;;  %p286_p2 = scmp.lt.s32.totalorder %s2583_s20, 3 }
   0x5   : > { %s3126_s21 = smov (%p29_p1, %s27_s21), 0  ;;  %p287_p3 = pnand %p1895_p0, %p286_p2 }
   0x6   : > { %v2481_v0 = vld [vmem:[%s3120_s3 + $0x100] sm:$0xff] (!%p287_p3)   ;;  %v2484_v3 = vld [vmem:[%s3120_s3 + $0x108] sm:$0xff] (!%p287_p3)   ;;  %v2487_v6 = vld [vmem:[%s3120_s3 + $0x110] sm:$0xff] (!%p287_p3)   ;;  %p358_p4 = scmp.lt.s32.totalorder (!%p287_p3), %s2575_s18, 1  ;;  %vm562_vm0 = vcmask (!%p287_p3), 1046528   ;;  %v2585_v60 = vmov (!%p287_p3), 0  }
   0x7   : > { %290 = sbr.rel (%p287_p3) target bundleno = 378 (0x17a), region = 40  ;;  %v2482_v1 = vld [vmem:[%s3120_s3 + $0x140] sm:$0xff] (!%p287_p3)   ;;  %2113 = vmatprep.subr.bf16.mxu0 (!%p287_p3), %v2481_v0  ;;  %v2485_v4 = vld [vmem:[%s3120_s3 + $0x148] sm:$0xff] (!%p287_p3)   ;;  %v2488_v7 = vld [vmem:[%s3120_s3 + $0x150] sm:$0xff] (!%p287_p3)   ;;  %vm484_vm1 = vsmask.f32 (!%p287_p3), 7424 }
   0x8   : > { %v2483_v2 = vld [vmem:[%s3120_s3 + $0xc0] sm:$0xff] (!%p287_p3)   ;;  %2311 = vmatprep.subr.bf16.mxu1 (!%p287_p3), %v2482_v1  ;;  %v2486_v5 = vld [vmem:[%s3120_s3 + $0xc8] sm:$0xff] (!%p287_p3)   ;;  %v2489_v8 = vld [vmem:[%s3120_s3 + $0xd0] sm:$0xff] (!%p287_p3)   ;;  %v2809_v61 = vrot.slane (!%p287_p3), %v2585_v60, 1  ;;  %vm1755_vm2 = vcmask (!%p287_p3), 519168  }
   0x9   : > { %2114 = vmatpush3.bf16.msra.mxu0 (!%p287_p3), %v2483_v2  ;;  %2312 = vmatpush3.bf16.msra.mxu1 (!%p287_p3), %v2482_v1  ;;  %v2490_v9 = vld [vmem:[%s3120_s3 + $0x118] sm:$0xff] (!%p287_p3)   ;;  %v2493_v12 = vld [vmem:[%s3120_s3 + $0x120] sm:$0xff] (!%p287_p3)   ;;  %v2496_v15 = vld [vmem:[%s3120_s3 + $0x128] sm:$0xff] (!%p287_p3)  }
   0xa   : > { %2115 = vmatprep.subr.bf16.mxu0 (!%p287_p3), %v2484_v3  ;;  %2313 = vmatprep.subr.bf16.mxu1 (!%p287_p3), %v2485_v4  ;;  %v2491_v10 = vld [vmem:[%s3120_s3 + $0x158] sm:$0xff] (!%p287_p3)   ;;  %v2494_v13 = vld [vmem:[%s3120_s3 + $0x160] sm:$0xff] (!%p287_p3)   ;;  %v2497_v16 = vld [vmem:[%s3120_s3 + $0x168] sm:$0xff] (!%p287_p3)  }
   0xb   : > { %v2492_v11 = vld [vmem:[%s3120_s3 + $0xd8] sm:$0xff] (!%p287_p3)   ;;  %v2495_v14 = vld [vmem:[%s3120_s3 + $0xe0] sm:$0xff] (!%p287_p3)   ;;  %v2498_v17 = vld [vmem:[%s3120_s3 + $0xe8] sm:$0xff] (!%p287_p3)  }
   0xc   : > { %v2499_v18 = vld [vmem:[%s3120_s3 + $0x130] sm:$0xff] (!%p287_p3)   ;;  %v2502_v21 = vld [vmem:[%s3120_s3 + $0x138] sm:$0xff] (!%p287_p3)   ;;  %v2507_v31 = vld [vmem:[%s3120_s3 + $0x40] sm:$0xff] (!%p287_p3)  }
   0xd   : > { %2116 = vmatpush3.bf16.msra.mxu0 (!%p287_p3), %v2486_v5  ;;  %2314 = vmatpush3.bf16.msra.mxu1 (!%p287_p3), %v2485_v4  ;;  %v2500_v19 = vld [vmem:[%s3120_s3 + $0x170] sm:$0xff] (!%p287_p3)   ;;  %v2503_v22 = vld [vmem:[%s3120_s3 + $0x178] sm:$0xff] (!%p287_p3)   ;;  %v2508_v34 = vld [vmem:[%s3120_s3 + $0x1c0] sm:$0xff] (!%p287_p3)  }
   0xe   : > { %2117 = vmatprep.subr.bf16.mxu0 %v2487_v6  ;;  %2315 = vmatprep.subr.bf16.mxu1 %v2488_v7  ;;  %s3128_s18 = smov (!%p358_p4, %s2575_s18), 1  ;;  %v2501_v20 = vld [vmem:[%s3120_s3 + $0xf0] sm:$0xff]   ;;  %v2504_v25 = vld [vmem:[%s3120_s3 + $0xf8] sm:$0xff]   ;;  %v2510_v39 = vld [vmem:[%s3120_s3] sm:$0xff]  }
   0xf   : > { %s2695_s12 = sshll.u32 %s3128_s18, 6  ;;  %v2511_v40 = vld [vmem:[%s3120_s3 + $0x180] sm:$0xff]   ;;  %v2512_v44 = vld [vmem:[%s3120_s3 + $0x48] sm:$0xff]   ;;  %v2516_v52 = vld [vmem:[%s3120_s3 + $0x50] sm:$0xff]   ;;  %s2455_s13 = smul.u32 48, %s3128_s18 }
  0x10   : > { %s2710_s25 = scalar_lea.vmem %s3117_s0, %s2695_s12  ;;  %v2514_v46 = vld [vmem:[%s3120_s3 + $0x1c8] sm:$0xff]   ;;  %v2517_v53 = vld [vmem:[%s3120_s3 + $0x10] sm:$0xff]   ;;  %v2518_v55 = vld [vmem:[%s3120_s3 + $0x58] sm:$0xff]   ;;  %s2096_s15 = sadd.s32 48, %s2695_s12 }
  0x11   : > { %2118 = vmatpush3.bf16.msra.mxu0 %v2489_v8  ;;  %2316 = vmatpush3.bf16.msra.mxu1 %v2488_v7  ;;  %v2719_v23 = vld [vmem:[%s2710_s25 + $0x8] sm:$0xff]   ;;  %v2722_v24 = vld [vmem:[%s2710_s25 + $0x10] sm:$0xff]   ;;  %v2741_v35 = vld [vmem:[%s2710_s25 + $0x18] sm:$0xff]   ;;  %s2098_s16 = sadd.s32 56, %s2695_s12  ;;  %s383_s6 = scalar_lea.vmem %s3118_s1, %s2096_s15 }
  0x12   : > { %2119 = vmatprep.subr.bf16.mxu0 %v2490_v9  ;;  %2317 = vmatprep.subr.bf16.mxu1 %v2491_v10  ;;  %v493_v26 = vshll.u32 %v2719_v23, 16  ;;  %v497_v27 = vshrl.u32 %v2719_v23, 16  ;;  %v501_v28 = vshll.u32 %v2722_v24, 16  ;;  %v564_v29 = vrot.slane %v2719_v23, 1  ;;  %v2513_v48 = vld [vmem:[%s3120_s3 + $0x8] sm:$0xff]   ;;  %v2519_v54 = vld [vmem:[%s3120_s3 + $0x1d0] sm:$0xff]   ;;  %s402_s11 = scalar_lea.vmem %s3119_s2, %s2098_s16  ;;  %s3074_s15 = scalar_lea.vmem %s3122_s5, %s2455_s13 }
  0x13   : > { %v566_v30 = vrot.slane %v2722_v24, 1  ;;  %v568_v38 = vrot.slane %v2741_v35, 1  ;;  %v505_v41 = vshrl.u32 %v2722_v24, 16  ;;  %v509_v45 = vshll.u32 %v2741_v35, 16  ;;  %v2515_v50 = vld [vmem:[%s3120_s3 + $0x188] sm:$0xff]   ;;  %v2521_v57 = vld [vmem:[%s3120_s3 + $0x190] sm:$0xff]  }
  0x14   : > { %v2735_v32 = vrot.slane %v493_v26, 1  ;;  %v503_v33 = vrot.slane %v501_v28, 1  ;;  %v513_v56 = vshrl.u32 %v2741_v35, 16  ;;  %v2802_v58 = vld [vmem:[%s2710_s25 + $0x20] sm:$0xff]   ;;  %v2807_v59 = vld [vmem:[%s2710_s25 + $0x28] sm:$0xff]   ;;  %v2520_v62 = vld [vmem:[%s3120_s3 + $0x18] sm:$0xff]  }
  0x15   : > { %2120 = vmatpush3.bf16.msra.mxu0 %v2492_v11  ;;  %2318 = vmatpush3.bf16.msra.mxu1 %v2491_v10  ;;  %v2746_v36 = vsel %vm562_vm0, %v564_v29, %v566_v30  ;;  %v2762_v43 = vsel %vm562_vm0, %v566_v30, %v568_v38  ;;  %v511_v49 = vrot.slane %v509_v45, 1  ;;  %v517_v0 = vshll.u32 %v2802_v58, 16  ;;  %v2524_v2 = vld [vmem:[%s3120_s3 + $0x60] sm:$0xff]   ;;  %v2526_v4 = vld [vmem:[%s3120_s3 + $0x1d8] sm:$0xff]   ;;  %v2534_v28 = vld [vmem:[%s3120_s3 + $0x30] sm:$0xff]  }
  0x16   : > { %2121 = vmatprep.subr.bf16.mxu0 %v2493_v12  ;;  %2319 = vmatprep.subr.bf16.mxu1 %v2494_v13  ;;  %v499_v37 = vor.u32 %v497_v27, %v2735_v32  ;;  %v507_v47 = vor.u32 %v505_v41, %v503_v33  ;;  %v570_v1 = vrot.slane %v2802_v58, 1  ;;  %v572_v3 = vrot.slane %v2807_v59, 1  ;;  %v2527_v7 = vld [vmem:[%s3120_s3 + $0x198] sm:$0xff]   ;;  %v2525_v10 = vld [vmem:[%s3120_s3 + $0x20] sm:$0xff]   ;;  %v2528_v12 = vld [vmem:[%s3120_s3 + $0x68] sm:$0xff]  }
  0x17   : > { %2327 = vmatprep.mubr.bf16.mxu1 %v2746_v36  ;;  %v515_v63 = vor.u32 %v513_v56, %v511_v49  ;;  %v519_v5 = vrot.slane %v517_v0, 1  ;;  %v521_v11 = vshrl.u32 %v2802_v58, 16  ;;  %v2533_v26 = vld [vmem:[%s3120_s3 + $0x1e0] sm:$0xff]   ;;  %v2538_v45 = vld [vmem:[%s3120_s3 + $0x1e8] sm:$0xff]  }
  0x18   : > { %v2759_v42 = vsel %vm484_vm1, %v499_v37, %v503_v33  ;;  %v2781_v51 = vsel %vm484_vm1, %v507_v47, %v511_v49  ;;  %v2824_v6 = vsel %vm562_vm0, %v568_v38, %v570_v1  ;;  %v2831_v8 = vsel %vm562_vm0, %v570_v1, %v572_v3  ;;  %v2539_v47 = vld [vmem:[%s2710_s25] sm:$0xff]   ;;  %v2544_v1 = vld [vmem:[%s3120_s3 + $0x1b8] sm:$0xff]  }
  0x19   : > { %2122 = vmatpush3.bf16.msra.mxu0 %v2495_v14  ;;  %2320 = vmatpush3.bf16.msra.mxu1 %v2494_v13  ;;  %v2837_v9 = vsel %vm484_vm1, %v515_v63, %v519_v5  ;;  %v525_v13 = vshll.u32 %v2807_v59, 16  ;;  %v2529_v14 = vld [vmem:[%s3120_s3 + $0x28] sm:$0xff]   ;;  %v563_v60 = vrot.slane %v2539_v47, 1  ;;  %v2545_v0 = vld [vmem:[%s3120_s3 + $0x80] sm:$0xff]  }
  0x1a   : > { %2123 = vmatprep.subr.bf16.mxu0 %v2496_v15  ;;  %2321 = vmatprep.subr.bf16.mxu1 %v2497_v16  ;;  %v523_v15 = vor.u32 %v521_v11, %v519_v5  ;;  %v2547_v5 = vld [vmem:[%s3120_s3 + $0x88] sm:$0xff]   ;;  %v2556_v11 = vld [vmem:[%s3120_s3 + $0x220] sm:$0xff]  }
  0x1b   : > { %861 = vmatprep.mubr.bf16.mxu0 %v2759_v42 }
  0x1d   : > { %2124 = vmatpush3.bf16.msra.mxu0 %v2498_v17  ;;  %2322 = vmatpush3.bf16.msra.mxu1 %v2497_v16  ;;  %v2855_v16 = vld [vmem:[%s383_s6] sm:$0xff]   ;;  %v529_v17 = vshrl.u32 %v2807_v59, 16 }
  0x1e   : > { %2125 = vmatprep.subr.bf16.mxu0 %v2499_v18  ;;  %2323 = vmatprep.subr.bf16.mxu1 %v2500_v19  ;;  %v527_v18 = vrot.slane %v525_v13, 1 }
  0x20   : > { %v531_v30 = vor.u32 %v529_v17, %v527_v18 }
  0x21   : > { %2126 = vmatpush3.bf16.msra.mxu0 %v2501_v20  ;;  %2324 = vmatpush3.bf16.msra.mxu1 %v2500_v19  ;;  %v2859_v19 = vld [vmem:[%s402_s11] sm:$0xff]   ;;  %v574_v20 = vrot.slane %v2855_v16, 1 }
  0x22   : > { %2127 = vmatprep.subr.bf16.mxu0 %v2502_v21  ;;  %2325 = vmatprep.subr.bf16.mxu1 %v2503_v22  ;;  %v2532_v21 = vld [vmem:[%s3120_s3 + $0x70] sm:$0xff]   ;;  %v541_v41 = vshll.u32 %v2859_v19, 16  ;;  %v545_v13 = vshrl.u32 %v2859_v19, 16 }
  0x23   : > { %v2874_v27 = vsel %vm562_vm0, %v572_v3, %v574_v20 }
  0x24   : > { %v2911_v49 = vrot.slane %v541_v41, 1 }
  0x25   : > { %2128 = vmatpush3.bf16.msra.mxu0 %v2504_v25  ;;  %2326 = vmatpush3.bf16.msra.mxu1 %v2503_v22  ;;  %v2866_v22 = vsel %vm484_vm1, %v523_v15, %v527_v18  ;;  %v576_v25 = vrot.slane %v2859_v19, 1 }
  0x26   : > { %2179 = vmatprep.subr.bf16.mxu1 %v2507_v31  ;;  %2245 = vmatprep.subr.bf16.mxu0 %v2508_v34  ;;  %v533_v31 = vshll.u32 %v2855_v16, 16  ;;  %v2535_v34 = vld [vmem:[%s3120_s3 + $0x1a0] sm:$0xff]  }
  0x27   : > { %v2882_v33 = vsel %vm562_vm0, %v574_v20, %v576_v25  ;;  %v2889_v37 = vsel %vm562_vm0, %v576_v25, %v2809_v61 }
  0x28   : > { %862 = vmatmul.mubr.bf16.vlgmr.msra.gmra.mrb[0].mxu0 %v2719_v23  ;;  %2328 = vmatmul.mubr.bf16.vlgmr.msra.gmra.mrb[0].mxu1 %v2762_v43  ;;  %v535_v38 = vrot.slane %v533_v31, 1 }
  0x29   : > { %2180 = vmatpush3.bf16.msra.mxu1 %v2510_v39  ;;  %2246 = vmatpush3.bf16.msra.mxu0 %v2511_v40  ;;  %v537_v39 = vshrl.u32 %v2855_v16, 16  ;;  %v2536_v40 = vld [vmem:[%s3120_s3 + $0x78] sm:$0xff]  }
  0x2a   : > { %2181 = vmatprep.subr.bf16.mxu1 %v2512_v44  ;;  %2247 = vmatprep.subr.bf16.mxu0 %v2514_v46  ;;  %v2537_v44 = vld [vmem:[%s3120_s3 + $0x38] sm:$0xff]   ;;  %v2904_v46 = vsel %vm484_vm1, %v531_v30, %v535_v38 }
  0x2b   : > { %869 = vmatprep.mubr.bf16.mxu0 %v2781_v51  ;;  %2331 = vmatprep.mubr.bf16.mxu1 %v2824_v6 }
  0x2d   : > { %2182 = vmatpush3.bf16.msra.mxu1 %v2513_v48  ;;  %2248 = vmatpush3.bf16.msra.mxu0 %v2515_v50  ;;  %v2540_v48 = vld [vmem:[%s3120_s3 + $0x1a8] sm:$0xff]   ;;  %v486_v50 = vshrl.u32 %v2539_v47, 16 }
  0x2e   : > { %2183 = vmatprep.subr.bf16.mxu1 %v2516_v52  ;;  %2249 = vmatprep.subr.bf16.mxu0 %v2519_v54  ;;  %v488_v52 = vshll.u32 %v2539_v47, 16  ;;  %v2542_v54 = vld [vmem:[%s3120_s3 + $0x1b0] sm:$0xff]  }
  0x30   : > { %870 = vmatmul.mubr.bf16.gmra.mrb[4].mxu0 %v2722_v24  ;;  %2332 = vmatmul.mubr.bf16.gmra.mrb[4].mxu1 %v2831_v8  ;;  %v490_v56 = vrot.slane %v488_v52, 1 }
  0x31   : > { %2184 = vmatpush3.bf16.msra.mxu1 %v2517_v53  ;;  %2250 = vmatpush3.bf16.msra.mxu0 %v2521_v57  ;;  %v2541_v53 = vld [vmem:[%s3120_s3 + $0x1f0] sm:$0xff]   ;;  %v2543_v57 = vld [vmem:[%s3120_s3 + $0x1f8] sm:$0xff]  }
  0x32   : > { %2185 = vmatprep.subr.bf16.mxu1 %v2518_v55  ;;  %2251 = vmatprep.subr.bf16.mxu0 %v2526_v4  ;;  %v539_v55 = vor.u32 %v537_v39, %v535_v38  ;;  %v2546_v4 = vld [vmem:[%s3120_s3 + $0x200] sm:$0xff]  }
  0x33   : > { %877 = vmatprep.mubr.bf16.mxu0 %v2837_v9  ;;  %2335 = vmatprep.mubr.bf16.mxu1 %v2874_v27 }
  0x34   : > { %v2925_v63 = vsel %vm484_vm1, %v539_v55, %v2911_v49 }
  0x35   : > { %2186 = vmatpush3.bf16.msra.mxu1 %v2520_v62  ;;  %2252 = vmatpush3.bf16.msra.mxu0 %v2527_v7  ;;  %v491_v62 = vor.u32 %v490_v56, %v486_v50  ;;  %v2552_v7 = vld [vmem:[%s3120_s3 + $0xa0] sm:$0xff]  }
  0x36   : > { %2187 = vmatprep.subr.bf16.mxu1 %v2524_v2  ;;  %2253 = vmatprep.subr.bf16.mxu0 %v2533_v26  ;;  %v2936_v2 = vsel %vm562_vm0, %v563_v60, %v564_v29  ;;  %v2549_v29 = vld [vmem:[%s3120_s3 + $0x90] sm:$0xff]  }
  0x37   : > { %v496_v3 = vsel %vm484_vm1, %v491_v62, %v2735_v32  ;;  %v2550_v32 = vld [vmem:[%s3120_s3 + $0x98] sm:$0xff]  }
  0x38   : > { %878 = vmatmul.mubr.bf16.gmra.mrb[8].mxu0 %v2741_v35  ;;  %2336 = vmatmul.mubr.bf16.gmra.mrb[8].mxu1 %v2882_v33 }
  0x39   : > { %2188 = vmatpush3.bf16.msra.mxu1 %v2525_v10  ;;  %885 = vmatprep.mubr.bf16.mxu0 %v2866_v22  ;;  %v2553_v10 = vld [vmem:[%s3120_s3 + $0x218] sm:$0xff]  }
  0x3a   : > { %2189 = vmatprep.subr.bf16.mxu1 %v2528_v12  ;;  %2254 = vmatpush3.bf16.msra.mxu0 %v2535_v34  ;;  %v2558_v12 = vld [vmem:[%s3120_s3 + $0x228] sm:$0xff]  }
  0x3b   : > { %2255 = vmatprep.subr.bf16.mxu0 %v2538_v45  ;;  %1167 = vmatprep.mubr.bf16.mxu1 %v496_v3 }
  0x3d   : > { %2190 = vmatpush3.bf16.msra.mxu1 %v2529_v14  ;;  %v2560_v14 = vld [vmem:[%s3120_s3 + $0x238] sm:$0xff]  }
  0x3e   : > { %2191 = vmatprep.subr.bf16.mxu1 %v2532_v21  ;;  %2256 = vmatpush3.bf16.msra.mxu0 %v2540_v48 }
  0x3f   : > { %2257 = vmatprep.subr.bf16.mxu0 %v2541_v53 }
  0x40   : > { %886 = vmatmul.mubr.bf16.gmra.mrb[12].mxu0 %v2802_v58 }
  0x41   : > { %2192 = vmatpush3.bf16.msra.mxu1 %v2534_v28  ;;  %893 = vmatprep.mubr.bf16.mxu0 %v2904_v46 }
  0x42   : > { %2193 = vmatprep.subr.bf16.mxu1 %v2536_v40  ;;  %2258 = vmatpush3.bf16.msra.mxu0 %v2542_v54 }
  0x43   : > { %2259 = vmatprep.subr.bf16.mxu0 %v2543_v57 }
  0x45   : > { %2194 = vmatpush3.bf16.msra.mxu1 %v2537_v44 }
  0x46   : > { %2339 = vmatprep.subr.bf16.mxu1 %v2545_v0  ;;  %2260 = vmatpush3.bf16.msra.mxu0 %v2544_v1 }
  0x47   : > { %2367 = vmatprep.subr.bf16.mxu0 %v2546_v4 }
  0x48   : > { %894 = vmatmul.mubr.bf16.gmra.mrb[16].mxu0 %v2807_v59  ;;  %1168 = vmatmul.mubr.bf16.vlgmr.msra.gmra.mrb[12].mxu1 %v2539_v47 }
  0x49   : > { %901 = vmatprep.mubr.bf16.mxu0 %v2925_v63  ;;  %1175 = vmatprep.mubr.bf16.mxu1 %v2759_v42  ;;  %v2548_v42 = vld [vmem:[%s3120_s3 + $0x208] sm:$0xff]  }
  0x4a   : > { %2340 = vmatpush3.bf16.msra.mxu1 %v2545_v0 }
  0x4b   : > { %2341 = vmatprep.subr.bf16.mxu1 %v2547_v5 }
  0x4e   : > { %2342 = vmatpush3.bf16.msra.mxu1 %v2547_v5 }
  0x4f   : > { %2343 = vmatprep.subr.bf16.mxu1 %v2549_v29 }
  0x50   : > { %902 = vmatmul.mubr.bf16.gmra.mrb[20].mxu0 %v2855_v16  ;;  %1176 = vmatmul.mubr.bf16.gmra.mrb[16].mxu1 %v2719_v23  ;;  %v2554_v23 = vld [vmem:[%s3120_s3 + $0xa8] sm:$0xff]  }
  0x51   : > { %1522 = vmatprep.mubr.bf16.mxu0 %v2781_v51  ;;  %1183 = vmatprep.mubr.bf16.mxu1 %v2781_v51  ;;  %v2551_v51 = vld [vmem:[%s3120_s3 + $0x210] sm:$0xff]  }
  0x52   : > { %2344 = vmatpush3.bf16.msra.mxu1 %v2549_v29 }
  0x53   : > { %2345 = vmatprep.subr.bf16.mxu1 %v2550_v32 }
  0x56   : > { %2346 = vmatpush3.bf16.msra.mxu1 %v2550_v32 }
  0x57   : > { %2347 = vmatprep.subr.bf16.mxu1 %v2552_v7 }
  0x58   : > { %1523 = vmatmul.mubr.bf16.vlgmr.msra.gmra.mrb[24].mxu0 %v2722_v24  ;;  %1184 = vmatmul.mubr.bf16.gmra.mrb[20].mxu1 %v2722_v24  ;;  %v2555_v24 = vld [vmem:[%s3120_s3 + $0xb0] sm:$0xff]  }
  0x59   : > { %2368 = vmatpush3.bf16.msra.mxu0 %v2546_v4  ;;  %1530 = vmatprep.mubr.bf16.mxu0 %v2837_v9 }
  0x5a   : > { %2369 = vmatprep.subr.bf16.mxu0 %v2548_v42  ;;  %1191 = vmatprep.mubr.bf16.mxu1 %v2837_v9  ;;  %v2557_v9 = vld [vmem:[%s3120_s3 + $0xb8] sm:$0xff]  }
  0x5b   : > { %2348 = vmatpush3.bf16.msra.mxu1 %v2552_v7 }
  0x5c   : > { %2349 = vmatprep.subr.bf16.mxu1 %v2554_v23 }
  0x5d   : > { %2370 = vmatpush3.bf16.msra.mxu0 %v2548_v42 }
  0x5e   : > { %2371 = vmatprep.subr.bf16.mxu0 %v2551_v51 }
  0x5f   : > { %2350 = vmatpush3.bf16.msra.mxu1 %v2554_v23 }
  0x60   : > { %1531 = vmatmul.mubr.bf16.gmra.mrb[28].mxu0 %v2741_v35  ;;  %1192 = vmatmul.mubr.bf16.gmra.mrb[24].mxu1 %v2741_v35  ;;  %v2559_v35 = vld [vmem:[%s3120_s3 + $0x230] sm:$0xff]  }
  0x61   : > { %2372 = vmatpush3.bf16.msra.mxu0 %v2551_v51  ;;  %1538 = vmatprep.mubr.bf16.mxu0 %v2866_v22 }
  0x62   : > { %2373 = vmatprep.subr.bf16.mxu0 %v2553_v10  ;;  %1199 = vmatprep.mubr.bf16.mxu1 %v2866_v22 }
  0x63   : > { %2351 = vmatprep.subr.bf16.mxu1 %v2555_v24 }
  0x64   : > { %2352 = vmatpush3.bf16.msra.mxu1 %v2555_v24 }
  0x65   : > { %2374 = vmatpush3.bf16.msra.mxu0 %v2553_v10  ;;  %2353 = vmatprep.subr.bf16.mxu1 %v2557_v9 }
  0x66   : > { %2375 = vmatprep.subr.bf16.mxu0 %v2556_v11 }
  0x68   : > { %1539 = vmatmul.mubr.bf16.gmra.mrb[32].mxu0 %v2802_v58  ;;  %2354 = vmatpush3.bf16.msra.mxu1 %v2557_v9 }
  0x69   : > { %1546 = vmatprep.mubr.bf16.mxu0 %v2904_v46  ;;  %2376 = vmatpush3.bf16.msra.mxu0 %v2556_v11 }
  0x6a   : > { %1200 = vmatmul.mubr.bf16.gmra.mrb[28].mxu1 %v2802_v58  ;;  %2377 = vmatprep.subr.bf16.mxu0 %v2558_v12  ;;  %v547_v58 = vor.u32 %v545_v13, %v2911_v49 }
  0x6b   : > { %1207 = vmatprep.mubr.bf16.mxu1 %v2904_v46 }
  0x6c   : > { %v552_v15 = vsel %vm484_vm1, %v547_v58, %v2809_v61 }
  0x6d   : > { %2378 = vmatpush3.bf16.msra.mxu0 %v2558_v12 }
  0x6e   : > { %2379 = vmatprep.subr.bf16.mxu0 %v2559_v35 }
  0x70   : > { %1547 = vmatmul.mubr.bf16.gmra.mrb[36].mxu0 %v2807_v59 }
  0x71   : > { %1554 = vmatprep.mubr.bf16.mxu0 %v2925_v63  ;;  %2380 = vmatpush3.bf16.msra.mxu0 %v2559_v35 }
  0x72   : > { %1208 = vmatmul.mubr.bf16.gmra.mrb[32].mxu1 %v2807_v59  ;;  %2381 = vmatprep.subr.bf16.mxu0 %v2560_v14 }
  0x73   : > { %2355 = vmatprep.mubr.bf16.mxu1 %v2936_v2 }
  0x75   : > { %2382 = vmatpush3.bf16.msra.mxu0 %v2560_v14 }
  0x78   : > { %1555 = vmatmul.mubr.bf16.gmra.mrb[40].mxu0 %v2855_v16 }
  0x79   : > { %1562 = vmatprep.mubr.bf16.mxu0 %v552_v15 }
  0x7a   : > { %2356 = vmatmul.mubr.bf16.vlgmr.msra.gmra.mrb[0].mxu1 %v2746_v36 }
  0x7b   : > { %2359 = vmatprep.mubr.bf16.mxu1 %v2762_v43 }
  0x80   : > { %1563 = vmatmul.mubr.bf16.gmra.mrb[44].mxu0 %v2859_v19 }
  0x81   : > { %2383 = vmatprep.mubr.bf16.mxu0 %v2762_v43 }
  0x82   : > { %2360 = vmatmul.mubr.bf16.gmra.mrb[4].mxu1 %v2824_v6 }
  0x83   : > { %2363 = vmatprep.mubr.bf16.mxu1 %v2831_v8 }
  0x88   : > { %2384 = vmatmul.mubr.bf16.vlgmr.msra.gmra.mrb[48].mxu0 %v2824_v6 }
  0x89   : > { %2387 = vmatprep.mubr.bf16.mxu0 %v2831_v8 }
  0x8a   : > { %2364 = vmatmul.mubr.bf16.gmra.mrb[8].mxu1 %v2874_v27 }
  0x90   : > { %2388 = vmatmul.mubr.bf16.gmra.mrb[52].mxu0 %v2874_v27 }
  0x91   : > { %2391 = vmatprep.mubr.bf16.mxu0 %v2882_v33 }
  0x98   : > { %2392 = vmatmul.mubr.bf16.gmra.mrb[56].mxu0 %v2889_v37 }
  0xfb   : > { %v2129_v36 = vpop.f32.mrb[0].mxu0 }
  0xfc   : > { %v2130_v59 = vpop.f32.mrb[1].mxu0 }
  0xfd   : > { %v2131_v61 = vadd.f32 %v2130_v59, %v2129_v36  ;;  %v2132_v43 = vpop.f32.mrb[2].mxu0 }
  0xfe   : > { %v2133_v16 = vpop.f32.mrb[3].mxu0 }
  0xff   : > { %v2134_v17 = vadd.f32 %v2133_v16, %v2132_v43 }
 0x103   : > { %v2135_v18 = vpop.f32.mrb[4].mxu0 }
 0x104   : > { %v2136_v19 = vpop.f32.mrb[5].mxu0 }
 0x105   : > { %v2137_v20 = vadd.f32 %v2136_v19, %v2135_v18  ;;  %v2138_v6 = vpop.f32.mrb[6].mxu0 }
 0x106   : > { %v2139_v21 = vpop.f32.mrb[7].mxu0 }
 0x107   : > { %v2140_v8 = vadd.f32 %v2139_v21, %v2138_v6 }
 0x10b   : > { %v2141_v22 = vpop.f32.mrb[8].mxu0 }
 0x10c   : > { %v2142_v25 = vpop.f32.mrb[9].mxu0 }
 0x10d   : > { %v2143_v26 = vadd.f32 %v2142_v25, %v2141_v22  ;;  %v2144_v27 = vpop.f32.mrb[10].mxu0 }
 0x10e   : > { %v2145_v28 = vpop.f32.mrb[11].mxu0 }
 0x10f   : > { %v2146_v30 = vadd.f32 %v2145_v28, %v2144_v27 }
 0x113   : > { %v2147_v31 = vpop.f32.mrb[12].mxu0 }
 0x114   : > { %v2148_v33 = vpop.f32.mrb[13].mxu0 }
 0x115   : > { %v2149_v34 = vadd.f32 %v2148_v33, %v2147_v31  ;;  %v2150_v37 = vpop.f32.mrb[14].mxu0 }
 0x116   : > { %v2151_v38 = vpop.f32.mrb[15].mxu0 }
 0x117   : > { %v2152_v39 = vadd.f32 %v2151_v38, %v2150_v37 }
 0x11b   : > { %v2153_v40 = vpop.f32.mrb[16].mxu0  ;;  %v2195_v44 = vpop.f32.mrb[12].mxu1 }
 0x11c   : > { %v2154_v41 = vpop.f32.mrb[17].mxu0  ;;  %v2196_v47 = vpop.f32.mrb[13].mxu1 }
 0x11d   : > { %v3025_v45 = vadd.f32 %v2154_v41, %v2153_v40  ;;  %v2156_v46 = vpop.f32.mrb[18].mxu0  ;;  %v2197_v49 = vadd.f32 %v2196_v47, %v2195_v44  ;;  %v2198_v50 = vpop.f32.mrb[14].mxu1 }
 0x11e   : > { %v2157_v48 = vpop.f32.mrb[19].mxu0  ;;  %v2199_v53 = vpop.f32.mrb[15].mxu1 }
 0x11f   : > { %v2158_v52 = vadd.f32 %v2157_v48, %v2156_v46  ;;  %v2200_v54 = vadd.f32 %v2199_v53, %v2198_v50  ;;  %v3027_v55 = vadd.f32 %v2197_v49, %v2131_v61 }
 0x121   : > { %v3029_v57 = vadd.f32 %v2200_v54, %v2134_v17 }
 0x123   : > { %v2159_v56 = vpop.f32.mrb[20].mxu0  ;;  %v2201_v62 = vpop.f32.mrb[16].mxu1 }
 0x124   : > { %v2160_v60 = vpop.f32.mrb[21].mxu0  ;;  %v2202_v1 = vpop.f32.mrb[17].mxu1 }
 0x125   : > { %v3031_v63 = vadd.f32 %v2160_v60, %v2159_v56  ;;  %v2162_v0 = vpop.f32.mrb[22].mxu0  ;;  %v2203_v3 = vadd.f32 %v2202_v1, %v2201_v62  ;;  %v2204_v4 = vpop.f32.mrb[18].mxu1 }
 0x126   : > { %v2163_v2 = vpop.f32.mrb[23].mxu0  ;;  %v2205_v29 = vpop.f32.mrb[19].mxu1 }
 0x127   : > { %v2164_v5 = vadd.f32 %v2163_v2, %v2162_v0  ;;  %v2206_v32 = vadd.f32 %v2205_v29, %v2204_v4  ;;  %v3033_v42 = vadd.f32 %v2203_v3, %v2137_v20 }
 0x129   : > { %v3035_v23 = vadd.f32 %v2206_v32, %v2140_v8 }
 0x12b   : > { %v2261_v7 = vpop.f32.mrb[24].mxu0  ;;  %v2207_v10 = vpop.f32.mrb[20].mxu1 }
 0x12c   : > { %v2262_v51 = vpop.f32.mrb[25].mxu0  ;;  %v2208_v11 = vpop.f32.mrb[21].mxu1 }
 0x12d   : > { %v3037_v24 = vadd.f32 %v2262_v51, %v2261_v7  ;;  %v2264_v9 = vpop.f32.mrb[26].mxu0  ;;  %v2209_v35 = vadd.f32 %v2208_v11, %v2207_v10  ;;  %v2210_v13 = vpop.f32.mrb[22].mxu1 }
 0x12e   : > { %v2265_v12 = vpop.f32.mrb[27].mxu0  ;;  %v2211_v58 = vpop.f32.mrb[23].mxu1 }
 0x12f   : > { %v3039_v14 = vadd.f32 %v2265_v12, %v2264_v9  ;;  %v2212_v15 = vadd.f32 %v2211_v58, %v2210_v13  ;;  %v3041_v36 = vadd.f32 %v2209_v35, %v2143_v26 }
 0x131   : > { %v3043_v61 = vadd.f32 %v2212_v15, %v2146_v30 }
 0x133   : > { %v2267_v59 = vpop.f32.mrb[28].mxu0  ;;  %v2213_v16 = vpop.f32.mrb[24].mxu1 }
 0x134   : > { %v2268_v43 = vpop.f32.mrb[29].mxu0  ;;  %v2214_v19 = vpop.f32.mrb[25].mxu1 }
 0x135   : > { %v2269_v17 = vadd.f32 %v2268_v43, %v2267_v59  ;;  %v2270_v18 = vpop.f32.mrb[30].mxu0  ;;  %v2215_v6 = vadd.f32 %v2214_v19, %v2213_v16  ;;  %v2216_v21 = vpop.f32.mrb[26].mxu1 }
 0x136   : > { %v2271_v20 = vpop.f32.mrb[31].mxu0  ;;  %v2217_v22 = vpop.f32.mrb[27].mxu1 }
 0x137   : > { %v2272_v8 = vadd.f32 %v2271_v20, %v2270_v18  ;;  %v2218_v25 = vadd.f32 %v2217_v22, %v2216_v21  ;;  %v2411_v27 = vadd.f32 %v2215_v6, %v2149_v34 }
 0x139   : > { %v2419_v31 = vadd.f32 %v2218_v25, %v2152_v39 }
 0x13b   : > { %v2273_v28 = vpop.f32.mrb[32].mxu0 }
 0x13c   : > { %v2274_v33 = vpop.f32.mrb[33].mxu0 }
 0x13d   : > { %v2219_v26 = vpop.f32.mrb[28].mxu1  ;;  %v2275_v37 = vadd.f32 %v2274_v33, %v2273_v28  ;;  %v2276_v38 = vpop.f32.mrb[34].mxu0 }
 0x13e   : > { %v2220_v30 = vpop.f32.mrb[29].mxu1  ;;  %v2277_v40 = vpop.f32.mrb[35].mxu0 }
 0x13f   : > { %v2221_v41 = vadd.f32 %v2220_v30, %v2219_v26  ;;  %v2222_v44 = vpop.f32.mrb[30].mxu1  ;;  %v2278_v46 = vadd.f32 %v2277_v40, %v2276_v38  ;;  %v3062_v30 = vld [vmem:[%s3121_s4] ss:$0 sm:$0xff] }
 0x140   : > { %v2223_v47 = vpop.f32.mrb[31].mxu1 }
 0x141   : > { %v2224_v48 = vadd.f32 %v2223_v47, %v2222_v44  ;;  %v3046_v49 = vadd.f32 %v2221_v41, %v3025_v45 }
 0x143   : > { %v2279_v50 = vpop.f32.mrb[36].mxu0  ;;  %v3048_v53 = vadd.f32 %v2224_v48, %v2158_v52 }
 0x144   : > { %v2280_v34 = vpop.f32.mrb[37].mxu0 }
 0x145   : > { %v2225_v54 = vpop.f32.mrb[32].mxu1  ;;  %v2281_v39 = vadd.f32 %v2280_v34, %v2279_v50  ;;  %v2282_v56 = vpop.f32.mrb[38].mxu0 }
 0x146   : > { %v2226_v60 = vpop.f32.mrb[33].mxu1  ;;  %v2283_v62 = vpop.f32.mrb[39].mxu0 }
 0x147   : > { %v2227_v0 = vadd.f32 %v2226_v60, %v2225_v54  ;;  %v2228_v1 = vpop.f32.mrb[34].mxu1  ;;  %v2284_v2 = vadd.f32 %v2283_v62, %v2282_v56 }
 0x148   : > { %v2229_v3 = vpop.f32.mrb[35].mxu1 }
 0x149   : > { %v2230_v4 = vadd.f32 %v2229_v3, %v2228_v1  ;;  %v2427_v29 = vadd.f32 %v2227_v0, %v3031_v63 }
 0x14b   : > { %v2285_v32 = vpop.f32.mrb[40].mxu0  ;;  %v2435_v7 = vadd.f32 %v2230_v4, %v2164_v5 }
 0x14c   : > { %v2286_v45 = vpop.f32.mrb[41].mxu0 }
 0x14d   : > { %v2357_v51 = vpop.f32.mrb[0].mxu1  ;;  %v2287_v10 = vadd.f32 %v2286_v45, %v2285_v32  ;;  %v2288_v52 = vpop.f32.mrb[42].mxu0 }
 0x14e   : > { %v2396_v9 = vadd.f32 %v3033_v42, %v2357_v51  ;;  %v1250_v11 = vpop.f32.mrb[1].mxu1  ;;  %v2289_v12 = vpop.f32.mrb[43].mxu0 }
 0x14f   : > { %v2400_v35 = vadd.f32 %v3027_v55, %v1250_v11  ;;  %v2358_v13 = vpop.f32.mrb[2].mxu1  ;;  %v2290_v58 = vadd.f32 %v2289_v12, %v2288_v52 }
 0x150   : > { %v2404_v15 = vadd.f32 %v3035_v23, %v2358_v13  ;;  %v1253_v59 = vpop.f32.mrb[3].mxu1  ;;  %v2397_v43 = vadd.f32 %v2396_v9, %v2269_v17 }
 0x151   : > { %v2408_v63 = vadd.f32 %v3029_v57, %v1253_v59  ;;  %v2401_v5 = vadd.f32 %v2400_v35, %v3037_v24 }
 0x152   : > { %v2405_v16 = vadd.f32 %v2404_v15, %v2272_v8 }
 0x153   : > { %v2291_v18 = vpop.f32.mrb[44].mxu0  ;;  %v2409_v19 = vadd.f32 %v2408_v63, %v3039_v14 }
 0x154   : > { %v2292_v20 = vpop.f32.mrb[45].mxu0 }
 0x155   : > { %v2361_v42 = vpop.f32.mrb[4].mxu1  ;;  %v2293_v6 = vadd.f32 %v2292_v20, %v2291_v18  ;;  %v2294_v21 = vpop.f32.mrb[46].mxu0 }
 0x156   : > { %v2412_v22 = vadd.f32 %v2411_v27, %v2361_v42  ;;  %v1266_v55 = vpop.f32.mrb[5].mxu1  ;;  %v2295_v25 = vpop.f32.mrb[47].mxu0 }
 0x157   : > { %v2416_v28 = vadd.f32 %v3041_v36, %v1266_v55  ;;  %v2362_v23 = vpop.f32.mrb[6].mxu1  ;;  %v2296_v33 = vadd.f32 %v2295_v25, %v2294_v21 }
 0x158   : > { %v2420_v17 = vadd.f32 %v2419_v31, %v2362_v23  ;;  %v1269_v26 = vpop.f32.mrb[7].mxu1  ;;  %v2413_v57 = vadd.f32 %v2412_v22, %v2281_v39 }
 0x159   : > { %v2424_v24 = vadd.f32 %v3043_v61, %v1269_v26  ;;  %v2417_v8 = vadd.f32 %v2416_v28, %v2275_v37 }
 0x15a   : > { %v2421_v38 = vadd.f32 %v2420_v17, %v2284_v2 }
 0x15b   : > { %v2385_v14 = vpop.f32.mrb[48].mxu0  ;;  %v2425_v27 = vadd.f32 %v2424_v24, %v2278_v46 }
 0x15c   : > { %v2398_v40 = vadd.f32 %v2397_v43, %v2385_v14  ;;  %v1605_v41 = vpop.f32.mrb[49].mxu0 }
 0x15d   : > { %v2365_v36 = vpop.f32.mrb[8].mxu1  ;;  %v2402_v44 = vadd.f32 %v2401_v5, %v1605_v41  ;;  %v2386_v47 = vpop.f32.mrb[50].mxu0 }
 0x15e   : > { %v2428_v31 = vadd.f32 %v2427_v29, %v2365_v36  ;;  %v1673_v48 = vadd.f32 %v2398_v40, %v3062_v30  ;;  %v1282_v50 = vpop.f32.mrb[9].mxu1  ;;  %v2406_v61 = vadd.f32 %v2405_v16, %v2386_v47  ;;  %v1608_v34 = vpop.f32.mrb[51].mxu0 }
 0x15f   : > { %v2432_v37 = vadd.f32 %v3046_v49, %v1282_v50  ;;  %v1671_v54 = vadd.f32 %v2402_v44, %v3062_v30  ;;  %v2366_v39 = vpop.f32.mrb[10].mxu1  ;;  %v2410_v56 = vadd.f32 %v2409_v19, %v1608_v34 }
 0x160   : > { %v1685_v60 = vmul.f32 0.1, %v1673_v48  ;;  %v2436_v46 = vadd.f32 %v2435_v7, %v2366_v39  ;;  %v1674_v62 = vadd.f32 %v2406_v61, %v3062_v30  ;;  %v1285_v0 = vpop.f32.mrb[11].mxu1  ;;  %v2429_v1 = vadd.f32 %v2428_v31, %v2293_v6 }
 0x161   : > { %v1683_v2 = vmul.f32 0.1, %v1671_v54  ;;  %v2440_v3 = vadd.f32 %v3048_v53, %v1285_v0  ;;  %v1672_v4 = vadd.f32 %v2410_v56, %v3062_v30  ;;  %v2433_v29 = vadd.f32 %v2432_v37, %v2287_v10 }
 0x162   : > { %v1697_v32 = vmax.f32 %v1673_v48, %v1685_v60  ;;  %v1686_v45 = vmul.f32 0.1, %v1674_v62  ;;  %v2437_v51 = vadd.f32 %v2436_v46, %v2296_v33 }
 0x163   : > { %v1695_v49 = vmax.f32 %v1671_v54, %v1683_v2  ;;  %v1684_v7 = vmul.f32 0.1, %v1672_v4  ;;  %v2389_v52 = vpop.f32.mrb[52].mxu0  ;;  %v2441_v9 = vadd.f32 %v2440_v3, %v2290_v58 }
 0x164   : > { %v2101_v11 = vpack.c.bf16 %v1697_v32, %v1697_v32  ;;  %v1698_v53 = vmax.f32 %v1674_v62, %v1686_v45  ;;  %v2414_v12 = vadd.f32 %v2413_v57, %v2389_v52  ;;  %v1621_v10 = vpop.f32.mrb[53].mxu0 }
 0x165   : > { %v2099_v35 = vpack.c.bf16 %v1695_v49, %v1695_v49  ;;  %v1696_v13 = vmax.f32 %v1672_v4, %v1684_v7  ;;  %v2418_v15 = vadd.f32 %v2417_v8, %v1621_v10  ;;  %v2390_v59 = vpop.f32.mrb[54].mxu0 }
 0x166   : > { %1758 = vst.msk [vmem:[%s3074_s15 + $0x8] sm:$0xf] %vm1755_vm2, %v2101_v11  ;;  %v2102_v43 = vpack.c.bf16 %v1698_v53, %v1698_v53  ;;  %v1677_v63 = vadd.f32 %v2414_v12, %v3062_v30  ;;  %v2422_v5 = vadd.f32 %v2421_v38, %v2390_v59  ;;  %v1624_v16 = vpop.f32.mrb[55].mxu0 }
 0x167   : > { %1756 = vst.msk [vmem:[%s3074_s15] sm:$0xf] %vm1755_vm2, %v2099_v35  ;;  %v2100_v58 = vpack.c.bf16 %v1696_v13, %v1696_v13  ;;  %v1675_v18 = vadd.f32 %v2418_v15, %v3062_v30  ;;  %v2426_v19 = vadd.f32 %v2425_v27, %v1624_v16 }
 0x168   : > { %1759 = vst.msk [vmem:[%s3074_s15 + $0xc] sm:$0xf] %vm1755_vm2, %v2102_v43  ;;  %v1689_v20 = vmul.f32 0.1, %v1677_v63  ;;  %v1678_v42 = vadd.f32 %v2422_v5, %v3062_v30 }
 0x169   : > { %1757 = vst.msk [vmem:[%s3074_s15 + $0x4] sm:$0xf] %vm1755_vm2, %v2100_v58  ;;  %v1687_v6 = vmul.f32 0.1, %v1675_v18  ;;  %v1676_v21 = vadd.f32 %v2426_v19, %v3062_v30 }
 0x16a   : > { %v1701_v22 = vmax.f32 %v1677_v63, %v1689_v20  ;;  %v1690_v55 = vmul.f32 0.1, %v1678_v42 }
 0x16b   : > { %v1699_v25 = vmax.f32 %v1675_v18, %v1687_v6  ;;  %v1688_v28 = vmul.f32 0.1, %v1676_v21  ;;  %v2393_v23 = vpop.f32.mrb[56].mxu0 }
 0x16c   : > { %v2105_v33 = vpack.c.bf16 %v1701_v22, %v1701_v22  ;;  %v1702_v17 = vmax.f32 %v1678_v42, %v1690_v55  ;;  %v2430_v26 = vadd.f32 %v2429_v1, %v2393_v23  ;;  %v1637_v57 = vpop.f32.mrb[57].mxu0 }
 0x16d   : > { %v2103_v24 = vpack.c.bf16 %v1699_v25, %v1699_v25  ;;  %v1700_v8 = vmax.f32 %v1676_v21, %v1688_v28  ;;  %v2434_v38 = vadd.f32 %v2433_v29, %v1637_v57  ;;  %v2394_v14 = vpop.f32.mrb[58].mxu0 }
 0x16e   : > { %1762 = vst.msk [vmem:[%s3074_s15 + $0x18] sm:$0xf] %vm1755_vm2, %v2105_v33  ;;  %v2106_v27 = vpack.c.bf16 %v1702_v17, %v1702_v17  ;;  %v1681_v40 = vadd.f32 %v2430_v26, %v3062_v30  ;;  %v2438_v41 = vadd.f32 %v2437_v51, %v2394_v14  ;;  %v1640_v36 = vpop.f32.mrb[59].mxu0 }
 0x16f   : > { %1760 = vst.msk [vmem:[%s3074_s15 + $0x10] sm:$0xf] %vm1755_vm2, %v2103_v24  ;;  %v2104_v44 = vpack.c.bf16 %v1700_v8, %v1700_v8  ;;  %v1679_v47 = vadd.f32 %v2434_v38, %v3062_v30  ;;  %v2442_v31 = vadd.f32 %v2441_v9, %v1640_v36 }
 0x170   : > { %1763 = vst.msk [vmem:[%s3074_s15 + $0x1c] sm:$0xf] %vm1755_vm2, %v2106_v27  ;;  %v1693_v48 = vmul.f32 0.1, %v1681_v40  ;;  %v1682_v50 = vadd.f32 %v2438_v41, %v3062_v30 }
 0x171   : > { %1761 = vst.msk [vmem:[%s3074_s15 + $0x14] sm:$0xf] %vm1755_vm2, %v2104_v44  ;;  %v1691_v61 = vmul.f32 0.1, %v1679_v47  ;;  %v1680_v34 = vadd.f32 %v2442_v31, %v3062_v30 }
 0x172   : > { %v1705_v37 = vmax.f32 %v1681_v40, %v1693_v48  ;;  %v1694_v54 = vmul.f32 0.1, %v1682_v50 }
 0x173   : > { %v1703_v39 = vmax.f32 %v1679_v47, %v1691_v61  ;;  %v1692_v56 = vmul.f32 0.1, %v1680_v34 }
 0x174   : > { %v2109_v60 = vpack.c.bf16 %v1705_v37, %v1705_v37  ;;  %v1706_v46 = vmax.f32 %v1682_v50, %v1694_v54 }
 0x175   : > { %v2107_v62 = vpack.c.bf16 %v1703_v39, %v1703_v39  ;;  %v1704_v0 = vmax.f32 %v1680_v34, %v1692_v56 }
 0x176   : > { %1766 = vst.msk [vmem:[%s3074_s15 + $0x28] sm:$0xf] %vm1755_vm2, %v2109_v60  ;;  %v2110_v1 = vpack.c.bf16 %v1706_v46, %v1706_v46 }
 0x177   : > { %1764 = vst.msk [vmem:[%s3074_s15 + $0x20] sm:$0xf] %vm1755_vm2, %v2107_v62  ;;  %v2108_v2 = vpack.c.bf16 %v1704_v0, %v1704_v0 }
 0x178   : > { %1767 = vst.msk [vmem:[%s3074_s15 + $0x2c] sm:$0xf] %vm1755_vm2, %v2110_v1 }
 0x179   : > { %1765 = vst.msk [vmem:[%s3074_s15 + $0x24] sm:$0xf] %vm1755_vm2, %v2108_v2 }
 0x17a PF: > { %s15_s20 = sadd.s32 1, %s2583_s20   ;;  %s3123_s18 = smov %s2579_s19 }
 0x17b   : > { %p12_p5 = scmp.ge.s32.totalorder %s15_s20, 4   ;;  %s3124_s19 = smov %s3126_s21 }
 0x17d   :  { %14 = sbr.rel (!%p12_p5) target bundleno = 2 (0x2), region = 78 }

// kernel: unet1x3_forward.13
= control target key start
LH: loop header
LB: loop body
LE: loop exit
PB: predicated region body
PF: predicated region fallthrough
CT: control target
= control target key end

     0   :  { %s877_s15 = smov 0   ;;  %s879_s16 = smov 0   ;;  %s1017_s0 = inlined_call_operand.vmem [shape: bf16[2,96,64], index: 0, kind: input, shape index: {}]   ;;  %s1018_s1 = inlined_call_operand.vmem [shape: bf16[2,1,64], index: 1, kind: input, shape index: {}]   ;;  %s1019_s2 = inlined_call_operand.vmem [shape: bf16[64,256], index: 2, kind: input, shape index: {}]   ;;  %s1020_s3 = inlined_call_operand.vmem [shape: f32[1,256], index: 3, kind: input, shape index: {}]   ;;  %s1021_s4 = inlined_call_operand.vmem [shape: bf16[2,96,256], index: 4, kind: output, shape index: {}]  }
   0x1   :  { %s881_s17 = smov 0  }
   0x2 LB: > { %s26_s18 = sadd.s32 1, %s845_s16  ;;  %p730_p0 = scmp.ge.s32.totalorder %s849_s17, 1  ;;  %s849_s17 = sphi %s881_s17, %s14_s17   ;;  %s845_s16 = sphi %s879_s16, %s1023_s16   ;;  %s841_s15 = sphi %s877_s15, %s1022_s15  }
   0x3   : > { %p28_p1 = scmp.ge.s32.totalorder %s26_s18, 2  ;;  %p191_p2 = scmp.lt.s32.totalorder %s849_s17, 3 }
   0x5   : > { %s1025_s18 = smov (%p28_p1, %s26_s18), 0  ;;  %p192_p3 = pnand %p730_p0, %p191_p2 }
   0x6   : > { %v815_v0 = vld [vmem:[%s1019_s2 + $0x4] ss:$8 sps:$4 sm:$0xff] (!%p192_p3)   ;;  %p230_p4 = scmp.lt.s32.totalorder (!%p192_p3), %s841_s15, 1  ;;  %v270_v1 = vlaneseq (!%p192_p3)  ;;  %v817_v2 = vld [vmem:[%s1019_s2] ss:$8 sps:$4 sm:$0xff] (!%p192_p3)   ;;  %v851_v3 = vmov (!%p192_p3), 0  }
   0x7   : > { %195 = sbr.rel (%p192_p3) target bundleno = 268 (0x10c), region = 36  ;;  %431 = vmatprep.mubr.bf16.mxu0 (!%p192_p3), %v851_v3  ;;  %461 = vmatprep.mubr.bf16.mxu1 (!%p192_p3), %v851_v3  ;;  %v818_v4 = vld [vmem:[%s1019_s2 + $0x14] ss:$8 sps:$4 sm:$0xff] (!%p192_p3)   ;;  %v820_v5 = vld [vmem:[%s1019_s2 + $0x10] ss:$8 sps:$4 sm:$0xff] (!%p192_p3)   ;;  %vm380_vm0 = vcmask (!%p192_p3), 523264  }
   0x8   : > { %399 = vmatprep.subr.bf16.mxu0 (!%p192_p3), %v815_v0  ;;  %780 = vmatprep.subr.bf16.mxu1 (!%p192_p3), %v815_v0  ;;  %v911_v6 = vshrl.u32 (!%p192_p3), %v270_v1, 7  ;;  %v821_v7 = vld [vmem:[%s1019_s2 + $0x24] ss:$8 sps:$4 sm:$0xff] (!%p192_p3)   ;;  %v823_v11 = vld [vmem:[%s1019_s2 + $0x20] ss:$8 sps:$4 sm:$0xff] (!%p192_p3)  }
   0x9   : > { %400 = vmatpush1.bf16.msra.mxu0 (!%p192_p3), %v817_v2  ;;  %784 = vmatpush1.bf16.msra.mxu1 (!%p192_p3), %v817_v2  ;;  %v824_v12 = vld [vmem:[%s1019_s2 + $0x34] ss:$8 sps:$4 sm:$0xff] (!%p192_p3)   ;;  %v826_v19 = vld [vmem:[%s1019_s2 + $0x30] ss:$8 sps:$4 sm:$0xff] (!%p192_p3)   ;;  %v298_v46 = vld [vmem:[%s1020_s3] sm:$0x3] (!%p192_p3) }
   0xa   : > { %401 = vmatprep.subr.bf16.mxu0 (!%p192_p3), %v818_v4  ;;  %781 = vmatprep.subr.bf16.mxu1 (!%p192_p3), %v818_v4  ;;  %v272_v9 = vsub.s32 (!%p192_p3), 0, %v911_v6  ;;  %v306_v47 = vsub.s32 (!%p192_p3), 1, %v911_v6 }
   0xc   : > { %v962_v48 = vrot.slane (!%p192_p3), %v298_v46, %v272_v9  ;;  %v964_v49 = vrot.slane (!%p192_p3), %v298_v46, %v306_v47 }
   0xd   : > { %402 = vmatpush1.bf16.msra.mxu0 (!%p192_p3), %v820_v5  ;;  %785 = vmatpush1.bf16.msra.mxu1 (!%p192_p3), %v820_v5 }
   0xe   : > { %s1027_s15 = smov (!%p230_p4, %s841_s15), 1  ;;  %403 = vmatprep.subr.bf16.mxu0 %v821_v7  ;;  %782 = vmatprep.subr.bf16.mxu1 %v821_v7 }
   0xf   : > { %s788_s29 = smul.u32 48, %s1027_s15  ;;  %s241_s6 = scalar_lea.vmem %s1018_s1, %s1027_s15 }
  0x10   : > { %v266_v8 = vld [vmem:[%s241_s6] sm:$0x1]  ;;  %s789_s22 = smul.u32 96, %s1027_s15 }
  0x11   : > { %s925_s9 = scalar_lea.vmem %s1017_s0, %s788_s29  ;;  %v268_v10 = vpack.i.b16 %v266_v8, %v266_v8  ;;  %404 = vmatpush1.bf16.msra.mxu0 %v823_v11  ;;  %786 = vmatpush1.bf16.msra.mxu1 %v823_v11 }
  0x12   : > { %v254_v14 = vld [vmem:[%s925_s9] sm:$0xf]  ;;  %v255_v15 = vld [vmem:[%s925_s9 + $0x4] sm:$0xf]  ;;  %v260_v16 = vld [vmem:[%s925_s9 + $0x18] sm:$0xf]  ;;  %405 = vmatprep.subr.bf16.mxu0 %v824_v12  ;;  %783 = vmatprep.subr.bf16.mxu1 %v824_v12  ;;  %s978_s24 = scalar_lea.vmem %s1021_s4, %s789_s22 }
  0x13   : > { %v273_v13 = vrot.slane %v268_v10, %v272_v9  ;;  %v261_v18 = vld [vmem:[%s925_s9 + $0x1c] sm:$0xf]  ;;  %v256_v25 = vld [vmem:[%s925_s9 + $0x8] sm:$0xf]  ;;  %v257_v27 = vld [vmem:[%s925_s9 + $0xc] sm:$0xf] }
  0x14   : > { %v262_v28 = vld [vmem:[%s925_s9 + $0x20] sm:$0xf]  ;;  %v263_v29 = vld [vmem:[%s925_s9 + $0x24] sm:$0xf]  ;;  %v258_v36 = vld [vmem:[%s925_s9 + $0x10] sm:$0xf] }
  0x15   : > { %v733_v17 = vcombine.low %v273_v13, %v273_v13  ;;  %406 = vmatpush1.bf16.msra.mxu0 %v826_v19  ;;  %787 = vmatpush1.bf16.msra.mxu1 %v826_v19  ;;  %v259_v37 = vld [vmem:[%s925_s9 + $0x14] sm:$0xf]  ;;  %v264_v38 = vld [vmem:[%s925_s9 + $0x28] sm:$0xf]  ;;  %v265_v39 = vld [vmem:[%s925_s9 + $0x2c] sm:$0xf] }
  0x17   : > { %v278_v20 = vmul.bf16 %v733_v17, %v254_v14  ;;  %v279_v21 = vmul.bf16 %v733_v17, %v255_v15  ;;  %v284_v22 = vmul.bf16 %v733_v17, %v260_v16  ;;  %v285_v23 = vmul.bf16 %v733_v17, %v261_v18 }
  0x18   : > { %v280_v30 = vmul.bf16 %v733_v17, %v256_v25  ;;  %v281_v31 = vmul.bf16 %v733_v17, %v257_v27  ;;  %v286_v32 = vmul.bf16 %v733_v17, %v262_v28  ;;  %v287_v33 = vmul.bf16 %v733_v17, %v263_v29 }
  0x19   : > { %v734_v24 = vcombine.low %v278_v20, %v279_v21  ;;  %v737_v26 = vcombine.low %v284_v22, %v285_v23  ;;  %v282_v40 = vmul.bf16 %v733_v17, %v258_v36  ;;  %v283_v41 = vmul.bf16 %v733_v17, %v259_v37 }
  0x1a   : > { %v735_v34 = vcombine.low %v280_v30, %v281_v31  ;;  %v738_v35 = vcombine.low %v286_v32, %v287_v33  ;;  %v288_v42 = vmul.bf16 %v733_v17, %v264_v38  ;;  %v289_v43 = vmul.bf16 %v733_v17, %v265_v39 }
  0x1b   : > { %748 = vmatmul.mubr.msk.bf16.vlgmr.msra.gmra.mrb[0].mxu0 %vm380_vm0, %v734_v24  ;;  %751 = vmatmul.mubr.msk.bf16.vlgmr.msra.gmra.mrb[0].mxu1 %vm380_vm0, %v737_v26  ;;  %v736_v44 = vcombine.low %v282_v40, %v283_v41 }
  0x1c   : > { %441 = vmatprep.mubr.bf16.mxu0 %v851_v3  ;;  %471 = vmatprep.mubr.bf16.mxu1 %v851_v3  ;;  %v739_v45 = vcombine.low %v288_v42, %v289_v43 }
  0x23   : > { %749 = vmatmul.mubr.msk.bf16.gmra.mrb[4].mxu0 %vm380_vm0, %v735_v34  ;;  %752 = vmatmul.mubr.msk.bf16.gmra.mrb[4].mxu1 %vm380_vm0, %v738_v35 }
  0x24   : > { %451 = vmatprep.mubr.bf16.mxu0 %v851_v3  ;;  %481 = vmatprep.mubr.bf16.mxu1 %v851_v3 }
  0x2b   : > { %750 = vmatmul.mubr.msk.bf16.gmra.mrb[8].mxu0 %vm380_vm0, %v736_v44  ;;  %753 = vmatmul.mubr.msk.bf16.gmra.mrb[8].mxu1 %vm380_vm0, %v739_v45 }
  0xee   : > { %v433_v50 = vpop.f32.mrb[0].mxu0  ;;  %v463_v51 = vpop.f32.mrb[0].mxu1 }
  0xef   : > { %v434_v52 = vadd.f32 %v433_v50, %v962_v48  ;;  %v464_v53 = vadd.f32 %v463_v51, %v962_v48  ;;  %v435_v54 = vpop.f32.mrb[1].mxu0  ;;  %v465_v55 = vpop.f32.mrb[1].mxu1 }
  0xf0   : > { %v436_v56 = vadd.f32 %v435_v54, %v964_v49  ;;  %v466_v57 = vadd.f32 %v465_v55, %v964_v49  ;;  %v437_v58 = vpop.f32.mrb[2].mxu0  ;;  %v467_v59 = vpop.f32.mrb[2].mxu1 }
  0xf1   : > { %v492_v60 = vmul.f32 0.1, %v434_v52  ;;  %v504_v61 = vmul.f32 0.1, %v464_v53  ;;  %v438_v62 = vadd.f32 %v437_v58, %v962_v48  ;;  %v468_v63 = vadd.f32 %v467_v59, %v962_v48  ;;  %v439_v0 = vpop.f32.mrb[3].mxu0  ;;  %v469_v1 = vpop.f32.mrb[3].mxu1 }
  0xf2   : > { %v493_v2 = vmul.f32 0.1, %v436_v56  ;;  %v505_v3 = vmul.f32 0.1, %v466_v57  ;;  %v440_v4 = vadd.f32 %v439_v0, %v964_v49  ;;  %v470_v5 = vadd.f32 %v469_v1, %v964_v49 }
  0xf3   : > { %v516_v6 = vmax.f32 %v434_v52, %v492_v60  ;;  %v528_v7 = vmax.f32 %v464_v53, %v504_v61  ;;  %v494_v8 = vmul.f32 0.1, %v438_v62  ;;  %v506_v9 = vmul.f32 0.1, %v468_v63 }
  0xf4   : > { %v517_v10 = vmax.f32 %v436_v56, %v493_v2  ;;  %v529_v11 = vmax.f32 %v466_v57, %v505_v3  ;;  %v495_v12 = vmul.f32 0.1, %v440_v4  ;;  %v507_v13 = vmul.f32 0.1, %v470_v5 }
  0xf5   : > { %v518_v14 = vmax.f32 %v438_v62, %v494_v8  ;;  %v530_v15 = vmax.f32 %v468_v63, %v506_v9 }
  0xf6   : > { %v768_v16 = vpack.c.bf16 %v517_v10, %v516_v6  ;;  %v774_v17 = vpack.c.bf16 %v529_v11, %v528_v7  ;;  %v519_v18 = vmax.f32 %v440_v4, %v495_v12  ;;  %v531_v19 = vmax.f32 %v470_v5, %v507_v13  ;;  %v443_v20 = vpop.f32.mrb[4].mxu0  ;;  %v473_v21 = vpop.f32.mrb[4].mxu1 }
  0xf7   : > { %v444_v22 = vadd.f32 %v443_v20, %v962_v48  ;;  %v474_v23 = vadd.f32 %v473_v21, %v962_v48  ;;  %v445_v24 = vpop.f32.mrb[5].mxu0  ;;  %v475_v25 = vpop.f32.mrb[5].mxu1 }
  0xf8   : > { %612 = vst [vmem:[%s978_s24] sm:$0xff] %v768_v16  ;;  %618 = vst [vmem:[%s978_s24 + $0x30] sm:$0xff] %v774_v17  ;;  %v769_v26 = vpack.c.bf16 %v519_v18, %v518_v14  ;;  %v775_v27 = vpack.c.bf16 %v531_v19, %v530_v15  ;;  %v446_v28 = vadd.f32 %v445_v24, %v964_v49  ;;  %v447_v30 = vpop.f32.mrb[6].mxu0  ;;  %v477_v31 = vpop.f32.mrb[6].mxu1 }
  0xf9   : > { %v476_v29 = vadd.f32 %v475_v25, %v964_v49  ;;  %v496_v32 = vmul.f32 0.1, %v444_v22  ;;  %v508_v33 = vmul.f32 0.1, %v474_v23  ;;  %v448_v34 = vadd.f32 %v447_v30, %v962_v48  ;;  %v449_v36 = vpop.f32.mrb[7].mxu0  ;;  %v479_v37 = vpop.f32.mrb[7].mxu1 }
  0xfa   : > { %v478_v35 = vadd.f32 %v477_v31, %v962_v48  ;;  %613 = vst [vmem:[%s978_s24 + $0x8] sm:$0xff] %v769_v26  ;;  %619 = vst [vmem:[%s978_s24 + $0x38] sm:$0xff] %v775_v27  ;;  %v497_v38 = vmul.f32 0.1, %v446_v28  ;;  %v450_v40 = vadd.f32 %v449_v36, %v964_v49  ;;  %v480_v41 = vadd.f32 %v479_v37, %v964_v49 }
  0xfb   : > { %v509_v39 = vmul.f32 0.1, %v476_v29  ;;  %v520_v42 = vmax.f32 %v444_v22, %v496_v32  ;;  %v532_v43 = vmax.f32 %v474_v23, %v508_v33  ;;  %v498_v44 = vmul.f32 0.1, %v448_v34 }
  0xfc   : > { %v510_v45 = vmul.f32 0.1, %v478_v35  ;;  %v521_v46 = vmax.f32 %v446_v28, %v497_v38  ;;  %v499_v50 = vmul.f32 0.1, %v450_v40  ;;  %v511_v51 = vmul.f32 0.1, %v480_v41 }
  0xfd   : > { %v533_v47 = vmax.f32 %v476_v29, %v509_v39  ;;  %v522_v52 = vmax.f32 %v448_v34, %v498_v44 }
  0xfe   : > { %v534_v53 = vmax.f32 %v478_v35, %v510_v45  ;;  %v770_v54 = vpack.c.bf16 %v521_v46, %v520_v42  ;;  %v523_v56 = vmax.f32 %v450_v40, %v499_v50  ;;  %v535_v57 = vmax.f32 %v480_v41, %v511_v51  ;;  %v453_v58 = vpop.f32.mrb[8].mxu0  ;;  %v483_v59 = vpop.f32.mrb[8].mxu1 }
  0xff   : > { %v776_v55 = vpack.c.bf16 %v533_v47, %v532_v43  ;;  %v454_v60 = vadd.f32 %v453_v58, %v962_v48  ;;  %v484_v61 = vadd.f32 %v483_v59, %v962_v48  ;;  %v455_v62 = vpop.f32.mrb[9].mxu0  ;;  %v485_v63 = vpop.f32.mrb[9].mxu1 }
 0x100   : > { %614 = vst [vmem:[%s978_s24 + $0x10] sm:$0xff] %v770_v54  ;;  %v771_v0 = vpack.c.bf16 %v523_v56, %v522_v52  ;;  %v777_v1 = vpack.c.bf16 %v535_v57, %v534_v53  ;;  %v456_v2 = vadd.f32 %v455_v62, %v964_v49  ;;  %v486_v3 = vadd.f32 %v485_v63, %v964_v49  ;;  %v457_v4 = vpop.f32.mrb[10].mxu0  ;;  %v487_v5 = vpop.f32.mrb[10].mxu1 }
 0x101   : > { %620 = vst [vmem:[%s978_s24 + $0x40] sm:$0xff] %v776_v55  ;;  %v500_v6 = vmul.f32 0.1, %v454_v60  ;;  %v512_v7 = vmul.f32 0.1, %v484_v61  ;;  %v458_v8 = vadd.f32 %v457_v4, %v962_v48  ;;  %v488_v9 = vadd.f32 %v487_v5, %v962_v48  ;;  %v459_v10 = vpop.f32.mrb[11].mxu0 }
 0x102   : > { %v489_v11 = vpop.f32.mrb[11].mxu1  ;;  %615 = vst [vmem:[%s978_s24 + $0x18] sm:$0xff] %v771_v0  ;;  %621 = vst [vmem:[%s978_s24 + $0x48] sm:$0xff] %v777_v1  ;;  %v501_v12 = vmul.f32 0.1, %v456_v2  ;;  %v460_v14 = vadd.f32 %v459_v10, %v964_v49 }
 0x103   : > { %v513_v13 = vmul.f32 0.1, %v486_v3  ;;  %v490_v15 = vadd.f32 %v489_v11, %v964_v49  ;;  %v524_v16 = vmax.f32 %v454_v60, %v500_v6  ;;  %v536_v17 = vmax.f32 %v484_v61, %v512_v7 }
 0x104   : > { %v502_v18 = vmul.f32 0.1, %v458_v8  ;;  %v514_v19 = vmul.f32 0.1, %v488_v9  ;;  %v525_v20 = vmax.f32 %v456_v2, %v501_v12  ;;  %v503_v21 = vmul.f32 0.1, %v460_v14 }
 0x105   : > { %v537_v48 = vmax.f32 %v486_v3, %v513_v13  ;;  %v515_v22 = vmul.f32 0.1, %v490_v15 }
 0x106   : > { %v526_v23 = vmax.f32 %v458_v8, %v502_v18  ;;  %v538_v24 = vmax.f32 %v488_v9, %v514_v19  ;;  %v772_v25 = vpack.c.bf16 %v525_v20, %v524_v16  ;;  %v527_v27 = vmax.f32 %v460_v14, %v503_v21 }
 0x107   : > { %v778_v26 = vpack.c.bf16 %v537_v48, %v536_v17  ;;  %v539_v28 = vmax.f32 %v490_v15, %v515_v22 }
 0x108   : > { %616 = vst [vmem:[%s978_s24 + $0x20] sm:$0xff] %v772_v25  ;;  %v773_v49 = vpack.c.bf16 %v527_v27, %v526_v23 }
 0x109   : > { %622 = vst [vmem:[%s978_s24 + $0x50] sm:$0xff] %v778_v26  ;;  %v779_v29 = vpack.c.bf16 %v539_v28, %v538_v24 }
 0x10a   : > { %617 = vst [vmem:[%s978_s24 + $0x28] sm:$0xff] %v773_v49 }
 0x10b   : > { %623 = vst [vmem:[%s978_s24 + $0x58] sm:$0xff] %v779_v29 }
 0x10c PF: > { %s14_s17 = sadd.s32 1, %s849_s17   ;;  %s1022_s15 = smov %s845_s16 }
 0x10d   : > { %p11_p5 = scmp.ge.s32.totalorder %s14_s17, 4   ;;  %s1023_s16 = smov %s1025_s18 }
 0x10f   :  { %13 = sbr.rel (!%p11_p5) target bundleno = 2 (0x2), region = 69 }

// kernel: unet1x3_forward.14
= control target key start
LH: loop header
LB: loop body
LE: loop exit
PB: predicated region body
PF: predicated region fallthrough
CT: control target
= control target key end

     0   :  { %s2009_s18 = smov 0   ;;  %s2011_s19 = smov 0   ;;  %s2559_s0 = inlined_call_operand.vmem [shape: bf16[2,192,64], index: 0, kind: input, shape index: {}, may-alias: {0,1,2}]   ;;  %s2560_s1 = inlined_call_operand.vmem [shape: bf16[2,192,64], index: 1, kind: input, shape index: {}, may-alias: {0,1,2}]   ;;  %s2561_s2 = inlined_call_operand.vmem [shape: bf16[2,192,64], index: 2, kind: input, shape index: {}, may-alias: {0,1,2}]   ;;  %s2562_s3 = inlined_call_operand.vmem [shape: bf16[3,192,64], index: 3, kind: input, shape index: {}]   ;;  %s2563_s4 = inlined_call_operand.vmem [shape: f32[1,64], index: 4, kind: input, shape index: {}]   ;;  %s2564_s5 = inlined_call_operand.vmem [shape: bf16[2,160,64], index: 5, kind: output, shape index: {}]  }
   0x1   :  { %s2013_s20 = smov 0  }
   0x2 LB: > { %s27_s21 = sadd.s32 1, %s1971_s19  ;;  %p1673_p0 = scmp.ge.s32.totalorder %s1975_s20, 1  ;;  %s1975_s20 = sphi %s2013_s20, %s15_s20   ;;  %s1971_s19 = sphi %s2011_s19, %s2566_s19   ;;  %s1967_s18 = sphi %s2009_s18, %s2565_s18  }
   0x3   : > { %p29_p1 = scmp.ge.s32.totalorder %s27_s21, 2  ;;  %p286_p2 = scmp.lt.s32.totalorder %s1975_s20, 3 }
   0x5   : > { %s2568_s21 = smov (%p29_p1, %s27_s21), 0  ;;  %p287_p3 = pnand %p1673_p0, %p286_p2 }
   0x6   : > { %p358_p4 = scmp.lt.s32.totalorder (!%p287_p3), %s1967_s18, 1  ;;  %v1916_v0 = vld [vmem:[%s2562_s3] sm:$0xff] (!%p287_p3)   ;;  %v1977_v1 = vmov (!%p287_p3), 0   ;;  %v1918_v3 = vld [vmem:[%s2562_s3 + $0x8] sm:$0xff] (!%p287_p3)   ;;  %vm504_vm0 = vsmask.f32 (!%p287_p3), 7424 }
   0x7   : > { %290 = sbr.rel (%p287_p3) target bundleno = 484 (0x1e4), region = 40  ;;  %1032 = vmatprep.subr.bf16.mxu1 (!%p287_p3), %v1977_v1  ;;  %844 = vmatprep.subr.bf16.mxu0 (!%p287_p3), %v1977_v1  ;;  %v1917_v2 = vld [vmem:[%s2562_s3 + $0x60] sm:$0xff] (!%p287_p3)   ;;  %v1919_v4 = vld [vmem:[%s2562_s3 + $0x68] sm:$0xff] (!%p287_p3)   ;;  %v1921_v5 = vld [vmem:[%s2562_s3 + $0x10] sm:$0xff] (!%p287_p3)   ;;  %s1978_s15 = smov (!%p287_p3), 64   ;;  %vm630_vm1 = vcmask (!%p287_p3), 1046528  }
   0x8   : > { %1033 = vmatpush1.bf16.msra.mxu1 (!%p287_p3), %v1916_v0  ;;  %845 = vmatpush1.bf16.msra.mxu0 (!%p287_p3), %v1917_v2  ;;  %v1922_v6 = vld [vmem:[%s2562_s3 + $0x70] sm:$0xff] (!%p287_p3)   ;;  %vm656_vm2 = vcmask (!%p287_p3), 523264   ;;  %v1923_v0 = vld [vmem:[%s2562_s3 + $0x18] sm:$0xff] (!%p287_p3)   ;;  %vm1525_vm3 = vcmask (!%p287_p3), 519168  }
   0x9   : > { %1034 = vmatprep.subr.bf16.mxu1 (!%p287_p3), %v1977_v1  ;;  %846 = vmatprep.subr.bf16.mxu0 (!%p287_p3), %v1977_v1  ;;  %v1924_v2 = vld [vmem:[%s2562_s3 + $0x78] sm:$0xff] (!%p287_p3)  }
   0xc   : > { %1035 = vmatpush1.bf16.msra.mxu1 (!%p287_p3), %v1918_v3  ;;  %847 = vmatpush1.bf16.msra.mxu0 (!%p287_p3), %v1919_v4  ;;  %v1925_v4 = vld [vmem:[%s2562_s3 + $0x20] sm:$0xff] (!%p287_p3)  }
   0xd   : > { %1036 = vmatprep.subr.bf16.mxu1 (!%p287_p3), %v1977_v1  ;;  %848 = vmatprep.subr.bf16.mxu0 (!%p287_p3), %v1977_v1 }
   0xe   : > { %s2570_s18 = smov (!%p358_p4, %s1967_s18), 1 }
   0xf   : > { %s2042_s28 = smul.u32 96, %s2570_s18 }
  0x10   : > { %1037 = vmatpush1.bf16.msra.mxu1 %v1921_v5  ;;  %849 = vmatpush1.bf16.msra.mxu0 %v1922_v6  ;;  %v1926_v6 = vld [vmem:[%s2562_s3 + $0x80] sm:$0xff]   ;;  %s1877_s26 = smul.u32 80, %s2570_s18 }
  0x11   : > { %s2055_s10 = scalar_lea.vmem %s2559_s0, %s2042_s28  ;;  %s1828_s13 = sadd.s32 80, %s2042_s28  ;;  %1038 = vmatprep.subr.bf16.mxu1 %v1977_v1  ;;  %850 = vmatprep.subr.bf16.mxu0 %v1977_v1 }
  0x12   : > { %v2062_v7 = vld [vmem:[%s2055_s10] sm:$0xff]   ;;  %v2065_v8 = vld [vmem:[%s2055_s10 + $0x8] sm:$0xff]   ;;  %v2069_v9 = vld [vmem:[%s2055_s10 + $0x10] sm:$0xff]   ;;  %s1830_s14 = sadd.s32 88, %s2042_s28  ;;  %s383_s22 = scalar_lea.vmem %s2560_s1, %s1828_s13 }
  0x13   : > { %v506_v10 = vshrl.u32 %v2062_v7, 16  ;;  %v508_v11 = vshll.u32 %v2062_v7, 16  ;;  %v513_v12 = vshll.u32 %v2065_v8, 16  ;;  %v517_v13 = vshrl.u32 %v2065_v8, 16  ;;  %v2079_v15 = vld [vmem:[%s2055_s10 + $0x18] sm:$0xff]   ;;  %v2083_v17 = vld [vmem:[%s2055_s10 + $0x20] sm:$0xff]   ;;  %s402_s25 = scalar_lea.vmem %s2561_s2, %s1830_s14  ;;  %s2475_s29 = scalar_lea.vmem %s2564_s5, %s1877_s26 }
  0x14   : > { %v521_v14 = vshll.u32 %v2069_v9, 16  ;;  %v525_v16 = vshrl.u32 %v2069_v9, 16  ;;  %v529_v21 = vshll.u32 %v2079_v15, 16  ;;  %v533_v22 = vshrl.u32 %v2079_v15, 16  ;;  %v2091_v26 = vld [vmem:[%s2055_s10 + $0x28] sm:$0xff]   ;;  %v2095_v31 = vld [vmem:[%s2055_s10 + $0x30] sm:$0xff]   ;;  %1039 = vmatpush1.bf16.msra.mxu1 %v1923_v0  ;;  %851 = vmatpush1.bf16.msra.mxu0 %v1924_v2 }
  0x15   : > { %v510_v18 = vrot.slane %v508_v11, 1  ;;  %v515_v19 = vrot.slane %v513_v12, 1  ;;  %v537_v23 = vshll.u32 %v2083_v17, 16  ;;  %v541_v27 = vshrl.u32 %v2083_v17, 16  ;;  %v2098_v32 = vld [vmem:[%s2055_s10 + $0x38] sm:$0xff]   ;;  %v2108_v40 = vld [vmem:[%s2055_s10 + $0x40] sm:$0xff]   ;;  %1040 = vmatprep.subr.bf16.mxu1 %v1977_v1  ;;  %852 = vmatprep.subr.bf16.mxu0 %v1977_v1 }
  0x16   : > { %v523_v20 = vrot.slane %v521_v14, 1  ;;  %v531_v29 = vrot.slane %v529_v21, 1  ;;  %v545_v34 = vshll.u32 %v2091_v26, 16  ;;  %v549_v35 = vshrl.u32 %v2091_v26, 16  ;;  %v2127_v49 = vld [vmem:[%s2055_s10 + $0x48] sm:$0xff]   ;;  %v2129_v51 = vld [vmem:[%s383_s22] sm:$0xff]  }
  0x17   : > { %v511_v24 = vor.u32 %v510_v18, %v506_v10  ;;  %v519_v25 = vor.u32 %v517_v13, %v515_v19  ;;  %v539_v30 = vrot.slane %v537_v23, 1  ;;  %v553_v39 = vshll.u32 %v2095_v31, 16  ;;  %v2134_v55 = vld [vmem:[%s402_s25] sm:$0xff]  }
  0x18   : > { %v527_v28 = vor.u32 %v525_v16, %v523_v20  ;;  %v535_v38 = vor.u32 %v533_v22, %v531_v29  ;;  %v547_v42 = vrot.slane %v545_v34, 1  ;;  %v557_v43 = vshrl.u32 %v2095_v31, 16  ;;  %1041 = vmatpush1.bf16.msra.mxu1 %v1925_v4  ;;  %853 = vmatpush1.bf16.msra.mxu0 %v1926_v6  ;;  %v1945_v2 = vld [vmem:[%s2562_s3 + $0xe0] sm:$0xff]  }
  0x19   : > { %v516_v33 = vsel %vm504_vm0, %v511_v24, %v515_v19  ;;  %v524_v36 = vsel %vm504_vm0, %v519_v25, %v523_v20  ;;  %v543_v41 = vor.u32 %v541_v27, %v539_v30  ;;  %v561_v44 = vshll.u32 %v2098_v32, 16  ;;  %v1927_v20 = vld [vmem:[%s2562_s3 + $0x28] sm:$0xff]   ;;  %1042 = vmatprep.subr.bf16.mxu1 %v1977_v1  ;;  %854 = vmatprep.subr.bf16.mxu0 %v1977_v1 }
  0x1a   : > { %605 = vrot.lane.b32.xlu0 %v516_v33, %s1978_s15  ;;  %v532_v37 = vsel %vm504_vm0, %v527_v28, %v531_v29  ;;  %v540_v45 = vsel %vm504_vm0, %v535_v38, %v539_v30  ;;  %v555_v46 = vrot.slane %v553_v39, 1  ;;  %v565_v47 = vshrl.u32 %v2098_v32, 16  ;;  %v1928_v24 = vld [vmem:[%s2562_s3 + $0x88] sm:$0xff]   ;;  %v1929_v33 = vld [vmem:[%s2562_s3 + $0x30] sm:$0xff]   ;;  %v1931_v38 = vld [vmem:[%s2562_s3 + $0x38] sm:$0xff]  }
  0x1b   : > { %609 = vrot.lane.b32.xlu1 %v532_v37, %s1978_s15  ;;  %v569_v48 = vshll.u32 %v2108_v40, 16  ;;  %v551_v50 = vor.u32 %v549_v35, %v547_v42  ;;  %v563_v52 = vrot.slane %v561_v44, 1  ;;  %v573_v53 = vshrl.u32 %v2108_v40, 16  ;;  %v1932_v39 = vld [vmem:[%s2562_s3 + $0x98] sm:$0xff]   ;;  %v1936_v44 = vld [vmem:[%s2562_s3 + $0xa8] sm:$0xff]  }
  0x1c   : > { %v577_v54 = vshll.u32 %v2127_v49, 16  ;;  %v548_v56 = vsel %vm504_vm0, %v543_v41, %v547_v42  ;;  %v559_v57 = vor.u32 %v557_v43, %v555_v46  ;;  %v581_v59 = vshrl.u32 %v2127_v49, 16  ;;  %1043 = vmatpush1.bf16.msra.mxu1 %v1927_v20  ;;  %855 = vmatpush1.bf16.msra.mxu0 %v1928_v24  ;;  %v1933_v41 = vld [vmem:[%s2562_s3 + $0x40] sm:$0xff]   ;;  %v1935_v43 = vld [vmem:[%s2562_s3 + $0x48] sm:$0xff]  }
  0x1d   : > { %v571_v58 = vrot.slane %v569_v48, 1  ;;  %v556_v60 = vsel %vm504_vm0, %v551_v50, %v555_v46  ;;  %v567_v61 = vor.u32 %v565_v47, %v563_v52  ;;  %v585_v62 = vshll.u32 %v2129_v51, 16  ;;  %1044 = vmatprep.subr.bf16.mxu1 %v1977_v1  ;;  %856 = vmatprep.subr.bf16.mxu0 %v1977_v1  ;;  %v1934_v42 = vld [vmem:[%s2562_s3 + $0xa0] sm:$0xff]   ;;  %v1938_v46 = vld [vmem:[%s2562_s3 + $0xb0] sm:$0xff]   ;;  %v1939_v47 = vld [vmem:[%s2562_s3 + $0x58] sm:$0xff]  }
  0x1e   : > { %607 = vrot.lane.b32.xlu0 %v524_v36, %s1978_s15  ;;  %v593_v63 = vshll.u32 %v2134_v55, 16  ;;  %v589_v3 = vshrl.u32 %v2129_v51, 16  ;;  %v579_v5 = vrot.slane %v577_v54, 1  ;;  %v564_v10 = vsel %vm504_vm0, %v559_v57, %v563_v52  ;;  %v1930_v36 = vld [vmem:[%s2562_s3 + $0x90] sm:$0xff]   ;;  %v1940_v48 = vld [vmem:[%s2562_s3 + $0xb8] sm:$0xff]   ;;  %v1941_v50 = vld [vmem:[%s2562_s3 + $0xc0] sm:$0xff]  }
  0x1f   : > { %611 = vrot.lane.b32.xlu1 %v540_v45, %s1978_s15  ;;  %v575_v11 = vor.u32 %v573_v53, %v571_v58  ;;  %v572_v12 = vsel %vm504_vm0, %v567_v61, %v571_v58  ;;  %v587_v14 = vrot.slane %v585_v62, 1  ;;  %v597_v18 = vshrl.u32 %v2134_v55, 16  ;;  %v1937_v45 = vld [vmem:[%s2562_s3 + $0x50] sm:$0xff]   ;;  %v1942_v58 = vld [vmem:[%s2562_s3 + $0xc8] sm:$0xff]  }
  0x20   : > { %v583_v13 = vor.u32 %v581_v59, %v579_v5  ;;  %v595_v16 = vrot.slane %v593_v63, 1  ;;  %v631_v19 = vrot.slane %v2062_v7, 1  ;;  %v632_v21 = vrot.slane %v2065_v8, 1  ;;  %1045 = vmatpush1.bf16.msra.mxu1 %v1929_v33  ;;  %857 = vmatpush1.bf16.msra.mxu0 %v1930_v36  ;;  %v1944_v63 = vld [vmem:[%s2562_s3 + $0xd8] sm:$0xff]   ;;  %v1950_v20 = vld [vmem:[%s2562_s3 + $0x108] sm:$0xff]  }
  0x21   : > { %v580_v22 = vsel %vm504_vm0, %v575_v11, %v579_v5  ;;  %v591_v23 = vor.u32 %v589_v3, %v587_v14  ;;  %v634_v25 = vrot.slane %v2069_v9, 1  ;;  %v2179_v30 = vrot.slane %v1977_v1, 1  ;;  %1046 = vmatprep.subr.bf16.mxu1 %v1977_v1  ;;  %858 = vmatprep.subr.bf16.mxu0 %v1977_v1  ;;  %v1946_v5 = vld [vmem:[%s2562_s3 + $0xe8] sm:$0xff]  }
  0x22   : > { %613 = vrot.lane.b32.xlu0 %v548_v56, %s1978_s15  ;;  %v588_v27 = vsel %vm504_vm0, %v583_v13, %v587_v14  ;;  %v633_v28 = vsel %vm630_vm1, %v631_v19, %v632_v21  ;;  %v599_v29 = vor.u32 %v597_v18, %v595_v16  ;;  %v636_v53 = vrot.slane %v2079_v15, 1  ;;  %v1948_v13 = vld [vmem:[%s2562_s3 + $0xf8] sm:$0xff]  }
  0x23   : > { %615 = vrot.lane.b32.xlu1 %v556_v60, %s1978_s15  ;;  %1748 = vmatprep.mubr.msk.bf16.mxu1 %vm656_vm2, %v633_v28  ;;  %v635_v34 = vsel %vm630_vm1, %v632_v21, %v634_v25  ;;  %v596_v35 = vsel %vm504_vm0, %v591_v23, %v595_v16  ;;  %v1943_v60 = vld [vmem:[%s2562_s3 + $0xd0] sm:$0xff]   ;;  %v638_v61 = vrot.slane %v2083_v17, 1  ;;  %v640_v0 = vrot.slane %v2091_v26, 1  ;;  %v1949_v16 = vld [vmem:[%s2562_s3 + $0x100] sm:$0xff]  }
  0x24   : > { %v604_v37 = vsel %vm504_vm0, %v599_v29, %v2179_v30  ;;  %1726 = vmatprep.mubr.msk.bf16.mxu0 %vm656_vm2, %v635_v34  ;;  %1047 = vmatpush1.bf16.msra.mxu1 %v1931_v38  ;;  %v2254_v57 = vsel %vm630_vm1, %v634_v25, %v636_v53  ;;  %v642_v6 = vrot.slane %v2095_v31, 1  ;;  %v644_v14 = vrot.slane %v2098_v32, 1  ;;  %v1952_v25 = vld [vmem:[%s2562_s3 + $0x118] sm:$0xff]  }
  0x25   : > { %859 = vmatpush1.bf16.msra.mxu0 %v1932_v39  ;;  %1048 = vmatprep.subr.bf16.mxu1 %v1977_v1  ;;  %v2277_v62 = vsel %vm630_vm1, %v636_v53, %v638_v61  ;;  %v2300_v4 = vsel %vm630_vm1, %v638_v61, %v640_v0  ;;  %v646_v21 = vrot.slane %v2108_v40, 1  ;;  %v652_v36 = vrot.slane %v2134_v55, 1 }
  0x26   : > { %617 = vrot.lane.b32.xlu0 %v564_v10, %s1978_s15  ;;  %860 = vmatprep.subr.bf16.mxu0 %v1977_v1  ;;  %v1947_v10 = vld [vmem:[%s2562_s3 + $0xf0] sm:$0xff]   ;;  %v2348_v19 = vsel %vm630_vm1, %v642_v6, %v644_v14 }
  0x27   : > { %619 = vrot.lane.b32.xlu1 %v572_v12, %s1978_s15  ;;  %v2324_v12 = vsel %vm630_vm1, %v640_v0, %v642_v6  ;;  %v647_v24 = vsel %vm630_vm1, %v644_v14, %v646_v21 }
  0x28   : > { %1049 = vmatpush1.bf16.msra.mxu1 %v1933_v41 }
  0x29   : > { %861 = vmatpush1.bf16.msra.mxu0 %v1934_v42  ;;  %1050 = vmatprep.subr.bf16.mxu1 %v1977_v1 }
  0x2a   : > { %621 = vrot.lane.b32.xlu0 %v580_v22, %s1978_s15  ;;  %862 = vmatprep.subr.bf16.mxu0 %v1977_v1  ;;  %v1951_v22 = vld [vmem:[%s2562_s3 + $0x110] sm:$0xff]  }
  0x2b   : > { %623 = vrot.lane.b32.xlu1 %v588_v27, %s1978_s15  ;;  %v648_v27 = vrot.slane %v2127_v49, 1 }
  0x2c   : > { %1051 = vmatpush1.bf16.msra.mxu1 %v1935_v43 }
  0x2d   : > { %863 = vmatpush1.bf16.msra.mxu0 %v1936_v44  ;;  %1052 = vmatprep.subr.bf16.mxu1 %v1977_v1  ;;  %v649_v29 = vsel %vm630_vm1, %v646_v21, %v648_v27 }
  0x2e   : > { %625 = vrot.lane.b32.xlu0 %v596_v35, %s1978_s15  ;;  %864 = vmatprep.subr.bf16.mxu0 %v1977_v1 }
  0x2f   : > { %627 = vrot.lane.b32.xlu1 %v604_v37, %s1978_s15 }
  0x30   : > { %1053 = vmatpush1.bf16.msra.mxu1 %v1937_v45 }
  0x31   : > { %865 = vmatpush1.bf16.msra.mxu0 %v1938_v46  ;;  %1054 = vmatprep.subr.bf16.mxu1 %v1977_v1 }
  0x32   : > { %866 = vmatprep.subr.bf16.mxu0 %v1977_v1 }
  0x34   : > { %1055 = vmatpush1.bf16.msra.mxu1 %v1939_v47 }
  0x35   : > { %867 = vmatpush1.bf16.msra.mxu0 %v1940_v48  ;;  %1851 = vmatprep.subr.bf16.mxu1 %v1977_v1 }
  0x36   : > { %1245 = vmatprep.subr.bf16.mxu0 %v1977_v1 }
  0x8c   : > { %v606_v52 = vpop.permute.xlu0 %605 }
  0x8d   : > { %v658_v54 = vsel %vm656_vm2, %v2062_v7, %v606_v52  ;;  %v610_v7 = vpop.permute.xlu1 %609 }
  0x8e   : > { %1065 = vmatmul.mubr.bf16.vlgmr.msra.gmra.mrb[0].mxu1 %v658_v54 }
  0x8f   : > { %1863 = vmatpush1.bf16.msra.mxu1 %v1941_v50  ;;  %1749 = vmatprep.mubr.msk.bf16.mxu1 %vm656_vm2, %v635_v34  ;;  %v650_v34 = vrot.slane %v2129_v51, 1 }
  0x90   : > { %v608_v56 = vpop.permute.xlu0 %607  ;;  %1852 = vmatprep.subr.bf16.mxu1 %v1977_v1 }
  0x91   : > { %v661_v59 = vsel %vm656_vm2, %v2065_v8, %v608_v56  ;;  %v2271_v8 = vsel %vm656_vm2, %v2069_v9, %v610_v7  ;;  %v612_v9 = vpop.permute.xlu1 %611  ;;  %v651_v35 = vsel %vm630_vm1, %v648_v27, %v650_v34  ;;  %v653_v38 = vsel %vm630_vm1, %v650_v34, %v652_v36 }
  0x92   : > { %877 = vmatmul.mubr.bf16.vlgmr.msra.gmra.mrb[0].mxu0 %v661_v59  ;;  %v2295_v3 = vsel %vm656_vm2, %v2079_v15, %v612_v9 }
  0x93   : > { %1246 = vmatpush1.bf16.msra.mxu0 %v1941_v50  ;;  %1727 = vmatprep.mubr.msk.bf16.mxu0 %vm656_vm2, %v2254_v57 }
  0x94   : > { %1247 = vmatprep.subr.bf16.mxu0 %v1977_v1  ;;  %1864 = vmatpush1.bf16.msra.mxu1 %v1942_v58  ;;  %v614_v15 = vpop.permute.xlu0 %613 }
  0x95   : > { %1853 = vmatprep.subr.bf16.mxu1 %v1977_v1  ;;  %v2319_v11 = vsel %vm656_vm2, %v2083_v17, %v614_v15  ;;  %v616_v17 = vpop.permute.xlu1 %615 }
  0x96   : > { %1073 = vmatmul.mubr.bf16.gmra.mrb[4].mxu1 %v661_v59  ;;  %v2343_v18 = vsel %vm656_vm2, %v2091_v26, %v616_v17 }
  0x97   : > { %1248 = vmatpush1.bf16.msra.mxu0 %v1942_v58  ;;  %1750 = vmatprep.mubr.msk.bf16.mxu1 %vm656_vm2, %v2254_v57 }
  0x98   : > { %1249 = vmatprep.subr.bf16.mxu0 %v1977_v1  ;;  %1865 = vmatpush1.bf16.msra.mxu1 %v1943_v60  ;;  %v618_v26 = vpop.permute.xlu0 %617 }
  0x99   : > { %1854 = vmatprep.subr.bf16.mxu1 %v1977_v1  ;;  %v2367_v23 = vsel %vm656_vm2, %v2095_v31, %v618_v26  ;;  %v620_v31 = vpop.permute.xlu1 %619 }
  0x9a   : > { %885 = vmatmul.mubr.bf16.gmra.mrb[4].mxu0 %v2271_v8  ;;  %v679_v28 = vsel %vm656_vm2, %v2098_v32, %v620_v31 }
  0x9b   : > { %1250 = vmatpush1.bf16.msra.mxu0 %v1943_v60  ;;  %1728 = vmatprep.mubr.msk.bf16.mxu0 %vm656_vm2, %v2277_v62 }
  0x9c   : > { %1251 = vmatprep.subr.bf16.mxu0 %v1977_v1  ;;  %1866 = vmatpush1.bf16.msra.mxu1 %v1944_v63  ;;  %v622_v33 = vpop.permute.xlu0 %621 }
  0x9d   : > { %1855 = vmatprep.subr.bf16.mxu1 %v1977_v1  ;;  %v624_v32 = vpop.permute.xlu1 %623 }
  0x9e   : > { %1081 = vmatmul.mubr.bf16.gmra.mrb[8].mxu1 %v2271_v8  ;;  %v685_v37 = vsel %vm656_vm2, %v2127_v49, %v624_v32  ;;  %v655_v49 = vsel %vm630_vm1, %v652_v36, %v2179_v30 }
  0x9f   : > { %1751 = vmatprep.mubr.msk.bf16.mxu1 %vm656_vm2, %v2277_v62  ;;  %1252 = vmatpush1.bf16.msra.mxu0 %v1944_v63 }
  0xa0   : > { %1253 = vmatprep.subr.bf16.mxu0 %v1977_v1  ;;  %1867 = vmatpush1.bf16.msra.mxu1 %v1945_v2 }
  0xa1   : > { %1856 = vmatprep.subr.bf16.mxu1 %v1977_v1 }
  0xa2   : > { %893 = vmatmul.mubr.bf16.gmra.mrb[8].mxu0 %v2295_v3 }
  0xa3   : > { %1729 = vmatprep.mubr.msk.bf16.mxu0 %vm656_vm2, %v2300_v4  ;;  %1254 = vmatpush1.bf16.msra.mxu0 %v1945_v2 }
  0xa4   : > { %1255 = vmatprep.subr.bf16.mxu0 %v1977_v1  ;;  %1868 = vmatpush1.bf16.msra.mxu1 %v1946_v5 }
  0xa5   : > { %1857 = vmatprep.subr.bf16.mxu1 %v1977_v1 }
  0xa6   : > { %1089 = vmatmul.mubr.bf16.gmra.mrb[12].mxu1 %v2295_v3 }
  0xa7   : > { %1752 = vmatprep.mubr.msk.bf16.mxu1 %vm656_vm2, %v2300_v4  ;;  %1256 = vmatpush1.bf16.msra.mxu0 %v1946_v5 }
  0xa8   : > { %1257 = vmatprep.subr.bf16.mxu0 %v1977_v1  ;;  %1869 = vmatpush1.bf16.msra.mxu1 %v1947_v10 }
  0xa9   : > { %1858 = vmatprep.subr.bf16.mxu1 %v1977_v1 }
  0xaa   : > { %901 = vmatmul.mubr.bf16.gmra.mrb[12].mxu0 %v2319_v11 }
  0xab   : > { %1730 = vmatprep.mubr.msk.bf16.mxu0 %vm656_vm2, %v2324_v12  ;;  %1258 = vmatpush1.bf16.msra.mxu0 %v1947_v10 }
  0xac   : > { %1259 = vmatprep.subr.bf16.mxu0 %v1977_v1  ;;  %1870 = vmatpush1.bf16.msra.mxu1 %v1948_v13 }
  0xad   : > { %1859 = vmatprep.subr.bf16.mxu1 %v1977_v1 }
  0xae   : > { %1097 = vmatmul.mubr.bf16.gmra.mrb[16].mxu1 %v2319_v11 }
  0xaf   : > { %1753 = vmatprep.mubr.msk.bf16.mxu1 %vm656_vm2, %v2324_v12  ;;  %1260 = vmatpush1.bf16.msra.mxu0 %v1948_v13 }
  0xb0   : > { %1261 = vmatprep.subr.bf16.mxu0 %v1977_v1  ;;  %1871 = vmatpush1.bf16.msra.mxu1 %v1949_v16 }
  0xb1   : > { %1860 = vmatprep.subr.bf16.mxu1 %v1977_v1 }
  0xb2   : > { %909 = vmatmul.mubr.bf16.gmra.mrb[16].mxu0 %v2343_v18 }
  0xb3   : > { %1731 = vmatprep.mubr.msk.bf16.mxu0 %vm656_vm2, %v2348_v19  ;;  %1262 = vmatpush1.bf16.msra.mxu0 %v1949_v16 }
  0xb4   : > { %1263 = vmatprep.subr.bf16.mxu0 %v1977_v1  ;;  %1872 = vmatpush1.bf16.msra.mxu1 %v1950_v20 }
  0xb5   : > { %1861 = vmatprep.subr.bf16.mxu1 %v1977_v1 }
  0xb6   : > { %1105 = vmatmul.mubr.bf16.gmra.mrb[20].mxu1 %v2343_v18 }
  0xb7   : > { %1754 = vmatprep.mubr.msk.bf16.mxu1 %vm656_vm2, %v2348_v19  ;;  %1264 = vmatpush1.bf16.msra.mxu0 %v1950_v20 }
  0xb8   : > { %1265 = vmatprep.subr.bf16.mxu0 %v1977_v1  ;;  %1873 = vmatpush1.bf16.msra.mxu1 %v1951_v22 }
  0xb9   : > { %1862 = vmatprep.subr.bf16.mxu1 %v1977_v1 }
  0xba   : > { %917 = vmatmul.mubr.bf16.gmra.mrb[20].mxu0 %v2367_v23 }
  0xbb   : > { %1732 = vmatprep.mubr.msk.bf16.mxu0 %vm656_vm2, %v647_v24  ;;  %1266 = vmatpush1.bf16.msra.mxu0 %v1951_v22 }
  0xbc   : > { %1267 = vmatprep.subr.bf16.mxu0 %v1977_v1  ;;  %1874 = vmatpush1.bf16.msra.mxu1 %v1952_v25  ;;  %v682_v1 = vsel %vm656_vm2, %v2108_v40, %v622_v33  ;;  %v626_v40 = vpop.permute.xlu0 %625 }
  0xbd   : > { %v688_v39 = vsel %vm656_vm2, %v2129_v51, %v626_v40  ;;  %v628_v51 = vpop.permute.xlu1 %627 }
  0xbe   : > { %1113 = vmatmul.mubr.bf16.gmra.mrb[24].mxu1 %v2367_v23  ;;  %v691_v41 = vsel %vm656_vm2, %v2134_v55, %v628_v51 }
  0xbf   : > { %1755 = vmatprep.mubr.msk.bf16.mxu1 %vm656_vm2, %v647_v24  ;;  %1268 = vmatpush1.bf16.msra.mxu0 %v1952_v25 }
  0xc2   : > { %925 = vmatmul.mubr.bf16.gmra.mrb[24].mxu0 %v679_v28 }
  0xc3   : > { %1733 = vmatprep.mubr.msk.bf16.mxu0 %vm656_vm2, %v649_v29 }
  0xc6   : > { %1121 = vmatmul.mubr.bf16.gmra.mrb[28].mxu1 %v679_v28 }
  0xc7   : > { %1756 = vmatprep.mubr.msk.bf16.mxu1 %vm656_vm2, %v649_v29 }
  0xca   : > { %933 = vmatmul.mubr.bf16.gmra.mrb[28].mxu0 %v682_v1 }
  0xcb   : > { %1734 = vmatprep.mubr.msk.bf16.mxu0 %vm656_vm2, %v651_v35 }
  0xce   : > { %1129 = vmatmul.mubr.bf16.gmra.mrb[32].mxu1 %v682_v1 }
  0xcf   : > { %1757 = vmatprep.mubr.msk.bf16.mxu1 %vm656_vm2, %v651_v35 }
  0xd2   : > { %941 = vmatmul.mubr.bf16.gmra.mrb[32].mxu0 %v685_v37 }
  0xd3   : > { %1735 = vmatprep.mubr.msk.bf16.mxu0 %vm656_vm2, %v653_v38 }
  0xd6   : > { %1137 = vmatmul.mubr.bf16.gmra.mrb[36].mxu1 %v685_v37 }
  0xd7   : > { %1799 = vmatprep.mubr.msk.bf16.mxu1 %vm656_vm2, %v647_v24 }
  0xda   : > { %949 = vmatmul.mubr.bf16.gmra.mrb[36].mxu0 %v688_v39 }
  0xdb   : > { %1794 = vmatprep.mubr.msk.bf16.mxu0 %vm656_vm2, %v2254_v57 }
  0xde   : > { %1318 = vmatmul.mubr.bf16.vlgmr.msra.gmra.mrb[40].mxu1 %v679_v28 }
  0xdf   : > { %1800 = vmatprep.mubr.msk.bf16.mxu1 %vm656_vm2, %v649_v29 }
  0xe2   : > { %1278 = vmatmul.mubr.bf16.vlgmr.msra.gmra.mrb[40].mxu0 %v2271_v8 }
  0xe3   : > { %1795 = vmatprep.mubr.msk.bf16.mxu0 %vm656_vm2, %v2277_v62 }
  0xe6   : > { %1326 = vmatmul.mubr.bf16.gmra.mrb[44].mxu1 %v682_v1 }
  0xe7   : > { %1801 = vmatprep.mubr.msk.bf16.mxu1 %vm656_vm2, %v651_v35 }
  0xea   : > { %1286 = vmatmul.mubr.bf16.gmra.mrb[44].mxu0 %v2295_v3 }
  0xeb   : > { %1796 = vmatprep.mubr.msk.bf16.mxu0 %vm656_vm2, %v2300_v4 }
  0xee   : > { %1334 = vmatmul.mubr.bf16.gmra.mrb[48].mxu1 %v685_v37 }
  0xef   : > { %1802 = vmatprep.mubr.msk.bf16.mxu1 %vm656_vm2, %v653_v38 }
  0xf2   : > { %1294 = vmatmul.mubr.bf16.gmra.mrb[48].mxu0 %v2319_v11 }
  0xf3   : > { %1797 = vmatprep.mubr.msk.bf16.mxu0 %vm656_vm2, %v2324_v12 }
  0xf6   : > { %1342 = vmatmul.mubr.bf16.gmra.mrb[52].mxu1 %v688_v39 }
  0xf7   : > { %1803 = vmatprep.mubr.msk.bf16.mxu1 %vm656_vm2, %v655_v49 }
  0xfa   : > { %1302 = vmatmul.mubr.bf16.gmra.mrb[52].mxu0 %v2343_v18 }
  0xfb   : > { %1798 = vmatprep.mubr.msk.bf16.mxu0 %vm656_vm2, %v2348_v19 }
  0xfe   : > { %1350 = vmatmul.mubr.bf16.gmra.mrb[56].mxu1 %v691_v41 }
 0x102   : > { %1310 = vmatmul.mubr.bf16.gmra.mrb[56].mxu0 %v2367_v23 }
 0x161   : > { %v1066_v42 = vpop.f32.mrb[0].mxu1 }
 0x162   : > { %v1068_v43 = vpop.f32.mrb[1].mxu1 }
 0x163   : > { %v1069_v44 = vpop.f32.mrb[2].mxu1 }
 0x164   : > { %v1071_v45 = vpop.f32.mrb[3].mxu1 }
 0x165   : > { %v878_v30 = vpop.f32.mrb[0].mxu0 }
 0x166   : > { %v2425_v46 = vadd.f32 %v1066_v42, %v878_v30  ;;  %v880_v47 = vpop.f32.mrb[1].mxu0 }
 0x167   : > { %v881_v48 = vpop.f32.mrb[2].mxu0 }
 0x168   : > { %v2427_v50 = vadd.f32 %v1069_v44, %v881_v48  ;;  %v883_v52 = vpop.f32.mrb[3].mxu0 }
 0x169   : > { %v1074_v53 = vpop.f32.mrb[4].mxu1 }
 0x16a   : > { %v1076_v55 = vpop.f32.mrb[5].mxu1 }
 0x16b   : > { %v1077_v54 = vpop.f32.mrb[6].mxu1 }
 0x16c   : > { %v1079_v56 = vpop.f32.mrb[7].mxu1 }
 0x16d   : > { %v886_v57 = vpop.f32.mrb[4].mxu0 }
 0x16e   : > { %v2429_v58 = vadd.f32 %v1074_v53, %v886_v57  ;;  %v888_v59 = vpop.f32.mrb[5].mxu0 }
 0x16f   : > { %v889_v7 = vpop.f32.mrb[6].mxu0 }
 0x170   : > { %v2431_v60 = vadd.f32 %v1077_v54, %v889_v7  ;;  %v891_v61 = vpop.f32.mrb[7].mxu0 }
 0x171   : > { %v1082_v8 = vpop.f32.mrb[8].mxu1 }
 0x172   : > { %v1084_v62 = vpop.f32.mrb[9].mxu1 }
 0x173   : > { %v1085_v63 = vpop.f32.mrb[10].mxu1 }
 0x174   : > { %v1087_v9 = vpop.f32.mrb[11].mxu1 }
 0x175   : > { %v894_v0 = vpop.f32.mrb[8].mxu0 }
 0x176   : > { %v2433_v2 = vadd.f32 %v1082_v8, %v894_v0  ;;  %v896_v3 = vpop.f32.mrb[9].mxu0 }
 0x177   : > { %v897_v4 = vpop.f32.mrb[10].mxu0 }
 0x178   : > { %v2435_v5 = vadd.f32 %v1085_v63, %v897_v4  ;;  %v899_v15 = vpop.f32.mrb[11].mxu0 }
 0x179   : > { %v1090_v6 = vpop.f32.mrb[12].mxu1 }
 0x17a   : > { %v1092_v10 = vpop.f32.mrb[13].mxu1 }
 0x17b   : > { %v1093_v11 = vpop.f32.mrb[14].mxu1 }
 0x17c   : > { %v1095_v12 = vpop.f32.mrb[15].mxu1 }
 0x17d   : > { %v902_v13 = vpop.f32.mrb[12].mxu0 }
 0x17e   : > { %v2437_v17 = vadd.f32 %v1090_v6, %v902_v13  ;;  %v904_v14 = vpop.f32.mrb[13].mxu0 }
 0x17f   : > { %v905_v16 = vpop.f32.mrb[14].mxu0 }
 0x180   : > { %v2439_v18 = vadd.f32 %v1093_v11, %v905_v16  ;;  %v907_v19 = vpop.f32.mrb[15].mxu0 }
 0x181   : > { %v1098_v20 = vpop.f32.mrb[16].mxu1 }
 0x182   : > { %v1100_v26 = vpop.f32.mrb[17].mxu1 }
 0x183   : > { %v1101_v21 = vpop.f32.mrb[18].mxu1 }
 0x184   : > { %v1103_v22 = vpop.f32.mrb[19].mxu1 }
 0x185   : > { %v910_v23 = vpop.f32.mrb[16].mxu0 }
 0x186   : > { %v2441_v24 = vadd.f32 %v1098_v20, %v910_v23  ;;  %v912_v25 = vpop.f32.mrb[17].mxu0 }
 0x187   : > { %v913_v31 = vpop.f32.mrb[18].mxu0  ;;  %v2464_v25 = vld [vmem:[%s2563_s4] ss:$0 sm:$0xff] }
 0x188   : > { %v2443_v27 = vadd.f32 %v1101_v21, %v913_v31  ;;  %v915_v28 = vpop.f32.mrb[19].mxu0 }
 0x189   : > { %v1106_v29 = vpop.f32.mrb[20].mxu1 }
 0x18a   : > { %v1108_v33 = vpop.f32.mrb[21].mxu1 }
 0x18b   : > { %v1109_v34 = vpop.f32.mrb[22].mxu1 }
 0x18c   : > { %v1111_v1 = vpop.f32.mrb[23].mxu1 }
 0x18d   : > { %v918_v35 = vpop.f32.mrb[20].mxu0 }
 0x18e   : > { %v1107_v32 = vadd.f32 %v1106_v29, %v918_v35  ;;  %v920_v36 = vpop.f32.mrb[21].mxu0 }
 0x18f   : > { %v921_v37 = vpop.f32.mrb[22].mxu0 }
 0x190   : > { %v1110_v38 = vadd.f32 %v1109_v34, %v921_v37  ;;  %v923_v40 = vpop.f32.mrb[23].mxu0 }
 0x191   : > { %v1114_v39 = vpop.f32.mrb[24].mxu1 }
 0x192   : > { %v1116_v49 = vpop.f32.mrb[25].mxu1 }
 0x193   : > { %v1117_v51 = vpop.f32.mrb[26].mxu1 }
 0x194   : > { %v1119_v41 = vpop.f32.mrb[27].mxu1 }
 0x195   : > { %v926_v42 = vpop.f32.mrb[24].mxu0 }
 0x196   : > { %v2445_v43 = vadd.f32 %v1114_v39, %v926_v42  ;;  %v928_v44 = vpop.f32.mrb[25].mxu0 }
 0x197   : > { %v929_v45 = vpop.f32.mrb[26].mxu0 }
 0x198   : > { %v2447_v30 = vadd.f32 %v1117_v51, %v929_v45  ;;  %v931_v47 = vpop.f32.mrb[27].mxu0 }
 0x199   : > { %v1122_v48 = vpop.f32.mrb[28].mxu1 }
 0x19a   : > { %v1124_v52 = vpop.f32.mrb[29].mxu1 }
 0x19b   : > { %v1125_v53 = vpop.f32.mrb[30].mxu1 }
 0x19c   : > { %v1127_v55 = vpop.f32.mrb[31].mxu1 }
 0x19d   : > { %v934_v54 = vpop.f32.mrb[28].mxu0 }
 0x19e   : > { %v2449_v56 = vadd.f32 %v1122_v48, %v934_v54  ;;  %v936_v57 = vpop.f32.mrb[29].mxu0 }
 0x19f   : > { %v937_v59 = vpop.f32.mrb[30].mxu0 }
 0x1a0   : > { %v2451_v7 = vadd.f32 %v1125_v53, %v937_v59  ;;  %v939_v61 = vpop.f32.mrb[31].mxu0 }
 0x1a1   : > { %v1130_v8 = vpop.f32.mrb[32].mxu1 }
 0x1a2   : > { %v1132_v62 = vpop.f32.mrb[33].mxu1 }
 0x1a3   : > { %v1133_v63 = vpop.f32.mrb[34].mxu1 }
 0x1a4   : > { %v1135_v9 = vpop.f32.mrb[35].mxu1 }
 0x1a5   : > { %v942_v0 = vpop.f32.mrb[32].mxu0 }
 0x1a6   : > { %v2453_v3 = vadd.f32 %v1130_v8, %v942_v0  ;;  %v944_v4 = vpop.f32.mrb[33].mxu0 }
 0x1a7   : > { %v945_v15 = vpop.f32.mrb[34].mxu0 }
 0x1a8   : > { %v2455_v6 = vadd.f32 %v1133_v63, %v945_v15  ;;  %v947_v10 = vpop.f32.mrb[35].mxu0 }
 0x1a9   : > { %v1138_v11 = vpop.f32.mrb[36].mxu1 }
 0x1aa   : > { %v1140_v12 = vpop.f32.mrb[37].mxu1 }
 0x1ab   : > { %v1141_v13 = vpop.f32.mrb[38].mxu1 }
 0x1ac   : > { %v1143_v14 = vpop.f32.mrb[39].mxu1 }
 0x1ad   : > { %v950_v16 = vpop.f32.mrb[36].mxu0 }
 0x1ae   : > { %v2457_v19 = vadd.f32 %v1138_v11, %v950_v16  ;;  %v952_v20 = vpop.f32.mrb[37].mxu0 }
 0x1af   : > { %v953_v26 = vpop.f32.mrb[38].mxu0 }
 0x1b0   : > { %v2459_v21 = vadd.f32 %v1141_v13, %v953_v26  ;;  %v955_v22 = vpop.f32.mrb[39].mxu0 }
 0x1b1   : > { %v1319_v23 = vpop.f32.mrb[40].mxu1 }
 0x1b2   : > { %v1368_v31 = vadd.f32 %v1319_v23, %v1107_v32  ;;  %v1321_v28 = vpop.f32.mrb[41].mxu1 }
 0x1b3   : > { %v1322_v29 = vpop.f32.mrb[42].mxu1 }
 0x1b4   : > { %v1395_v33 = vadd.f32 %v2464_v25, %v1368_v31  ;;  %v1369_v34 = vadd.f32 %v1322_v29, %v1110_v38  ;;  %v1324_v1 = vpop.f32.mrb[43].mxu1 }
 0x1b5   : > { %v1279_v35 = vpop.f32.mrb[40].mxu0 }
 0x1b6   : > { %v1415_v36 = vmul.f32 0.1, %v1395_v33  ;;  %v1396_v37 = vadd.f32 %v2464_v25, %v1369_v34  ;;  %v1358_v40 = vadd.f32 %v1279_v35, %v2425_v46  ;;  %v1281_v39 = vpop.f32.mrb[41].mxu0 }
 0x1b7   : > { %v1282_v49 = vpop.f32.mrb[42].mxu0 }
 0x1b8   : > { %v1435_v51 = vmax.f32 %v1395_v33, %v1415_v36  ;;  %v1416_v41 = vmul.f32 0.1, %v1396_v37  ;;  %v1385_v42 = vadd.f32 %v2464_v25, %v1358_v40  ;;  %v1359_v32 = vadd.f32 %v1282_v49, %v2427_v50  ;;  %v1284_v44 = vpop.f32.mrb[43].mxu0 }
 0x1b9   : > { %v1327_v38 = vpop.f32.mrb[44].mxu1 }
 0x1ba   : > { %v1841_v45 = vpack.c.bf16 %v1435_v51, %v1435_v51  ;;  %v1436_v46 = vmax.f32 %v1396_v37, %v1416_v41  ;;  %v1405_v47 = vmul.f32 0.1, %v1385_v42  ;;  %v1386_v48 = vadd.f32 %v2464_v25, %v1359_v32  ;;  %v1329_v52 = vpop.f32.mrb[45].mxu1 }
 0x1bb   : > { %v1370_v53 = vadd.f32 %v1327_v38, %v2445_v43  ;;  %v1330_v55 = vpop.f32.mrb[46].mxu1 }
 0x1bc   : > { %1536 = vst.msk [vmem:[%s2475_s29 + $0x28] sm:$0xf] %vm1525_vm3, %v1841_v45  ;;  %v1842_v50 = vpack.c.bf16 %v1436_v46, %v1436_v46  ;;  %v1425_v54 = vmax.f32 %v1385_v42, %v1405_v47  ;;  %v1406_v57 = vmul.f32 0.1, %v1386_v48  ;;  %v1371_v59 = vadd.f32 %v1330_v55, %v2447_v30  ;;  %v1332_v61 = vpop.f32.mrb[47].mxu1 }
 0x1bd   : > { %v1397_v8 = vadd.f32 %v2464_v25, %v1370_v53  ;;  %v1287_v62 = vpop.f32.mrb[44].mxu0 }
 0x1be   : > { %1537 = vst.msk [vmem:[%s2475_s29 + $0x2c] sm:$0xf] %vm1525_vm3, %v1842_v50  ;;  %v1831_v63 = vpack.c.bf16 %v1425_v54, %v1425_v54  ;;  %v1426_v9 = vmax.f32 %v1386_v48, %v1406_v57  ;;  %v1398_v43 = vadd.f32 %v2464_v25, %v1371_v59  ;;  %v1360_v0 = vadd.f32 %v1287_v62, %v2429_v58  ;;  %v1289_v4 = vpop.f32.mrb[45].mxu0 }
 0x1bf   : > { %v1417_v15 = vmul.f32 0.1, %v1397_v8  ;;  %v1290_v10 = vpop.f32.mrb[46].mxu0 }
 0x1c0   : > { %1526 = vst.msk [vmem:[%s2475_s29] sm:$0xf] %vm1525_vm3, %v1831_v63  ;;  %v1832_v11 = vpack.c.bf16 %v1426_v9, %v1426_v9  ;;  %v1418_v30 = vmul.f32 0.1, %v1398_v43  ;;  %v1387_v12 = vadd.f32 %v2464_v25, %v1360_v0  ;;  %v1361_v13 = vadd.f32 %v1290_v10, %v2431_v60  ;;  %v1292_v14 = vpop.f32.mrb[47].mxu0 }
 0x1c1   : > { %v1437_v16 = vmax.f32 %v1397_v8, %v1417_v15  ;;  %v1335_v20 = vpop.f32.mrb[48].mxu1 }
 0x1c2   : > { %1527 = vst.msk [vmem:[%s2475_s29 + $0x4] sm:$0xf] %vm1525_vm3, %v1832_v11  ;;  %v1438_v26 = vmax.f32 %v1398_v43, %v1418_v30  ;;  %v1407_v58 = vmul.f32 0.1, %v1387_v12  ;;  %v1388_v22 = vadd.f32 %v2464_v25, %v1361_v13  ;;  %v1372_v23 = vadd.f32 %v1335_v20, %v2449_v56  ;;  %v1337_v31 = vpop.f32.mrb[49].mxu1 }
 0x1c3   : > { %v1843_v28 = vpack.c.bf16 %v1437_v16, %v1437_v16  ;;  %v1338_v29 = vpop.f32.mrb[50].mxu1 }
 0x1c4   : > { %v1844_v33 = vpack.c.bf16 %v1438_v26, %v1438_v26  ;;  %v1427_v34 = vmax.f32 %v1387_v12, %v1407_v58  ;;  %v1408_v60 = vmul.f32 0.1, %v1388_v22  ;;  %v1399_v1 = vadd.f32 %v2464_v25, %v1372_v23  ;;  %v1340_v35 = vpop.f32.mrb[51].mxu1 }
 0x1c5   : > { %1538 = vst.msk [vmem:[%s2475_s29 + $0x30] sm:$0xf] %vm1525_vm3, %v1843_v28  ;;  %v1373_v36 = vadd.f32 %v1338_v29, %v2451_v7  ;;  %v1295_v37 = vpop.f32.mrb[48].mxu0 }
 0x1c6   : > { %1539 = vst.msk [vmem:[%s2475_s29 + $0x34] sm:$0xf] %vm1525_vm3, %v1844_v33  ;;  %v1833_v40 = vpack.c.bf16 %v1427_v34, %v1427_v34  ;;  %v1428_v56 = vmax.f32 %v1388_v22, %v1408_v60  ;;  %v1419_v39 = vmul.f32 0.1, %v1399_v1  ;;  %v1362_v49 = vadd.f32 %v1295_v37, %v2433_v2  ;;  %v1297_v51 = vpop.f32.mrb[49].mxu0 }
 0x1c7   : > { %v1400_v41 = vadd.f32 %v2464_v25, %v1373_v36  ;;  %v1298_v42 = vpop.f32.mrb[50].mxu0 }
 0x1c8   : > { %1528 = vst.msk [vmem:[%s2475_s29 + $0x8] sm:$0xf] %vm1525_vm3, %v1833_v40  ;;  %v1834_v32 = vpack.c.bf16 %v1428_v56, %v1428_v56  ;;  %v1439_v44 = vmax.f32 %v1399_v1, %v1419_v39  ;;  %v1389_v7 = vadd.f32 %v2464_v25, %v1362_v49  ;;  %v1363_v38 = vadd.f32 %v1298_v42, %v2435_v5  ;;  %v1300_v45 = vpop.f32.mrb[51].mxu0 }
 0x1c9   : > { %v1420_v46 = vmul.f32 0.1, %v1400_v41  ;;  %v1343_v47 = vpop.f32.mrb[52].mxu1 }
 0x1ca   : > { %1529 = vst.msk [vmem:[%s2475_s29 + $0xc] sm:$0xf] %vm1525_vm3, %v1834_v32  ;;  %v1845_v48 = vpack.c.bf16 %v1439_v44, %v1439_v44  ;;  %v1409_v2 = vmul.f32 0.1, %v1389_v7  ;;  %v1390_v52 = vadd.f32 %v2464_v25, %v1363_v38  ;;  %v1374_v53 = vadd.f32 %v1343_v47, %v2453_v3  ;;  %v1345_v55 = vpop.f32.mrb[53].mxu1 }
 0x1cb   : > { %v1440_v50 = vmax.f32 %v1400_v41, %v1420_v46  ;;  %v1346_v54 = vpop.f32.mrb[54].mxu1 }
 0x1cc   : > { %1540 = vst.msk [vmem:[%s2475_s29 + $0x38] sm:$0xf] %vm1525_vm3, %v1845_v48  ;;  %v1429_v57 = vmax.f32 %v1389_v7, %v1409_v2  ;;  %v1410_v5 = vmul.f32 0.1, %v1390_v52  ;;  %v1401_v59 = vadd.f32 %v2464_v25, %v1374_v53  ;;  %v1375_v61 = vadd.f32 %v1346_v54, %v2455_v6  ;;  %v1348_v8 = vpop.f32.mrb[55].mxu1 }
 0x1cd   : > { %v1846_v62 = vpack.c.bf16 %v1440_v50, %v1440_v50  ;;  %v1303_v63 = vpop.f32.mrb[52].mxu0 }
 0x1ce   : > { %v1835_v9 = vpack.c.bf16 %v1429_v57, %v1429_v57  ;;  %v1430_v43 = vmax.f32 %v1390_v52, %v1410_v5  ;;  %v1421_v3 = vmul.f32 0.1, %v1401_v59  ;;  %v1402_v0 = vadd.f32 %v2464_v25, %v1375_v61  ;;  %v1305_v4 = vpop.f32.mrb[53].mxu0 }
 0x1cf   : > { %1541 = vst.msk [vmem:[%s2475_s29 + $0x3c] sm:$0xf] %vm1525_vm3, %v1846_v62  ;;  %v1364_v15 = vadd.f32 %v1303_v63, %v2437_v17  ;;  %v1306_v10 = vpop.f32.mrb[54].mxu0 }
 0x1d0   : > { %1530 = vst.msk [vmem:[%s2475_s29 + $0x10] sm:$0xf] %vm1525_vm3, %v1835_v9  ;;  %v1836_v11 = vpack.c.bf16 %v1430_v43, %v1430_v43  ;;  %v1441_v6 = vmax.f32 %v1401_v59, %v1421_v3  ;;  %v1422_v30 = vmul.f32 0.1, %v1402_v0  ;;  %v1365_v12 = vadd.f32 %v1306_v10, %v2439_v18  ;;  %v1308_v13 = vpop.f32.mrb[55].mxu0 }
 0x1d1   : > { %v1391_v14 = vadd.f32 %v2464_v25, %v1364_v15  ;;  %v1351_v16 = vpop.f32.mrb[56].mxu1 }
 0x1d2   : > { %1531 = vst.msk [vmem:[%s2475_s29 + $0x14] sm:$0xf] %vm1525_vm3, %v1836_v11  ;;  %v1847_v20 = vpack.c.bf16 %v1441_v6, %v1441_v6  ;;  %v1442_v26 = vmax.f32 %v1402_v0, %v1422_v30  ;;  %v1392_v17 = vadd.f32 %v2464_v25, %v1365_v12  ;;  %v1376_v58 = vadd.f32 %v1351_v16, %v2457_v19  ;;  %v1353_v22 = vpop.f32.mrb[57].mxu1 }
 0x1d3   : > { %v1411_v23 = vmul.f32 0.1, %v1391_v14  ;;  %v1354_v31 = vpop.f32.mrb[58].mxu1 }
 0x1d4   : > { %1542 = vst.msk [vmem:[%s2475_s29 + $0x40] sm:$0xf] %vm1525_vm3, %v1847_v20  ;;  %v1848_v28 = vpack.c.bf16 %v1442_v26, %v1442_v26  ;;  %v1412_v18 = vmul.f32 0.1, %v1392_v17  ;;  %v1403_v29 = vadd.f32 %v2464_v25, %v1376_v58  ;;  %v1377_v33 = vadd.f32 %v1354_v31, %v2459_v21  ;;  %v1356_v34 = vpop.f32.mrb[59].mxu1 }
 0x1d5   : > { %v1431_v60 = vmax.f32 %v1391_v14, %v1411_v23  ;;  %v1311_v1 = vpop.f32.mrb[56].mxu0 }
 0x1d6   : > { %1543 = vst.msk [vmem:[%s2475_s29 + $0x44] sm:$0xf] %vm1525_vm3, %v1848_v28  ;;  %v1432_v35 = vmax.f32 %v1392_v17, %v1412_v18  ;;  %v1423_v19 = vmul.f32 0.1, %v1403_v29  ;;  %v1404_v36 = vadd.f32 %v2464_v25, %v1377_v33  ;;  %v1366_v37 = vadd.f32 %v1311_v1, %v2441_v24  ;;  %v1313_v40 = vpop.f32.mrb[57].mxu0 }
 0x1d7   : > { %v1837_v56 = vpack.c.bf16 %v1431_v60, %v1431_v60  ;;  %v1314_v39 = vpop.f32.mrb[58].mxu0 }
 0x1d8   : > { %v1838_v49 = vpack.c.bf16 %v1432_v35, %v1432_v35  ;;  %v1443_v21 = vmax.f32 %v1403_v29, %v1423_v19  ;;  %v1424_v51 = vmul.f32 0.1, %v1404_v36  ;;  %v1393_v41 = vadd.f32 %v2464_v25, %v1366_v37  ;;  %v1316_v42 = vpop.f32.mrb[59].mxu0 }
 0x1d9   : > { %1532 = vst.msk [vmem:[%s2475_s29 + $0x18] sm:$0xf] %vm1525_vm3, %v1837_v56  ;;  %v1367_v32 = vadd.f32 %v1314_v39, %v2443_v27 }
 0x1da   : > { %1533 = vst.msk [vmem:[%s2475_s29 + $0x1c] sm:$0xf] %vm1525_vm3, %v1838_v49  ;;  %v1849_v24 = vpack.c.bf16 %v1443_v21, %v1443_v21  ;;  %v1444_v44 = vmax.f32 %v1404_v36, %v1424_v51  ;;  %v1413_v7 = vmul.f32 0.1, %v1393_v41 }
 0x1db   : > { %v1394_v38 = vadd.f32 %v2464_v25, %v1367_v32 }
 0x1dc   : > { %1544 = vst.msk [vmem:[%s2475_s29 + $0x48] sm:$0xf] %vm1525_vm3, %v1849_v24  ;;  %v1850_v45 = vpack.c.bf16 %v1444_v44, %v1444_v44  ;;  %v1433_v46 = vmax.f32 %v1393_v41, %v1413_v7 }
 0x1dd   : > { %v1414_v47 = vmul.f32 0.1, %v1394_v38 }
 0x1de   : > { %1545 = vst.msk [vmem:[%s2475_s29 + $0x4c] sm:$0xf] %vm1525_vm3, %v1850_v45  ;;  %v1839_v48 = vpack.c.bf16 %v1433_v46, %v1433_v46 }
 0x1df   : > { %v1434_v2 = vmax.f32 %v1394_v38, %v1414_v47 }
 0x1e0   : > { %1534 = vst.msk [vmem:[%s2475_s29 + $0x20] sm:$0xf] %vm1525_vm3, %v1839_v48 }
 0x1e1   : > { %v1840_v52 = vpack.c.bf16 %v1434_v2, %v1434_v2 }
 0x1e3   : > { %1535 = vst.msk [vmem:[%s2475_s29 + $0x24] sm:$0xf] %vm1525_vm3, %v1840_v52 }
 0x1e4 PF: > { %s15_s20 = sadd.s32 1, %s1975_s20   ;;  %s2565_s18 = smov %s1971_s19 }
 0x1e5   : > { %p12_p5 = scmp.ge.s32.totalorder %s15_s20, 4   ;;  %s2566_s19 = smov %s2568_s21 }
 0x1e7   :  { %14 = sbr.rel (!%p12_p5) target bundleno = 2 (0x2), region = 78 }

// kernel: unet1x3_forward.15
= control target key start
LH: loop header
LB: loop body
LE: loop exit
PB: predicated region body
PF: predicated region fallthrough
CT: control target
= control target key end

     0   :  { %s1826_s18 = smov 0   ;;  %s1828_s19 = smov 0   ;;  %s2308_s0 = inlined_call_operand.vmem [shape: bf16[2,160,64], index: 0, kind: input, shape index: {}, may-alias: {0,1,2}]   ;;  %s2309_s1 = inlined_call_operand.vmem [shape: bf16[2,160,64], index: 1, kind: input, shape index: {}, may-alias: {0,1,2}]   ;;  %s2310_s2 = inlined_call_operand.vmem [shape: bf16[2,160,64], index: 2, kind: input, shape index: {}, may-alias: {0,1,2}]   ;;  %s2311_s3 = inlined_call_operand.vmem [shape: bf16[3,192,8], index: 3, kind: input, shape index: {}]   ;;  %s2312_s4 = inlined_call_operand.vmem [shape: f32[1,8], index: 4, kind: input, shape index: {}]   ;;  %s2313_s5 = inlined_call_operand.vmem [shape: bf16[2,128,8], index: 5, kind: output, shape index: {}]  }
   0x1   :  { %s1830_s20 = smov 0  }
   0x2 LB: > { %s27_s21 = sadd.s32 1, %s1788_s19  ;;  %p1507_p0 = scmp.ge.s32.totalorder %s1792_s20, 1  ;;  %s1792_s20 = sphi %s1830_s20, %s15_s20   ;;  %s1788_s19 = sphi %s1828_s19, %s2315_s19   ;;  %s1784_s18 = sphi %s1826_s18, %s2314_s18  }
   0x3   : > { %p29_p1 = scmp.ge.s32.totalorder %s27_s21, 2  ;;  %p286_p2 = scmp.lt.s32.totalorder %s1792_s20, 3 }
   0x5   : > { %s2317_s21 = smov (%p29_p1, %s27_s21), 0  ;;  %p287_p3 = pnand %p1507_p0, %p286_p2 }
   0x6   : > { %p358_p4 = scmp.lt.s32.totalorder (!%p287_p3), %s1784_s18, 1  ;;  %v1734_v0 = vld [vmem:[%s2311_s3] sm:$0xff] (!%p287_p3)   ;;  %v1794_v1 = vmov (!%p287_p3), 0   ;;  %v1736_v3 = vld [vmem:[%s2311_s3 + $0x8] sm:$0xff] (!%p287_p3)   ;;  %vm490_vm0 = vsmask.f32 (!%p287_p3), 7424 }
   0x7   : > { %290 = sbr.rel (%p287_p3) target bundleno = 455 (0x1c7), region = 40  ;;  %966 = vmatprep.subr.bf16.mxu1 (!%p287_p3), %v1794_v1  ;;  %794 = vmatprep.subr.bf16.mxu0 (!%p287_p3), %v1794_v1  ;;  %v1735_v2 = vld [vmem:[%s2311_s3 + $0x60] sm:$0xff] (!%p287_p3)   ;;  %v1737_v4 = vld [vmem:[%s2311_s3 + $0x68] sm:$0xff] (!%p287_p3)   ;;  %v1738_v5 = vld [vmem:[%s2311_s3 + $0x10] sm:$0xff] (!%p287_p3)   ;;  %v1886_v9 = vrot.slane (!%p287_p3), %v1794_v1, 1  ;;  %s1795_s25 = smov (!%p287_p3), 64  }
   0x8   : > { %967 = vmatpush1.bf16.msra.mxu1 (!%p287_p3), %v1734_v0  ;;  %795 = vmatpush1.bf16.msra.mxu0 (!%p287_p3), %v1735_v2  ;;  %v1739_v6 = vld [vmem:[%s2311_s3 + $0x70] sm:$0xff] (!%p287_p3)   ;;  %vm596_vm1 = vcmask (!%p287_p3), 1046528   ;;  %vm618_vm2 = vcmask (!%p287_p3), 523264   ;;  %v1740_v53 = vld [vmem:[%s2311_s3 + $0x18] sm:$0xff] (!%p287_p3)   ;;  %v1742_v57 = vld [vmem:[%s2311_s3 + $0x20] sm:$0xff] (!%p287_p3)   ;;  %vm1363_vm3 = vcmask (!%p287_p3), 60416  }
   0x9   : > { %968 = vmatprep.subr.bf16.mxu1 (!%p287_p3), %v1794_v1  ;;  %796 = vmatprep.subr.bf16.mxu0 (!%p287_p3), %v1794_v1  ;;  %v1741_v56 = vld [vmem:[%s2311_s3 + $0x78] sm:$0xff] (!%p287_p3)   ;;  %v1743_v63 = vld [vmem:[%s2311_s3 + $0x80] sm:$0xff] (!%p287_p3)  }
   0xc   : > { %969 = vmatpush1.bf16.msra.mxu1 (!%p287_p3), %v1736_v3  ;;  %797 = vmatpush1.bf16.msra.mxu0 (!%p287_p3), %v1737_v4 }
   0xd   : > { %970 = vmatprep.subr.bf16.mxu1 (!%p287_p3), %v1794_v1  ;;  %798 = vmatprep.subr.bf16.mxu0 (!%p287_p3), %v1794_v1 }
   0xe   : > { %s2319_s18 = smov (!%p358_p4, %s1784_s18), 1 }
   0xf   : > { %s1859_s28 = smul.u32 80, %s2319_s18  ;;  %s1654_s26 = sshll.u32 %s2319_s18, 6 }
  0x10   : > { %971 = vmatpush1.bf16.msra.mxu1 %v1738_v5  ;;  %799 = vmatpush1.bf16.msra.mxu0 %v1739_v6  ;;  %v1744_v6 = vld [vmem:[%s2311_s3 + $0x28] sm:$0xff]  }
  0x11   : > { %s1872_s10 = scalar_lea.vmem %s2308_s0, %s1859_s28  ;;  %s1651_s13 = sadd.s32 64, %s1859_s28  ;;  %972 = vmatprep.subr.bf16.mxu1 %v1794_v1  ;;  %800 = vmatprep.subr.bf16.mxu0 %v1794_v1 }
  0x12   : > { %v1879_v7 = vld [vmem:[%s1872_s10] sm:$0xff]   ;;  %v1882_v8 = vld [vmem:[%s1872_s10 + $0x8] sm:$0xff]   ;;  %v1889_v10 = vld [vmem:[%s1872_s10 + $0x10] sm:$0xff]   ;;  %s1653_s14 = sadd.s32 72, %s1859_s28  ;;  %s383_s17 = scalar_lea.vmem %s2309_s1, %s1651_s13 }
  0x13   : > { %v492_v11 = vshrl.u32 %v1879_v7, 16  ;;  %v494_v12 = vshll.u32 %v1879_v7, 16  ;;  %v499_v13 = vshll.u32 %v1882_v8, 16  ;;  %v503_v14 = vshrl.u32 %v1882_v8, 16  ;;  %v1899_v16 = vld [vmem:[%s1872_s10 + $0x18] sm:$0xff]   ;;  %v1903_v18 = vld [vmem:[%s1872_s10 + $0x20] sm:$0xff]   ;;  %s402_s24 = scalar_lea.vmem %s2310_s2, %s1653_s14  ;;  %s2238_s28 = scalar_lea.vmem %s2313_s5, %s1654_s26 }
  0x14   : > { %v507_v15 = vshll.u32 %v1889_v10, 16  ;;  %v511_v17 = vshrl.u32 %v1889_v10, 16  ;;  %v515_v22 = vshll.u32 %v1899_v16, 16  ;;  %v519_v23 = vshrl.u32 %v1899_v16, 16  ;;  %v1911_v27 = vld [vmem:[%s1872_s10 + $0x28] sm:$0xff]   ;;  %v1918_v32 = vld [vmem:[%s1872_s10 + $0x30] sm:$0xff]   ;;  %973 = vmatpush1.bf16.msra.mxu1 %v1740_v53  ;;  %801 = vmatpush1.bf16.msra.mxu0 %v1741_v56 }
  0x15   : > { %v496_v19 = vrot.slane %v494_v12, 1  ;;  %v501_v20 = vrot.slane %v499_v13, 1  ;;  %v523_v24 = vshll.u32 %v1903_v18, 16  ;;  %v527_v28 = vshrl.u32 %v1903_v18, 16  ;;  %v1921_v33 = vld [vmem:[%s1872_s10 + $0x38] sm:$0xff]   ;;  %v1935_v41 = vld [vmem:[%s383_s17] sm:$0xff]   ;;  %974 = vmatprep.subr.bf16.mxu1 %v1794_v1  ;;  %802 = vmatprep.subr.bf16.mxu0 %v1794_v1 }
  0x16   : > { %v509_v21 = vrot.slane %v507_v15, 1  ;;  %v517_v30 = vrot.slane %v515_v22, 1  ;;  %v531_v35 = vshll.u32 %v1911_v27, 16  ;;  %v535_v36 = vshrl.u32 %v1911_v27, 16  ;;  %v1943_v50 = vld [vmem:[%s402_s24] sm:$0xff]   ;;  %v1746_v22 = vld [vmem:[%s2311_s3 + $0x30] sm:$0xff]  }
  0x17   : > { %v497_v25 = vor.u32 %v496_v19, %v492_v11  ;;  %v505_v26 = vor.u32 %v503_v14, %v501_v20  ;;  %v525_v31 = vrot.slane %v523_v24, 1  ;;  %v539_v40 = vshll.u32 %v1918_v32, 16  ;;  %v1745_v14 = vld [vmem:[%s2311_s3 + $0x88] sm:$0xff]  }
  0x18   : > { %v513_v29 = vor.u32 %v511_v17, %v509_v21  ;;  %v521_v39 = vor.u32 %v519_v23, %v517_v30  ;;  %v533_v43 = vrot.slane %v531_v35, 1  ;;  %v543_v44 = vshrl.u32 %v1918_v32, 16  ;;  %975 = vmatpush1.bf16.msra.mxu1 %v1742_v57  ;;  %803 = vmatpush1.bf16.msra.mxu0 %v1743_v63  ;;  %v1754_v35 = vld [vmem:[%s2311_s3 + $0x50] sm:$0xff]   ;;  %v1763_v56 = vld [vmem:[%s2311_s3 + $0xe8] sm:$0xff]   ;;  %v1766_v63 = vld [vmem:[%s2311_s3 + $0x100] sm:$0xff]  }
  0x19   : > { %v502_v34 = vsel %vm490_vm0, %v497_v25, %v501_v20  ;;  %v510_v37 = vsel %vm490_vm0, %v505_v26, %v509_v21  ;;  %v529_v42 = vor.u32 %v527_v28, %v525_v31  ;;  %v547_v45 = vshll.u32 %v1921_v33, 16  ;;  %976 = vmatprep.subr.bf16.mxu1 %v1794_v1  ;;  %804 = vmatprep.subr.bf16.mxu0 %v1794_v1  ;;  %v1747_v25 = vld [vmem:[%s2311_s3 + $0x90] sm:$0xff]   ;;  %v1748_v26 = vld [vmem:[%s2311_s3 + $0x38] sm:$0xff]  }
  0x1a   : > { %575 = vrot.lane.b32.xlu0 %v502_v34, %s1795_s25  ;;  %v518_v38 = vsel %vm490_vm0, %v513_v29, %v517_v30  ;;  %v526_v46 = vsel %vm490_vm0, %v521_v39, %v525_v31  ;;  %v541_v47 = vrot.slane %v539_v40, 1  ;;  %v551_v48 = vshrl.u32 %v1921_v33, 16  ;;  %v1749_v28 = vld [vmem:[%s2311_s3 + $0x98] sm:$0xff]   ;;  %v1750_v29 = vld [vmem:[%s2311_s3 + $0x40] sm:$0xff]   ;;  %v1752_v31 = vld [vmem:[%s2311_s3 + $0x48] sm:$0xff]  }
  0x1b   : > { %579 = vrot.lane.b32.xlu1 %v518_v38, %s1795_s25  ;;  %v555_v49 = vshll.u32 %v1935_v41, 16  ;;  %v537_v51 = vor.u32 %v535_v36, %v533_v43  ;;  %v559_v52 = vshrl.u32 %v1935_v41, 16  ;;  %v549_v54 = vrot.slane %v547_v45, 1  ;;  %v1751_v30 = vld [vmem:[%s2311_s3 + $0xa0] sm:$0xff]   ;;  %v1753_v34 = vld [vmem:[%s2311_s3 + $0xa8] sm:$0xff]   ;;  %v1755_v36 = vld [vmem:[%s2311_s3 + $0xb0] sm:$0xff]  }
  0x1c   : > { %v563_v55 = vshll.u32 %v1943_v50, 16  ;;  %v534_v58 = vsel %vm490_vm0, %v529_v42, %v533_v43  ;;  %v545_v59 = vor.u32 %v543_v44, %v541_v47  ;;  %v567_v0 = vshrl.u32 %v1943_v50, 16  ;;  %977 = vmatpush1.bf16.msra.mxu1 %v1744_v6  ;;  %805 = vmatpush1.bf16.msra.mxu0 %v1745_v14  ;;  %v1757_v38 = vld [vmem:[%s2311_s3 + $0xb8] sm:$0xff]   ;;  %v1758_v42 = vld [vmem:[%s2311_s3 + $0xc0] sm:$0xff]   ;;  %v1759_v45 = vld [vmem:[%s2311_s3 + $0xc8] sm:$0xff]  }
  0x1d   : > { %v542_v60 = vsel %vm490_vm0, %v537_v51, %v541_v47  ;;  %v553_v61 = vor.u32 %v551_v48, %v549_v54  ;;  %v557_v62 = vrot.slane %v555_v49, 1  ;;  %v597_v3 = vrot.slane %v1879_v7, 1  ;;  %978 = vmatprep.subr.bf16.mxu1 %v1794_v1  ;;  %806 = vmatprep.subr.bf16.mxu0 %v1794_v1  ;;  %v1760_v47 = vld [vmem:[%s2311_s3 + $0xd0] sm:$0xff]   ;;  %v1761_v51 = vld [vmem:[%s2311_s3 + $0xd8] sm:$0xff]  }
  0x1e   : > { %577 = vrot.lane.b32.xlu0 %v510_v37, %s1795_s25  ;;  %v565_v2 = vrot.slane %v563_v55, 1  ;;  %v550_v4 = vsel %vm490_vm0, %v545_v59, %v549_v54  ;;  %v598_v11 = vrot.slane %v1882_v8, 1  ;;  %v600_v15 = vrot.slane %v1889_v10, 1  ;;  %v1756_v37 = vld [vmem:[%s2311_s3 + $0x58] sm:$0xff]  }
  0x1f   : > { %581 = vrot.lane.b32.xlu1 %v526_v46, %s1795_s25  ;;  %v561_v5 = vor.u32 %v559_v52, %v557_v62  ;;  %v558_v12 = vsel %vm490_vm0, %v553_v61, %v557_v62  ;;  %v602_v19 = vrot.slane %v1899_v16, 1  ;;  %v614_v39 = vrot.slane %v1943_v50, 1  ;;  %v1762_v52 = vld [vmem:[%s2311_s3 + $0xe0] sm:$0xff]   ;;  %v1765_v61 = vld [vmem:[%s2311_s3 + $0xf8] sm:$0xff]  }
  0x20   : > { %v569_v13 = vor.u32 %v567_v0, %v565_v2  ;;  %v599_v17 = vsel %vm596_vm1, %v597_v3, %v598_v11  ;;  %v601_v20 = vsel %vm596_vm1, %v598_v11, %v600_v15  ;;  %979 = vmatpush1.bf16.msra.mxu1 %v1746_v22  ;;  %807 = vmatpush1.bf16.msra.mxu0 %v1747_v25  ;;  %v604_v48 = vrot.slane %v1903_v18, 1  ;;  %v1767_v3 = vld [vmem:[%s2311_s3 + $0x108] sm:$0xff]  }
  0x21   : > { %1579 = vmatprep.mubr.msk.bf16.mxu1 %vm618_vm2, %v599_v17  ;;  %v566_v21 = vsel %vm490_vm0, %v561_v5, %v565_v2  ;;  %v1994_v23 = vsel %vm596_vm1, %v600_v15, %v602_v19  ;;  %1559 = vmatprep.mubr.msk.bf16.mxu0 %vm618_vm2, %v601_v20  ;;  %v2053_v40 = vsel %vm596_vm1, %v614_v39, %v1886_v9  ;;  %v606_v53 = vrot.slane %v1911_v27, 1  ;;  %v1768_v5 = vld [vmem:[%s2311_s3 + $0x110] sm:$0xff]  }
  0x22   : > { %583 = vrot.lane.b32.xlu0 %v534_v58, %s1795_s25  ;;  %v574_v24 = vsel %vm490_vm0, %v569_v13, %v1886_v9  ;;  %980 = vmatprep.subr.bf16.mxu1 %v1794_v1  ;;  %v2085_v49 = vsel %vm596_vm1, %v602_v19, %v604_v48  ;;  %v608_v57 = vrot.slane %v1918_v32, 1  ;;  %v1764_v58 = vld [vmem:[%s2311_s3 + $0xf0] sm:$0xff]   ;;  %v610_v62 = vrot.slane %v1921_v33, 1 }
  0x23   : > { %585 = vrot.lane.b32.xlu1 %v542_v60, %s1795_s25  ;;  %808 = vmatprep.subr.bf16.mxu0 %v1794_v1  ;;  %v2109_v55 = vsel %vm596_vm1, %v604_v48, %v606_v53 }
  0x24   : > { %981 = vmatpush1.bf16.msra.mxu1 %v1748_v26  ;;  %809 = vmatpush1.bf16.msra.mxu0 %v1749_v28  ;;  %v2132_v60 = vsel %vm596_vm1, %v606_v53, %v608_v57  ;;  %v611_v2 = vsel %vm596_vm1, %v608_v57, %v610_v62 }
  0x25   : > { %982 = vmatprep.subr.bf16.mxu1 %v1794_v1  ;;  %810 = vmatprep.subr.bf16.mxu0 %v1794_v1 }
  0x26   : > { %587 = vrot.lane.b32.xlu0 %v550_v4, %s1795_s25  ;;  %v612_v4 = vrot.slane %v1935_v41, 1 }
  0x27   : > { %589 = vrot.lane.b32.xlu1 %v558_v12, %s1795_s25  ;;  %v1769_v12 = vld [vmem:[%s2311_s3 + $0x118] sm:$0xff]  }
  0x28   : > { %983 = vmatpush1.bf16.msra.mxu1 %v1750_v29  ;;  %811 = vmatpush1.bf16.msra.mxu0 %v1751_v30  ;;  %v613_v11 = vsel %vm596_vm1, %v610_v62, %v612_v4  ;;  %v615_v14 = vsel %vm596_vm1, %v612_v4, %v614_v39 }
  0x29   : > { %984 = vmatprep.subr.bf16.mxu1 %v1794_v1  ;;  %812 = vmatprep.subr.bf16.mxu0 %v1794_v1 }
  0x2a   : > { %591 = vrot.lane.b32.xlu0 %v566_v21, %s1795_s25 }
  0x2b   : > { %593 = vrot.lane.b32.xlu1 %v574_v24, %s1795_s25 }
  0x2c   : > { %985 = vmatpush1.bf16.msra.mxu1 %v1752_v31  ;;  %813 = vmatpush1.bf16.msra.mxu0 %v1753_v34 }
  0x2d   : > { %986 = vmatprep.subr.bf16.mxu1 %v1794_v1  ;;  %814 = vmatprep.subr.bf16.mxu0 %v1794_v1 }
  0x30   : > { %987 = vmatpush1.bf16.msra.mxu1 %v1754_v35  ;;  %815 = vmatpush1.bf16.msra.mxu0 %v1755_v36 }
  0x31   : > { %988 = vmatprep.subr.bf16.mxu1 %v1794_v1  ;;  %816 = vmatprep.subr.bf16.mxu0 %v1794_v1 }
  0x34   : > { %989 = vmatpush1.bf16.msra.mxu1 %v1756_v37  ;;  %817 = vmatpush1.bf16.msra.mxu0 %v1757_v38 }
  0x35   : > { %1671 = vmatprep.subr.bf16.mxu1 %v1794_v1  ;;  %1163 = vmatprep.subr.bf16.mxu0 %v1794_v1 }
  0x8c   : > { %v576_v43 = vpop.permute.xlu0 %575 }
  0x8d   : > { %v620_v44 = vsel %vm618_vm2, %v1879_v7, %v576_v43  ;;  %v580_v7 = vpop.permute.xlu1 %579 }
  0x8e   : > { %999 = vmatmul.mubr.bf16.vlgmr.msra.gmra.mrb[0].mxu1 %v620_v44 }
  0x8f   : > { %1683 = vmatpush1.bf16.msra.mxu1 %v1758_v42  ;;  %1580 = vmatprep.mubr.msk.bf16.mxu1 %vm618_vm2, %v601_v20 }
  0x90   : > { %v578_v46 = vpop.permute.xlu0 %577  ;;  %1672 = vmatprep.subr.bf16.mxu1 %v1794_v1 }
  0x91   : > { %v623_v9 = vsel %vm618_vm2, %v1882_v8, %v578_v46  ;;  %v2077_v8 = vsel %vm618_vm2, %v1889_v10, %v580_v7  ;;  %v582_v10 = vpop.permute.xlu1 %581 }
  0x92   : > { %827 = vmatmul.mubr.bf16.vlgmr.msra.gmra.mrb[0].mxu0 %v623_v9  ;;  %v2103_v54 = vsel %vm618_vm2, %v1899_v16, %v582_v10 }
  0x93   : > { %1164 = vmatpush1.bf16.msra.mxu0 %v1758_v42  ;;  %1684 = vmatpush1.bf16.msra.mxu1 %v1759_v45 }
  0x94   : > { %1165 = vmatprep.subr.bf16.mxu0 %v1794_v1  ;;  %1560 = vmatprep.mubr.msk.bf16.mxu0 %vm618_vm2, %v1994_v23  ;;  %v584_v16 = vpop.permute.xlu0 %583 }
  0x95   : > { %1673 = vmatprep.subr.bf16.mxu1 %v1794_v1  ;;  %v2127_v59 = vsel %vm618_vm2, %v1903_v18, %v584_v16  ;;  %v586_v18 = vpop.permute.xlu1 %585 }
  0x96   : > { %1007 = vmatmul.mubr.bf16.gmra.mrb[4].mxu1 %v623_v9  ;;  %v635_v0 = vsel %vm618_vm2, %v1911_v27, %v586_v18 }
  0x97   : > { %1166 = vmatpush1.bf16.msra.mxu0 %v1759_v45  ;;  %1581 = vmatprep.mubr.msk.bf16.mxu1 %vm618_vm2, %v1994_v23 }
  0x98   : > { %1167 = vmatprep.subr.bf16.mxu0 %v1794_v1  ;;  %1685 = vmatpush1.bf16.msra.mxu1 %v1760_v47  ;;  %v588_v27 = vpop.permute.xlu0 %587 }
  0x99   : > { %1674 = vmatprep.subr.bf16.mxu1 %v1794_v1  ;;  %v638_v6 = vsel %vm618_vm2, %v1918_v32, %v588_v27  ;;  %v590_v13 = vpop.permute.xlu1 %589 }
  0x9a   : > { %835 = vmatmul.mubr.bf16.gmra.mrb[4].mxu0 %v2077_v8  ;;  %v641_v32 = vsel %vm618_vm2, %v1921_v33, %v590_v13 }
  0x9b   : > { %1168 = vmatpush1.bf16.msra.mxu0 %v1760_v47  ;;  %1561 = vmatprep.mubr.msk.bf16.mxu0 %vm618_vm2, %v2085_v49 }
  0x9c   : > { %1169 = vmatprep.subr.bf16.mxu0 %v1794_v1  ;;  %1686 = vmatpush1.bf16.msra.mxu1 %v1761_v51  ;;  %v592_v15 = vpop.permute.xlu0 %591 }
  0x9d   : > { %1675 = vmatprep.subr.bf16.mxu1 %v1794_v1  ;;  %v644_v17 = vsel %vm618_vm2, %v1935_v41, %v592_v15 }
  0x9e   : > { %1015 = vmatmul.mubr.bf16.gmra.mrb[8].mxu1 %v2077_v8 }
  0x9f   : > { %1170 = vmatpush1.bf16.msra.mxu0 %v1761_v51  ;;  %1582 = vmatprep.mubr.msk.bf16.mxu1 %vm618_vm2, %v2085_v49 }
  0xa0   : > { %1171 = vmatprep.subr.bf16.mxu0 %v1794_v1  ;;  %1687 = vmatpush1.bf16.msra.mxu1 %v1762_v52 }
  0xa1   : > { %1676 = vmatprep.subr.bf16.mxu1 %v1794_v1 }
  0xa2   : > { %843 = vmatmul.mubr.bf16.gmra.mrb[8].mxu0 %v2103_v54 }
  0xa3   : > { %1172 = vmatpush1.bf16.msra.mxu0 %v1762_v52  ;;  %1562 = vmatprep.mubr.msk.bf16.mxu0 %vm618_vm2, %v2109_v55 }
  0xa4   : > { %1173 = vmatprep.subr.bf16.mxu0 %v1794_v1  ;;  %1688 = vmatpush1.bf16.msra.mxu1 %v1763_v56 }
  0xa5   : > { %1677 = vmatprep.subr.bf16.mxu1 %v1794_v1 }
  0xa6   : > { %1023 = vmatmul.mubr.bf16.gmra.mrb[12].mxu1 %v2103_v54 }
  0xa7   : > { %1583 = vmatprep.mubr.msk.bf16.mxu1 %vm618_vm2, %v2109_v55  ;;  %1174 = vmatpush1.bf16.msra.mxu0 %v1763_v56 }
  0xa8   : > { %1175 = vmatprep.subr.bf16.mxu0 %v1794_v1  ;;  %1689 = vmatpush1.bf16.msra.mxu1 %v1764_v58 }
  0xa9   : > { %1678 = vmatprep.subr.bf16.mxu1 %v1794_v1 }
  0xaa   : > { %851 = vmatmul.mubr.bf16.gmra.mrb[12].mxu0 %v2127_v59 }
  0xab   : > { %1563 = vmatprep.mubr.msk.bf16.mxu0 %vm618_vm2, %v2132_v60  ;;  %1176 = vmatpush1.bf16.msra.mxu0 %v1764_v58 }
  0xac   : > { %1177 = vmatprep.subr.bf16.mxu0 %v1794_v1  ;;  %1690 = vmatpush1.bf16.msra.mxu1 %v1765_v61 }
  0xad   : > { %1679 = vmatprep.subr.bf16.mxu1 %v1794_v1 }
  0xae   : > { %1031 = vmatmul.mubr.bf16.gmra.mrb[16].mxu1 %v2127_v59 }
  0xaf   : > { %1584 = vmatprep.mubr.msk.bf16.mxu1 %vm618_vm2, %v2132_v60  ;;  %1178 = vmatpush1.bf16.msra.mxu0 %v1765_v61 }
  0xb0   : > { %1179 = vmatprep.subr.bf16.mxu0 %v1794_v1  ;;  %1691 = vmatpush1.bf16.msra.mxu1 %v1766_v63 }
  0xb1   : > { %1680 = vmatprep.subr.bf16.mxu1 %v1794_v1 }
  0xb2   : > { %859 = vmatmul.mubr.bf16.gmra.mrb[16].mxu0 %v635_v0 }
  0xb3   : > { %1564 = vmatprep.mubr.msk.bf16.mxu0 %vm618_vm2, %v611_v2  ;;  %1180 = vmatpush1.bf16.msra.mxu0 %v1766_v63 }
  0xb4   : > { %1181 = vmatprep.subr.bf16.mxu0 %v1794_v1  ;;  %1692 = vmatpush1.bf16.msra.mxu1 %v1767_v3 }
  0xb5   : > { %1681 = vmatprep.subr.bf16.mxu1 %v1794_v1 }
  0xb6   : > { %1039 = vmatmul.mubr.bf16.gmra.mrb[20].mxu1 %v635_v0 }
  0xb7   : > { %1585 = vmatprep.mubr.msk.bf16.mxu1 %vm618_vm2, %v611_v2  ;;  %1182 = vmatpush1.bf16.msra.mxu0 %v1767_v3 }
  0xb8   : > { %1183 = vmatprep.subr.bf16.mxu0 %v1794_v1  ;;  %1693 = vmatpush1.bf16.msra.mxu1 %v1768_v5 }
  0xb9   : > { %1682 = vmatprep.subr.bf16.mxu1 %v1794_v1 }
  0xba   : > { %867 = vmatmul.mubr.bf16.gmra.mrb[20].mxu0 %v638_v6 }
  0xbb   : > { %1565 = vmatprep.mubr.msk.bf16.mxu0 %vm618_vm2, %v613_v11  ;;  %1184 = vmatpush1.bf16.msra.mxu0 %v1768_v5 }
  0xbc   : > { %1694 = vmatpush1.bf16.msra.mxu1 %v1769_v12  ;;  %1185 = vmatprep.subr.bf16.mxu0 %v1794_v1  ;;  %v594_v1 = vpop.permute.xlu1 %593 }
  0xbd   : > { %v647_v33 = vsel %vm618_vm2, %v1943_v50, %v594_v1 }
  0xbe   : > { %1047 = vmatmul.mubr.bf16.gmra.mrb[24].mxu1 %v638_v6 }
  0xbf   : > { %1586 = vmatprep.mubr.msk.bf16.mxu1 %vm618_vm2, %v613_v11  ;;  %1186 = vmatpush1.bf16.msra.mxu0 %v1769_v12 }
  0xc2   : > { %875 = vmatmul.mubr.bf16.gmra.mrb[24].mxu0 %v641_v32 }
  0xc3   : > { %1566 = vmatprep.mubr.msk.bf16.mxu0 %vm618_vm2, %v615_v14 }
  0xc6   : > { %1055 = vmatmul.mubr.bf16.gmra.mrb[28].mxu1 %v641_v32 }
  0xc7   : > { %1627 = vmatprep.mubr.msk.bf16.mxu1 %vm618_vm2, %v611_v2 }
  0xca   : > { %883 = vmatmul.mubr.bf16.gmra.mrb[28].mxu0 %v644_v17 }
  0xcb   : > { %1623 = vmatprep.mubr.msk.bf16.mxu0 %vm618_vm2, %v1994_v23 }
  0xce   : > { %1228 = vmatmul.mubr.bf16.vlgmr.msra.gmra.mrb[32].mxu1 %v638_v6 }
  0xcf   : > { %1628 = vmatprep.mubr.msk.bf16.mxu1 %vm618_vm2, %v613_v11 }
  0xd2   : > { %1196 = vmatmul.mubr.bf16.vlgmr.msra.gmra.mrb[32].mxu0 %v2077_v8 }
  0xd3   : > { %1624 = vmatprep.mubr.msk.bf16.mxu0 %vm618_vm2, %v2085_v49 }
  0xd6   : > { %1236 = vmatmul.mubr.bf16.gmra.mrb[36].mxu1 %v641_v32 }
  0xd7   : > { %1629 = vmatprep.mubr.msk.bf16.mxu1 %vm618_vm2, %v615_v14 }
  0xda   : > { %1204 = vmatmul.mubr.bf16.gmra.mrb[36].mxu0 %v2103_v54 }
  0xdb   : > { %1625 = vmatprep.mubr.msk.bf16.mxu0 %vm618_vm2, %v2109_v55 }
  0xde   : > { %1244 = vmatmul.mubr.bf16.gmra.mrb[40].mxu1 %v644_v17 }
  0xdf   : > { %1630 = vmatprep.mubr.msk.bf16.mxu1 %vm618_vm2, %v2053_v40 }
  0xe2   : > { %1212 = vmatmul.mubr.bf16.gmra.mrb[40].mxu0 %v2127_v59 }
  0xe3   : > { %1626 = vmatprep.mubr.msk.bf16.mxu0 %vm618_vm2, %v2132_v60 }
  0xe6   : > { %1252 = vmatmul.mubr.bf16.gmra.mrb[44].mxu1 %v647_v33 }
  0xea   : > { %1220 = vmatmul.mubr.bf16.gmra.mrb[44].mxu0 %v635_v0 }
 0x161   : > { %v1000_v41 = vpop.f32.mrb[0].mxu1 }
 0x162   : > { %v1002_v19 = vpop.f32.mrb[1].mxu1 }
 0x163   : > { %v1003_v20 = vpop.f32.mrb[2].mxu1 }
 0x164   : > { %v1005_v21 = vpop.f32.mrb[3].mxu1 }
 0x165   : > { %v828_v22 = vpop.f32.mrb[0].mxu0 }
 0x166   : > { %v2204_v23 = vadd.f32 %v1000_v41, %v828_v22  ;;  %v830_v24 = vpop.f32.mrb[1].mxu0 }
 0x167   : > { %v831_v25 = vpop.f32.mrb[2].mxu0 }
 0x168   : > { %v2206_v26 = vadd.f32 %v1003_v20, %v831_v25  ;;  %v833_v28 = vpop.f32.mrb[3].mxu0 }
 0x169   : > { %v1008_v29 = vpop.f32.mrb[4].mxu1 }
 0x16a   : > { %v1010_v30 = vpop.f32.mrb[5].mxu1 }
 0x16b   : > { %v1011_v50 = vpop.f32.mrb[6].mxu1 }
 0x16c   : > { %v1013_v31 = vpop.f32.mrb[7].mxu1 }
 0x16d   : > { %v836_v34 = vpop.f32.mrb[4].mxu0 }
 0x16e   : > { %v2208_v35 = vadd.f32 %v1008_v29, %v836_v34  ;;  %v838_v36 = vpop.f32.mrb[5].mxu0 }
 0x16f   : > { %v839_v37 = vpop.f32.mrb[6].mxu0 }
 0x170   : > { %v2210_v38 = vadd.f32 %v1011_v50, %v839_v37  ;;  %v841_v39 = vpop.f32.mrb[7].mxu0 }
 0x171   : > { %v1016_v40 = vpop.f32.mrb[8].mxu1 }
 0x172   : > { %v1018_v42 = vpop.f32.mrb[9].mxu1 }
 0x173   : > { %v1019_v43 = vpop.f32.mrb[10].mxu1  ;;  %v2231_v42 = vld [vmem:[%s2312_s4] ss:$0 sm:$0xff] }
 0x174   : > { %v1021_v44 = vpop.f32.mrb[11].mxu1 }
 0x175   : > { %v844_v45 = vpop.f32.mrb[8].mxu0 }
 0x176   : > { %v2212_v46 = vadd.f32 %v1016_v40, %v844_v45  ;;  %v846_v9 = vpop.f32.mrb[9].mxu0 }
 0x177   : > { %v847_v7 = vpop.f32.mrb[10].mxu0 }
 0x178   : > { %v2214_v47 = vadd.f32 %v1019_v43, %v847_v7  ;;  %v849_v48 = vpop.f32.mrb[11].mxu0 }
 0x179   : > { %v1024_v8 = vpop.f32.mrb[12].mxu1 }
 0x17a   : > { %v1026_v49 = vpop.f32.mrb[13].mxu1 }
 0x17b   : > { %v1027_v51 = vpop.f32.mrb[14].mxu1 }
 0x17c   : > { %v1029_v10 = vpop.f32.mrb[15].mxu1 }
 0x17d   : > { %v852_v52 = vpop.f32.mrb[12].mxu0 }
 0x17e   : > { %v2216_v53 = vadd.f32 %v1024_v8, %v852_v52  ;;  %v854_v54 = vpop.f32.mrb[13].mxu0 }
 0x17f   : > { %v855_v55 = vpop.f32.mrb[14].mxu0 }
 0x180   : > { %v2218_v56 = vadd.f32 %v1027_v51, %v855_v55  ;;  %v857_v16 = vpop.f32.mrb[15].mxu0 }
 0x181   : > { %v1032_v57 = vpop.f32.mrb[16].mxu1 }
 0x182   : > { %v1034_v58 = vpop.f32.mrb[17].mxu1 }
 0x183   : > { %v1035_v59 = vpop.f32.mrb[18].mxu1 }
 0x184   : > { %v1037_v60 = vpop.f32.mrb[19].mxu1 }
 0x185   : > { %v860_v61 = vpop.f32.mrb[16].mxu0 }
 0x186   : > { %v1033_v18 = vadd.f32 %v1032_v57, %v860_v61  ;;  %v862_v62 = vpop.f32.mrb[17].mxu0 }
 0x187   : > { %v863_v63 = vpop.f32.mrb[18].mxu0 }
 0x188   : > { %v1036_v0 = vadd.f32 %v1035_v59, %v863_v63  ;;  %v865_v2 = vpop.f32.mrb[19].mxu0 }
 0x189   : > { %v1040_v3 = vpop.f32.mrb[20].mxu1 }
 0x18a   : > { %v1042_v27 = vpop.f32.mrb[21].mxu1 }
 0x18b   : > { %v1043_v4 = vpop.f32.mrb[22].mxu1 }
 0x18c   : > { %v1045_v5 = vpop.f32.mrb[23].mxu1 }
 0x18d   : > { %v868_v6 = vpop.f32.mrb[20].mxu0 }
 0x18e   : > { %v1041_v11 = vadd.f32 %v1040_v3, %v868_v6  ;;  %v870_v12 = vpop.f32.mrb[21].mxu0 }
 0x18f   : > { %v871_v13 = vpop.f32.mrb[22].mxu0 }
 0x190   : > { %v1044_v32 = vadd.f32 %v1043_v4, %v871_v13  ;;  %v873_v14 = vpop.f32.mrb[23].mxu0 }
 0x191   : > { %v1048_v15 = vpop.f32.mrb[24].mxu1 }
 0x192   : > { %v1050_v17 = vpop.f32.mrb[25].mxu1 }
 0x193   : > { %v1051_v1 = vpop.f32.mrb[26].mxu1 }
 0x194   : > { %v1053_v33 = vpop.f32.mrb[27].mxu1 }
 0x195   : > { %v876_v41 = vpop.f32.mrb[24].mxu0 }
 0x196   : > { %v2220_v19 = vadd.f32 %v1048_v15, %v876_v41  ;;  %v878_v20 = vpop.f32.mrb[25].mxu0 }
 0x197   : > { %v879_v21 = vpop.f32.mrb[26].mxu0 }
 0x198   : > { %v2222_v22 = vadd.f32 %v1051_v1, %v879_v21  ;;  %v881_v24 = vpop.f32.mrb[27].mxu0 }
 0x199   : > { %v1056_v25 = vpop.f32.mrb[28].mxu1 }
 0x19a   : > { %v1058_v28 = vpop.f32.mrb[29].mxu1 }
 0x19b   : > { %v1059_v29 = vpop.f32.mrb[30].mxu1 }
 0x19c   : > { %v1061_v30 = vpop.f32.mrb[31].mxu1 }
 0x19d   : > { %v884_v50 = vpop.f32.mrb[28].mxu0 }
 0x19e   : > { %v2224_v31 = vadd.f32 %v1056_v25, %v884_v50  ;;  %v886_v34 = vpop.f32.mrb[29].mxu0 }
 0x19f   : > { %v887_v36 = vpop.f32.mrb[30].mxu0 }
 0x1a0   : > { %v2226_v37 = vadd.f32 %v1059_v29, %v887_v36  ;;  %v889_v39 = vpop.f32.mrb[31].mxu0 }
 0x1a1   : > { %v1229_v40 = vpop.f32.mrb[32].mxu1 }
 0x1a2   : > { %v1268_v43 = vadd.f32 %v1229_v40, %v1033_v18  ;;  %v1231_v44 = vpop.f32.mrb[33].mxu1 }
 0x1a3   : > { %v1232_v45 = vpop.f32.mrb[34].mxu1 }
 0x1a4   : > { %v1291_v9 = vadd.f32 %v2231_v42, %v1268_v43  ;;  %v1269_v7 = vadd.f32 %v1232_v45, %v1036_v0  ;;  %v1234_v48 = vpop.f32.mrb[35].mxu1 }
 0x1a5   : > { %v1197_v8 = vpop.f32.mrb[32].mxu0 }
 0x1a6   : > { %v1663_v49 = vpack.c.bf16 %v1291_v9, %v1291_v9  ;;  %v1292_v51 = vadd.f32 %v2231_v42, %v1269_v7  ;;  %v1260_v10 = vadd.f32 %v1197_v8, %v2204_v23  ;;  %v1199_v52 = vpop.f32.mrb[33].mxu0 }
 0x1a7   : > { %v1200_v54 = vpop.f32.mrb[34].mxu0 }
 0x1a8   : > { %1372 = vst.msk [vmem:[%s2238_s28 + $0x20] sm:$0xf] %vm1363_vm3, %v1663_v49  ;;  %v1664_v55 = vpack.c.bf16 %v1292_v51, %v1292_v51  ;;  %v1283_v16 = vadd.f32 %v2231_v42, %v1260_v10  ;;  %v1261_v57 = vadd.f32 %v1200_v54, %v2206_v26  ;;  %v1202_v58 = vpop.f32.mrb[35].mxu0 }
 0x1a9   : > { %v1237_v59 = vpop.f32.mrb[36].mxu1 }
 0x1aa   : > { %1373 = vst.msk [vmem:[%s2238_s28 + $0x24] sm:$0xf] %vm1363_vm3, %v1664_v55  ;;  %v1655_v60 = vpack.c.bf16 %v1283_v16, %v1283_v16  ;;  %v1284_v61 = vadd.f32 %v2231_v42, %v1261_v57  ;;  %v1270_v18 = vadd.f32 %v1237_v59, %v1041_v11  ;;  %v1239_v23 = vpop.f32.mrb[37].mxu1 }
 0x1ab   : > { %v1240_v62 = vpop.f32.mrb[38].mxu1 }
 0x1ac   : > { %1364 = vst.msk [vmem:[%s2238_s28] sm:$0xf] %vm1363_vm3, %v1655_v60  ;;  %v1656_v63 = vpack.c.bf16 %v1284_v61, %v1284_v61  ;;  %v1293_v0 = vadd.f32 %v2231_v42, %v1270_v18  ;;  %v1271_v2 = vadd.f32 %v1240_v62, %v1044_v32  ;;  %v1242_v3 = vpop.f32.mrb[39].mxu1 }
 0x1ad   : > { %v1205_v26 = vpop.f32.mrb[36].mxu0 }
 0x1ae   : > { %1365 = vst.msk [vmem:[%s2238_s28 + $0x4] sm:$0xf] %vm1363_vm3, %v1656_v63  ;;  %v1665_v27 = vpack.c.bf16 %v1293_v0, %v1293_v0  ;;  %v1294_v4 = vadd.f32 %v2231_v42, %v1271_v2  ;;  %v1262_v5 = vadd.f32 %v1205_v26, %v2208_v35  ;;  %v1207_v6 = vpop.f32.mrb[37].mxu0 }
 0x1af   : > { %v1208_v11 = vpop.f32.mrb[38].mxu0 }
 0x1b0   : > { %1374 = vst.msk [vmem:[%s2238_s28 + $0x28] sm:$0xf] %vm1363_vm3, %v1665_v27  ;;  %v1666_v12 = vpack.c.bf16 %v1294_v4, %v1294_v4  ;;  %v1285_v13 = vadd.f32 %v2231_v42, %v1262_v5  ;;  %v1263_v32 = vadd.f32 %v1208_v11, %v2210_v38  ;;  %v1210_v14 = vpop.f32.mrb[39].mxu0 }
 0x1b1   : > { %v1245_v15 = vpop.f32.mrb[40].mxu1 }
 0x1b2   : > { %1375 = vst.msk [vmem:[%s2238_s28 + $0x2c] sm:$0xf] %vm1363_vm3, %v1666_v12  ;;  %v1657_v17 = vpack.c.bf16 %v1285_v13, %v1285_v13  ;;  %v1286_v1 = vadd.f32 %v2231_v42, %v1263_v32  ;;  %v1272_v35 = vadd.f32 %v1245_v15, %v2220_v19  ;;  %v1247_v33 = vpop.f32.mrb[41].mxu1 }
 0x1b3   : > { %v1248_v41 = vpop.f32.mrb[42].mxu1 }
 0x1b4   : > { %1366 = vst.msk [vmem:[%s2238_s28 + $0x8] sm:$0xf] %vm1363_vm3, %v1657_v17  ;;  %v1658_v20 = vpack.c.bf16 %v1286_v1, %v1286_v1  ;;  %v1295_v21 = vadd.f32 %v2231_v42, %v1272_v35  ;;  %v1273_v38 = vadd.f32 %v1248_v41, %v2222_v22  ;;  %v1250_v24 = vpop.f32.mrb[43].mxu1 }
 0x1b5   : > { %v1213_v25 = vpop.f32.mrb[40].mxu0 }
 0x1b6   : > { %1367 = vst.msk [vmem:[%s2238_s28 + $0xc] sm:$0xf] %vm1363_vm3, %v1658_v20  ;;  %v1667_v28 = vpack.c.bf16 %v1295_v21, %v1295_v21  ;;  %v1296_v29 = vadd.f32 %v2231_v42, %v1273_v38  ;;  %v1264_v19 = vadd.f32 %v1213_v25, %v2212_v46  ;;  %v1215_v30 = vpop.f32.mrb[41].mxu0 }
 0x1b7   : > { %v1216_v50 = vpop.f32.mrb[42].mxu0 }
 0x1b8   : > { %1376 = vst.msk [vmem:[%s2238_s28 + $0x30] sm:$0xf] %vm1363_vm3, %v1667_v28  ;;  %v1668_v34 = vpack.c.bf16 %v1296_v29, %v1296_v29  ;;  %v1287_v36 = vadd.f32 %v2231_v42, %v1264_v19  ;;  %v1265_v22 = vadd.f32 %v1216_v50, %v2214_v47  ;;  %v1218_v39 = vpop.f32.mrb[43].mxu0 }
 0x1b9   : > { %v1253_v40 = vpop.f32.mrb[44].mxu1 }
 0x1ba   : > { %1377 = vst.msk [vmem:[%s2238_s28 + $0x34] sm:$0xf] %vm1363_vm3, %v1668_v34  ;;  %v1659_v43 = vpack.c.bf16 %v1287_v36, %v1287_v36  ;;  %v1288_v44 = vadd.f32 %v2231_v42, %v1265_v22  ;;  %v1274_v46 = vadd.f32 %v1253_v40, %v2224_v31  ;;  %v1255_v45 = vpop.f32.mrb[45].mxu1 }
 0x1bb   : > { %v1256_v9 = vpop.f32.mrb[46].mxu1 }
 0x1bc   : > { %1368 = vst.msk [vmem:[%s2238_s28 + $0x10] sm:$0xf] %vm1363_vm3, %v1659_v43  ;;  %v1660_v7 = vpack.c.bf16 %v1288_v44, %v1288_v44  ;;  %v1297_v48 = vadd.f32 %v2231_v42, %v1274_v46  ;;  %v1275_v47 = vadd.f32 %v1256_v9, %v2226_v37  ;;  %v1258_v8 = vpop.f32.mrb[47].mxu1 }
 0x1bd   : > { %v1221_v49 = vpop.f32.mrb[44].mxu0 }
 0x1be   : > { %1369 = vst.msk [vmem:[%s2238_s28 + $0x14] sm:$0xf] %vm1363_vm3, %v1660_v7  ;;  %v1669_v51 = vpack.c.bf16 %v1297_v48, %v1297_v48  ;;  %v1298_v10 = vadd.f32 %v2231_v42, %v1275_v47  ;;  %v1266_v31 = vadd.f32 %v1221_v49, %v2216_v53  ;;  %v1223_v52 = vpop.f32.mrb[45].mxu0 }
 0x1bf   : > { %v1224_v54 = vpop.f32.mrb[46].mxu0 }
 0x1c0   : > { %1378 = vst.msk [vmem:[%s2238_s28 + $0x38] sm:$0xf] %vm1363_vm3, %v1669_v51  ;;  %v1670_v55 = vpack.c.bf16 %v1298_v10, %v1298_v10  ;;  %v1289_v16 = vadd.f32 %v2231_v42, %v1266_v31  ;;  %v1267_v37 = vadd.f32 %v1224_v54, %v2218_v56  ;;  %v1226_v57 = vpop.f32.mrb[47].mxu0 }
 0x1c2   : > { %1379 = vst.msk [vmem:[%s2238_s28 + $0x3c] sm:$0xf] %vm1363_vm3, %v1670_v55  ;;  %v1661_v58 = vpack.c.bf16 %v1289_v16, %v1289_v16  ;;  %v1290_v59 = vadd.f32 %v2231_v42, %v1267_v37 }
 0x1c4   : > { %1370 = vst.msk [vmem:[%s2238_s28 + $0x18] sm:$0xf] %vm1363_vm3, %v1661_v58  ;;  %v1662_v60 = vpack.c.bf16 %v1290_v59, %v1290_v59 }
 0x1c6   : > { %1371 = vst.msk [vmem:[%s2238_s28 + $0x1c] sm:$0xf] %vm1363_vm3, %v1662_v60 }
 0x1c7 PF: > { %s15_s20 = sadd.s32 1, %s1792_s20   ;;  %s2314_s18 = smov %s1788_s19 }
 0x1c8   : > { %p12_p5 = scmp.ge.s32.totalorder %s15_s20, 4   ;;  %s2315_s19 = smov %s2317_s21 }
 0x1ca   :  { %14 = sbr.rel (!%p12_p5) target bundleno = 2 (0x2), region = 78 }

</bundles_post_ra>
